<compile_context>
chip_gen: v5e
topology: v5e:2x2
jax: 0.10.0
libtpu: 0.0.40
codegen_flags: <defaults>
</compile_context>

<pallas_src>
import numpy as np

import jax
import jax.numpy as jnp
from jax.experimental import pallas as pl
from jax.experimental.pallas import tpu as pltpu

EPS = 1e-5       # nn.InstanceNorm2d default (affine=False, no running stats)
LANE = 128


# --------------------------------------------------------------------------- helpers
def _round_up(x, m):
    return (x + m - 1) // m * m


def _scatter_1d(k, s, p, n_in, n_out):
    """S[r, o, i] = 1 iff o == i*s - p + r (1-D transposed-conv scatter map)."""
    r = np.arange(k)[:, None, None]
    o = np.arange(n_out)[None, :, None]
    i = np.arange(n_in)[None, None, :]
    return (o == i * s - p + r).astype(np.float32)


def _block_diag(mat, nb):
    return np.kron(np.eye(nb, dtype=np.float32), mat.astype(np.float32))


def _layer_geoms(num_filters, num_channels):
    F = num_filters
    return [
        dict(Ci=4 * F, Co=4 * F, k=4, s=1, p=0, Hi=4, Ho=7),
        dict(Ci=4 * F, Co=2 * F, k=5, s=2, p=1, Hi=7, Ho=15),
        dict(Ci=2 * F, Co=1 * F, k=5, s=2, p=1, Hi=15, Ho=32),  # output_padding=1 -> 32
        dict(Ci=1 * F, Co=num_channels, k=5, s=1, p=2, Hi=32, Ho=32),
    ]


def _conv_as_matrices(w_ct, bias, geom, nb, in_width_pad, *, need_scatter=True,
                      need_norm=True):
    """Lower one ConvTranspose2d (+ InstanceNorm helpers) to small dense matrices."""
    Ci, Co, k, _ = w_ct.shape
    Hi, Ho, s, p = geom["Hi"], geom["Ho"], geom["s"], geom["p"]
    S = _scatter_1d(k, s, p, Hi, Ho)                  # [k, Ho, Hi]; same for H and W axes
    woco = Ho * Co
    woco_pad = _round_up(woco, LANE)

    # B[(wi,ci), (r, wo, co)] = sum_t W[ci, co, r, t] * S[t, wo, wi]   (f32 build, bf16 later)
    B = jnp.einsum("cdrt,tow->wcrod", w_ct.astype(jnp.float32), jnp.asarray(S))
    B = B.reshape(Hi * Ci, k, woco)
    B = jnp.pad(B, ((0, 0), (0, 0), (0, woco_pad - woco)))      # pad lanes to 128 multiple
    B = B.reshape(Hi * Ci, k * woco_pad)
    if in_width_pad is not None:
        B = jnp.pad(B, ((0, in_width_pad - Hi * Ci), (0, 0)))   # rows for padded input cols

    out = dict(
        B=B, woco_pad=woco_pad,
        bias_row=jnp.pad(jnp.tile(bias.astype(jnp.float32), Ho),
                         (0, woco_pad - woco)).reshape(1, woco_pad))

    if need_scatter:   # block-diag H-tap scatter (used for the stride-2 layers + layer 1)
        out["SHbd"] = np.stack([_block_diag(S[r], nb) for r in range(k)])

    if need_norm:      # InstanceNorm helpers: 0/1 matrices so per-(n,co) sums are matmuls
        R = np.zeros((woco_pad, Co), np.float32)
        R[:woco, :] = np.tile(np.eye(Co, dtype=np.float32), (Ho, 1))
        E = _block_diag(np.ones((Ho, 1), np.float32), nb)       # [nb*Ho, nb]
        out.update(R=R, RT=np.ascontiguousarray(R.T),
                   E=E, ET=np.ascontiguousarray(E.T))
    return out


def _fuse_linear(lin_w, lin_b, B1, geom1, nb):
    """Fold Linear + UnFlatten(4) into layer 1's step-A matrices, concatenated over hi."""
    C0, Hi = geom1["Ci"], geom1["Hi"]                 # Hi == 4 (UnFlatten spatial size)
    j = np.arange(Hi * C0)
    wi, ci = j // C0, j % C0
    Cs, ds = [], []
    for hi in range(Hi):
        col_idx = ci * (Hi * Hi) + hi * Hi + wi       # NCHW flat index of (ci, hi, wi)
        Cs.append(jnp.dot(lin_w[:, col_idx].astype(jnp.float32), B1))   # [L, k1*pad1]
        ds.append(jnp.dot(lin_b[col_idx].astype(jnp.float32), B1))      # [k1*pad1]
    C_cat = jnp.concatenate(Cs, axis=1)               # [L, Hi * k1*pad1]  (one wide matmul)
    d_cat = jnp.concatenate(ds, axis=0).reshape(1, -1)
    E1 = np.stack([_block_diag(np.eye(Hi, dtype=np.float32)[:, hi:hi + 1], nb)
                   for hi in range(Hi)])              # [Hi, nb*Hi, nb]
    return C_cat, d_cat, E1


def _stride1_masks(k, p, H, nb):
    """Row-validity masks for the roll-based H-scatter of a stride-1, Hi==Ho layer."""
    rows = np.arange(nb * H) % H
    masks = [((rows - (r - p) >= 0) & (rows - (r - p) < H)).astype(np.float32)
             for r in range(k)]
    return np.stack(masks)[:, :, None]                # [k, nb*H, 1]


# --------------------------------------------------------------------------- kernel
def _make_kernel(cfg):
    n_hi = cfg["n_hi"]
    chunk1 = cfg["chunk1"]
    k1, k2, k3, k4 = cfg["ks"]
    p1, p2, p3, p4 = cfg["pads"]
    hw1, hw2, hw3 = cfg["hws"]
    shifts4 = cfg["shifts4"]
    rows4 = cfg["rows4"]

    f32, bf16 = jnp.float32, jnp.bfloat16

    def dot(a, b):
        return jnp.dot(a, b, preferred_element_type=f32)

    def kernel(z_ref,
               cc_ref, dc_ref, e1_ref, sh1_ref, b1_ref, r1_ref, rt1_ref, eb1_ref, ebt1_ref,
               w2_ref, sh2_ref, b2_ref, r2_ref, rt2_ref, eb2_ref, ebt2_ref,
               w3_ref, sh3_ref, b3_ref, r3_ref, rt3_ref, eb3_ref, ebt3_ref,
               w4_ref, m4_ref, b4_ref,
               o_ref):

        def conv_scatter(x_bf, w_ref, sh_ref, k, pad):
            # per-tap fusion: step A (channel/W-tap mix) + step B (H-tap scatter);
            # the live intermediate never exceeds [rows, pad].
            acc = None
            for r in range(k):
                t = dot(x_bf, w_ref[:, r * pad:(r + 1) * pad]).astype(bf16)
                c = dot(sh_ref[r], t)
                acc = c if acc is None else acc + c
            return acc

        def inst_norm_relu(y, r_ref, rt_ref, e_ref, et_ref, hw):
            # one-pass stats; kept in f32 (tiny matmuls on idle MXU slack).
            col = dot(et_ref[...], y)                       # sum over ho  -> [NB, pad]
            s1 = dot(col, r_ref[...])                       # sum over wo  -> [NB, Co]
            s2 = dot(dot(et_ref[...], y * y), r_ref[...])
            mean = s1 * (1.0 / hw)
            var = jnp.maximum(s2 * (1.0 / hw) - mean * mean, 0.0)
            inv = jax.lax.rsqrt(var + EPS)
            mean_b = dot(dot(e_ref[...], mean), rt_ref[...])
            inv_b = dot(dot(e_ref[...], inv), rt_ref[...])
            return jnp.maximum((y - mean_b) * inv_b, 0.0).astype(bf16)

        z = z_ref[...].astype(bf16)                         # [NB, L]

        # -- Linear + UnFlatten + layer-1 channel/W-tap mix: one wide bf16 matmul --
        zc = dot(z, cc_ref[...]) + dc_ref[...]              # [NB, n_hi*chunk1] f32

        # place hi-rows (block-diag unit columns)
        y1 = None
        for hi in range(n_hi):
            part = zc[:, hi * chunk1:(hi + 1) * chunk1].astype(bf16)
            c = dot(e1_ref[hi], part)
            y1 = c if y1 is None else y1 + c                # [NB*Hi1, k1*pad1] f32
        y1 = y1.astype(bf16)

        # -- layer 1: per-tap H-scatter + bias + InstanceNorm + ReLU --
        y = None
        for r in range(k1):
            c = dot(sh1_ref[r], y1[:, r * p1:(r + 1) * p1])
            y = c if y is None else y + c
        y = y + b1_ref[...]
        x = inst_norm_relu(y, r1_ref, rt1_ref, eb1_ref, ebt1_ref, hw1)

        # -- layer 2 --
        y = conv_scatter(x, w2_ref, sh2_ref, k2, p2) + b2_ref[...]
        x = inst_norm_relu(y, r2_ref, rt2_ref, eb2_ref, ebt2_ref, hw2)

        # -- layer 3 --
        y = conv_scatter(x, w3_ref, sh3_ref, k3, p3) + b3_ref[...]
        x = inst_norm_relu(y, r3_ref, rt3_ref, eb3_ref, ebt3_ref, hw3)

        # -- layer 4 (stride 1, Hi == Ho): H-tap scatter = sublane roll + row mask --
        y = None
        for r in range(k4):
            t = dot(x, w4_ref[:, r * p4:(r + 1) * p4])      # [NB*Ho4, pad4] f32
            sh = shifts4[r] % rows4
            if sh != 0:
                t = pltpu.roll(t, sh, 0)                    # out[i] = t[i - shift]
            t = t * m4_ref[r]                               # kill cross-sample / oob rows
            y = t if y is None else y + t
        y = y + b4_ref[...]

        # lane-dense store: full 128-wide padded block, valid columns sliced by wrapper
        o_ref[...] = jax.nn.sigmoid(y)

    return kernel


# --------------------------------------------------------------------------- forward
def local_norm_emission_decoder(zts, params, *, dim=32, nb=8):
    """zts: [B, T, latent_dim] -> [B, T, dim, dim]   (num_channels == 1)."""
    B, T, L = zts.shape
    N = B * T
    num_filters = params["lin_w"].shape[1] // 64
    num_channels = params["ct4_b"].shape[0]
    assert num_channels == 1, "final .view() in the module requires num_channels == 1"

    geoms = _layer_geoms(num_filters, num_channels)
    assert geoms[-1]["Ho"] == dim
    g4 = geoms[3]
    assert g4["s"] == 1 and g4["Hi"] == g4["Ho"]      # roll-based H-scatter precondition

    # Fixed samples-per-step; pad the batch up to a multiple (odd/prime B*T no longer
    # degenerates to NB=1).  For v5e/v6e a larger nb amortizes constants further;
    # nb=8 keeps G >= 2 at these shapes so both v7x TensorCores get work.
    NB = nb
    N_pad = _round_up(N, NB)
    G = N_pad // NB

    l1 = _conv_as_matrices(params["ct1_w"], params["ct1_b"], geoms[0], NB, None)
    l2 = _conv_as_matrices(params["ct2_w"], params["ct2_b"], geoms[1], NB, l1["woco_pad"])
    l3 = _conv_as_matrices(params["ct3_w"], params["ct3_b"], geoms[2], NB, l2["woco_pad"])
    l4 = _conv_as_matrices(params["ct4_w"], params["ct4_b"], geoms[3], NB, l3["woco_pad"],
                           need_scatter=False, need_norm=False)
    C_cat, d_cat, E1 = _fuse_linear(params["lin_w"], params["lin_b"], l1["B"], geoms[0], NB)
    m4 = _stride1_masks(g4["k"], g4["p"], g4["Ho"], NB)

    bf = lambda a: jnp.asarray(a, dtype=jnp.bfloat16)   # exact for the 0/1 matrices
    fp = lambda a: jnp.asarray(a, dtype=jnp.float32)

    z2 = zts.reshape(N, L).astype(jnp.float32)
    if N_pad != N:
        z2 = jnp.pad(z2, ((0, N_pad - N), (0, 0)))

    operands = [
        z2,
        bf(C_cat), fp(d_cat), bf(E1), bf(l1["SHbd"]), fp(l1["bias_row"]),
        fp(l1["R"]), fp(l1["RT"]), fp(l1["E"]), fp(l1["ET"]),
        bf(l2["B"]), bf(l2["SHbd"]), fp(l2["bias_row"]),
        fp(l2["R"]), fp(l2["RT"]), fp(l2["E"]), fp(l2["ET"]),
        bf(l3["B"]), bf(l3["SHbd"]), fp(l3["bias_row"]),
        fp(l3["R"]), fp(l3["RT"]), fp(l3["E"]), fp(l3["ET"]),
        bf(l4["B"]), fp(m4), fp(l4["bias_row"]),
    ]

    Ho4 = g4["Ho"]
    pad4 = l4["woco_pad"]
    out_w = Ho4 * num_channels

    cfg = dict(
        n_hi=geoms[0]["Hi"],
        chunk1=geoms[0]["k"] * l1["woco_pad"],
        ks=tuple(g["k"] for g in geoms),
        pads=(l1["woco_pad"], l2["woco_pad"], l3["woco_pad"], pad4),
        hws=tuple(float(g["Ho"] ** 2) for g in geoms[:3]),
        shifts4=tuple(r - g4["p"] for r in range(g4["k"])),
        rows4=NB * Ho4,
    )
    kernel = _make_kernel(cfg)

    in_specs = [pl.BlockSpec((NB, L), lambda g: (g, 0))]
    for op in operands[1:]:
        in_specs.append(
            pl.BlockSpec(tuple(op.shape), lambda g, _n=len(op.shape): (0,) * _n))
    out_specs = pl.BlockSpec((NB * Ho4, pad4), lambda g: (g, 0))

    out2d = pl.pallas_call(
        kernel,
        out_shape=jax.ShapeDtypeStruct((N_pad * Ho4, pad4), jnp.float32),
        grid=(G,),
        in_specs=in_specs,
        out_specs=out_specs,
        compiler_params=pltpu.CompilerParams(
            dimension_semantics=("parallel",),
            vmem_limit_bytes=32 * 1024 * 1024,
        ),
    )(*operands)

    out = out2d[: N * Ho4, :out_w].reshape(N, Ho4, out_w)
    return out.reshape(B, T, dim, dim)


# --------------------------------------------------------------------------- params
def init_params(key, latent_dim, num_filters, num_channels):
    conv_dim = num_filters * 4 ** 3
    ks = jax.random.split(key, 10)

    def nrm(k, shape, scale=0.1):
        return (scale * jax.random.normal(k, shape)).astype(jnp.float32)

    return {
        "lin_w": nrm(ks[0], (latent_dim, conv_dim)),
        "lin_b": nrm(ks[1], (conv_dim,)),
        # ConvTranspose2d weight layout: [Cin, Cout, kH, kW]
        "ct1_w": nrm(ks[2], (conv_dim // 16, num_filters * 4, 4, 4)),
        "ct1_b": nrm(ks[3], (num_filters * 4,)),
        "ct2_w": nrm(ks[4], (num_filters * 4, num_filters * 2, 5, 5)),
        "ct2_b": nrm(ks[5], (num_filters * 2,)),
        "ct3_w": nrm(ks[6], (num_filters * 2, num_filters, 5, 5)),
        "ct3_b": nrm(ks[7], (num_filters,)),
        "ct4_w": nrm(ks[8], (num_filters, num_channels, 5, 5)),
        "ct4_b": nrm(ks[9], (num_channels,)),
    }


# --------------------------------------------------------------------------- reference
def _reference_decoder(zts, params, *, dim=32):
    """Pure-JAX (XLA, f32) reference with PyTorch semantics for validation."""
    B, T, L = zts.shape
    N = B * T
    z = zts.reshape(N, L)
    h = z @ params["lin_w"] + params["lin_b"]
    C0 = params["lin_w"].shape[1] // 16
    x = h.reshape(N, C0, 4, 4)

    def ct(x, w, b, stride, pad, opad):
        Ci, Co, k, _ = w.shape
        wf = jnp.transpose(jnp.flip(w, (2, 3)), (1, 0, 2, 3))     # [Co, Ci, k, k]
        lo, hi = k - 1 - pad, k - 1 - pad + opad
        y = jax.lax.conv_general_dilated(
            x, wf, window_strides=(1, 1), padding=[(lo, hi), (lo, hi)],
            lhs_dilation=(stride, stride),
            dimension_numbers=("NCHW", "OIHW", "NCHW"))
        return y + b.reshape(1, Co, 1, 1)

    def inorm_relu(y):
        m = y.mean(axis=(2, 3), keepdims=True)
        v = ((y - m) ** 2).mean(axis=(2, 3), keepdims=True)
        return jnp.maximum((y - m) * jax.lax.rsqrt(v + EPS), 0.0)

    x = inorm_relu(ct(x, params["ct1_w"], params["ct1_b"], 1, 0, 0))
    x = inorm_relu(ct(x, params["ct2_w"], params["ct2_b"], 2, 1, 0))
    x = inorm_relu(ct(x, params["ct3_w"], params["ct3_b"], 2, 1, 1))
    x = jax.nn.sigmoid(ct(x, params["ct4_w"], params["ct4_b"], 1, 2, 0))
    return x.reshape(B, T, dim, dim)


if __name__ == "__main__":
    B, T = 2, 8               # BatchSize, GenerationLen
    latent_dim = 16
    num_filters = 4
    num_channels = 1
    dim = 32                  # spatial size implied by the conv stack

    key = jax.random.PRNGKey(0)
    kz, kp = jax.random.split(key)
    zts = jax.random.normal(kz, (B, T, latent_dim), dtype=jnp.float32)
    params = init_params(kp, latent_dim, num_filters, num_channels)

    fwd = jax.jit(local_norm_emission_decoder)
    out = fwd(zts, params)
    jax.block_until_ready(out)
    assert out.shape == (B, T, dim, dim), out.shape
    assert bool(jnp.all(jnp.isfinite(out)))

    ref = jax.jit(_reference_decoder)(zts, params)
    err_max = float(jnp.max(jnp.abs(out - ref)))
    err_mean = float(jnp.mean(jnp.abs(out - ref)))
    # bf16 matmuls (f32 accumulation, f32 InstanceNorm stats) vs the f32 reference
    assert err_max < 5e-2, f"max abs error vs reference: {err_max}"
    assert err_mean < 5e-3, f"mean abs error vs reference: {err_mean}"
    print("KERNEL_OK")
</pallas_src>

<mosaic_0001>
module attributes {stable_mosaic.version = 11 : i64} {
  func.func @kernel(%arg0: i32, %arg1: memref<8x16xf32, #tpu.memory_space<vmem>>, %arg2: memref<16x2048xbf16, #tpu.memory_space<vmem>>, %arg3: memref<1x2048xf32, #tpu.memory_space<vmem>>, %arg4: memref<4x32x8xbf16, #tpu.memory_space<vmem>>, %arg5: memref<4x56x32xbf16, #tpu.memory_space<vmem>>, %arg6: memref<1x128xf32, #tpu.memory_space<vmem>>, %arg7: memref<128x16xf32, #tpu.memory_space<vmem>>, %arg8: memref<16x128xf32, #tpu.memory_space<vmem>>, %arg9: memref<56x8xf32, #tpu.memory_space<vmem>>, %arg10: memref<8x56xf32, #tpu.memory_space<vmem>>, %arg11: memref<128x640xbf16, #tpu.memory_space<vmem>>, %arg12: memref<5x120x56xbf16, #tpu.memory_space<vmem>>, %arg13: memref<1x128xf32, #tpu.memory_space<vmem>>, %arg14: memref<128x8xf32, #tpu.memory_space<vmem>>, %arg15: memref<8x128xf32, #tpu.memory_space<vmem>>, %arg16: memref<120x8xf32, #tpu.memory_space<vmem>>, %arg17: memref<8x120xf32, #tpu.memory_space<vmem>>, %arg18: memref<128x640xbf16, #tpu.memory_space<vmem>>, %arg19: memref<5x256x120xbf16, #tpu.memory_space<vmem>>, %arg20: memref<1x128xf32, #tpu.memory_space<vmem>>, %arg21: memref<128x4xf32, #tpu.memory_space<vmem>>, %arg22: memref<4x128xf32, #tpu.memory_space<vmem>>, %arg23: memref<256x8xf32, #tpu.memory_space<vmem>>, %arg24: memref<8x256xf32, #tpu.memory_space<vmem>>, %arg25: memref<128x640xbf16, #tpu.memory_space<vmem>>, %arg26: memref<5x256x1xf32, #tpu.memory_space<vmem>>, %arg27: memref<1x128xf32, #tpu.memory_space<vmem>>, %arg28: memref<256x128xf32, #tpu.memory_space<vmem>>) attributes {dimension_semantics = [#tpu.dimension_semantics<parallel>], iteration_bounds = array<i64: 2>, scalar_prefetch = 0 : i64, scratch_operands = 0 : i64, tpu.core_type = #tpu.core_type<tc>, window_params = [{transform_indices = @transform_0, window_bounds = array<i64: 8, 16>}, {pipeline_mode = #tpu.pipeline_mode<synchronous>, transform_indices = @transform_1, window_bounds = array<i64: 16, 2048>}, {pipeline_mode = #tpu.pipeline_mode<synchronous>, transform_indices = @transform_2, window_bounds = array<i64: 1, 2048>}, {pipeline_mode = #tpu.pipeline_mode<synchronous>, transform_indices = @transform_3, window_bounds = array<i64: 4, 32, 8>}, {pipeline_mode = #tpu.pipeline_mode<synchronous>, transform_indices = @transform_4, window_bounds = array<i64: 4, 56, 32>}, {pipeline_mode = #tpu.pipeline_mode<synchronous>, transform_indices = @transform_5, window_bounds = array<i64: 1, 128>}, {pipeline_mode = #tpu.pipeline_mode<synchronous>, transform_indices = @transform_6, window_bounds = array<i64: 128, 16>}, {pipeline_mode = #tpu.pipeline_mode<synchronous>, transform_indices = @transform_7, window_bounds = array<i64: 16, 128>}, {pipeline_mode = #tpu.pipeline_mode<synchronous>, transform_indices = @transform_8, window_bounds = array<i64: 56, 8>}, {pipeline_mode = #tpu.pipeline_mode<synchronous>, transform_indices = @transform_9, window_bounds = array<i64: 8, 56>}, {pipeline_mode = #tpu.pipeline_mode<synchronous>, transform_indices = @transform_10, window_bounds = array<i64: 128, 640>}, {pipeline_mode = #tpu.pipeline_mode<synchronous>, transform_indices = @transform_11, window_bounds = array<i64: 5, 120, 56>}, {pipeline_mode = #tpu.pipeline_mode<synchronous>, transform_indices = @transform_12, window_bounds = array<i64: 1, 128>}, {pipeline_mode = #tpu.pipeline_mode<synchronous>, transform_indices = @transform_13, window_bounds = array<i64: 128, 8>}, {pipeline_mode = #tpu.pipeline_mode<synchronous>, transform_indices = @transform_14, window_bounds = array<i64: 8, 128>}, {pipeline_mode = #tpu.pipeline_mode<synchronous>, transform_indices = @transform_15, window_bounds = array<i64: 120, 8>}, {pipeline_mode = #tpu.pipeline_mode<synchronous>, transform_indices = @transform_16, window_bounds = array<i64: 8, 120>}, {pipeline_mode = #tpu.pipeline_mode<synchronous>, transform_indices = @transform_17, window_bounds = array<i64: 128, 640>}, {pipeline_mode = #tpu.pipeline_mode<synchronous>, transform_indices = @transform_18, window_bounds = array<i64: 5, 256, 120>}, {pipeline_mode = #tpu.pipeline_mode<synchronous>, transform_indices = @transform_19, window_bounds = array<i64: 1, 128>}, {pipeline_mode = #tpu.pipeline_mode<synchronous>, transform_indices = @transform_20, window_bounds = array<i64: 128, 4>}, {pipeline_mode = #tpu.pipeline_mode<synchronous>, transform_indices = @transform_21, window_bounds = array<i64: 4, 128>}, {pipeline_mode = #tpu.pipeline_mode<synchronous>, transform_indices = @transform_22, window_bounds = array<i64: 256, 8>}, {pipeline_mode = #tpu.pipeline_mode<synchronous>, transform_indices = @transform_23, window_bounds = array<i64: 8, 256>}, {pipeline_mode = #tpu.pipeline_mode<synchronous>, transform_indices = @transform_24, window_bounds = array<i64: 128, 640>}, {pipeline_mode = #tpu.pipeline_mode<synchronous>, transform_indices = @transform_25, window_bounds = array<i64: 5, 256, 1>}, {pipeline_mode = #tpu.pipeline_mode<synchronous>, transform_indices = @transform_26, window_bounds = array<i64: 1, 128>}, {transform_indices = @transform_27, window_bounds = array<i64: 256, 128>}]} {
    %c0 = arith.constant 0 : index
    %c0_0 = arith.constant 0 : index
    %0 = vector.load %arg1[%c0, %c0_0] : memref<8x16xf32, #tpu.memory_space<vmem>>, vector<8x16xf32>
    %1 = arith.truncf %0 : vector<8x16xf32> to vector<8x16xbf16>
    %c0_1 = arith.constant 0 : index
    %c0_2 = arith.constant 0 : index
    %2 = vector.load %arg2[%c0_1, %c0_2] : memref<16x2048xbf16, #tpu.memory_space<vmem>>, vector<16x2048xbf16>
    %cst = arith.constant dense<0.000000e+00> : vector<8x2048xf32>
    %3 = tpu.matmul %1, %2, %cst {dimension_numbers = #tpu.dot_dimension_numbers<[1], [0], [0], [1], [0, 0, 1, 1], [], []>} : vector<8x16xbf16>, vector<16x2048xbf16>, vector<8x2048xf32> -> vector<8x2048xf32>
    %c0_3 = arith.constant 0 : index
    %c0_4 = arith.constant 0 : index
    %4 = vector.load %arg3[%c0_3, %c0_4] : memref<1x2048xf32, #tpu.memory_space<vmem>>, vector<1x2048xf32>
    %5 = vector.broadcast %4 : vector<1x2048xf32> to vector<8x2048xf32>
    %6 = arith.addf %3, %5 : vector<8x2048xf32>
    %7 = vector.extract_strided_slice %6 {offsets = [0, 0], sizes = [8, 512], strides = [1, 1]} : vector<8x2048xf32> to vector<8x512xf32>
    %8 = arith.truncf %7 : vector<8x512xf32> to vector<8x512xbf16>
    %c0_5 = arith.constant 0 : index
    %c0_6 = arith.constant 0 : index
    %c0_7 = arith.constant 0 : index
    %9 = vector.load %arg4[%c0_5, %c0_6, %c0_7] : memref<4x32x8xbf16, #tpu.memory_space<vmem>>, vector<1x32x8xbf16>
    %10 = vector.shape_cast %9 : vector<1x32x8xbf16> to vector<32x8xbf16>
    %cst_8 = arith.constant dense<0.000000e+00> : vector<32x512xf32>
    %11 = tpu.matmul %10, %8, %cst_8 {dimension_numbers = #tpu.dot_dimension_numbers<[1], [0], [0], [1], [0, 0, 1, 1], [], []>} : vector<32x8xbf16>, vector<8x512xbf16>, vector<32x512xf32> -> vector<32x512xf32>
    %12 = vector.extract_strided_slice %6 {offsets = [0, 512], sizes = [8, 512], strides = [1, 1]} : vector<8x2048xf32> to vector<8x512xf32>
    %13 = arith.truncf %12 : vector<8x512xf32> to vector<8x512xbf16>
    %c1 = arith.constant 1 : index
    %c0_9 = arith.constant 0 : index
    %c0_10 = arith.constant 0 : index
    %14 = vector.load %arg4[%c1, %c0_9, %c0_10] : memref<4x32x8xbf16, #tpu.memory_space<vmem>>, vector<1x32x8xbf16>
    %15 = vector.shape_cast %14 : vector<1x32x8xbf16> to vector<32x8xbf16>
    %cst_11 = arith.constant dense<0.000000e+00> : vector<32x512xf32>
    %16 = tpu.matmul %15, %13, %cst_11 {dimension_numbers = #tpu.dot_dimension_numbers<[1], [0], [0], [1], [0, 0, 1, 1], [], []>} : vector<32x8xbf16>, vector<8x512xbf16>, vector<32x512xf32> -> vector<32x512xf32>
    %17 = arith.addf %11, %16 : vector<32x512xf32>
    %18 = vector.extract_strided_slice %6 {offsets = [0, 1024], sizes = [8, 512], strides = [1, 1]} : vector<8x2048xf32> to vector<8x512xf32>
    %19 = arith.truncf %18 : vector<8x512xf32> to vector<8x512xbf16>
    %c2 = arith.constant 2 : index
    %c0_12 = arith.constant 0 : index
    %c0_13 = arith.constant 0 : index
    %20 = vector.load %arg4[%c2, %c0_12, %c0_13] : memref<4x32x8xbf16, #tpu.memory_space<vmem>>, vector<1x32x8xbf16>
    %21 = vector.shape_cast %20 : vector<1x32x8xbf16> to vector<32x8xbf16>
    %cst_14 = arith.constant dense<0.000000e+00> : vector<32x512xf32>
    %22 = tpu.matmul %21, %19, %cst_14 {dimension_numbers = #tpu.dot_dimension_numbers<[1], [0], [0], [1], [0, 0, 1, 1], [], []>} : vector<32x8xbf16>, vector<8x512xbf16>, vector<32x512xf32> -> vector<32x512xf32>
    %23 = arith.addf %17, %22 : vector<32x512xf32>
    %24 = vector.extract_strided_slice %6 {offsets = [0, 1536], sizes = [8, 512], strides = [1, 1]} : vector<8x2048xf32> to vector<8x512xf32>
    %25 = arith.truncf %24 : vector<8x512xf32> to vector<8x512xbf16>
    %c3 = arith.constant 3 : index
    %c0_15 = arith.constant 0 : index
    %c0_16 = arith.constant 0 : index
    %26 = vector.load %arg4[%c3, %c0_15, %c0_16] : memref<4x32x8xbf16, #tpu.memory_space<vmem>>, vector<1x32x8xbf16>
    %27 = vector.shape_cast %26 : vector<1x32x8xbf16> to vector<32x8xbf16>
    %cst_17 = arith.constant dense<0.000000e+00> : vector<32x512xf32>
    %28 = tpu.matmul %27, %25, %cst_17 {dimension_numbers = #tpu.dot_dimension_numbers<[1], [0], [0], [1], [0, 0, 1, 1], [], []>} : vector<32x8xbf16>, vector<8x512xbf16>, vector<32x512xf32> -> vector<32x512xf32>
    %29 = arith.addf %23, %28 : vector<32x512xf32>
    %30 = arith.truncf %29 : vector<32x512xf32> to vector<32x512xbf16>
    %c0_18 = arith.constant 0 : index
    %c0_19 = arith.constant 0 : index
    %c0_20 = arith.constant 0 : index
    %31 = vector.load %arg5[%c0_18, %c0_19, %c0_20] : memref<4x56x32xbf16, #tpu.memory_space<vmem>>, vector<1x56x32xbf16>
    %32 = vector.shape_cast %31 : vector<1x56x32xbf16> to vector<56x32xbf16>
    %33 = vector.extract_strided_slice %30 {offsets = [0, 0], sizes = [32, 128], strides = [1, 1]} : vector<32x512xbf16> to vector<32x128xbf16>
    %cst_21 = arith.constant dense<0.000000e+00> : vector<56x128xf32>
    %34 = tpu.matmul %32, %33, %cst_21 {dimension_numbers = #tpu.dot_dimension_numbers<[1], [0], [0], [1], [0, 0, 1, 1], [], []>} : vector<56x32xbf16>, vector<32x128xbf16>, vector<56x128xf32> -> vector<56x128xf32>
    %c1_22 = arith.constant 1 : index
    %c0_23 = arith.constant 0 : index
    %c0_24 = arith.constant 0 : index
    %35 = vector.load %arg5[%c1_22, %c0_23, %c0_24] : memref<4x56x32xbf16, #tpu.memory_space<vmem>>, vector<1x56x32xbf16>
    %36 = vector.shape_cast %35 : vector<1x56x32xbf16> to vector<56x32xbf16>
    %37 = vector.extract_strided_slice %30 {offsets = [0, 128], sizes = [32, 128], strides = [1, 1]} : vector<32x512xbf16> to vector<32x128xbf16>
    %cst_25 = arith.constant dense<0.000000e+00> : vector<56x128xf32>
    %38 = tpu.matmul %36, %37, %cst_25 {dimension_numbers = #tpu.dot_dimension_numbers<[1], [0], [0], [1], [0, 0, 1, 1], [], []>} : vector<56x32xbf16>, vector<32x128xbf16>, vector<56x128xf32> -> vector<56x128xf32>
    %39 = arith.addf %34, %38 : vector<56x128xf32>
    %c2_26 = arith.constant 2 : index
    %c0_27 = arith.constant 0 : index
    %c0_28 = arith.constant 0 : index
    %40 = vector.load %arg5[%c2_26, %c0_27, %c0_28] : memref<4x56x32xbf16, #tpu.memory_space<vmem>>, vector<1x56x32xbf16>
    %41 = vector.shape_cast %40 : vector<1x56x32xbf16> to vector<56x32xbf16>
    %42 = vector.extract_strided_slice %30 {offsets = [0, 256], sizes = [32, 128], strides = [1, 1]} : vector<32x512xbf16> to vector<32x128xbf16>
    %cst_29 = arith.constant dense<0.000000e+00> : vector<56x128xf32>
    %43 = tpu.matmul %41, %42, %cst_29 {dimension_numbers = #tpu.dot_dimension_numbers<[1], [0], [0], [1], [0, 0, 1, 1], [], []>} : vector<56x32xbf16>, vector<32x128xbf16>, vector<56x128xf32> -> vector<56x128xf32>
    %44 = arith.addf %39, %43 : vector<56x128xf32>
    %c3_30 = arith.constant 3 : index
    %c0_31 = arith.constant 0 : index
    %c0_32 = arith.constant 0 : index
    %45 = vector.load %arg5[%c3_30, %c0_31, %c0_32] : memref<4x56x32xbf16, #tpu.memory_space<vmem>>, vector<1x56x32xbf16>
    %46 = vector.shape_cast %45 : vector<1x56x32xbf16> to vector<56x32xbf16>
    %47 = vector.extract_strided_slice %30 {offsets = [0, 384], sizes = [32, 128], strides = [1, 1]} : vector<32x512xbf16> to vector<32x128xbf16>
    %cst_33 = arith.constant dense<0.000000e+00> : vector<56x128xf32>
    %48 = tpu.matmul %46, %47, %cst_33 {dimension_numbers = #tpu.dot_dimension_numbers<[1], [0], [0], [1], [0, 0, 1, 1], [], []>} : vector<56x32xbf16>, vector<32x128xbf16>, vector<56x128xf32> -> vector<56x128xf32>
    %49 = arith.addf %44, %48 : vector<56x128xf32>
    %c0_34 = arith.constant 0 : index
    %c0_35 = arith.constant 0 : index
    %50 = vector.load %arg6[%c0_34, %c0_35] : memref<1x128xf32, #tpu.memory_space<vmem>>, vector<1x128xf32>
    %51 = vector.broadcast %50 : vector<1x128xf32> to vector<56x128xf32>
    %52 = arith.addf %49, %51 : vector<56x128xf32>
    %c0_36 = arith.constant 0 : index
    %c0_37 = arith.constant 0 : index
    %53 = vector.load %arg10[%c0_36, %c0_37] : memref<8x56xf32, #tpu.memory_space<vmem>>, vector<8x56xf32>
    %cst_38 = arith.constant dense<0.000000e+00> : vector<8x128xf32>
    %54 = tpu.matmul %53, %52, %cst_38 {dimension_numbers = #tpu.dot_dimension_numbers<[1], [0], [0], [1], [0, 0, 1, 1], [], []>} : vector<8x56xf32>, vector<56x128xf32>, vector<8x128xf32> -> vector<8x128xf32>
    %c0_39 = arith.constant 0 : index
    %c0_40 = arith.constant 0 : index
    %55 = vector.load %arg7[%c0_39, %c0_40] : memref<128x16xf32, #tpu.memory_space<vmem>>, vector<128x16xf32>
    %cst_41 = arith.constant dense<0.000000e+00> : vector<8x16xf32>
    %56 = tpu.matmul %54, %55, %cst_41 {dimension_numbers = #tpu.dot_dimension_numbers<[1], [0], [0], [1], [0, 0, 1, 1], [], []>} : vector<8x128xf32>, vector<128x16xf32>, vector<8x16xf32> -> vector<8x16xf32>
    %c0_42 = arith.constant 0 : index
    %c0_43 = arith.constant 0 : index
    %57 = vector.load %arg10[%c0_42, %c0_43] : memref<8x56xf32, #tpu.memory_space<vmem>>, vector<8x56xf32>
    %58 = arith.mulf %52, %52 : vector<56x128xf32>
    %cst_44 = arith.constant dense<0.000000e+00> : vector<8x128xf32>
    %59 = tpu.matmul %57, %58, %cst_44 {dimension_numbers = #tpu.dot_dimension_numbers<[1], [0], [0], [1], [0, 0, 1, 1], [], []>} : vector<8x56xf32>, vector<56x128xf32>, vector<8x128xf32> -> vector<8x128xf32>
    %c0_45 = arith.constant 0 : index
    %c0_46 = arith.constant 0 : index
    %60 = vector.load %arg7[%c0_45, %c0_46] : memref<128x16xf32, #tpu.memory_space<vmem>>, vector<128x16xf32>
    %cst_47 = arith.constant dense<0.000000e+00> : vector<8x16xf32>
    %61 = tpu.matmul %59, %60, %cst_47 {dimension_numbers = #tpu.dot_dimension_numbers<[1], [0], [0], [1], [0, 0, 1, 1], [], []>} : vector<8x128xf32>, vector<128x16xf32>, vector<8x16xf32> -> vector<8x16xf32>
    %cst_48 = arith.constant 0.0204081628 : f32
    %62 = vector.broadcast %cst_48 : f32 to vector<8x16xf32>
    %63 = arith.mulf %56, %62 : vector<8x16xf32>
    %cst_49 = arith.constant 0.0204081628 : f32
    %64 = vector.broadcast %cst_49 : f32 to vector<8x16xf32>
    %65 = arith.mulf %61, %64 : vector<8x16xf32>
    %66 = arith.mulf %63, %63 : vector<8x16xf32>
    %67 = arith.subf %65, %66 : vector<8x16xf32>
    %cst_50 = arith.constant 0.000000e+00 : f32
    %68 = vector.broadcast %cst_50 : f32 to vector<8x16xf32>
    %69 = arith.maximumf %67, %68 : vector<8x16xf32>
    %cst_51 = arith.constant 9.99999974E-6 : f32
    %70 = vector.broadcast %cst_51 : f32 to vector<8x16xf32>
    %71 = arith.addf %69, %70 : vector<8x16xf32>
    %72 = math.rsqrt %71 : vector<8x16xf32>
    %c0_52 = arith.constant 0 : index
    %c0_53 = arith.constant 0 : index
    %73 = vector.load %arg9[%c0_52, %c0_53] : memref<56x8xf32, #tpu.memory_space<vmem>>, vector<56x8xf32>
    %cst_54 = arith.constant dense<0.000000e+00> : vector<56x16xf32>
    %74 = tpu.matmul %73, %63, %cst_54 {dimension_numbers = #tpu.dot_dimension_numbers<[1], [0], [0], [1], [0, 0, 1, 1], [], []>} : vector<56x8xf32>, vector<8x16xf32>, vector<56x16xf32> -> vector<56x16xf32>
    %c0_55 = arith.constant 0 : index
    %c0_56 = arith.constant 0 : index
    %75 = vector.load %arg8[%c0_55, %c0_56] : memref<16x128xf32, #tpu.memory_space<vmem>>, vector<16x128xf32>
    %cst_57 = arith.constant dense<0.000000e+00> : vector<56x128xf32>
    %76 = tpu.matmul %74, %75, %cst_57 {dimension_numbers = #tpu.dot_dimension_numbers<[1], [0], [0], [1], [0, 0, 1, 1], [], []>} : vector<56x16xf32>, vector<16x128xf32>, vector<56x128xf32> -> vector<56x128xf32>
    %c0_58 = arith.constant 0 : index
    %c0_59 = arith.constant 0 : index
    %77 = vector.load %arg9[%c0_58, %c0_59] : memref<56x8xf32, #tpu.memory_space<vmem>>, vector<56x8xf32>
    %cst_60 = arith.constant dense<0.000000e+00> : vector<56x16xf32>
    %78 = tpu.matmul %77, %72, %cst_60 {dimension_numbers = #tpu.dot_dimension_numbers<[1], [0], [0], [1], [0, 0, 1, 1], [], []>} : vector<56x8xf32>, vector<8x16xf32>, vector<56x16xf32> -> vector<56x16xf32>
    %c0_61 = arith.constant 0 : index
    %c0_62 = arith.constant 0 : index
    %79 = vector.load %arg8[%c0_61, %c0_62] : memref<16x128xf32, #tpu.memory_space<vmem>>, vector<16x128xf32>
    %cst_63 = arith.constant dense<0.000000e+00> : vector<56x128xf32>
    %80 = tpu.matmul %78, %79, %cst_63 {dimension_numbers = #tpu.dot_dimension_numbers<[1], [0], [0], [1], [0, 0, 1, 1], [], []>} : vector<56x16xf32>, vector<16x128xf32>, vector<56x128xf32> -> vector<56x128xf32>
    %81 = arith.subf %52, %76 : vector<56x128xf32>
    %82 = arith.mulf %81, %80 : vector<56x128xf32>
    %cst_64 = arith.constant 0.000000e+00 : f32
    %83 = vector.broadcast %cst_64 : f32 to vector<56x128xf32>
    %84 = arith.maximumf %82, %83 : vector<56x128xf32>
    %85 = arith.truncf %84 : vector<56x128xf32> to vector<56x128xbf16>
    %c0_65 = arith.constant 0 : index
    %c0_66 = arith.constant 0 : index
    %86 = vector.load %arg11[%c0_65, %c0_66] : memref<128x640xbf16, #tpu.memory_space<vmem>>, vector<128x128xbf16>
    %cst_67 = arith.constant dense<0.000000e+00> : vector<56x128xf32>
    %87 = tpu.matmul %85, %86, %cst_67 {dimension_numbers = #tpu.dot_dimension_numbers<[1], [0], [0], [1], [0, 0, 1, 1], [], []>} : vector<56x128xbf16>, vector<128x128xbf16>, vector<56x128xf32> -> vector<56x128xf32>
    %88 = arith.truncf %87 : vector<56x128xf32> to vector<56x128xbf16>
    %c0_68 = arith.constant 0 : index
    %c0_69 = arith.constant 0 : index
    %c0_70 = arith.constant 0 : index
    %89 = vector.load %arg12[%c0_68, %c0_69, %c0_70] : memref<5x120x56xbf16, #tpu.memory_space<vmem>>, vector<1x120x56xbf16>
    %90 = vector.shape_cast %89 : vector<1x120x56xbf16> to vector<120x56xbf16>
    %cst_71 = arith.constant dense<0.000000e+00> : vector<120x128xf32>
    %91 = tpu.matmul %90, %88, %cst_71 {dimension_numbers = #tpu.dot_dimension_numbers<[1], [0], [0], [1], [0, 0, 1, 1], [], []>} : vector<120x56xbf16>, vector<56x128xbf16>, vector<120x128xf32> -> vector<120x128xf32>
    %c0_72 = arith.constant 0 : index
    %c128 = arith.constant 128 : index
    %92 = vector.load %arg11[%c0_72, %c128] : memref<128x640xbf16, #tpu.memory_space<vmem>>, vector<128x128xbf16>
    %cst_73 = arith.constant dense<0.000000e+00> : vector<56x128xf32>
    %93 = tpu.matmul %85, %92, %cst_73 {dimension_numbers = #tpu.dot_dimension_numbers<[1], [0], [0], [1], [0, 0, 1, 1], [], []>} : vector<56x128xbf16>, vector<128x128xbf16>, vector<56x128xf32> -> vector<56x128xf32>
    %94 = arith.truncf %93 : vector<56x128xf32> to vector<56x128xbf16>
    %c1_74 = arith.constant 1 : index
    %c0_75 = arith.constant 0 : index
    %c0_76 = arith.constant 0 : index
    %95 = vector.load %arg12[%c1_74, %c0_75, %c0_76] : memref<5x120x56xbf16, #tpu.memory_space<vmem>>, vector<1x120x56xbf16>
    %96 = vector.shape_cast %95 : vector<1x120x56xbf16> to vector<120x56xbf16>
    %cst_77 = arith.constant dense<0.000000e+00> : vector<120x128xf32>
    %97 = tpu.matmul %96, %94, %cst_77 {dimension_numbers = #tpu.dot_dimension_numbers<[1], [0], [0], [1], [0, 0, 1, 1], [], []>} : vector<120x56xbf16>, vector<56x128xbf16>, vector<120x128xf32> -> vector<120x128xf32>
    %98 = arith.addf %91, %97 : vector<120x128xf32>
    %c0_78 = arith.constant 0 : index
    %c256 = arith.constant 256 : index
    %99 = vector.load %arg11[%c0_78, %c256] : memref<128x640xbf16, #tpu.memory_space<vmem>>, vector<128x128xbf16>
    %cst_79 = arith.constant dense<0.000000e+00> : vector<56x128xf32>
    %100 = tpu.matmul %85, %99, %cst_79 {dimension_numbers = #tpu.dot_dimension_numbers<[1], [0], [0], [1], [0, 0, 1, 1], [], []>} : vector<56x128xbf16>, vector<128x128xbf16>, vector<56x128xf32> -> vector<56x128xf32>
    %101 = arith.truncf %100 : vector<56x128xf32> to vector<56x128xbf16>
    %c2_80 = arith.constant 2 : index
    %c0_81 = arith.constant 0 : index
    %c0_82 = arith.constant 0 : index
    %102 = vector.load %arg12[%c2_80, %c0_81, %c0_82] : memref<5x120x56xbf16, #tpu.memory_space<vmem>>, vector<1x120x56xbf16>
    %103 = vector.shape_cast %102 : vector<1x120x56xbf16> to vector<120x56xbf16>
    %cst_83 = arith.constant dense<0.000000e+00> : vector<120x128xf32>
    %104 = tpu.matmul %103, %101, %cst_83 {dimension_numbers = #tpu.dot_dimension_numbers<[1], [0], [0], [1], [0, 0, 1, 1], [], []>} : vector<120x56xbf16>, vector<56x128xbf16>, vector<120x128xf32> -> vector<120x128xf32>
    %105 = arith.addf %98, %104 : vector<120x128xf32>
    %c0_84 = arith.constant 0 : index
    %c384 = arith.constant 384 : index
    %106 = vector.load %arg11[%c0_84, %c384] : memref<128x640xbf16, #tpu.memory_space<vmem>>, vector<128x128xbf16>
    %cst_85 = arith.constant dense<0.000000e+00> : vector<56x128xf32>
    %107 = tpu.matmul %85, %106, %cst_85 {dimension_numbers = #tpu.dot_dimension_numbers<[1], [0], [0], [1], [0, 0, 1, 1], [], []>} : vector<56x128xbf16>, vector<128x128xbf16>, vector<56x128xf32> -> vector<56x128xf32>
    %108 = arith.truncf %107 : vector<56x128xf32> to vector<56x128xbf16>
    %c3_86 = arith.constant 3 : index
    %c0_87 = arith.constant 0 : index
    %c0_88 = arith.constant 0 : index
    %109 = vector.load %arg12[%c3_86, %c0_87, %c0_88] : memref<5x120x56xbf16, #tpu.memory_space<vmem>>, vector<1x120x56xbf16>
    %110 = vector.shape_cast %109 : vector<1x120x56xbf16> to vector<120x56xbf16>
    %cst_89 = arith.constant dense<0.000000e+00> : vector<120x128xf32>
    %111 = tpu.matmul %110, %108, %cst_89 {dimension_numbers = #tpu.dot_dimension_numbers<[1], [0], [0], [1], [0, 0, 1, 1], [], []>} : vector<120x56xbf16>, vector<56x128xbf16>, vector<120x128xf32> -> vector<120x128xf32>
    %112 = arith.addf %105, %111 : vector<120x128xf32>
    %c0_90 = arith.constant 0 : index
    %c512 = arith.constant 512 : index
    %113 = vector.load %arg11[%c0_90, %c512] : memref<128x640xbf16, #tpu.memory_space<vmem>>, vector<128x128xbf16>
    %cst_91 = arith.constant dense<0.000000e+00> : vector<56x128xf32>
    %114 = tpu.matmul %85, %113, %cst_91 {dimension_numbers = #tpu.dot_dimension_numbers<[1], [0], [0], [1], [0, 0, 1, 1], [], []>} : vector<56x128xbf16>, vector<128x128xbf16>, vector<56x128xf32> -> vector<56x128xf32>
    %115 = arith.truncf %114 : vector<56x128xf32> to vector<56x128xbf16>
    %c4 = arith.constant 4 : index
    %c0_92 = arith.constant 0 : index
    %c0_93 = arith.constant 0 : index
    %116 = vector.load %arg12[%c4, %c0_92, %c0_93] : memref<5x120x56xbf16, #tpu.memory_space<vmem>>, vector<1x120x56xbf16>
    %117 = vector.shape_cast %116 : vector<1x120x56xbf16> to vector<120x56xbf16>
    %cst_94 = arith.constant dense<0.000000e+00> : vector<120x128xf32>
    %118 = tpu.matmul %117, %115, %cst_94 {dimension_numbers = #tpu.dot_dimension_numbers<[1], [0], [0], [1], [0, 0, 1, 1], [], []>} : vector<120x56xbf16>, vector<56x128xbf16>, vector<120x128xf32> -> vector<120x128xf32>
    %119 = arith.addf %112, %118 : vector<120x128xf32>
    %c0_95 = arith.constant 0 : index
    %c0_96 = arith.constant 0 : index
    %120 = vector.load %arg13[%c0_95, %c0_96] : memref<1x128xf32, #tpu.memory_space<vmem>>, vector<1x128xf32>
    %121 = vector.broadcast %120 : vector<1x128xf32> to vector<120x128xf32>
    %122 = arith.addf %119, %121 : vector<120x128xf32>
    %c0_97 = arith.constant 0 : index
    %c0_98 = arith.constant 0 : index
    %123 = vector.load %arg17[%c0_97, %c0_98] : memref<8x120xf32, #tpu.memory_space<vmem>>, vector<8x120xf32>
    %cst_99 = arith.constant dense<0.000000e+00> : vector<8x128xf32>
    %124 = tpu.matmul %123, %122, %cst_99 {dimension_numbers = #tpu.dot_dimension_numbers<[1], [0], [0], [1], [0, 0, 1, 1], [], []>} : vector<8x120xf32>, vector<120x128xf32>, vector<8x128xf32> -> vector<8x128xf32>
    %c0_100 = arith.constant 0 : index
    %c0_101 = arith.constant 0 : index
    %125 = vector.load %arg14[%c0_100, %c0_101] : memref<128x8xf32, #tpu.memory_space<vmem>>, vector<128x8xf32>
    %cst_102 = arith.constant dense<0.000000e+00> : vector<8x8xf32>
    %126 = tpu.matmul %124, %125, %cst_102 {dimension_numbers = #tpu.dot_dimension_numbers<[1], [0], [0], [1], [0, 0, 1, 1], [], []>} : vector<8x128xf32>, vector<128x8xf32>, vector<8x8xf32> -> vector<8x8xf32>
    %c0_103 = arith.constant 0 : index
    %c0_104 = arith.constant 0 : index
    %127 = vector.load %arg17[%c0_103, %c0_104] : memref<8x120xf32, #tpu.memory_space<vmem>>, vector<8x120xf32>
    %128 = arith.mulf %122, %122 : vector<120x128xf32>
    %cst_105 = arith.constant dense<0.000000e+00> : vector<8x128xf32>
    %129 = tpu.matmul %127, %128, %cst_105 {dimension_numbers = #tpu.dot_dimension_numbers<[1], [0], [0], [1], [0, 0, 1, 1], [], []>} : vector<8x120xf32>, vector<120x128xf32>, vector<8x128xf32> -> vector<8x128xf32>
    %c0_106 = arith.constant 0 : index
    %c0_107 = arith.constant 0 : index
    %130 = vector.load %arg14[%c0_106, %c0_107] : memref<128x8xf32, #tpu.memory_space<vmem>>, vector<128x8xf32>
    %cst_108 = arith.constant dense<0.000000e+00> : vector<8x8xf32>
    %131 = tpu.matmul %129, %130, %cst_108 {dimension_numbers = #tpu.dot_dimension_numbers<[1], [0], [0], [1], [0, 0, 1, 1], [], []>} : vector<8x128xf32>, vector<128x8xf32>, vector<8x8xf32> -> vector<8x8xf32>
    %cst_109 = arith.constant 0.00444444455 : f32
    %132 = vector.broadcast %cst_109 : f32 to vector<8x8xf32>
    %133 = arith.mulf %126, %132 : vector<8x8xf32>
    %cst_110 = arith.constant 0.00444444455 : f32
    %134 = vector.broadcast %cst_110 : f32 to vector<8x8xf32>
    %135 = arith.mulf %131, %134 : vector<8x8xf32>
    %136 = arith.mulf %133, %133 : vector<8x8xf32>
    %137 = arith.subf %135, %136 : vector<8x8xf32>
    %cst_111 = arith.constant 0.000000e+00 : f32
    %138 = vector.broadcast %cst_111 : f32 to vector<8x8xf32>
    %139 = arith.maximumf %137, %138 : vector<8x8xf32>
    %cst_112 = arith.constant 9.99999974E-6 : f32
    %140 = vector.broadcast %cst_112 : f32 to vector<8x8xf32>
    %141 = arith.addf %139, %140 : vector<8x8xf32>
    %142 = math.rsqrt %141 : vector<8x8xf32>
    %c0_113 = arith.constant 0 : index
    %c0_114 = arith.constant 0 : index
    %143 = vector.load %arg16[%c0_113, %c0_114] : memref<120x8xf32, #tpu.memory_space<vmem>>, vector<120x8xf32>
    %cst_115 = arith.constant dense<0.000000e+00> : vector<120x8xf32>
    %144 = tpu.matmul %143, %133, %cst_115 {dimension_numbers = #tpu.dot_dimension_numbers<[1], [0], [0], [1], [0, 0, 1, 1], [], []>} : vector<120x8xf32>, vector<8x8xf32>, vector<120x8xf32> -> vector<120x8xf32>
    %c0_116 = arith.constant 0 : index
    %c0_117 = arith.constant 0 : index
    %145 = vector.load %arg15[%c0_116, %c0_117] : memref<8x128xf32, #tpu.memory_space<vmem>>, vector<8x128xf32>
    %cst_118 = arith.constant dense<0.000000e+00> : vector<120x128xf32>
    %146 = tpu.matmul %144, %145, %cst_118 {dimension_numbers = #tpu.dot_dimension_numbers<[1], [0], [0], [1], [0, 0, 1, 1], [], []>} : vector<120x8xf32>, vector<8x128xf32>, vector<120x128xf32> -> vector<120x128xf32>
    %c0_119 = arith.constant 0 : index
    %c0_120 = arith.constant 0 : index
    %147 = vector.load %arg16[%c0_119, %c0_120] : memref<120x8xf32, #tpu.memory_space<vmem>>, vector<120x8xf32>
    %cst_121 = arith.constant dense<0.000000e+00> : vector<120x8xf32>
    %148 = tpu.matmul %147, %142, %cst_121 {dimension_numbers = #tpu.dot_dimension_numbers<[1], [0], [0], [1], [0, 0, 1, 1], [], []>} : vector<120x8xf32>, vector<8x8xf32>, vector<120x8xf32> -> vector<120x8xf32>
    %c0_122 = arith.constant 0 : index
    %c0_123 = arith.constant 0 : index
    %149 = vector.load %arg15[%c0_122, %c0_123] : memref<8x128xf32, #tpu.memory_space<vmem>>, vector<8x128xf32>
    %cst_124 = arith.constant dense<0.000000e+00> : vector<120x128xf32>
    %150 = tpu.matmul %148, %149, %cst_124 {dimension_numbers = #tpu.dot_dimension_numbers<[1], [0], [0], [1], [0, 0, 1, 1], [], []>} : vector<120x8xf32>, vector<8x128xf32>, vector<120x128xf32> -> vector<120x128xf32>
    %151 = arith.subf %122, %146 : vector<120x128xf32>
    %152 = arith.mulf %151, %150 : vector<120x128xf32>
    %cst_125 = arith.constant 0.000000e+00 : f32
    %153 = vector.broadcast %cst_125 : f32 to vector<120x128xf32>
    %154 = arith.maximumf %152, %153 : vector<120x128xf32>
    %155 = arith.truncf %154 : vector<120x128xf32> to vector<120x128xbf16>
    %c0_126 = arith.constant 0 : index
    %c0_127 = arith.constant 0 : index
    %156 = vector.load %arg18[%c0_126, %c0_127] : memref<128x640xbf16, #tpu.memory_space<vmem>>, vector<128x128xbf16>
    %cst_128 = arith.constant dense<0.000000e+00> : vector<120x128xf32>
    %157 = tpu.matmul %155, %156, %cst_128 {dimension_numbers = #tpu.dot_dimension_numbers<[1], [0], [0], [1], [0, 0, 1, 1], [], []>} : vector<120x128xbf16>, vector<128x128xbf16>, vector<120x128xf32> -> vector<120x128xf32>
    %158 = arith.truncf %157 : vector<120x128xf32> to vector<120x128xbf16>
    %c0_129 = arith.constant 0 : index
    %c0_130 = arith.constant 0 : index
    %c0_131 = arith.constant 0 : index
    %159 = vector.load %arg19[%c0_129, %c0_130, %c0_131] : memref<5x256x120xbf16, #tpu.memory_space<vmem>>, vector<1x256x120xbf16>
    %160 = vector.shape_cast %159 : vector<1x256x120xbf16> to vector<256x120xbf16>
    %cst_132 = arith.constant dense<0.000000e+00> : vector<256x128xf32>
    %161 = tpu.matmul %160, %158, %cst_132 {dimension_numbers = #tpu.dot_dimension_numbers<[1], [0], [0], [1], [0, 0, 1, 1], [], []>} : vector<256x120xbf16>, vector<120x128xbf16>, vector<256x128xf32> -> vector<256x128xf32>
    %c0_133 = arith.constant 0 : index
    %c128_134 = arith.constant 128 : index
    %162 = vector.load %arg18[%c0_133, %c128_134] : memref<128x640xbf16, #tpu.memory_space<vmem>>, vector<128x128xbf16>
    %cst_135 = arith.constant dense<0.000000e+00> : vector<120x128xf32>
    %163 = tpu.matmul %155, %162, %cst_135 {dimension_numbers = #tpu.dot_dimension_numbers<[1], [0], [0], [1], [0, 0, 1, 1], [], []>} : vector<120x128xbf16>, vector<128x128xbf16>, vector<120x128xf32> -> vector<120x128xf32>
    %164 = arith.truncf %163 : vector<120x128xf32> to vector<120x128xbf16>
    %c1_136 = arith.constant 1 : index
    %c0_137 = arith.constant 0 : index
    %c0_138 = arith.constant 0 : index
    %165 = vector.load %arg19[%c1_136, %c0_137, %c0_138] : memref<5x256x120xbf16, #tpu.memory_space<vmem>>, vector<1x256x120xbf16>
    %166 = vector.shape_cast %165 : vector<1x256x120xbf16> to vector<256x120xbf16>
    %cst_139 = arith.constant dense<0.000000e+00> : vector<256x128xf32>
    %167 = tpu.matmul %166, %164, %cst_139 {dimension_numbers = #tpu.dot_dimension_numbers<[1], [0], [0], [1], [0, 0, 1, 1], [], []>} : vector<256x120xbf16>, vector<120x128xbf16>, vector<256x128xf32> -> vector<256x128xf32>
    %168 = arith.addf %161, %167 : vector<256x128xf32>
    %c0_140 = arith.constant 0 : index
    %c256_141 = arith.constant 256 : index
    %169 = vector.load %arg18[%c0_140, %c256_141] : memref<128x640xbf16, #tpu.memory_space<vmem>>, vector<128x128xbf16>
    %cst_142 = arith.constant dense<0.000000e+00> : vector<120x128xf32>
    %170 = tpu.matmul %155, %169, %cst_142 {dimension_numbers = #tpu.dot_dimension_numbers<[1], [0], [0], [1], [0, 0, 1, 1], [], []>} : vector<120x128xbf16>, vector<128x128xbf16>, vector<120x128xf32> -> vector<120x128xf32>
    %171 = arith.truncf %170 : vector<120x128xf32> to vector<120x128xbf16>
    %c2_143 = arith.constant 2 : index
    %c0_144 = arith.constant 0 : index
    %c0_145 = arith.constant 0 : index
    %172 = vector.load %arg19[%c2_143, %c0_144, %c0_145] : memref<5x256x120xbf16, #tpu.memory_space<vmem>>, vector<1x256x120xbf16>
    %173 = vector.shape_cast %172 : vector<1x256x120xbf16> to vector<256x120xbf16>
    %cst_146 = arith.constant dense<0.000000e+00> : vector<256x128xf32>
    %174 = tpu.matmul %173, %171, %cst_146 {dimension_numbers = #tpu.dot_dimension_numbers<[1], [0], [0], [1], [0, 0, 1, 1], [], []>} : vector<256x120xbf16>, vector<120x128xbf16>, vector<256x128xf32> -> vector<256x128xf32>
    %175 = arith.addf %168, %174 : vector<256x128xf32>
    %c0_147 = arith.constant 0 : index
    %c384_148 = arith.constant 384 : index
    %176 = vector.load %arg18[%c0_147, %c384_148] : memref<128x640xbf16, #tpu.memory_space<vmem>>, vector<128x128xbf16>
    %cst_149 = arith.constant dense<0.000000e+00> : vector<120x128xf32>
    %177 = tpu.matmul %155, %176, %cst_149 {dimension_numbers = #tpu.dot_dimension_numbers<[1], [0], [0], [1], [0, 0, 1, 1], [], []>} : vector<120x128xbf16>, vector<128x128xbf16>, vector<120x128xf32> -> vector<120x128xf32>
    %178 = arith.truncf %177 : vector<120x128xf32> to vector<120x128xbf16>
    %c3_150 = arith.constant 3 : index
    %c0_151 = arith.constant 0 : index
    %c0_152 = arith.constant 0 : index
    %179 = vector.load %arg19[%c3_150, %c0_151, %c0_152] : memref<5x256x120xbf16, #tpu.memory_space<vmem>>, vector<1x256x120xbf16>
    %180 = vector.shape_cast %179 : vector<1x256x120xbf16> to vector<256x120xbf16>
    %cst_153 = arith.constant dense<0.000000e+00> : vector<256x128xf32>
    %181 = tpu.matmul %180, %178, %cst_153 {dimension_numbers = #tpu.dot_dimension_numbers<[1], [0], [0], [1], [0, 0, 1, 1], [], []>} : vector<256x120xbf16>, vector<120x128xbf16>, vector<256x128xf32> -> vector<256x128xf32>
    %182 = arith.addf %175, %181 : vector<256x128xf32>
    %c0_154 = arith.constant 0 : index
    %c512_155 = arith.constant 512 : index
    %183 = vector.load %arg18[%c0_154, %c512_155] : memref<128x640xbf16, #tpu.memory_space<vmem>>, vector<128x128xbf16>
    %cst_156 = arith.constant dense<0.000000e+00> : vector<120x128xf32>
    %184 = tpu.matmul %155, %183, %cst_156 {dimension_numbers = #tpu.dot_dimension_numbers<[1], [0], [0], [1], [0, 0, 1, 1], [], []>} : vector<120x128xbf16>, vector<128x128xbf16>, vector<120x128xf32> -> vector<120x128xf32>
    %185 = arith.truncf %184 : vector<120x128xf32> to vector<120x128xbf16>
    %c4_157 = arith.constant 4 : index
    %c0_158 = arith.constant 0 : index
    %c0_159 = arith.constant 0 : index
    %186 = vector.load %arg19[%c4_157, %c0_158, %c0_159] : memref<5x256x120xbf16, #tpu.memory_space<vmem>>, vector<1x256x120xbf16>
    %187 = vector.shape_cast %186 : vector<1x256x120xbf16> to vector<256x120xbf16>
    %cst_160 = arith.constant dense<0.000000e+00> : vector<256x128xf32>
    %188 = tpu.matmul %187, %185, %cst_160 {dimension_numbers = #tpu.dot_dimension_numbers<[1], [0], [0], [1], [0, 0, 1, 1], [], []>} : vector<256x120xbf16>, vector<120x128xbf16>, vector<256x128xf32> -> vector<256x128xf32>
    %189 = arith.addf %182, %188 : vector<256x128xf32>
    %c0_161 = arith.constant 0 : index
    %c0_162 = arith.constant 0 : index
    %190 = vector.load %arg20[%c0_161, %c0_162] : memref<1x128xf32, #tpu.memory_space<vmem>>, vector<1x128xf32>
    %191 = vector.broadcast %190 : vector<1x128xf32> to vector<256x128xf32>
    %192 = arith.addf %189, %191 : vector<256x128xf32>
    %c0_163 = arith.constant 0 : index
    %c0_164 = arith.constant 0 : index
    %193 = vector.load %arg24[%c0_163, %c0_164] : memref<8x256xf32, #tpu.memory_space<vmem>>, vector<8x256xf32>
    %cst_165 = arith.constant dense<0.000000e+00> : vector<8x128xf32>
    %194 = tpu.matmul %193, %192, %cst_165 {dimension_numbers = #tpu.dot_dimension_numbers<[1], [0], [0], [1], [0, 0, 1, 1], [], []>} : vector<8x256xf32>, vector<256x128xf32>, vector<8x128xf32> -> vector<8x128xf32>
    %c0_166 = arith.constant 0 : index
    %c0_167 = arith.constant 0 : index
    %195 = vector.load %arg21[%c0_166, %c0_167] : memref<128x4xf32, #tpu.memory_space<vmem>>, vector<128x4xf32>
    %cst_168 = arith.constant dense<0.000000e+00> : vector<8x4xf32>
    %196 = tpu.matmul %194, %195, %cst_168 {dimension_numbers = #tpu.dot_dimension_numbers<[1], [0], [0], [1], [0, 0, 1, 1], [], []>} : vector<8x128xf32>, vector<128x4xf32>, vector<8x4xf32> -> vector<8x4xf32>
    %c0_169 = arith.constant 0 : index
    %c0_170 = arith.constant 0 : index
    %197 = vector.load %arg24[%c0_169, %c0_170] : memref<8x256xf32, #tpu.memory_space<vmem>>, vector<8x256xf32>
    %198 = arith.mulf %192, %192 : vector<256x128xf32>
    %cst_171 = arith.constant dense<0.000000e+00> : vector<8x128xf32>
    %199 = tpu.matmul %197, %198, %cst_171 {dimension_numbers = #tpu.dot_dimension_numbers<[1], [0], [0], [1], [0, 0, 1, 1], [], []>} : vector<8x256xf32>, vector<256x128xf32>, vector<8x128xf32> -> vector<8x128xf32>
    %c0_172 = arith.constant 0 : index
    %c0_173 = arith.constant 0 : index
    %200 = vector.load %arg21[%c0_172, %c0_173] : memref<128x4xf32, #tpu.memory_space<vmem>>, vector<128x4xf32>
    %cst_174 = arith.constant dense<0.000000e+00> : vector<8x4xf32>
    %201 = tpu.matmul %199, %200, %cst_174 {dimension_numbers = #tpu.dot_dimension_numbers<[1], [0], [0], [1], [0, 0, 1, 1], [], []>} : vector<8x128xf32>, vector<128x4xf32>, vector<8x4xf32> -> vector<8x4xf32>
    %cst_175 = arith.constant 9.765625E-4 : f32
    %202 = vector.broadcast %cst_175 : f32 to vector<8x4xf32>
    %203 = arith.mulf %196, %202 : vector<8x4xf32>
    %cst_176 = arith.constant 9.765625E-4 : f32
    %204 = vector.broadcast %cst_176 : f32 to vector<8x4xf32>
    %205 = arith.mulf %201, %204 : vector<8x4xf32>
    %206 = arith.mulf %203, %203 : vector<8x4xf32>
    %207 = arith.subf %205, %206 : vector<8x4xf32>
    %cst_177 = arith.constant 0.000000e+00 : f32
    %208 = vector.broadcast %cst_177 : f32 to vector<8x4xf32>
    %209 = arith.maximumf %207, %208 : vector<8x4xf32>
    %cst_178 = arith.constant 9.99999974E-6 : f32
    %210 = vector.broadcast %cst_178 : f32 to vector<8x4xf32>
    %211 = arith.addf %209, %210 : vector<8x4xf32>
    %212 = math.rsqrt %211 : vector<8x4xf32>
    %c0_179 = arith.constant 0 : index
    %c0_180 = arith.constant 0 : index
    %213 = vector.load %arg23[%c0_179, %c0_180] : memref<256x8xf32, #tpu.memory_space<vmem>>, vector<256x8xf32>
    %cst_181 = arith.constant dense<0.000000e+00> : vector<256x4xf32>
    %214 = tpu.matmul %213, %203, %cst_181 {dimension_numbers = #tpu.dot_dimension_numbers<[1], [0], [0], [1], [0, 0, 1, 1], [], []>} : vector<256x8xf32>, vector<8x4xf32>, vector<256x4xf32> -> vector<256x4xf32>
    %c0_182 = arith.constant 0 : index
    %c0_183 = arith.constant 0 : index
    %215 = vector.load %arg22[%c0_182, %c0_183] : memref<4x128xf32, #tpu.memory_space<vmem>>, vector<4x128xf32>
    %cst_184 = arith.constant dense<0.000000e+00> : vector<256x128xf32>
    %216 = tpu.matmul %214, %215, %cst_184 {dimension_numbers = #tpu.dot_dimension_numbers<[1], [0], [0], [1], [0, 0, 1, 1], [], []>} : vector<256x4xf32>, vector<4x128xf32>, vector<256x128xf32> -> vector<256x128xf32>
    %c0_185 = arith.constant 0 : index
    %c0_186 = arith.constant 0 : index
    %217 = vector.load %arg23[%c0_185, %c0_186] : memref<256x8xf32, #tpu.memory_space<vmem>>, vector<256x8xf32>
    %cst_187 = arith.constant dense<0.000000e+00> : vector<256x4xf32>
    %218 = tpu.matmul %217, %212, %cst_187 {dimension_numbers = #tpu.dot_dimension_numbers<[1], [0], [0], [1], [0, 0, 1, 1], [], []>} : vector<256x8xf32>, vector<8x4xf32>, vector<256x4xf32> -> vector<256x4xf32>
    %c0_188 = arith.constant 0 : index
    %c0_189 = arith.constant 0 : index
    %219 = vector.load %arg22[%c0_188, %c0_189] : memref<4x128xf32, #tpu.memory_space<vmem>>, vector<4x128xf32>
    %cst_190 = arith.constant dense<0.000000e+00> : vector<256x128xf32>
    %220 = tpu.matmul %218, %219, %cst_190 {dimension_numbers = #tpu.dot_dimension_numbers<[1], [0], [0], [1], [0, 0, 1, 1], [], []>} : vector<256x4xf32>, vector<4x128xf32>, vector<256x128xf32> -> vector<256x128xf32>
    %221 = arith.subf %192, %216 : vector<256x128xf32>
    %222 = arith.mulf %221, %220 : vector<256x128xf32>
    %cst_191 = arith.constant 0.000000e+00 : f32
    %223 = vector.broadcast %cst_191 : f32 to vector<256x128xf32>
    %224 = arith.maximumf %222, %223 : vector<256x128xf32>
    %225 = arith.truncf %224 : vector<256x128xf32> to vector<256x128xbf16>
    %c0_192 = arith.constant 0 : index
    %c0_193 = arith.constant 0 : index
    %226 = vector.load %arg25[%c0_192, %c0_193] : memref<128x640xbf16, #tpu.memory_space<vmem>>, vector<128x128xbf16>
    %cst_194 = arith.constant dense<0.000000e+00> : vector<256x128xf32>
    %227 = tpu.matmul %225, %226, %cst_194 {dimension_numbers = #tpu.dot_dimension_numbers<[1], [0], [0], [1], [0, 0, 1, 1], [], []>} : vector<256x128xbf16>, vector<128x128xbf16>, vector<256x128xf32> -> vector<256x128xf32>
    %c254_i32 = arith.constant 254 : i32
    %228 = tpu.dynamic_rotate %227 by %c254_i32 dim 0 : vector<256x128xf32>, i32 -> vector<256x128xf32>
    %c0_195 = arith.constant 0 : index
    %c0_196 = arith.constant 0 : index
    %c0_197 = arith.constant 0 : index
    %229 = vector.load %arg26[%c0_195, %c0_196, %c0_197] : memref<5x256x1xf32, #tpu.memory_space<vmem>>, vector<1x256x1xf32>
    %230 = vector.shape_cast %229 : vector<1x256x1xf32> to vector<256x1xf32>
    %231 = vector.broadcast %230 : vector<256x1xf32> to vector<256x128xf32>
    %232 = arith.mulf %228, %231 : vector<256x128xf32>
    %c0_198 = arith.constant 0 : index
    %c128_199 = arith.constant 128 : index
    %233 = vector.load %arg25[%c0_198, %c128_199] : memref<128x640xbf16, #tpu.memory_space<vmem>>, vector<128x128xbf16>
    %cst_200 = arith.constant dense<0.000000e+00> : vector<256x128xf32>
    %234 = tpu.matmul %225, %233, %cst_200 {dimension_numbers = #tpu.dot_dimension_numbers<[1], [0], [0], [1], [0, 0, 1, 1], [], []>} : vector<256x128xbf16>, vector<128x128xbf16>, vector<256x128xf32> -> vector<256x128xf32>
    %c255_i32 = arith.constant 255 : i32
    %235 = tpu.dynamic_rotate %234 by %c255_i32 dim 0 : vector<256x128xf32>, i32 -> vector<256x128xf32>
    %c1_201 = arith.constant 1 : index
    %c0_202 = arith.constant 0 : index
    %c0_203 = arith.constant 0 : index
    %236 = vector.load %arg26[%c1_201, %c0_202, %c0_203] : memref<5x256x1xf32, #tpu.memory_space<vmem>>, vector<1x256x1xf32>
    %237 = vector.shape_cast %236 : vector<1x256x1xf32> to vector<256x1xf32>
    %238 = vector.broadcast %237 : vector<256x1xf32> to vector<256x128xf32>
    %239 = arith.mulf %235, %238 : vector<256x128xf32>
    %240 = arith.addf %232, %239 : vector<256x128xf32>
    %c0_204 = arith.constant 0 : index
    %c256_205 = arith.constant 256 : index
    %241 = vector.load %arg25[%c0_204, %c256_205] : memref<128x640xbf16, #tpu.memory_space<vmem>>, vector<128x128xbf16>
    %cst_206 = arith.constant dense<0.000000e+00> : vector<256x128xf32>
    %242 = tpu.matmul %225, %241, %cst_206 {dimension_numbers = #tpu.dot_dimension_numbers<[1], [0], [0], [1], [0, 0, 1, 1], [], []>} : vector<256x128xbf16>, vector<128x128xbf16>, vector<256x128xf32> -> vector<256x128xf32>
    %c2_207 = arith.constant 2 : index
    %c0_208 = arith.constant 0 : index
    %c0_209 = arith.constant 0 : index
    %243 = vector.load %arg26[%c2_207, %c0_208, %c0_209] : memref<5x256x1xf32, #tpu.memory_space<vmem>>, vector<1x256x1xf32>
    %244 = vector.shape_cast %243 : vector<1x256x1xf32> to vector<256x1xf32>
    %245 = vector.broadcast %244 : vector<256x1xf32> to vector<256x128xf32>
    %246 = arith.mulf %242, %245 : vector<256x128xf32>
    %247 = arith.addf %240, %246 : vector<256x128xf32>
    %c0_210 = arith.constant 0 : index
    %c384_211 = arith.constant 384 : index
    %248 = vector.load %arg25[%c0_210, %c384_211] : memref<128x640xbf16, #tpu.memory_space<vmem>>, vector<128x128xbf16>
    %cst_212 = arith.constant dense<0.000000e+00> : vector<256x128xf32>
    %249 = tpu.matmul %225, %248, %cst_212 {dimension_numbers = #tpu.dot_dimension_numbers<[1], [0], [0], [1], [0, 0, 1, 1], [], []>} : vector<256x128xbf16>, vector<128x128xbf16>, vector<256x128xf32> -> vector<256x128xf32>
    %c1_i32 = arith.constant 1 : i32
    %250 = tpu.dynamic_rotate %249 by %c1_i32 dim 0 : vector<256x128xf32>, i32 -> vector<256x128xf32>
    %c3_213 = arith.constant 3 : index
    %c0_214 = arith.constant 0 : index
    %c0_215 = arith.constant 0 : index
    %251 = vector.load %arg26[%c3_213, %c0_214, %c0_215] : memref<5x256x1xf32, #tpu.memory_space<vmem>>, vector<1x256x1xf32>
    %252 = vector.shape_cast %251 : vector<1x256x1xf32> to vector<256x1xf32>
    %253 = vector.broadcast %252 : vector<256x1xf32> to vector<256x128xf32>
    %254 = arith.mulf %250, %253 : vector<256x128xf32>
    %255 = arith.addf %247, %254 : vector<256x128xf32>
    %c0_216 = arith.constant 0 : index
    %c512_217 = arith.constant 512 : index
    %256 = vector.load %arg25[%c0_216, %c512_217] : memref<128x640xbf16, #tpu.memory_space<vmem>>, vector<128x128xbf16>
    %cst_218 = arith.constant dense<0.000000e+00> : vector<256x128xf32>
    %257 = tpu.matmul %225, %256, %cst_218 {dimension_numbers = #tpu.dot_dimension_numbers<[1], [0], [0], [1], [0, 0, 1, 1], [], []>} : vector<256x128xbf16>, vector<128x128xbf16>, vector<256x128xf32> -> vector<256x128xf32>
    %c2_i32 = arith.constant 2 : i32
    %258 = tpu.dynamic_rotate %257 by %c2_i32 dim 0 : vector<256x128xf32>, i32 -> vector<256x128xf32>
    %c4_219 = arith.constant 4 : index
    %c0_220 = arith.constant 0 : index
    %c0_221 = arith.constant 0 : index
    %259 = vector.load %arg26[%c4_219, %c0_220, %c0_221] : memref<5x256x1xf32, #tpu.memory_space<vmem>>, vector<1x256x1xf32>
    %260 = vector.shape_cast %259 : vector<1x256x1xf32> to vector<256x1xf32>
    %261 = vector.broadcast %260 : vector<256x1xf32> to vector<256x128xf32>
    %262 = arith.mulf %258, %261 : vector<256x128xf32>
    %263 = arith.addf %255, %262 : vector<256x128xf32>
    %c0_222 = arith.constant 0 : index
    %c0_223 = arith.constant 0 : index
    %264 = vector.load %arg27[%c0_222, %c0_223] : memref<1x128xf32, #tpu.memory_space<vmem>>, vector<1x128xf32>
    %265 = vector.broadcast %264 : vector<1x128xf32> to vector<256x128xf32>
    %266 = arith.addf %263, %265 : vector<256x128xf32>
    %267 = arith.negf %266 : vector<256x128xf32>
    %268 = math.exp %267 : vector<256x128xf32>
    %cst_224 = arith.constant 1.000000e+00 : f32
    %269 = vector.broadcast %cst_224 : f32 to vector<256x128xf32>
    %270 = arith.addf %269, %268 : vector<256x128xf32>
    %271 = arith.divf %269, %270 : vector<256x128xf32>
    %c0_225 = arith.constant 0 : index
    %c0_226 = arith.constant 0 : index
    %272 = vector.load %arg28[%c0_225, %c0_226] : memref<256x128xf32, #tpu.memory_space<vmem>>, vector<256x128xf32>
    tpu.vector_store %arg28[%c0_225, %c0_226], %271 {strides = array<i32>} : memref<256x128xf32, #tpu.memory_space<vmem>>, vector<256x128xf32>,
    return
  }
  func.func @transform_0(%arg0: i32) -> (i32, i32) {
    %c0_i32 = arith.constant 0 : i32
    %c0_i32_0 = arith.constant 0 : i32
    return %arg0, %c0_i32 : i32, i32
  }
  func.func @transform_1(%arg0: i32) -> (i32, i32) {
    %c0_i32 = arith.constant 0 : i32
    %c0_i32_0 = arith.constant 0 : i32
    %c0_i32_1 = arith.constant 0 : i32
    return %c0_i32, %c0_i32_0 : i32, i32
  }
  func.func @transform_2(%arg0: i32) -> (i32, i32) {
    %c0_i32 = arith.constant 0 : i32
    %c0_i32_0 = arith.constant 0 : i32
    %c0_i32_1 = arith.constant 0 : i32
    return %c0_i32, %c0_i32_0 : i32, i32
  }
  func.func @transform_3(%arg0: i32) -> (i32, i32, i32) {
    %c0_i32 = arith.constant 0 : i32
    %c0_i32_0 = arith.constant 0 : i32
    %c0_i32_1 = arith.constant 0 : i32
    %c0_i32_2 = arith.constant 0 : i32
    return %c0_i32, %c0_i32_0, %c0_i32_1 : i32, i32, i32
  }
  func.func @transform_4(%arg0: i32) -> (i32, i32, i32) {
    %c0_i32 = arith.constant 0 : i32
    %c0_i32_0 = arith.constant 0 : i32
    %c0_i32_1 = arith.constant 0 : i32
    %c0_i32_2 = arith.constant 0 : i32
    return %c0_i32, %c0_i32_0, %c0_i32_1 : i32, i32, i32
  }
  func.func @transform_5(%arg0: i32) -> (i32, i32) {
    %c0_i32 = arith.constant 0 : i32
    %c0_i32_0 = arith.constant 0 : i32
    %c0_i32_1 = arith.constant 0 : i32
    return %c0_i32, %c0_i32_0 : i32, i32
  }
  func.func @transform_6(%arg0: i32) -> (i32, i32) {
    %c0_i32 = arith.constant 0 : i32
    %c0_i32_0 = arith.constant 0 : i32
    %c0_i32_1 = arith.constant 0 : i32
    return %c0_i32, %c0_i32_0 : i32, i32
  }
  func.func @transform_7(%arg0: i32) -> (i32, i32) {
    %c0_i32 = arith.constant 0 : i32
    %c0_i32_0 = arith.constant 0 : i32
    %c0_i32_1 = arith.constant 0 : i32
    return %c0_i32, %c0_i32_0 : i32, i32
  }
  func.func @transform_8(%arg0: i32) -> (i32, i32) {
    %c0_i32 = arith.constant 0 : i32
    %c0_i32_0 = arith.constant 0 : i32
    %c0_i32_1 = arith.constant 0 : i32
    return %c0_i32, %c0_i32_0 : i32, i32
  }
  func.func @transform_9(%arg0: i32) -> (i32, i32) {
    %c0_i32 = arith.constant 0 : i32
    %c0_i32_0 = arith.constant 0 : i32
    %c0_i32_1 = arith.constant 0 : i32
    return %c0_i32, %c0_i32_0 : i32, i32
  }
  func.func @transform_10(%arg0: i32) -> (i32, i32) {
    %c0_i32 = arith.constant 0 : i32
    %c0_i32_0 = arith.constant 0 : i32
    %c0_i32_1 = arith.constant 0 : i32
    return %c0_i32, %c0_i32_0 : i32, i32
  }
  func.func @transform_11(%arg0: i32) -> (i32, i32, i32) {
    %c0_i32 = arith.constant 0 : i32
    %c0_i32_0 = arith.constant 0 : i32
    %c0_i32_1 = arith.constant 0 : i32
    %c0_i32_2 = arith.constant 0 : i32
    return %c0_i32, %c0_i32_0, %c0_i32_1 : i32, i32, i32
  }
  func.func @transform_12(%arg0: i32) -> (i32, i32) {
    %c0_i32 = arith.constant 0 : i32
    %c0_i32_0 = arith.constant 0 : i32
    %c0_i32_1 = arith.constant 0 : i32
    return %c0_i32, %c0_i32_0 : i32, i32
  }
  func.func @transform_13(%arg0: i32) -> (i32, i32) {
    %c0_i32 = arith.constant 0 : i32
    %c0_i32_0 = arith.constant 0 : i32
    %c0_i32_1 = arith.constant 0 : i32
    return %c0_i32, %c0_i32_0 : i32, i32
  }
  func.func @transform_14(%arg0: i32) -> (i32, i32) {
    %c0_i32 = arith.constant 0 : i32
    %c0_i32_0 = arith.constant 0 : i32
    %c0_i32_1 = arith.constant 0 : i32
    return %c0_i32, %c0_i32_0 : i32, i32
  }
  func.func @transform_15(%arg0: i32) -> (i32, i32) {
    %c0_i32 = arith.constant 0 : i32
    %c0_i32_0 = arith.constant 0 : i32
    %c0_i32_1 = arith.constant 0 : i32
    return %c0_i32, %c0_i32_0 : i32, i32
  }
  func.func @transform_16(%arg0: i32) -> (i32, i32) {
    %c0_i32 = arith.constant 0 : i32
    %c0_i32_0 = arith.constant 0 : i32
    %c0_i32_1 = arith.constant 0 : i32
    return %c0_i32, %c0_i32_0 : i32, i32
  }
  func.func @transform_17(%arg0: i32) -> (i32, i32) {
    %c0_i32 = arith.constant 0 : i32
    %c0_i32_0 = arith.constant 0 : i32
    %c0_i32_1 = arith.constant 0 : i32
    return %c0_i32, %c0_i32_0 : i32, i32
  }
  func.func @transform_18(%arg0: i32) -> (i32, i32, i32) {
    %c0_i32 = arith.constant 0 : i32
    %c0_i32_0 = arith.constant 0 : i32
    %c0_i32_1 = arith.constant 0 : i32
    %c0_i32_2 = arith.constant 0 : i32
    return %c0_i32, %c0_i32_0, %c0_i32_1 : i32, i32, i32
  }
  func.func @transform_19(%arg0: i32) -> (i32, i32) {
    %c0_i32 = arith.constant 0 : i32
    %c0_i32_0 = arith.constant 0 : i32
    %c0_i32_1 = arith.constant 0 : i32
    return %c0_i32, %c0_i32_0 : i32, i32
  }
  func.func @transform_20(%arg0: i32) -> (i32, i32) {
    %c0_i32 = arith.constant 0 : i32
    %c0_i32_0 = arith.constant 0 : i32
    %c0_i32_1 = arith.constant 0 : i32
    return %c0_i32, %c0_i32_0 : i32, i32
  }
  func.func @transform_21(%arg0: i32) -> (i32, i32) {
    %c0_i32 = arith.constant 0 : i32
    %c0_i32_0 = arith.constant 0 : i32
    %c0_i32_1 = arith.constant 0 : i32
    return %c0_i32, %c0_i32_0 : i32, i32
  }
  func.func @transform_22(%arg0: i32) -> (i32, i32) {
    %c0_i32 = arith.constant 0 : i32
    %c0_i32_0 = arith.constant 0 : i32
    %c0_i32_1 = arith.constant 0 : i32
    return %c0_i32, %c0_i32_0 : i32, i32
  }
  func.func @transform_23(%arg0: i32) -> (i32, i32) {
    %c0_i32 = arith.constant 0 : i32
    %c0_i32_0 = arith.constant 0 : i32
    %c0_i32_1 = arith.constant 0 : i32
    return %c0_i32, %c0_i32_0 : i32, i32
  }
  func.func @transform_24(%arg0: i32) -> (i32, i32) {
    %c0_i32 = arith.constant 0 : i32
    %c0_i32_0 = arith.constant 0 : i32
    %c0_i32_1 = arith.constant 0 : i32
    return %c0_i32, %c0_i32_0 : i32, i32
  }
  func.func @transform_25(%arg0: i32) -> (i32, i32, i32) {
    %c0_i32 = arith.constant 0 : i32
    %c0_i32_0 = arith.constant 0 : i32
    %c0_i32_1 = arith.constant 0 : i32
    %c0_i32_2 = arith.constant 0 : i32
    return %c0_i32, %c0_i32_0, %c0_i32_1 : i32, i32, i32
  }
  func.func @transform_26(%arg0: i32) -> (i32, i32) {
    %c0_i32 = arith.constant 0 : i32
    %c0_i32_0 = arith.constant 0 : i32
    %c0_i32_1 = arith.constant 0 : i32
    return %c0_i32, %c0_i32_0 : i32, i32
  }
  func.func @transform_27(%arg0: i32) -> (i32, i32) {
    %c0_i32 = arith.constant 0 : i32
    %c0_i32_0 = arith.constant 0 : i32
    return %arg0, %c0_i32 : i32, i32
  }
}

</mosaic_0001>

<bundles_post_ra>
// kernel: tile.33
= control target key start
LH: loop header
LB: loop body
LE: loop exit
PB: predicated region body
PF: predicated region fallthrough
CT: control target
= control target key end

     0   :  { %s40_s0 = inlined_call_operand.vmem [shape: f32[4], index: 0, kind: input, shape index: {}]   ;;  %s41_s1 = inlined_call_operand.vmem [shape: f32[32,4], index: 1, kind: output, shape index: {}]  }
   0x1   :  { %v4_v0 = vld [vmem:[%s40_s0] ss:$0 sm:$0xff] }
   0x2   :  { %5 = vst [vmem:[%s41_s1] sm:$0xff] %v4_v0 }
   0x3   :  { %12 = vst [vmem:[%s41_s1 + $0x8] sm:$0xff] %v4_v0 }
   0x4   :  { %13 = vst [vmem:[%s41_s1 + $0x10] sm:$0xff] %v4_v0 }
   0x5   :  { %14 = vst [vmem:[%s41_s1 + $0x18] sm:$0xff] %v4_v0 }

// kernel: tile.28
= control target key start
LH: loop header
LB: loop body
LE: loop exit
PB: predicated region body
PF: predicated region fallthrough
CT: control target
= control target key end

     0   :  { %s28_s0 = inlined_call_operand.vmem [shape: f32[8], index: 0, kind: input, shape index: {}]   ;;  %s29_s1 = inlined_call_operand.vmem [shape: f32[15,8], index: 1, kind: output, shape index: {}]  }
   0x1   :  { %v4_v0 = vld [vmem:[%s28_s0] ss:$0 sm:$0xff] }
   0x2   :  { %5 = vst [vmem:[%s29_s1] sm:$0xff] %v4_v0 }
   0x3   :  { %8 = vst [vmem:[%s29_s1 + $0x8] sm:$0xff] %v4_v0 }

// kernel: tile.29
= control target key start
LH: loop header
LB: loop body
LE: loop exit
PB: predicated region body
PF: predicated region fallthrough
CT: control target
= control target key end

     0   :  { %s123_s10 = smov 112   ;;  %s124_s11 = smov 96   ;;  %vm3_vm0 = vcmask 64512   ;;  %vm9_vm1 = vcmask 982912   ;;  %vm15_vm2 = vcmask 917312   ;;  %vm21_vm3 = vcmask 851712   ;;  %s195_s0 = inlined_call_operand.vmem [shape: f32[15,8], index: 0, kind: input, shape index: {}]   ;;  %s196_s1 = inlined_call_operand.vmem [shape: f32[120], index: 1, kind: output, shape index: {}]  }
   0x1   :  { %v95_v0 = vld [vmem:[%s195_s0 + $0xe] sm:$0x1]   ;;  %v97_v1 = vld [vmem:[%s195_s0 + $0xc] sm:$0x1]   ;;  %v99_v2 = vld [vmem:[%s195_s0 + $0xa] sm:$0x1]  }
   0x2   :  { %7 = vrot.lane.b32.xlu0 %v95_v0, %s123_s10  ;;  %19 = vrot.lane.b32.xlu1 %v97_v1, %s124_s11  ;;  %s125_s14 = smov 80   ;;  %v96_v3 = vld [vmem:[%s195_s0 + $0xd] sm:$0x1]   ;;  %v98_v4 = vld [vmem:[%s195_s0 + $0xb] sm:$0x1]   ;;  %s126_s19 = smov 104  }
   0x3   :  { %31 = vrot.lane.b32.xlu2 %v99_v2, %s125_s14  ;;  %s127_s20 = smov 88   ;;  %v100_v5 = vld [vmem:[%s195_s0 + $0x9] sm:$0x1]   ;;  %s128_s23 = smov 72   ;;  %v101_v6 = vld [vmem:[%s195_s0 + $0x8] sm:$0x1]  }
   0x4   :  { %v102_v7 = vld [vmem:[%s195_s0 + $0x7] sm:$0x1]   ;;  %s129_s28 = smov 64   ;;  %s130_s29 = smov 56   ;;  %v103_v8 = vld [vmem:[%s195_s0 + $0x6] sm:$0x1]  }
   0x5   :  { %s131_s3 = smov 48   ;;  %v104_v9 = vld [vmem:[%s195_s0 + $0x5] sm:$0x1]   ;;  %v105_v10 = vld [vmem:[%s195_s0 + $0x4] sm:$0x1]   ;;  %s132_s8 = smov 40  }
   0x6   :  { %s133_s9 = smov 32   ;;  %v106_v11 = vld [vmem:[%s195_s0 + $0x3] sm:$0x1]   ;;  %s134_s12 = smov 24   ;;  %v107_v12 = vld [vmem:[%s195_s0 + $0x2] sm:$0x1]  }
   0x7   :  { %v108_v13 = vld [vmem:[%s195_s0 + $0x1] sm:$0x1]   ;;  %s135_s17 = smov 16   ;;  %s136_s18 = smov 8   ;;  %v2_v14 = vld [vmem:[%s195_s0] sm:$0x1]  }
   0x8   :  { %4 = vst.msk [vmem:[#allocation0] sm:$0x1] %vm3_vm0, %v2_v14   ;;  %vm27_vm4 = vcmask 786112   ;;  %vm33_vm5 = vcmask 720512   ;;  %vm39_vm6 = vcmask 654912   ;;  %vm45_vm7 = vcmask 589312  }
   0x9   :  { %vm51_vm8 = vcmask 523712   ;;  %vm57_vm9 = vcmask 458112   ;;  %vm63_vm10 = vcmask 392512   ;;  %vm69_vm11 = vcmask 326912  }
   0xa   :  { %13 = vrot.lane.b32.xlu0 %v96_v3, %s126_s19  ;;  %25 = vrot.lane.b32.xlu1 %v98_v4, %s127_s20  ;;  %vm75_vm12 = vcmask 261312   ;;  %vm81_vm13 = vcmask 195712   ;;  %vm87_vm14 = vcmask 130112  }
   0xb   :  { %37 = vrot.lane.b32.xlu2 %v100_v5, %s128_s23 }
  0x12   :  { %43 = vrot.lane.b32.xlu0 %v101_v6, %s129_s28  ;;  %49 = vrot.lane.b32.xlu1 %v102_v7, %s130_s29 }
  0x13   :  { %55 = vrot.lane.b32.xlu2 %v103_v8, %s131_s3 }
  0x1a   :  { %61 = vrot.lane.b32.xlu0 %v104_v9, %s132_s8  ;;  %67 = vrot.lane.b32.xlu1 %v105_v10, %s133_s9 }
  0x1b   :  { %73 = vrot.lane.b32.xlu2 %v106_v11, %s134_s12 }
  0x22   :  { %79 = vrot.lane.b32.xlu0 %v107_v12, %s135_s17  ;;  %85 = vrot.lane.b32.xlu1 %v108_v13, %s136_s18 }
  0x5d   :  { %v32_v15 = vpop.permute.xlu2 %31  }
  0x65   :  { %v38_v16 = vpop.permute.xlu2 %37  }
  0x6d   :  { %v56_v17 = vpop.permute.xlu2 %55  }
  0x74   :  { %v8_v18 = vpop.permute.xlu0 %7   ;;  %v20_v19 = vpop.permute.xlu1 %19  }
  0x75   :  { %10 = vst.msk [vmem:[#allocation0] sm:$0x1] %vm9_vm1, %v8_v18   ;;  %v74_v20 = vpop.permute.xlu2 %73  }
  0x7c   :  { %v14_v21 = vpop.permute.xlu0 %13   ;;  %v26_v22 = vpop.permute.xlu1 %25  }
  0x7d   :  { %16 = vst.msk [vmem:[#allocation0] sm:$0x1] %vm15_vm2, %v14_v21  }
  0x7e   :  { %22 = vst.msk [vmem:[#allocation0] sm:$0x1] %vm21_vm3, %v20_v19  }
  0x7f   :  { %28 = vst.msk [vmem:[#allocation0] sm:$0x1] %vm27_vm4, %v26_v22  }
  0x80   :  { %34 = vst.msk [vmem:[#allocation0] sm:$0x1] %vm33_vm5, %v32_v15  }
  0x81   :  { %40 = vst.msk [vmem:[#allocation0] sm:$0x1] %vm39_vm6, %v38_v16  }
  0x84   :  { %v44_v23 = vpop.permute.xlu0 %43   ;;  %v50_v24 = vpop.permute.xlu1 %49  }
  0x85   :  { %46 = vst.msk [vmem:[#allocation0] sm:$0x1] %vm45_vm7, %v44_v23  }
  0x86   :  { %52 = vst.msk [vmem:[#allocation0] sm:$0x1] %vm51_vm8, %v50_v24  }
  0x87   :  { %58 = vst.msk [vmem:[#allocation0] sm:$0x1] %vm57_vm9, %v56_v17  }
  0x8c   :  { %v62_v25 = vpop.permute.xlu0 %61   ;;  %v68_v26 = vpop.permute.xlu1 %67  }
  0x8d   :  { %64 = vst.msk [vmem:[#allocation0] sm:$0x1] %vm63_vm10, %v62_v25  }
  0x8e   :  { %70 = vst.msk [vmem:[#allocation0] sm:$0x1] %vm69_vm11, %v68_v26  }
  0x8f   :  { %76 = vst.msk [vmem:[#allocation0] sm:$0x1] %vm75_vm12, %v74_v20  }
  0x94   :  { %v80_v27 = vpop.permute.xlu0 %79   ;;  %v86_v28 = vpop.permute.xlu1 %85  }
  0x95   :  { %82 = vst.msk [vmem:[#allocation0] sm:$0x1] %vm81_vm13, %v80_v27  }
  0x96   :  { %88 = vst.msk [vmem:[#allocation0] sm:$0x1] %vm87_vm14, %v86_v28  }
  0x9d   :  { %v91_v29 = vld [vmem:[#allocation0] sm:$0x1] }
  0x9e   :  { %94 = vst [vmem:[%s196_s1] sm:$0x1] %v91_v29 }

// kernel: tile.23
= control target key start
LH: loop header
LB: loop body
LE: loop exit
PB: predicated region body
PF: predicated region fallthrough
CT: control target
= control target key end

     0   :  { %s22_s0 = inlined_call_operand.vmem [shape: f32[16], index: 0, kind: input, shape index: {}]   ;;  %s23_s1 = inlined_call_operand.vmem [shape: f32[7,16], index: 1, kind: output, shape index: {}]  }
   0x1   :  { %v4_v0 = vld [vmem:[%s22_s0] ss:$0 sm:$0xff] }
   0x2   :  { %5 = vst [vmem:[%s23_s1] sm:$0xff] %v4_v0 }

// kernel: tile.24
= control target key start
LH: loop header
LB: loop body
LE: loop exit
PB: predicated region body
PF: predicated region fallthrough
CT: control target
= control target key end

     0   :  { %s59_s10 = smov 96   ;;  %s60_s11 = smov 64   ;;  %vm3_vm0 = vcmask 130048   ;;  %vm9_vm1 = vcmask 917248   ;;  %vm15_vm2 = vcmask 786048   ;;  %vm21_vm3 = vcmask 654848   ;;  %s99_s0 = inlined_call_operand.vmem [shape: f32[7,16], index: 0, kind: input, shape index: {}]   ;;  %s100_s1 = inlined_call_operand.vmem [shape: f32[112], index: 1, kind: output, shape index: {}]  }
   0x1   :  { %v47_v0 = vld [vmem:[%s99_s0 + $0x6] sm:$0x1]   ;;  %v49_v1 = vld [vmem:[%s99_s0 + $0x4] sm:$0x1]   ;;  %v51_v2 = vld [vmem:[%s99_s0 + $0x2] sm:$0x1]  }
   0x2   :  { %7 = vrot.lane.b32.xlu0 %v47_v0, %s59_s10  ;;  %19 = vrot.lane.b32.xlu1 %v49_v1, %s60_s11  ;;  %s61_s14 = smov 32   ;;  %v48_v3 = vld [vmem:[%s99_s0 + $0x5] sm:$0x1]   ;;  %v50_v4 = vld [vmem:[%s99_s0 + $0x3] sm:$0x1]   ;;  %s62_s21 = smov 80  }
   0x3   :  { %31 = vrot.lane.b32.xlu2 %v51_v2, %s61_s14  ;;  %v52_v5 = vld [vmem:[%s99_s0 + $0x1] sm:$0x1]   ;;  %s63_s22 = smov 48   ;;  %s64_s23 = smov 16   ;;  %v2_v6 = vld [vmem:[%s99_s0] sm:$0x1]  }
   0x4   :  { %4 = vst.msk [vmem:[#allocation0] sm:$0x1] %vm3_vm0, %v2_v6   ;;  %vm27_vm4 = vcmask 523648   ;;  %vm33_vm5 = vcmask 392448   ;;  %vm39_vm6 = vcmask 261248  }
   0xa   :  { %13 = vrot.lane.b32.xlu0 %v48_v3, %s62_s21  ;;  %25 = vrot.lane.b32.xlu1 %v50_v4, %s63_s22 }
   0xb   :  { %37 = vrot.lane.b32.xlu2 %v52_v5, %s64_s23 }
  0x5d   :  { %v32_v7 = vpop.permute.xlu2 %31  }
  0x65   :  { %v38_v8 = vpop.permute.xlu2 %37  }
  0x74   :  { %v8_v9 = vpop.permute.xlu0 %7   ;;  %v20_v10 = vpop.permute.xlu1 %19  }
  0x75   :  { %10 = vst.msk [vmem:[#allocation0] sm:$0x1] %vm9_vm1, %v8_v9  }
  0x7c   :  { %v14_v11 = vpop.permute.xlu0 %13   ;;  %v26_v12 = vpop.permute.xlu1 %25  }
  0x7d   :  { %16 = vst.msk [vmem:[#allocation0] sm:$0x1] %vm15_vm2, %v14_v11  }
  0x7e   :  { %22 = vst.msk [vmem:[#allocation0] sm:$0x1] %vm21_vm3, %v20_v10  }
  0x7f   :  { %28 = vst.msk [vmem:[#allocation0] sm:$0x1] %vm27_vm4, %v26_v12  }
  0x80   :  { %34 = vst.msk [vmem:[#allocation0] sm:$0x1] %vm33_vm5, %v32_v7  }
  0x81   :  { %40 = vst.msk [vmem:[#allocation0] sm:$0x1] %vm39_vm6, %v38_v8  }
  0x88   :  { %v43_v13 = vld [vmem:[#allocation0] sm:$0x1] }
  0x89   :  { %46 = vst [vmem:[%s100_s1] sm:$0x1] %v43_v13 }

// kernel: local_norm_emission_decoder.1
= control target key start
LH: loop header
LB: loop body
LE: loop exit
PB: predicated region body
PF: predicated region fallthrough
CT: control target
= control target key end

     0   :  { %s18238_s0 = inlined_call_operand.vmem [shape: f32[16,16], index: 0, kind: input, shape index: {}]   ;;  %s18239_s1 = inlined_call_operand.vmem [shape: bf16[16,2048], index: 1, kind: input, shape index: {}]   ;;  %s18240_s2 = inlined_call_operand.vmem [shape: f32[1,2048], index: 2, kind: input, shape index: {}]   ;;  %s18241_s3 = inlined_call_operand.vmem [shape: bf16[4,32,8], index: 3, kind: input, shape index: {}]   ;;  %s18242_s4 = inlined_call_operand.vmem [shape: bf16[4,56,32], index: 4, kind: input, shape index: {}]   ;;  %s18243_s5 = inlined_call_operand.vmem [shape: f32[1,128], index: 5, kind: input, shape index: {}]   ;;  %s18244_s6 = inlined_call_operand.vmem [shape: f32[128,16], index: 6, kind: input, shape index: {}]   ;;  %s18245_s7 = inlined_call_operand.vmem [shape: f32[16,128], index: 7, kind: input, shape index: {}]   ;;  %s18246_s8 = inlined_call_operand.vmem [shape: f32[56,8], index: 8, kind: input, shape index: {}]   ;;  %s18247_s9 = inlined_call_operand.vmem [shape: f32[8,56], index: 9, kind: input, shape index: {}]   ;;  %s18248_s10 = inlined_call_operand.vmem [shape: bf16[128,640], index: 10, kind: input, shape index: {}]   ;;  %s18249_s11 = inlined_call_operand.vmem [shape: bf16[5,120,56], index: 11, kind: input, shape index: {}]   ;;  %s18250_s12 = inlined_call_operand.vmem [shape: f32[1,128], index: 12, kind: input, shape index: {}]   ;;  %s18251_s13 = inlined_call_operand.vmem [shape: f32[128,8], index: 13, kind: input, shape index: {}]   ;;  %s18252_s14 = inlined_call_operand.vmem [shape: f32[8,128], index: 14, kind: input, shape index: {}]   ;;  %s18253_s15 = inlined_call_operand.vmem [shape: f32[120,8], index: 15, kind: input, shape index: {}]   ;;  %s18254_s16 = inlined_call_operand.vmem [shape: f32[8,120], index: 16, kind: input, shape index: {}]   ;;  %s18255_s17 = inlined_call_operand.vmem [shape: bf16[128,640], index: 17, kind: input, shape index: {}]   ;;  %s18256_s18 = inlined_call_operand.vmem [shape: bf16[5,256,120], index: 18, kind: input, shape index: {}]   ;;  %s18257_s19 = inlined_call_operand.vmem [shape: f32[1,128], index: 19, kind: input, shape index: {}]   ;;  %s18258_s20 = inlined_call_operand.vmem [shape: f32[128,4], index: 20, kind: input, shape index: {}]   ;;  %s18259_s21 = inlined_call_operand.vmem [shape: f32[4,128], index: 21, kind: input, shape index: {}]   ;;  %s18260_s22 = inlined_call_operand.vmem [shape: f32[256,8], index: 22, kind: input, shape index: {}]   ;;  %s18261_s23 = inlined_call_operand.vmem [shape: f32[8,256], index: 23, kind: input, shape index: {}]   ;;  %s18262_s24 = inlined_call_operand.vmem [shape: bf16[128,640], index: 24, kind: input, shape index: {}]   ;;  %s18263_s25 = inlined_call_operand.vmem [shape: f32[5,256,1], index: 25, kind: input, shape index: {}]   ;;  %s18264_s26 = inlined_call_operand.vmem [shape: f32[1,128], index: 26, kind: input, shape index: {}]   ;;  %s18265_s27 = inlined_call_operand.hbm [shape: f32[512,128], index: 27, kind: output, shape index: {}]  }
   0x1   :  { %18336 = sst [smem:[#allocation128_spill]] %s18238_s0 }
   0x2   :  { %18337 = sst [smem:[#allocation129_spill]] %s18239_s1 }
   0x3   :  { %18338 = sst [smem:[#allocation130_spill]] %s18240_s2 }
   0x4   :  { %18339 = sst [smem:[#allocation131_spill]] %s18241_s3 }
   0x5   :  { %18340 = sst [smem:[#allocation132_spill]] %s18242_s4 }
   0x6   :  { %18341 = sst [smem:[#allocation133_spill]] %s18243_s5 }
   0x7   :  { %18342 = sst [smem:[#allocation134_spill]] %s18244_s6 }
   0x8   :  { %18343 = sst [smem:[#allocation135_spill]] %s18245_s7 }
   0x9   :  { %18344 = sst [smem:[#allocation136_spill]] %s18246_s8 }
   0xa   :  { %18345 = sst [smem:[#allocation137_spill]] %s18247_s9 }
   0xb   :  { %18346 = sst [smem:[#allocation138_spill]] %s18248_s10 }
   0xc   :  { %18347 = sst [smem:[#allocation139_spill]] %s18249_s11 }
   0xd   :  { %18348 = sst [smem:[#allocation140_spill]] %s18250_s12 }
   0xe   :  { %18349 = sst [smem:[#allocation141_spill]] %s18251_s13 }
   0xf   :  { %32 = vsyncpa [#allocation3], 0 }
  0x10   :  { %34 = vsyncpa [#allocation3 + $0x1], 0  ;;  %s12781_s7 = smov 0   ;;  %s12783_s4 = smov 0  }
  0x11   :  { %s12785_s8 = smov 0   ;;  %s12787_s30 = smov 0  }
  0x12 LB: > { %18350 = sst [smem:[#allocation5_spill]] %s12624_s7  ;;  %s12802_s9 = sadd.s32 4294967295, %s12636_s30   ;;  %s12636_s30 = sphi %s12787_s30, %s18742_s30   ;;  %s12632_s8 = sphi %s12785_s8, %s18744_s8   ;;  %s12628_s4 = sphi %s12783_s4, %s18746_s4   ;;  %s12624_s7 = sphi %s12781_s7, %s18745_s7  }
  0x13   : > { %18351 = sst [smem:[#allocation6_spill]] %s12632_s8  ;;  %s10233_s5 = sadd.s32 4294967294, %s12636_s30  }
  0x14   : > { %18352 = sst [smem:[#allocation7_spill]] %s12636_s30  ;;  %s12806_s28 = sadd.s32 1, %s12636_s30  }
  0x15   : > { %18353 = sst [smem:[#allocation8_spill]] %s12806_s28  ;;  %s619_s0 = sadd.s32 1, %s12632_s8 }
  0x16   : > { %s616_s10 = ssub.s32 %s12636_s30, %s12806_s28  ;;  %p629_p0 = scmp.ne.s32.totalorder %s12632_s8, %s12628_s4 }
  0x17   : > { %p617_p1 = scmp.eq.s32.totalorder %s616_s10, 0  ;;  %p630_p2 = scmp.eq.s32.totalorder %s12802_s9, 1 }
  0x18   : > { %p635_p3 = scmp.ne.s32.totalorder %s12628_s4, %s12624_s7  ;;  %p636_p4 = scmp.eq.s32.totalorder %s10233_s5, 1 }
  0x19   : > { %s12817_s29 = scalar_select %p617_p1, %s12632_s8, %s619_s0  }
  0x1a   : > { %p12819_p5 = por %p630_p2, %p629_p0  ;;  %p12823_p6 = por %p636_p4, %p635_p3 }
  0x1b   : > { %18354 = sst [smem:[#allocation9_spill]] %s12817_s29  ;;  %p10236_p7 = scmp.ge.s32.totalorder %s12636_s30, 1 }
  0x1c   : > { %s18355_s1 = scalar_select %p12819_p5, 1, 0 }
  0x1d   : > { %s18357_s6 = scalar_select %p12823_p6, 1, 0 }
  0x1e   : > { %18356 = sst [smem:[#allocation10_spill]] %s18355_s1  ;;  %p739_p8 = scmp.lt.s32.totalorder %s12636_s30, 3 }
  0x1f   : > { %18358 = sst [smem:[#allocation11_spill]] %s18357_s6 }
  0x20   : > { %p740_p9 = pnand %p10236_p7, %p739_p8 }
  0x22   : > { %743 = sbr.rel (%p740_p9) target bundleno = 5283 (0x14a3), region = 128 }
  0x27   : > { %s18359_s3 = sld [smem:[#allocation129_spill]]  ;;  %p810_p10 = scmp.lt.s32.totalorder %s12802_s9, 1  ;;  %vm950_vm0 = vcmask 130048   ;;  %vm1196_vm1 = vcmask 1043456   ;;  %vm1189_vm2 = vcmask 64512   ;;  %vm1700_vm3 = vcmask 261120  }
  0x28   : > { %s18360_s10 = sld [smem:[#allocation128_spill]]  ;;  %vm1985_vm4 = vcmask 457728   ;;  %vm3546_vm8 = vcmask 982016   ;;  %vm6553_vm12 = vcmask 31744  }
  0x29   : > { %s811_s5 = scalar_select %p810_p10, %s12802_s9, 1 }
  0x2a   : > { %s18361_s30 = sld [smem:[#allocation130_spill]] }
  0x2b   : > { %s10238_s0 = sshll.u32 %s811_s5, 3  ;;  %s18363_s5 = sld [smem:[#allocation131_spill]] }
  0x2c   : > { %s18368_s8 = sld [smem:[#allocation132_spill]] }
  0x2d   : > { %v10241_v0 = vld [vmem:[%s18359_s3] sm:$0xf]  ;;  %v12115_v2 = vld [vmem:[%s18359_s3 + $0x4] sm:$0xf]  ;;  %v10249_v5 = vld [vmem:[%s18359_s3 + $0x8] sm:$0xf] }
  0x2e   : > { %v12123_v1 = vld [vmem:[%s18359_s3 + $0x3c] sm:$0xf0]  ;;  %v10243_v4 = vld [vmem:[%s18359_s3 + $0x40] sm:$0xf0]  ;;  %v12124_v6 = vld [vmem:[%s18359_s3 + $0x44] sm:$0xf0]  ;;  %s813_s1 = scalar_lea.vmem %s18360_s10, %s10238_s0 }
  0x2f   : > { %v10242_v3 = vor.u32 %v12123_v1, %v10241_v0  ;;  %v10246_v7 = vor.u32 %v12115_v2, %v10243_v4  ;;  %v10250_v8 = vor.u32 %v12124_v6, %v10249_v5  ;;  %v12117_v9 = vld [vmem:[%s18359_s3 + $0x14] sm:$0xf]  ;;  %v12116_v12 = vld [vmem:[%s18359_s3 + $0xc] sm:$0xf]  ;;  %v10257_v14 = vld [vmem:[%s18359_s3 + $0x10] sm:$0xf] }
  0x30   : > { %v10259_v10 = vld [vmem:[%s18359_s3 + $0x50] sm:$0xf0]  ;;  %v10251_v13 = vld [vmem:[%s18359_s3 + $0x48] sm:$0xf0]  ;;  %v12125_v16 = vld [vmem:[%s18359_s3 + $0x4c] sm:$0xf0]  ;;  %s18362_s10 = smov %s18361_s30 }
  0x31   : > { %961 = vmatpush.bf16.msra.mxu0 %v10242_v3  ;;  %v10262_v11 = vor.u32 %v12117_v9, %v10259_v10  ;;  %974 = vmatpush.bf16.msra.mxu3 %v10246_v7  ;;  %v10254_v15 = vor.u32 %v12116_v12, %v10251_v13  ;;  %v10265_v17 = vld [vmem:[%s18359_s3 + $0x18] sm:$0xf]  ;;  %v10258_v18 = vor.u32 %v12125_v16, %v10257_v14  ;;  %v12118_v20 = vld [vmem:[%s18359_s3 + $0x1c] sm:$0xf]  ;;  %v816_v23 = vld [vmem:[%s813_s1] sm:$0xff]  ;;  %s18374_s0 = sld [smem:[#allocation134_spill]] }
  0x32   : > { %987 = vmatpush.bf16.msra.mxu2 %v10250_v8  ;;  %v12126_v19 = vld [vmem:[%s18359_s3 + $0x54] sm:$0xf0]  ;;  %v10267_v21 = vld [vmem:[%s18359_s3 + $0x58] sm:$0xf0]  ;;  %v817_v24 = vpack.c.bf16 %v816_v23, %v816_v23  ;;  %v12119_v26 = vld [vmem:[%s18359_s3 + $0x24] sm:$0xf]  ;;  %s18369_s28 = smov %s18368_s8 }
  0x33   : > { %1026 = vmatpush.bf16.msra.mxu1 %v10262_v11  ;;  %v10266_v22 = vor.u32 %v12126_v19, %v10265_v17  ;;  %v10270_v25 = vor.u32 %v12118_v20, %v10267_v21  ;;  %v10275_v27 = vld [vmem:[%s18359_s3 + $0x60] sm:$0xf0]  ;;  %v10273_v28 = vld [vmem:[%s18359_s3 + $0x20] sm:$0xf]  ;;  %v10281_v31 = vld [vmem:[%s18359_s3 + $0x28] sm:$0xf] }
  0x34   : > { %10303 = vmatmul.msk.bf16.vlgmr.msra.gmra.mxu0 %vm950_vm0, %v817_v24  ;;  %10304 = vmatmul.msk.bf16.vlgmr.msra.gmra.mxu3 %vm950_vm0, %v817_v24  ;;  %v10278_v29 = vor.u32 %v12119_v26, %v10275_v27  ;;  %v12127_v30 = vld [vmem:[%s18359_s3 + $0x5c] sm:$0xf0]  ;;  %v12128_v32 = vld [vmem:[%s18359_s3 + $0x64] sm:$0xf0]  ;;  %v12121_v35 = vld [vmem:[%s18359_s3 + $0x34] sm:$0xf] }
  0x35   : > { %1000 = vmatpush.bf16.msrb.mxu3 %v10254_v15  ;;  %1013 = vmatpush.bf16.msrb.mxu0 %v10258_v18  ;;  %v10274_v33 = vor.u32 %v12127_v30, %v10273_v28  ;;  %v10282_v34 = vor.u32 %v12128_v32, %v10281_v31  ;;  %v10291_v36 = vld [vmem:[%s18359_s3 + $0x70] sm:$0xf0]  ;;  %v12120_v38 = vld [vmem:[%s18359_s3 + $0x2c] sm:$0xf]  ;;  %v10289_v41 = vld [vmem:[%s18359_s3 + $0x30] sm:$0xf] }
  0x36   : > { %1039 = vmatpush.bf16.msrb.mxu2 %v10266_v22  ;;  %10308 = vmatmul.msk.bf16.vlgmr.msra.gmra.mxu1 %vm950_vm0, %v817_v24  ;;  %v10294_v37 = vor.u32 %v12121_v35, %v10291_v36  ;;  %v10283_v39 = vld [vmem:[%s18359_s3 + $0x68] sm:$0xf0]  ;;  %v12129_v42 = vld [vmem:[%s18359_s3 + $0x6c] sm:$0xf0]  ;;  %v10297_v43 = vld [vmem:[%s18359_s3 + $0x38] sm:$0xf] }
  0x37   : > { %10305 = vmatmul.msk.bf16.vlgmr.msra.gmra.mxu2 %vm950_vm0, %v817_v24  ;;  %1078 = vmatpush.bf16.msrb.mxu1 %v10278_v29  ;;  %v10286_v40 = vor.u32 %v12120_v38, %v10283_v39  ;;  %v10290_v44 = vor.u32 %v12129_v42, %v10289_v41  ;;  %v12130_v45 = vld [vmem:[%s18359_s3 + $0x74] sm:$0xf0]  ;;  %v12122_v47 = vld [vmem:[%s18359_s3 + $0x3c] sm:$0xf]  ;;  %v12949_v50 = vld [vmem:[%s18361_s30] sm:$0xff]  ;;  %s18375_s29 = sld [smem:[#allocation133_spill]] }
  0x38   : > { %v10298_v46 = vor.u32 %v12130_v45, %v10297_v43  ;;  %v10299_v48 = vld [vmem:[%s18359_s3 + $0x78] sm:$0xf0]  ;;  %v843_v51 = vperm.slane %v12949_v50, 5  ;;  %v839_v55 = vperm.slane %v12949_v50, 1  ;;  %v12957_v59 = vld [vmem:[%s18363_s5 + $0x10] sm:$0xff]  ;;  %v838_v1 = vperm.slane %v12949_v50, 0 }
  0x39   : > { %1052 = vmatpush.bf16.msra.mxu3 %v10270_v25  ;;  %1065 = vmatpush.bf16.msra.mxu0 %v10274_v33  ;;  %v10302_v49 = vor.u32 %v12122_v47, %v10299_v48  ;;  %v842_v3 = vperm.slane %v12949_v50, 4  ;;  %v840_v6 = vperm.slane %v12949_v50, 2  ;;  %v844_v13 = vperm.slane %v12949_v50, 6  ;;  %v12134_v17 = vld [vmem:[%s18363_s5 + $0x18] sm:$0xff]  ;;  %v12980_v28 = vld [vmem:[%s18362_s10 + $0x8] sm:$0xff]  ;;  %v12131_v39 = vld [vmem:[%s18363_s5] sm:$0xff] }
  0x3a   : > { %1091 = vmatpush.bf16.msra.mxu2 %v10282_v34  ;;  %v841_v25 = vperm.slane %v12949_v50, 3  ;;  %v847_v29 = vperm.slane %v12980_v28, 1  ;;  %v845_v34 = vperm.slane %v12949_v50, 7  ;;  %v846_v36 = vperm.slane %v12980_v28, 0  ;;  %s18376_s2 = sld [smem:[#allocation137_spill]] }
  0x3b   : > { %1130 = vmatpush.bf16.msra.mxu1 %v10294_v37  ;;  %v848_v50 = vperm.slane %v12980_v28, 2  ;;  %s18377_s1 = sld [smem:[#allocation136_spill]] }
  0x3c   : > { %s18379_s6 = sld [smem:[#allocation138_spill]] }
  0x3d   : > { %s18380_s30 = sld [smem:[#allocation139_spill]] }
  0x3e   : > { %s18390_s12 = sld [smem:[#allocation140_spill]] }
  0x3f   : > { %s18391_s13 = sld [smem:[#allocation141_spill]] }
  0x43   : > { %s18381_s11 = smov %s18380_s30 }
  0x44   : > { %10306 = vmatmul.msk.bf16.vlgmr.msrb.gmra.mxu3 %vm950_vm0, %v817_v24  ;;  %10307 = vmatmul.msk.bf16.vlgmr.msrb.gmra.mxu0 %vm950_vm0, %v817_v24 }
  0x45   : > { %1104 = vmatpush.bf16.msrb.mxu3 %v10286_v40  ;;  %1117 = vmatpush.bf16.msrb.mxu0 %v10290_v44 }
  0x46   : > { %10312 = vmatmul.msk.bf16.vlgmr.msrb.gmra.mxu1 %vm950_vm0, %v817_v24 }
  0x47   : > { %10309 = vmatmul.msk.bf16.vlgmr.msrb.gmra.mxu2 %vm950_vm0, %v817_v24 }
  0x48   : > { %1143 = vmatpush.bf16.msrb.mxu2 %v10298_v46 }
  0x54   : > { %10310 = vmatmul.msk.bf16.vlgmr.msra.gmra.mxu3 %vm950_vm0, %v817_v24  ;;  %10311 = vmatmul.msk.bf16.vlgmr.msra.gmra.mxu0 %vm950_vm0, %v817_v24 }
  0x55   : > { %1156 = vmatpush.bf16.msra.mxu3 %v10302_v49 }
  0x56   : > { %10316 = vmatmul.msk.bf16.vlgmr.msra.gmra.mxu1 %vm950_vm0, %v817_v24 }
  0x57   : > { %10313 = vmatmul.msk.bf16.vlgmr.msra.gmra.mxu2 %vm950_vm0, %v817_v24 }
  0x64   : > { %10314 = vmatmul.msk.bf16.vlgmr.msrb.gmra.mxu3 %vm950_vm0, %v817_v24  ;;  %10315 = vmatmul.msk.bf16.vlgmr.msrb.gmra.mxu0 %vm950_vm0, %v817_v24 }
  0x67   : > { %10317 = vmatmul.msk.bf16.vlgmr.msrb.gmra.mxu2 %vm950_vm0, %v817_v24 }
  0x74   : > { %10318 = vmatmul.msk.bf16.vlgmr.msra.gmra.mxu3 %vm950_vm0, %v817_v24 }
  0xb1   : > { %v963_v52 = vpop.f32.mrf.mxu0 }
  0xb2   : > { %v964_v4 = vadd.f32 %v963_v52, %v838_v1 }
  0xb3   : > { %v1028_v53 = vpop.f32.mrf.mxu1 }
  0xb4   : > { %v1029_v54 = vadd.f32 %v1028_v53, %v843_v51  ;;  %v1162_v10 = vpack.c.bf16 %v964_v4, %v964_v4  ;;  %v12135_v4 = vld [vmem:[%s18363_s5 + $0x20] sm:$0xff] }
  0xb6   : > { %v1171_v56 = vpack.c.bf16 %v1029_v54, %v1029_v54  ;;  %v1302_v15 = vsel %vm1196_vm1, %v1162_v10, 0 }
  0xb7   : > { %v976_v58 = vpop.f32.mrf.mxu3 }
  0xb8   : > { %v1201_v57 = vsel %vm1196_vm1, %v1171_v56, 0  ;;  %v977_v60 = vadd.f32 %v976_v58, %v839_v55  ;;  %v12132_v55 = vld [vmem:[%s18363_s5 + $0x8] sm:$0xff]  ;;  %v851_v58 = vperm.slane %v12980_v28, 5 }
  0xb9   : > { %1235 = vmatpush.bf16.msrb.mxu1 %v1201_v57  ;;  %v965_v62 = vpop.f32.mrf.mxu0 }
  0xba   : > { %v989_v61 = vpop.f32.mrf.mxu2  ;;  %v1163_v63 = vpack.c.bf16 %v977_v60, %v977_v60  ;;  %v849_v60 = vperm.slane %v12980_v28, 3 }
  0xbb   : > { %v1030_v0 = vpop.f32.mrf.mxu1  ;;  %v990_v11 = vadd.f32 %v989_v61, %v840_v6 }
  0xbc   : > { %10333 = vmatmul.msk.bf16.vlgmr.msrb.gmra.mxu1 %vm1189_vm2, %v12957_v59  ;;  %v1305_v2 = vsel %vm1196_vm1, %v1163_v63, 0 }
  0xbd   : > { %1339 = vmatpush.bf16.msra.mxu1 %v1305_v2  ;;  %v1164_v18 = vpack.c.bf16 %v990_v11, %v990_v11 }
  0xbf   : > { %v978_v5 = vpop.f32.mrf.mxu3  ;;  %v1308_v23 = vsel %vm1196_vm1, %v1164_v18, 0 }
  0xc1   : > { %v1015_v8 = vpop.f32.mrf.mxu0 }
  0xc2   : > { %v991_v7 = vpop.f32.mrf.mxu2  ;;  %v1016_v9 = vadd.f32 %v1015_v8, %v842_v3  ;;  %v850_v3 = vperm.slane %v12980_v28, 4 }
  0xc3   : > { %v1080_v30 = vpop.f32.mrf.mxu1 }
  0xc4   : > { %v1170_v12 = vpack.c.bf16 %v1016_v9, %v1016_v9  ;;  %v1081_v33 = vadd.f32 %v1080_v30, %v847_v29 }
  0xc6   : > { %v1198_v14 = vsel %vm1196_vm1, %v1170_v12, 0  ;;  %v1390_v35 = vpack.c.bf16 %v1081_v33, %v1081_v33  ;;  %v852_v12 = vperm.slane %v12980_v28, 6 }
  0xc7   : > { %v1002_v16 = vpop.f32.mrf.mxu3  ;;  %1216 = vmatpush.bf16.msra.mxu0 %v1198_v14 }
  0xc8   : > { %v1003_v32 = vadd.f32 %v1002_v16, %v841_v25  ;;  %v1418_v40 = vsel %vm1196_vm1, %v1390_v35, 0 }
  0xc9   : > { %v1017_v21 = vpop.f32.mrf.mxu0  ;;  %1452 = vmatpush.bf16.msrb.mxu1 %v1418_v40 }
  0xca   : > { %v1041_v19 = vpop.f32.mrf.mxu2  ;;  %10331 = vmatmul.msk.bf16.vlgmr.msra.gmra.mxu0 %vm1189_vm2, %v12957_v59  ;;  %v1165_v37 = vpack.c.bf16 %v1003_v32, %v1003_v32  ;;  %v12137_v21 = vld [vmem:[%s18363_s5 + $0x30] sm:$0xff] }
  0xcb   : > { %1320 = vmatpush.bf16.msrb.mxu0 %v1302_v15  ;;  %v1042_v20 = vadd.f32 %v1041_v19, %v844_v13  ;;  %v1082_v44 = vpop.f32.mrf.mxu1 }
  0xcc   : > { %10334 = vmatmul.msk.bf16.gmra.mxu1 %vm1189_vm2, %v12134_v17  ;;  %v1311_v46 = vsel %vm1196_vm1, %v1165_v37, 0 }
  0xcd   : > { %v1172_v22 = vpack.c.bf16 %v1042_v20, %v1042_v20  ;;  %v853_v20 = vperm.slane %v12980_v28, 7 }
  0xcf   : > { %v1204_v24 = vsel %vm1196_vm1, %v1172_v22, 0  ;;  %v1004_v26 = vpop.f32.mrf.mxu3 }
  0xd0   : > { %1254 = vmatpush.bf16.msra.mxu2 %v1204_v24 }
  0xd1   : > { %v1067_v31 = vpop.f32.mrf.mxu0 }
  0xd2   : > { %v1043_v27 = vpop.f32.mrf.mxu2  ;;  %v1068_v42 = vadd.f32 %v1067_v31, %v846_v36 }
  0xd3   : > { %10335 = vmatmul.msk.bf16.vlgmr.msra.gmra.mxu2 %vm1189_vm2, %v12957_v59  ;;  %v12138_v27 = vld [vmem:[%s18363_s5 + $0x38] sm:$0xff] }
  0xd4   : > { %1358 = vmatpush.bf16.msrb.mxu2 %v1308_v23  ;;  %v1389_v48 = vpack.c.bf16 %v1068_v42, %v1068_v42 }
  0xd6   : > { %v1415_v52 = vsel %vm1196_vm1, %v1389_v48, 0 }
  0xd7   : > { %v1054_v38 = vpop.f32.mrf.mxu3  ;;  %1433 = vmatpush.bf16.msra.mxu0 %v1415_v52 }
  0xd8   : > { %v1055_v41 = vadd.f32 %v1054_v38, %v845_v34 }
  0xd9   : > { %v1069_v43 = vpop.f32.mrf.mxu0 }
  0xda   : > { %v1173_v45 = vpack.c.bf16 %v1055_v41, %v1055_v41  ;;  %10332 = vmatmul.msk.bf16.gmra.mxu0 %vm1189_vm2, %v12134_v17  ;;  %v1093_v51 = vpop.f32.mrf.mxu2 }
  0xdb   : > { %v1094_v53 = vadd.f32 %v1093_v51, %v848_v50 }
  0xdc   : > { %10349 = vmatmul.msk.bf16.vlgmr.msra.gmra.mxu1 %vm1189_vm2, %v12131_v39  ;;  %v1207_v47 = vsel %vm1196_vm1, %v1173_v45, 0 }
  0xdd   : > { %1273 = vmatpush.bf16.msrb.mxu3 %v1207_v47  ;;  %v1391_v54 = vpack.c.bf16 %v1094_v53, %v1094_v53 }
  0xdf   : > { %v1056_v49 = vpop.f32.mrf.mxu3  ;;  %v1421_v56 = vsel %vm1196_vm1, %v1391_v54, 0 }
  0xe0   : > { %10337 = vmatmul.msk.bf16.vlgmr.msrb.gmra.mxu3 %vm1189_vm2, %v12957_v59  ;;  %1471 = vmatpush.bf16.msra.mxu2 %v1421_v56  ;;  %v1132_v59 = vpop.f32.mrf.mxu1 }
  0xe1   : > { %1377 = vmatpush.bf16.msra.mxu3 %v1311_v46  ;;  %v1119_v62 = vpop.f32.mrf.mxu0  ;;  %v1133_v63 = vadd.f32 %v1132_v59, %v851_v58 }
  0xe2   : > { %v1095_v57 = vpop.f32.mrf.mxu2  ;;  %v1120_v7 = vadd.f32 %v1119_v62, %v850_v3 }
  0xe3   : > { %10336 = vmatmul.msk.bf16.gmra.mxu2 %vm1189_vm2, %v12134_v17  ;;  %v1519_v1 = vpack.c.bf16 %v1133_v63, %v1133_v63 }
  0xe4   : > { %v1518_v11 = vpack.c.bf16 %v1120_v7, %v1120_v7 }
  0xe5   : > { %v1547_v5 = vsel %vm1196_vm1, %v1519_v1, 0 }
  0xe6   : > { %1581 = vmatpush.bf16.msra.mxu1 %v1547_v5  ;;  %v1544_v14 = vsel %vm1196_vm1, %v1518_v11, 0 }
  0xe7   : > { %v1106_v61 = vpop.f32.mrf.mxu3 }
  0xe8   : > { %v1107_v0 = vadd.f32 %v1106_v61, %v849_v60  ;;  %v1134_v8 = vpop.f32.mrf.mxu1 }
  0xe9   : > { %v1121_v10 = vpop.f32.mrf.mxu0 }
  0xea   : > { %10347 = vmatmul.msk.bf16.vlgmr.msrb.gmra.mxu0 %vm1189_vm2, %v12131_v39  ;;  %v1392_v2 = vpack.c.bf16 %v1107_v0, %v1107_v0  ;;  %v1145_v13 = vpop.f32.mrf.mxu2 }
  0xeb   : > { %1562 = vmatpush.bf16.msrb.mxu0 %v1544_v14  ;;  %v1146_v15 = vadd.f32 %v1145_v13, %v852_v12 }
  0xec   : > { %10350 = vmatmul.msk.bf16.gmra.mxu1 %vm1189_vm2, %v12132_v55  ;;  %v1424_v6 = vsel %vm1196_vm1, %v1392_v2, 0 }
  0xed   : > { %1490 = vmatpush.bf16.msrb.mxu3 %v1424_v6  ;;  %v1520_v16 = vpack.c.bf16 %v1146_v15, %v1146_v15 }
  0xef   : > { %v1108_v9 = vpop.f32.mrf.mxu3  ;;  %v1550_v18 = vsel %vm1196_vm1, %v1520_v16, 0 }
  0xf0   : > { %10338 = vmatmul.msk.bf16.gmra.mxu3 %vm1189_vm2, %v12134_v17  ;;  %v12136_v17 = vld [vmem:[%s18363_s5 + $0x28] sm:$0xff]  ;;  %s12594_s5 = scalar_lea.hbm %s18265_s27, 512 }
  0xf2   : > { %v1147_v19 = vpop.f32.mrf.mxu2 }
  0xf3   : > { %10351 = vmatmul.msk.bf16.vlgmr.msrb.gmra.mxu2 %vm1189_vm2, %v12131_v39 }
  0xf4   : > { %1600 = vmatpush.bf16.msrb.mxu2 %v1550_v18 }
  0xf7   : > { %v1158_v22 = vpop.f32.mrf.mxu3 }
  0xf8   : > { %v1159_v23 = vadd.f32 %v1158_v22, %v853_v20 }
  0xfa   : > { %10348 = vmatmul.msk.bf16.gmra.mxu0 %vm1189_vm2, %v12132_v55  ;;  %v1521_v24 = vpack.c.bf16 %v1159_v23, %v1159_v23 }
  0xfc   : > { %10369 = vmatmul.msk.bf16.vlgmr.msrb.gmra.mxu1 %vm1189_vm2, %v12135_v4  ;;  %v1553_v25 = vsel %vm1196_vm1, %v1521_v24, 0 }
  0xff   : > { %v1160_v26 = vpop.f32.mrf.mxu3 }
 0x100   : > { %10353 = vmatmul.msk.bf16.vlgmr.msra.gmra.mxu3 %vm1189_vm2, %v12131_v39 }
 0x101   : > { %1619 = vmatpush.bf16.msra.mxu3 %v1553_v25 }
 0x103   : > { %10352 = vmatmul.msk.bf16.gmra.mxu2 %vm1189_vm2, %v12132_v55 }
 0x10a   : > { %10367 = vmatmul.msk.bf16.vlgmr.msra.gmra.mxu0 %vm1189_vm2, %v12135_v4 }
 0x10c   : > { %10370 = vmatmul.msk.bf16.gmra.mxu1 %vm1189_vm2, %v12136_v17 }
 0x110   : > { %10354 = vmatmul.msk.bf16.gmra.mxu3 %vm1189_vm2, %v12132_v55 }
 0x113   : > { %10371 = vmatmul.msk.bf16.vlgmr.msra.gmra.mxu2 %vm1189_vm2, %v12135_v4 }
 0x11a   : > { %10368 = vmatmul.msk.bf16.gmra.mxu0 %vm1189_vm2, %v12136_v17 }
 0x11c   : > { %10389 = vmatmul.msk.bf16.vlgmr.msra.gmra.mxu1 %vm1189_vm2, %v12137_v21 }
 0x120   : > { %10373 = vmatmul.msk.bf16.vlgmr.msrb.gmra.mxu3 %vm1189_vm2, %v12135_v4 }
 0x123   : > { %10372 = vmatmul.msk.bf16.gmra.mxu2 %vm1189_vm2, %v12136_v17 }
 0x12a   : > { %10387 = vmatmul.msk.bf16.vlgmr.msrb.gmra.mxu0 %vm1189_vm2, %v12137_v21 }
 0x12c   : > { %10390 = vmatmul.msk.bf16.gmra.mxu1 %vm1189_vm2, %v12138_v27 }
 0x130   : > { %10374 = vmatmul.msk.bf16.gmra.mxu3 %vm1189_vm2, %v12136_v17 }
 0x133   : > { %10391 = vmatmul.msk.bf16.vlgmr.msrb.gmra.mxu2 %vm1189_vm2, %v12137_v21 }
 0x139   : > { %v13046_v28 = vpop.f32.mrf.mxu1 }
 0x13a   : > { %10388 = vmatmul.msk.bf16.gmra.mxu0 %vm1189_vm2, %v12138_v27 }
 0x140   : > { %10393 = vmatmul.msk.bf16.vlgmr.msra.gmra.mxu3 %vm1189_vm2, %v12137_v21 }
 0x141   : > { %v1239_v29 = vpop.f32.mrf.mxu1 }
 0x143   : > { %10392 = vmatmul.msk.bf16.gmra.mxu2 %vm1189_vm2, %v12138_v27 }
 0x147   : > { %v1218_v30 = vpop.f32.mrf.mxu0 }
 0x149   : > { %v1242_v31 = vpop.f32.mrf.mxu1 }
 0x14f   : > { %v1220_v32 = vpop.f32.mrf.mxu0 }
 0x150   : > { %10394 = vmatmul.msk.bf16.gmra.mxu3 %vm1189_vm2, %v12138_v27 }
 0x151   : > { %v1244_v33 = vpop.f32.mrf.mxu1 }
 0x156   : > { %v1256_v34 = vpop.f32.mrf.mxu2 }
 0x157   : > { %v1223_v35 = vpop.f32.mrf.mxu0 }
 0x159   : > { %v1341_v36 = vpop.f32.mrf.mxu1 }
 0x15e   : > { %v13052_v37 = vpop.f32.mrf.mxu2 }
 0x15f   : > { %v1225_v38 = vpop.f32.mrf.mxu0 }
 0x161   : > { %v1343_v39 = vpop.f32.mrf.mxu1 }
 0x162   : > { %v1344_v22 = vadd.f32 %v1343_v39, %v1239_v29 }
 0x163   : > { %v13054_v40 = vpop.f32.mrf.mxu3 }
 0x166   : > { %v13056_v41 = vpop.f32.mrf.mxu2 }
 0x167   : > { %v1322_v42 = vpop.f32.mrf.mxu0 }
 0x168   : > { %v1323_v23 = vadd.f32 %v1322_v42, %v1218_v30 }
 0x169   : > { %v1346_v43 = vpop.f32.mrf.mxu1 }
 0x16a   : > { %v1347_v19 = vadd.f32 %v1346_v43, %v1242_v31 }
 0x16b   : > { %v13058_v44 = vpop.f32.mrf.mxu3 }
 0x16e   : > { %v13060_v45 = vpop.f32.mrf.mxu2 }
 0x16f   : > { %v1324_v46 = vpop.f32.mrf.mxu0 }
 0x170   : > { %v1325_v20 = vadd.f32 %v1324_v46, %v1220_v32 }
 0x171   : > { %v1348_v47 = vpop.f32.mrf.mxu1 }
 0x172   : > { %v1349_v24 = vadd.f32 %v1348_v47, %v1244_v33 }
 0x173   : > { %v13062_v48 = vpop.f32.mrf.mxu3 }
 0x176   : > { %v1360_v49 = vpop.f32.mrf.mxu2 }
 0x177   : > { %v13064_v50 = vadd.f32 %v1360_v49, %v1256_v34  ;;  %v1327_v51 = vpop.f32.mrf.mxu0 }
 0x178   : > { %v1328_v52 = vadd.f32 %v1327_v51, %v1223_v35  ;;  %v1342_v51 = vadd.f32 %v1341_v36, %v13046_v28 }
 0x179   : > { %18364 = vst [vmem:[#allocation12_spill] sm:$0xff] %v13064_v50  ;;  %v1454_v53 = vpop.f32.mrf.mxu1 }
 0x17a   : > { %v1503_v29 = vadd.f32 %v1454_v53, %v1342_v51 }
 0x17b   : > { %v13066_v54 = vpop.f32.mrf.mxu3 }
 0x17e   : > { %v13068_v55 = vpop.f32.mrf.mxu2 }
 0x17f   : > { %v1329_v56 = vpop.f32.mrf.mxu0 }
 0x180   : > { %v1330_v27 = vadd.f32 %v1329_v56, %v1225_v38 }
 0x181   : > { %v1456_v57 = vpop.f32.mrf.mxu1 }
 0x183   : > { %v13070_v58 = vpop.f32.mrf.mxu3 }
 0x186   : > { %v13072_v59 = vpop.f32.mrf.mxu2 }
 0x187   : > { %v1435_v60 = vpop.f32.mrf.mxu0 }
 0x188   : > { %v1502_v50 = vadd.f32 %v1435_v60, %v1323_v23 }
 0x189   : > { %v1459_v61 = vpop.f32.mrf.mxu1 }
 0x18a   : > { %v1511_v34 = vadd.f32 %v1459_v61, %v1347_v19 }
 0x18b   : > { %v13074_v62 = vpop.f32.mrf.mxu3 }
 0x18e   : > { %v13076_v63 = vpop.f32.mrf.mxu2 }
 0x18f   : > { %v1437_v0 = vpop.f32.mrf.mxu0 }
 0x190   : > { %v1506_v35 = vadd.f32 %v1437_v0, %v1325_v20 }
 0x191   : > { %v1461_v3 = vpop.f32.mrf.mxu1 }
 0x193   : > { %v13078_v1 = vpop.f32.mrf.mxu3 }
 0x194   : > { %v1385_v20 = vadd.f32 %v13078_v1, %v13062_v48 }
 0x196   : > { %v13080_v2 = vpop.f32.mrf.mxu2 }
 0x197   : > { %18365 = vst [vmem:[#allocation13_spill] sm:$0xff] %v13080_v2  ;;  %v1440_v4 = vpop.f32.mrf.mxu0  ;;  %v1507_v2 = vadd.f32 %v1456_v57, %v1344_v22  ;;  %v1382_v22 = vadd.f32 %v13074_v62, %v13058_v44 }
 0x198   : > { %v1510_v21 = vadd.f32 %v1440_v4, %v1328_v52 }
 0x199   : > { %v1583_v7 = vpop.f32.mrf.mxu1 }
 0x19a   : > { %v1632_v38 = vadd.f32 %v1583_v7, %v1503_v29 }
 0x19b   : > { %v13082_v5 = vpop.f32.mrf.mxu3 }
 0x19c   : > { %v1387_v48 = vadd.f32 %v13082_v5, %v13066_v54 }
 0x19e   : > { %v13084_v6 = vpop.f32.mrf.mxu2 }
 0x19f   : > { %v1442_v8 = vpop.f32.mrf.mxu0 }
 0x1a0   : > { %v1514_v31 = vadd.f32 %v1442_v8, %v1330_v27  ;;  %v1380_v27 = vadd.f32 %v13070_v58, %v13054_v40 }
 0x1a1   : > { %v1585_v12 = vpop.f32.mrf.mxu1 }
 0x1a2   : > { %v1636_v39 = vadd.f32 %v1585_v12, %v1507_v2  ;;  %v12143_v12 = vld [vmem:[%s18368_s8 + $0x24] sm:$0xff] }
 0x1a3   : > { %v13086_v9 = vpop.f32.mrf.mxu3 }
 0x1a4   : > { %18366 = vst [vmem:[#allocation14_spill] sm:$0xff] %v13086_v9  ;;  %v1515_v9 = vadd.f32 %v1461_v3, %v1349_v24  ;;  %v1363_v24 = vadd.f32 %v13068_v55, %v13052_v37 }
 0x1a6   : > { %v13088_v10 = vpop.f32.mrf.mxu2  ;;  %v1508_v44 = vadd.f32 %v13084_v6, %v1363_v24 }
 0x1a7   : > { %v1564_v11 = vpop.f32.mrf.mxu0 }
 0x1a8   : > { %v1631_v30 = vadd.f32 %v1564_v11, %v1502_v50 }
 0x1a9   : > { %v1588_v16 = vpop.f32.mrf.mxu1 }
 0x1aa   : > { %v1640_v32 = vadd.f32 %v1588_v16, %v1511_v34  ;;  %v1647_v61 = vpack.c.bf16 %v1632_v38, %v1631_v30  ;;  %v1368_v34 = vadd.f32 %v13076_v63, %v13060_v45  ;;  %v18372_v45 = vld [vmem:[#allocation12_spill] sm:$0xff]  ;;  %v18373_v63 = vld [vmem:[#allocation13_spill] sm:$0xff] }
 0x1ab   : > { %v13090_v13 = vpop.f32.mrf.mxu3  ;;  %v18370_v62 = vld [vmem:[#allocation14_spill] sm:$0xff]  ;;  %v1504_v51 = vadd.f32 %v18373_v63, %v18372_v45 }
 0x1ac   : > { %v1692_v50 = vunpack.c.h.b16 %v1647_v61  ;;  %v1759_v2 = vunpack.c.l.b16 %v1647_v61 }
 0x1ae   : > { %v13092_v15 = vpop.f32.mrf.mxu2 }
 0x1af   : > { %v1566_v14 = vpop.f32.mrf.mxu0  ;;  %18367 = vst [vmem:[#allocation15_spill] sm:$0xff] %v13092_v15 }
 0x1b0   : > { %v1635_v43 = vadd.f32 %v1566_v14, %v1506_v35 }
 0x1b1   : > { %v1590_v15 = vpop.f32.mrf.mxu1 }
 0x1b2   : > { %v1644_v42 = vadd.f32 %v1590_v15, %v1515_v9  ;;  %v1649_v52 = vpack.c.bf16 %v1636_v39, %v1635_v43  ;;  %v12139_v15 = vld [vmem:[%s18369_s28] sm:$0xff]  ;;  %v12140_v43 = vld [vmem:[%s18369_s28 + $0x8] sm:$0xff] }
 0x1b3   : > { %v13094_v17 = vpop.f32.mrf.mxu3 }
 0x1b4   : > { %v1693_v4 = vunpack.c.h.b16 %v1649_v52  ;;  %v1760_v53 = vunpack.c.l.b16 %v1649_v52  ;;  %v1513_v23 = vadd.f32 %v13094_v17, %v1385_v20  ;;  %v1505_v17 = vadd.f32 %v18370_v62, %v1380_v27 }
 0x1b6   : > { %v13096_v25 = vpop.f32.mrf.mxu2  ;;  %v1696_v9 = vpack.c.b16 %v1693_v4, %v1692_v50  ;;  %v1763_v11 = vpack.c.b16 %v1760_v53, %v1759_v2  ;;  %v18371_v37 = vld [vmem:[#allocation15_spill] sm:$0xff] }
 0x1b7   : > { %v1569_v18 = vpop.f32.mrf.mxu0  ;;  %v1516_v55 = vadd.f32 %v18371_v37, %v1368_v34  ;;  %v12149_v53 = vld [vmem:[%s18369_s28 + $0x5c] sm:$0xff] }
 0x1b8   : > { %v1639_v49 = vadd.f32 %v1569_v18, %v1510_v21  ;;  %v12142_v18 = vld [vmem:[%s18369_s28 + $0x1c] sm:$0xff]  ;;  %v1366_v21 = vadd.f32 %v13072_v59, %v13056_v41  ;;  %v1509_v41 = vadd.f32 %v13090_v13, %v1382_v22 }
 0x1b9   : > { %v12145_v2 = vld [vmem:[%s18369_s28 + $0x38] sm:$0xff] }
 0x1ba   : > { %v1651_v46 = vpack.c.bf16 %v1640_v32, %v1639_v49  ;;  %v1512_v1 = vadd.f32 %v13088_v10, %v1366_v21  ;;  %v12144_v10 = vld [vmem:[%s18369_s28 + $0x2c] sm:$0xff] }
 0x1bb   : > { %v13098_v26 = vpop.f32.mrf.mxu3 }
 0x1bc   : > { %v1694_v28 = vunpack.c.h.b16 %v1651_v46  ;;  %v1761_v36 = vunpack.c.l.b16 %v1651_v46  ;;  %v1517_v40 = vadd.f32 %v13098_v26, %v1387_v48  ;;  %v1633_v26 = vadd.f32 %v13096_v25, %v1504_v51  ;;  %v10401_v25 = vld [vmem:[%s18369_s28 + $0x34] sm:$0xf] }
 0x1be   : > { %v1604_v3 = vpop.f32.mrf.mxu2 }
 0x1bf   : > { %v1571_v33 = vpop.f32.mrf.mxu0  ;;  %v1637_v13 = vadd.f32 %v1604_v3, %v1508_v44  ;;  %v12148_v3 = vld [vmem:[%s18369_s28 + $0x54] sm:$0xff] }
 0x1c0   : > { %v1643_v47 = vadd.f32 %v1571_v33, %v1514_v31 }
 0x1c2   : > { %v1653_v56 = vpack.c.bf16 %v1644_v42, %v1643_v47 }
 0x1c3   : > { %v1621_v0 = vpop.f32.mrf.mxu3 }
 0x1c4   : > { %v1695_v57 = vunpack.c.h.b16 %v1653_v56  ;;  %v1762_v60 = vunpack.c.l.b16 %v1653_v56  ;;  %v1634_v54 = vadd.f32 %v1621_v0, %v1505_v17 }
 0x1c6   : > { %v1697_v8 = vpack.c.b16 %v1695_v57, %v1694_v28  ;;  %v1764_v14 = vpack.c.b16 %v1762_v60, %v1761_v36  ;;  %v1607_v16 = vpop.f32.mrf.mxu2  ;;  %v1648_v33 = vpack.c.bf16 %v1634_v54, %v1633_v26  ;;  %v1683_v60 = vunpack.c.l.b16 %v10401_v25 }
 0x1c7   : > { %v1641_v58 = vadd.f32 %v1607_v16, %v1512_v1 }
 0x1c8   : > { %1719 = vmatpush.bf16.msra.mxu0 %v1697_v8  ;;  %12387 = vmatpush.bf16.msra.mxu2 %v1697_v8  ;;  %v1837_v0 = vunpack.c.l.b16 %v1648_v33  ;;  %v1918_v28 = vunpack.c.h.b16 %v1648_v33  ;;  %v1687_v4 = vpack.c.b16 %v1683_v60, %v1683_v60  ;;  %v12141_v8 = vld [vmem:[%s18369_s28 + $0x10] sm:$0xff] }
 0x1c9   : > { %1785 = vmatpush.bf16.msrb.mxu1 %v1764_v14  ;;  %v1661_v14 = vld [vmem:[%s18369_s28 + $0x18] sm:$0xf] }
 0x1ca   : > { %v1754_v50 = vunpack.c.l.b16 %v1661_v14  ;;  %v2017_v14 = vld [vmem:[%s18374_s0 + $0x40] sm:$0xff] }
 0x1cb   : > { %v1623_v7 = vpop.f32.mrf.mxu3 }
 0x1cc   : > { %1720 = vmatpush.bf16.msra.mxu0 %v1696_v9  ;;  %12388 = vmatpush.bf16.msra.mxu2 %v1696_v9  ;;  %v1638_v49 = vadd.f32 %v1623_v7, %v1509_v41  ;;  %v1758_v9 = vpack.c.b16 %v1754_v50, %v1754_v50  ;;  %v12150_v7 = vld [vmem:[%s18369_s28 + $0x64] sm:$0xff] }
 0x1cd   : > { %1786 = vmatpush.bf16.msrb.mxu1 %v1763_v11  ;;  %v12146_v11 = vld [vmem:[%s18369_s28 + $0x40] sm:$0xff] }
 0x1ce   : > { %v1609_v35 = vpop.f32.mrf.mxu2  ;;  %v1650_v29 = vpack.c.bf16 %v1638_v49, %v1637_v13 }
 0x1cf   : > { %10415 = vmatmul.msk.bf16.vlgmr.msra.gmra.mxu2 %vm1700_vm3, %v12143_v12  ;;  %10414 = vmatmul.msk.bf16.vlgmr.msra.gmra.mxu0 %vm1700_vm3, %v12142_v18  ;;  %v1645_v6 = vadd.f32 %v1609_v35, %v1516_v55  ;;  %v10463_v12 = vld [vmem:[%s18369_s28 + $0x6c] sm:$0xf] }
 0x1d0   : > { %10430 = vmatmul.msk.bf16.vlgmr.msrb.gmra.mxu1 %vm1700_vm3, %v12139_v15  ;;  %v1838_v38 = vunpack.c.l.b16 %v1650_v29  ;;  %v1919_v52 = vunpack.c.h.b16 %v1650_v29  ;;  %v1913_v15 = vunpack.c.l.b16 %v10463_v12  ;;  %v12147_v18 = vld [vmem:[%s18369_s28 + $0x48] sm:$0xff]  ;;  %v2024_v29 = vld [vmem:[%s18374_s0 + $0x78] sm:$0xff] }
 0x1d1   : > { %2025 = vmatpush.msra.mxu1 %v2024_v29 }
 0x1d2   : > { %v1841_v36 = vpack.c.b16 %v1838_v38, %v1837_v0  ;;  %v1922_v57 = vpack.c.b16 %v1919_v52, %v1918_v28  ;;  %v1917_v16 = vpack.c.b16 %v1913_v15, %v1913_v15  ;;  %v2019_v52 = vld [vmem:[%s18374_s0 + $0x50] sm:$0xff] }
 0x1d3   : > { %v1626_v19 = vpop.f32.mrf.mxu3 }
 0x1d4   : > { %v1642_v59 = vadd.f32 %v1626_v19, %v1513_v23  ;;  %v10440_v19 = vld [vmem:[%s18369_s28 + $0x50] sm:$0xf] }
 0x1d5   : > { %v1828_v20 = vunpack.c.l.b16 %v10440_v19 }
 0x1d6   : > { %v1652_v31 = vpack.c.bf16 %v1642_v59, %v1641_v58 }
 0x1d7   : > { %v1832_v21 = vpack.c.b16 %v1828_v20, %v1828_v20 }
 0x1d8   : > { %v1839_v39 = vunpack.c.l.b16 %v1652_v31  ;;  %v1920_v42 = vunpack.c.h.b16 %v1652_v31 }
 0x1db   : > { %v1628_v5 = vpop.f32.mrf.mxu3 }
 0x1dc   : > { %v1646_v32 = vadd.f32 %v1628_v5, %v1517_v40 }
 0x1de   : > { %v1654_v30 = vpack.c.bf16 %v1646_v32, %v1645_v6 }
 0x1df   : > { %10416 = vmatmul.msk.bf16.gmra.mxu2 %vm1700_vm3, %v12144_v10 }
 0x1e0   : > { %v1840_v46 = vunpack.c.l.b16 %v1654_v30  ;;  %v1921_v47 = vunpack.c.h.b16 %v1654_v30  ;;  %10431 = vmatmul.msk.bf16.gmra.mxu1 %vm1700_vm3, %v12140_v43  ;;  %v2023_v30 = vld [vmem:[%s18374_s0 + $0x70] sm:$0xff] }
 0x1e1   : > { %2026 = vmatpush.msra.mxu1 %v2023_v30 }
 0x1e2   : > { %v1842_v56 = vpack.c.b16 %v1840_v46, %v1839_v39  ;;  %v1923_v61 = vpack.c.b16 %v1921_v47, %v1920_v42  ;;  %v2022_v39 = vld [vmem:[%s18374_s0 + $0x68] sm:$0xff]  ;;  %v2021_v42 = vld [vmem:[%s18374_s0 + $0x60] sm:$0xff]  ;;  %v2020_v47 = vld [vmem:[%s18374_s0 + $0x58] sm:$0xff] }
 0x1e3   : > { %2027 = vmatpush.msra.mxu1 %v2022_v39 }
 0x1e4   : > { %1863 = vmatpush.bf16.msrb.mxu2 %v1842_v56  ;;  %1944 = vmatpush.bf16.msrb.mxu3 %v1923_v61 }
 0x1e5   : > { %2028 = vmatpush.msra.mxu1 %v2021_v42 }
 0x1e7   : > { %2029 = vmatpush.msra.mxu1 %v2020_v47 }
 0x1e8   : > { %1864 = vmatpush.bf16.msrb.mxu2 %v1841_v36  ;;  %1945 = vmatpush.bf16.msrb.mxu3 %v1922_v57  ;;  %v2018_v36 = vld [vmem:[%s18374_s0 + $0x48] sm:$0xff] }
 0x1e9   : > { %2030 = vmatpush.msra.mxu1 %v2019_v52 }
 0x1eb   : > { %10476 = vmatmul.msk.bf16.vlgmr.msrb.gmra.mxu3 %vm1700_vm3, %v12148_v3  ;;  %2031 = vmatpush.msra.mxu1 %v2018_v36 }
 0x1ec   : > { %2072 = vmatpush.msra.mxu3 %v2024_v29 }
 0x1ed   : > { %2032 = vmatpush.msra.mxu1 %v2017_v14 }
 0x1ee   : > { %2073 = vmatpush.msra.mxu3 %v2023_v30  ;;  %v2110_v30 = vld [vmem:[%s18377_s1 + $0x10] sm:$0xff] }
 0x1ef   : > { %10417 = vmatmul.msk.bf16.gmra.mxu2 %vm1700_vm3, %v1687_v4 }
 0x1f0   : > { %10432 = vmatmul.msk.bf16.gmra.mxu1 %vm1700_vm3, %v12141_v8  ;;  %2074 = vmatpush.msra.mxu3 %v2022_v39 }
 0x1f2   : > { %2075 = vmatpush.msra.mxu3 %v2021_v42  ;;  %v2111_v42 = vld [vmem:[%s18377_s1 + $0x18] sm:$0xff] }
 0x1f4   : > { %2076 = vmatpush.msra.mxu3 %v2020_v47 }
 0x1f6   : > { %2077 = vmatpush.msra.mxu3 %v2019_v52  ;;  %v2112_v52 = vld [vmem:[%s18377_s1 + $0x20] sm:$0xff] }
 0x1f8   : > { %2078 = vmatpush.msra.mxu3 %v2018_v36  ;;  %v2114_v36 = vld [vmem:[%s18377_s1 + $0x30] sm:$0xff] }
 0x1fa   : > { %2079 = vmatpush.msra.mxu3 %v2017_v14 }
 0x1fb   : > { %10477 = vmatmul.msk.bf16.gmra.mxu3 %vm1700_vm3, %v12149_v53 }
 0x1ff   : > { %10453 = vmatmul.msk.bf16.vlgmr.msrb.gmra.mxu2 %vm1700_vm3, %v12145_v2 }
 0x200   : > { %10433 = vmatmul.msk.bf16.gmra.mxu1 %vm1700_vm3, %v1758_v9  ;;  %v12434_v9 = vld [vmem:[%s18375_s29] ss:$0 sm:$0xff] }
 0x20b   : > { %10478 = vmatmul.msk.bf16.gmra.mxu3 %vm1700_vm3, %v12150_v7 }
 0x20f   : > { %10454 = vmatmul.msk.bf16.gmra.mxu2 %vm1700_vm3, %v12146_v11  ;;  %v2016_v11 = vld [vmem:[%s18374_s0 + $0x38] sm:$0xff] }
 0x210   : > { %2033 = vmatpush.msra.mxu1 %v2016_v11  ;;  %2080 = vmatpush.msra.mxu3 %v2016_v11 }
 0x21b   : > { %10479 = vmatmul.msk.bf16.gmra.mxu3 %vm1700_vm3, %v1917_v16 }
 0x21f   : > { %10455 = vmatmul.msk.bf16.gmra.mxu2 %vm1700_vm3, %v12147_v18 }
 0x22f   : > { %10456 = vmatmul.msk.bf16.gmra.mxu2 %vm1700_vm3, %v1832_v21 }
 0x24c   : > { %v1722_v26 = vpop.f32.mrf.mxu0 }
 0x24d   : > { %v1788_v22 = vpop.f32.mrf.mxu1 }
 0x24e   : > { %v1789_v4 = vadd.f32 %v1788_v22, %v1722_v26  ;;  %v2015_v22 = vld [vmem:[%s18374_s0 + $0x30] sm:$0xff] }
 0x24f   : > { %2034 = vmatpush.msra.mxu1 %v2015_v22  ;;  %2081 = vmatpush.msra.mxu3 %v2015_v22  ;;  %v10540_v22 = vld [vmem:[%s18379_s6 + $0x118] sm:$0xf] }
 0x252   : > { %v1727_v23 = vpop.f32.mrf.mxu2 }
 0x254   : > { %v1724_v0 = vpop.f32.mrf.mxu0 }
 0x255   : > { %v1790_v24 = vpop.f32.mrf.mxu1 }
 0x256   : > { %v1791_v8 = vadd.f32 %v1790_v24, %v1724_v0 }
 0x25a   : > { %v1729_v27 = vpop.f32.mrf.mxu2 }
 0x25d   : > { %v1793_v34 = vpop.f32.mrf.mxu1 }
 0x25e   : > { %v1794_v48 = vadd.f32 %v1793_v34, %v1727_v23 }
 0x262   : > { %v1732_v1 = vpop.f32.mrf.mxu2 }
 0x265   : > { %v1795_v41 = vpop.f32.mrf.mxu1 }
 0x266   : > { %v1796_v56 = vadd.f32 %v1795_v41, %v1729_v27 }
 0x26a   : > { %v1734_v59 = vpop.f32.mrf.mxu2 }
 0x26d   : > { %v1798_v44 = vpop.f32.mrf.mxu1 }
 0x26e   : > { %v1799_v62 = vadd.f32 %v1798_v44, %v1732_v1  ;;  %v13189_v17 = vpop.f32.mrf.mxu3  ;;  %v2013_v44 = vld [vmem:[%s18374_s0 + $0x20] sm:$0xff] }
 0x272   : > { %v1737_v35 = vpop.f32.mrf.mxu2 }
 0x275   : > { %v1800_v37 = vpop.f32.mrf.mxu1 }
 0x276   : > { %v13191_v55 = vpop.f32.mrf.mxu3  ;;  %v1801_v46 = vadd.f32 %v1800_v37, %v1734_v59 }
 0x27a   : > { %v1739_v40 = vpop.f32.mrf.mxu2 }
 0x27b   : > { %v2011_v40 = vld [vmem:[%s18374_s0 + $0x10] sm:$0xff] }
 0x27d   : > { %v1803_v58 = vpop.f32.mrf.mxu1 }
 0x27e   : > { %v1952_v49 = vpop.f32.mrf.mxu3  ;;  %v1804_v61 = vadd.f32 %v1803_v58, %v1737_v35  ;;  %v2012_v35 = vld [vmem:[%s18374_s0 + $0x18] sm:$0xff] }
 0x282   : > { %v1866_v45 = vpop.f32.mrf.mxu2 }
 0x283   : > { %v1885_v18 = vadd.f32 %v1866_v45, %v1789_v4  ;;  %v2010_v45 = vld [vmem:[%s18374_s0 + $0x8] sm:$0xff] }
 0x285   : > { %v1805_v63 = vpop.f32.mrf.mxu1  ;;  %v1966_v1 = vadd.f32 %v13189_v17, %v1885_v18 }
 0x286   : > { %v1954_v51 = vpop.f32.mrf.mxu3 }
 0x28a   : > { %v1868_v54 = vpop.f32.mrf.mxu2 }
 0x28b   : > { %v1886_v7 = vadd.f32 %v1868_v54, %v1791_v8 }
 0x28d   : > { %v1967_v24 = vadd.f32 %v13191_v55, %v1886_v7  ;;  %v13264_v55 = vadd.f32 %v12434_v9, %v1966_v1  ;;  %v10857_v1 = vld [vmem:[%s18379_s6 + $0x128] sm:$0xf] }
 0x28e   : > { %v1957_v5 = vpop.f32.mrf.mxu3 }
 0x28f   : > { %v13256_v17 = vadd.f32 %v12434_v9, %v1967_v24  ;;  %v2045_v63 = vmul.f32 %v13264_v55, %v13264_v55  ;;  %v10572_v24 = vld [vmem:[%s18379_s6 + $0x11c] sm:$0xf] }
 0x291   : > { %v2046_v58 = vmul.f32 %v13256_v17, %v13256_v17 }
 0x292   : > { %v1871_v10 = vpop.f32.mrf.mxu2 }
 0x293   : > { %v1887_v53 = vadd.f32 %v1871_v10, %v1794_v48  ;;  %v2014_v48 = vld [vmem:[%s18374_s0 + $0x28] sm:$0xff] }
 0x294   : > { %2035 = vmatpush.msra.mxu1 %v2014_v48  ;;  %2082 = vmatpush.msra.mxu3 %v2014_v48  ;;  %v12173_v48 = vld [vmem:[%s18379_s6 + $0x12c] sm:$0xf0] }
 0x295   : > { %v1968_v19 = vadd.f32 %v1952_v49, %v1887_v53  ;;  %v1984_v49 = vld [vmem:[%s18376_s2] sm:$0xff]  ;;  %s18378_s2 = sld [smem:[#allocation135_spill]] }
 0x296   : > { %v1959_v13 = vpop.f32.mrf.mxu3  ;;  %2036 = vmatpush.msra.mxu1 %v2013_v44  ;;  %2083 = vmatpush.msra.mxu3 %v2013_v44  ;;  %v10573_v44 = vor.u32 %v12173_v48, %v10572_v24  ;;  %v10833_v24 = vld [vmem:[%s18379_s6 + $0x38] sm:$0xf] }
 0x297   : > { %v13248_v59 = vadd.f32 %v12434_v9, %v1968_v19 }
 0x298   : > { %2037 = vmatpush.msra.mxu1 %v2012_v35  ;;  %2084 = vmatpush.msra.mxu3 %v2012_v35  ;;  %v10536_v35 = vld [vmem:[%s18379_s6 + $0xf0] sm:$0xf] }
 0x299   : > { %v2047_v37 = vmul.f32 %v13248_v59, %v13248_v59 }
 0x29a   : > { %v1873_v6 = vpop.f32.mrf.mxu2  ;;  %2038 = vmatpush.msra.mxu1 %v2011_v40  ;;  %2085 = vmatpush.msra.mxu3 %v2011_v40  ;;  %v10568_v40 = vld [vmem:[%s18379_s6 + $0xf4] sm:$0xf] }
 0x29b   : > { %v1888_v57 = vadd.f32 %v1873_v6, %v1796_v56  ;;  %v2108_v6 = vld [vmem:[%s18377_s1] sm:$0xff] }
 0x29c   : > { %2039 = vmatpush.msra.mxu1 %v2010_v45  ;;  %2086 = vmatpush.msra.mxu3 %v2010_v45  ;;  %v10853_v45 = vld [vmem:[%s18379_s6 + $0x100] sm:$0xf] }
 0x29d   : > { %v1969_v12 = vadd.f32 %v1954_v51, %v1888_v57  ;;  %v2009_v51 = vld [vmem:[%s18374_s0] sm:$0xff]  ;;  %v2175_v57 = vld [vmem:[%s18378_s2 + $0x8] sm:$0xff] }
 0x29e   : > { %v1962_v31 = vpop.f32.mrf.mxu3  ;;  %2040 = vmatpush.msra.mxu1 %v2009_v51  ;;  %2087 = vmatpush.msra.mxu3 %v2009_v51 }
 0x29f   : > { %v13239_v34 = vadd.f32 %v12434_v9, %v1969_v12 }
 0x2a0   : > { %2211 = vmatpush.msrb.mxu1 %v2175_v57  ;;  %2308 = vmatpush.msrb.mxu3 %v2175_v57  ;;  %v10841_v57 = vld [vmem:[%s18379_s6 + $0x88] sm:$0xf] }
 0x2a2   : > { %v1876_v32 = vpop.f32.mrf.mxu2 }
 0x2a3   : > { %v1889_v28 = vadd.f32 %v1876_v32, %v1799_v62  ;;  %v2048_v62 = vmul.f32 %v13239_v34, %v13239_v34 }
 0x2a5   : > { %v1970_v50 = vadd.f32 %v1957_v5, %v1889_v28 }
 0x2a6   : > { %v1964_v43 = vpop.f32.mrf.mxu3 }
 0x2a7   : > { %v13230_v21 = vadd.f32 %v12434_v9, %v1970_v50 }
 0x2a9   : > { %v2049_v41 = vmul.f32 %v13230_v21, %v13230_v21 }
 0x2aa   : > { %v1878_v33 = vpop.f32.mrf.mxu2 }
 0x2ab   : > { %v1890_v38 = vadd.f32 %v1878_v33, %v1801_v46 }
 0x2ad   : > { %v1971_v60 = vadd.f32 %v1959_v13, %v1890_v38 }
 0x2af   : > { %v13225_v16 = vadd.f32 %v12434_v9, %v1971_v60  ;;  %v2174_v60 = vld [vmem:[%s18378_s2] sm:$0xff]  ;;  %s12386_s2 = sshll.u32 %s12802_s9, 8 }
 0x2b0   : > { %2212 = vmatpush.msrb.mxu1 %v2174_v60  ;;  %2309 = vmatpush.msrb.mxu3 %v2174_v60  ;;  %v12214_v60 = vld [vmem:[%s18379_s6 + $0x98] sm:$0xf0]  ;;  %s10167_s10 = scalar_lea.hbm %s18265_s27, %s12386_s2 }
 0x2b1   : > { %v2050_v27 = vmul.f32 %v13225_v16, %v13225_v16 }
 0x2b2   : > { %v1881_v25 = vpop.f32.mrf.mxu2 }
 0x2b3   : > { %v1891_v3 = vadd.f32 %v1881_v25, %v1804_v61  ;;  %v2113_v25 = vld [vmem:[%s18377_s1 + $0x28] sm:$0xff] }
 0x2b5   : > { %v1972_v2 = vadd.f32 %v1962_v31, %v1891_v3  ;;  %v2109_v31 = vld [vmem:[%s18377_s1 + $0x8] sm:$0xff] }
 0x2b7   : > { %v13223_v15 = vadd.f32 %v12434_v9, %v1972_v2 }
 0x2b9   : > { %1998 = vmatpush.msrb.mxu0 %v13223_v15  ;;  %v2051_v20 = vmul.f32 %v13223_v15, %v13223_v15 }
 0x2ba   : > { %v1883_v23 = vpop.f32.mrf.mxu2 }
 0x2bb   : > { %1999 = vmatpush.msrb.mxu0 %v13225_v16  ;;  %2061 = vmatpush.msra.mxu2 %v2051_v20  ;;  %v12158_v23 = vld [vmem:[%s18379_s6 + $0x128] sm:$0xf0] }
 0x2bd   : > { %2000 = vmatpush.msrb.mxu0 %v13230_v21  ;;  %2062 = vmatpush.msra.mxu2 %v2050_v27  ;;  %v10541_v27 = vor.u32 %v12158_v23, %v10540_v22  ;;  %v12167_v23 = vld [vmem:[%s18379_s6 + $0x3c] sm:$0xf0] }
 0x2bf   : > { %2001 = vmatpush.msrb.mxu0 %v13239_v34  ;;  %2063 = vmatpush.msra.mxu2 %v2049_v41  ;;  %v12218_v41 = vld [vmem:[%s18379_s6 + $0x138] sm:$0xf0] }
 0x2c1   : > { %2002 = vmatpush.msrb.mxu0 %v13248_v59  ;;  %2064 = vmatpush.msra.mxu2 %v2048_v62  ;;  %v10858_v62 = vor.u32 %v12218_v41, %v10857_v1  ;;  %v10512_v41 = vld [vmem:[%s18379_s6] sm:$0xf] }
 0x2c3   : > { %2003 = vmatpush.msrb.mxu0 %v13256_v17  ;;  %2065 = vmatpush.msra.mxu2 %v2047_v37  ;;  %v12157_v37 = vld [vmem:[%s18379_s6 + $0x100] sm:$0xf0] }
 0x2c5   : > { %2004 = vmatpush.msrb.mxu0 %v13264_v55  ;;  %2066 = vmatpush.msra.mxu2 %v2046_v58  ;;  %v10537_v58 = vor.u32 %v12157_v37, %v10536_v35  ;;  %v12166_v37 = vld [vmem:[%s18379_s6 + $0x14] sm:$0xf0] }
 0x2c6   : > { %10480 = vmatmul.msk.f32.vlgmr.msrb.gmra.mxu0 %vm1985_vm4, %v1984_v49 }
 0x2c7   : > { %2067 = vmatpush.msra.mxu2 %v2045_v63  ;;  %v12217_v63 = vld [vmem:[%s18379_s6 + $0x110] sm:$0xf0] }
 0x2c8   : > { %10481 = vmatmul.msk.f32.vlgmr.msra.gmra.mxu2 %vm1985_vm4, %v1984_v49  ;;  %v12172_v49 = vld [vmem:[%s18379_s6 + $0x104] sm:$0xf0] }
 0x2c9   : > { %v10569_v51 = vor.u32 %v12172_v49, %v10568_v40  ;;  %v10829_v40 = vld [vmem:[%s18379_s6 + $0x10] sm:$0xf] }
 0x343   : > { %v2006_v54 = vpop.f32.mrf.mxu0 }
 0x344   : > { %2041 = vmatmul.f32.vlgmr.msra.gmra.mxu1 %v2006_v54  ;;  %v10854_v54 = vor.u32 %v12217_v63, %v10853_v45 }
 0x345   : > { %2532 = vmatpush.bf16.msra.mxu1 %v10573_v44  ;;  %v12151_v44 = vld [vmem:[%s18379_s6 + $0x10] sm:$0xf0] }
 0x346   : > { %v10513_v35 = vor.u32 %v12151_v44, %v10512_v41 }
 0x349   : > { %2533 = vmatpush.bf16.msra.mxu1 %v10569_v51 }
 0x34b   : > { %v2069_v5 = vpop.f32.mrf.mxu2 }
 0x34c   : > { %2088 = vmatmul.f32.vlgmr.msra.gmra.mxu3 %v2069_v5  ;;  %v10532_v5 = vld [vmem:[%s18379_s6 + $0xc8] sm:$0xf] }
 0x34d   : > { %3350 = vmatpush.bf16.msra.mxu3 %v10858_v62  ;;  %v10544_v62 = vld [vmem:[%s18379_s6 + $0x4] sm:$0xf] }
 0x34e   : > { %v10545_v49 = vor.u32 %v12166_v37, %v10544_v62 }
 0x351   : > { %3351 = vmatpush.bf16.msra.mxu3 %v10854_v54 }
 0x3c1   : > { %v2042_v10 = vpop.f32.mrf.mxu1 }
 0x3c2   : > { %v2092_v13 = vmul.f32 0.020408163, %v2042_v10  ;;  %v12156_v10 = vld [vmem:[%s18379_s6 + $0xd8] sm:$0xf0] }
 0x3c4   : > { %2151 = vmatpush.msra.mxu0 %v2092_v13  ;;  %v2094_v32 = vmul.f32 %v2092_v13, %v2092_v13  ;;  %v10564_v13 = vld [vmem:[%s18379_s6 + $0xcc] sm:$0xf] }
 0x3c5   : > { %10482 = vmatmul.msk.f32.vlgmr.msra.gmra.mxu0 %vm1189_vm2, %v2108_v6 }
 0x3c6   : > { %2421 = vmatpush.bf16.msrb.mxu0 %v10541_v27  ;;  %v12212_v27 = vld [vmem:[%s18379_s6 + $0x48] sm:$0xf0] }
 0x3c7   : > { %v10834_v1 = vor.u32 %v12212_v27, %v10833_v24 }
 0x3ca   : > { %2422 = vmatpush.bf16.msrb.mxu0 %v10537_v58  ;;  %v12211_v58 = vld [vmem:[%s18379_s6 + $0x20] sm:$0xf0] }
 0x3cb   : > { %v10830_v45 = vor.u32 %v12211_v58, %v10829_v40 }
 0x3cd   : > { %10483 = vmatmul.msk.f32.gmra.mxu0 %vm1189_vm2, %v2109_v31 }
 0x3cf   : > { %v2089_v43 = vpop.f32.mrf.mxu3 }
 0x3d0   : > { %v2093_v26 = vmul.f32 0.020408163, %v2089_v43  ;;  %v12216_v43 = vld [vmem:[%s18379_s6 + $0xe8] sm:$0xf0] }
 0x3d2   : > { %v2095_v29 = vsub.f32 %v2093_v26, %v2094_v32  ;;  %v10849_v32 = vld [vmem:[%s18379_s6 + $0xd8] sm:$0xf] }
 0x3d4   : > { %v2096_v33 = vmax.f32 %v2095_v29, 0.0  ;;  %v10850_v29 = vor.u32 %v12216_v43, %v10849_v32 }
 0x3d5   : > { %10484 = vmatmul.msk.f32.gmra.mxu0 %vm1189_vm2, %v2110_v30 }
 0x3d6   : > { %v2097_v39 = vadd.f32 1e-05, %v2096_v33  ;;  %v12155_v33 = vld [vmem:[%s18379_s6 + $0xb0] sm:$0xf0]  ;;  %3352 = vmatpush.bf16.msra.mxu3 %v10850_v29 }
 0x3d8   : > { %12438 = vrsqrt.f32 %v2097_v39  ;;  %vm2104_vm6 = vweird.f32 %v2097_v39 }
 0x3dd   : > { %10485 = vmatmul.msk.f32.gmra.mxu0 %vm1189_vm2, %v2111_v42 }
 0x3de   : > { %v12439_v46 = vpop.eup %12438 }
 0x3df   : > { %v2099_v47 = vmul.f32 %v12439_v46, %v2097_v39  ;;  %vm2105_vm5 = vweird.f32 %v12439_v46  ;;  %v10560_v39 = vld [vmem:[%s18379_s6 + $0xa4] sm:$0xf] }
 0x3e0   : > { %vm2106_vm7 = vmor %vm2104_vm6, %vm2105_vm5 }
 0x3e1   : > { %v2100_v38 = vmul.f32 %v12439_v46, %v2099_v47  ;;  %v10845_v47 = vld [vmem:[%s18379_s6 + $0xb0] sm:$0xf] }
 0x3e3   : > { %v2101_v56 = vmul.f32 0.5, %v2100_v38  ;;  %v12215_v38 = vld [vmem:[%s18379_s6 + $0xc0] sm:$0xf0] }
 0x3e5   : > { %10486 = vmatmul.msk.f32.gmra.mxu0 %vm1189_vm2, %v2112_v52  ;;  %v2102_v61 = vsub.f32 1.5, %v2101_v56  ;;  %v10846_v56 = vor.u32 %v12215_v38, %v10845_v47 }
 0x3e7   : > { %v2103_v0 = vmul.f32 %v12439_v46, %v2102_v61  ;;  %3353 = vmatpush.bf16.msra.mxu3 %v10846_v56  ;;  %v10524_v61 = vld [vmem:[%s18379_s6 + $0x78] sm:$0xf] }
 0x3e9   : > { %v2107_v28 = vsel %vm2106_vm7, %v12439_v46, %v2103_v0  ;;  %v12170_v46 = vld [vmem:[%s18379_s6 + $0xb4] sm:$0xf0]  ;;  %v12154_v0 = vld [vmem:[%s18379_s6 + $0x88] sm:$0xf0] }
 0x3ea   : > { %2250 = vmatpush.msrb.mxu2 %v2107_v28  ;;  %v10556_v28 = vld [vmem:[%s18379_s6 + $0x7c] sm:$0xf] }
 0x3eb   : > { %10496 = vmatmul.msk.f32.vlgmr.msrb.gmra.mxu2 %vm1189_vm2, %v2108_v6  ;;  %v10533_v6 = vor.u32 %v12156_v10, %v10532_v5 }
 0x3ed   : > { %10487 = vmatmul.msk.f32.gmra.mxu0 %vm1189_vm2, %v2113_v25 }
 0x3ee   : > { %2423 = vmatpush.bf16.msrb.mxu0 %v10533_v6 }
 0x3f3   : > { %10497 = vmatmul.msk.f32.gmra.mxu2 %vm1189_vm2, %v2109_v31  ;;  %v12171_v31 = vld [vmem:[%s18379_s6 + $0xdc] sm:$0xf0] }
 0x3f4   : > { %v10565_v26 = vor.u32 %v12171_v31, %v10564_v13 }
 0x3f5   : > { %10488 = vmatmul.msk.f32.gmra.mxu0 %vm1189_vm2, %v2114_v36 }
 0x3f6   : > { %2534 = vmatpush.bf16.msra.mxu1 %v10565_v26 }
 0x3fb   : > { %10498 = vmatmul.msk.f32.gmra.mxu2 %vm1189_vm2, %v2110_v30  ;;  %v10528_v30 = vld [vmem:[%s18379_s6 + $0xa0] sm:$0xf] }
 0x403   : > { %10499 = vmatmul.msk.f32.gmra.mxu2 %vm1189_vm2, %v2111_v42  ;;  %v10529_v42 = vor.u32 %v12155_v33, %v10528_v30 }
 0x405   : > { %2424 = vmatpush.bf16.msrb.mxu0 %v10529_v42 }
 0x40b   : > { %10500 = vmatmul.msk.f32.gmra.mxu2 %vm1189_vm2, %v2112_v52  ;;  %v10561_v52 = vor.u32 %v12170_v46, %v10560_v39 }
 0x40d   : > { %2535 = vmatpush.bf16.msra.mxu1 %v10561_v52 }
 0x413   : > { %10501 = vmatmul.msk.f32.gmra.mxu2 %vm1189_vm2, %v2113_v25  ;;  %v10525_v25 = vor.u32 %v12154_v0, %v10524_v61 }
 0x415   : > { %2425 = vmatpush.bf16.msrb.mxu0 %v10525_v25 }
 0x41b   : > { %10502 = vmatmul.msk.f32.gmra.mxu2 %vm1189_vm2, %v2114_v36  ;;  %v12169_v36 = vld [vmem:[%s18379_s6 + $0x8c] sm:$0xf0] }
 0x442   : > { %v2153_v3 = vpop.f32.mrf.mxu0 }
 0x443   : > { %10489 = vmatmul.msk.f32.vlgmr.msrb.gmra.mxu1 %vm950_vm0, %v2153_v3  ;;  %v10557_v3 = vor.u32 %v12169_v36, %v10556_v28 }
 0x445   : > { %2536 = vmatpush.bf16.msra.mxu1 %v10557_v3 }
 0x44a   : > { %v2156_v4 = vpop.f32.mrf.mxu0 }
 0x44b   : > { %10490 = vmatmul.msk.f32.gmra.mxu1 %vm950_vm0, %v2156_v4  ;;  %v10842_v4 = vor.u32 %v12214_v60, %v10841_v57 }
 0x44d   : > { %3354 = vmatpush.bf16.msra.mxu3 %v10842_v4 }
 0x452   : > { %v2159_v8 = vpop.f32.mrf.mxu0 }
 0x453   : > { %10491 = vmatmul.msk.f32.gmra.mxu1 %vm950_vm0, %v2159_v8  ;;  %v10520_v8 = vld [vmem:[%s18379_s6 + $0x50] sm:$0xf] }
 0x45a   : > { %v2162_v14 = vpop.f32.mrf.mxu0 }
 0x45b   : > { %10492 = vmatmul.msk.f32.gmra.mxu1 %vm950_vm0, %v2162_v14  ;;  %v12153_v14 = vld [vmem:[%s18379_s6 + $0x60] sm:$0xf0] }
 0x462   : > { %v2165_v53 = vpop.f32.mrf.mxu0 }
 0x463   : > { %10493 = vmatmul.msk.f32.gmra.mxu1 %vm950_vm0, %v2165_v53  ;;  %v10552_v53 = vld [vmem:[%s18379_s6 + $0x54] sm:$0xf] }
 0x46a   : > { %v2168_v50 = vpop.f32.mrf.mxu0 }
 0x46b   : > { %10494 = vmatmul.msk.f32.gmra.mxu1 %vm950_vm0, %v2168_v50  ;;  %v10521_v50 = vor.u32 %v12153_v14, %v10520_v8 }
 0x46d   : > { %2426 = vmatpush.bf16.msrb.mxu0 %v10521_v50 }
 0x46e   : > { %v2252_v2 = vpop.f32.mrf.mxu2 }
 0x46f   : > { %10503 = vmatmul.msk.f32.vlgmr.msrb.gmra.mxu3 %vm950_vm0, %v2252_v2  ;;  %v12168_v2 = vld [vmem:[%s18379_s6 + $0x64] sm:$0xf0] }
 0x472   : > { %v2171_v9 = vpop.f32.mrf.mxu0 }
 0x473   : > { %10495 = vmatmul.msk.f32.gmra.mxu1 %vm950_vm0, %v2171_v9  ;;  %v10837_v9 = vld [vmem:[%s18379_s6 + $0x60] sm:$0xf] }
 0x476   : > { %v2255_v7 = vpop.f32.mrf.mxu2 }
 0x477   : > { %10504 = vmatmul.msk.f32.gmra.mxu3 %vm950_vm0, %v2255_v7  ;;  %v12213_v7 = vld [vmem:[%s18379_s6 + $0x70] sm:$0xf0] }
 0x47e   : > { %v2258_v11 = vpop.f32.mrf.mxu2 }
 0x47f   : > { %10505 = vmatmul.msk.f32.gmra.mxu3 %vm950_vm0, %v2258_v11  ;;  %v10553_v11 = vor.u32 %v12168_v2, %v10552_v53 }
 0x481   : > { %2537 = vmatpush.bf16.msra.mxu1 %v10553_v11 }
 0x486   : > { %v2261_v12 = vpop.f32.mrf.mxu2 }
 0x487   : > { %10506 = vmatmul.msk.f32.gmra.mxu3 %vm950_vm0, %v2261_v12  ;;  %v10838_v12 = vor.u32 %v12213_v7, %v10837_v9 }
 0x489   : > { %3355 = vmatpush.bf16.msra.mxu3 %v10838_v12 }
 0x48d   : > { %3356 = vmatpush.bf16.msra.mxu3 %v10834_v1 }
 0x48e   : > { %v2264_v18 = vpop.f32.mrf.mxu2 }
 0x48f   : > { %10507 = vmatmul.msk.f32.gmra.mxu3 %vm950_vm0, %v2264_v18  ;;  %v10516_v18 = vld [vmem:[%s18379_s6 + $0x28] sm:$0xf] }
 0x491   : > { %3357 = vmatpush.bf16.msra.mxu3 %v10830_v45 }
 0x496   : > { %v2267_v19 = vpop.f32.mrf.mxu2 }
 0x497   : > { %10508 = vmatmul.msk.f32.gmra.mxu3 %vm950_vm0, %v2267_v19  ;;  %v12152_v19 = vld [vmem:[%s18379_s6 + $0x38] sm:$0xf0] }
 0x498   : > { %v10517_v22 = vor.u32 %v12152_v19, %v10516_v18 }
 0x49a   : > { %2427 = vmatpush.bf16.msrb.mxu0 %v10517_v22 }
 0x49e   : > { %v2270_v20 = vpop.f32.mrf.mxu2  ;;  %2428 = vmatpush.bf16.msrb.mxu0 %v10513_v35 }
 0x49f   : > { %10509 = vmatmul.msk.f32.gmra.mxu3 %vm950_vm0, %v2270_v20  ;;  %v10548_v20 = vld [vmem:[%s18379_s6 + $0x2c] sm:$0xf] }
 0x4a0   : > { %v10549_v48 = vor.u32 %v12167_v23, %v10548_v20 }
 0x4a2   : > { %2538 = vmatpush.bf16.msra.mxu1 %v10549_v48 }
 0x4a6   : > { %2539 = vmatpush.bf16.msra.mxu1 %v10545_v49 }
 0x4c0   : > { %v2214_v63 = vpop.f32.mrf.mxu1 }
 0x4c1   : > { %v2332_v5 = vsub.f32 %v13264_v55, %v2214_v63 }
 0x4c8   : > { %v2217_v51 = vpop.f32.mrf.mxu1 }
 0x4c9   : > { %v2333_v13 = vsub.f32 %v13256_v17, %v2217_v51 }
 0x4d0   : > { %v2220_v10 = vpop.f32.mrf.mxu1 }
 0x4d1   : > { %v2334_v55 = vsub.f32 %v13248_v59, %v2220_v10 }
 0x4d8   : > { %v2223_v30 = vpop.f32.mrf.mxu1 }
 0x4d9   : > { %v2335_v39 = vsub.f32 %v13239_v34, %v2223_v30  ;;  %v12175_v30 = vld [vmem:[%s18381_s11 + $0x44] sm:$0xff] }
 0x4e0   : > { %v2226_v47 = vpop.f32.mrf.mxu1 }
 0x4e1   : > { %v2336_v59 = vsub.f32 %v13230_v21, %v2226_v47 }
 0x4e8   : > { %v2229_v0 = vpop.f32.mrf.mxu1 }
 0x4e9   : > { %v2337_v34 = vsub.f32 %v13225_v16, %v2229_v0  ;;  %v12186_v0 = vld [vmem:[%s18379_s6 + $0xe0] sm:$0xf0] }
 0x4f0   : > { %v2232_v4 = vpop.f32.mrf.mxu1 }
 0x4f1   : > { %v2338_v14 = vsub.f32 %v13223_v15, %v2232_v4  ;;  %v12184_v4 = vld [vmem:[%s18379_s6 + $0x90] sm:$0xf0] }
 0x4f2   : > { %v2311_v54 = vpop.f32.mrf.mxu3 }
 0x4f3   : > { %v2339_v6 = vmul.f32 %v2332_v5, %v2311_v54 }
 0x4f5   : > { %v2346_v43 = vmax.f32 %v2339_v6, 0.0 }
 0x4fa   : > { %v2314_v31 = vpop.f32.mrf.mxu3 }
 0x4fb   : > { %v2340_v32 = vmul.f32 %v2333_v13, %v2314_v31 }
 0x4fd   : > { %v2347_v26 = vmax.f32 %v2340_v32, 0.0 }
 0x4ff   : > { %v13487_v29 = vpack.c.bf16 %v2347_v26, %v2346_v43  ;;  %v12174_v43 = vld [vmem:[%s18380_s30 + $0x3c] sm:$0xff]  ;;  %s807_s30 = sand.u32 1, %s12628_s4  }
 0x500   : > { %v12159_v26 = vld [vmem:[%s18381_s11] sm:$0xff]  ;;  %s10237_s8 = sshll.u32 %s807_s30, 8  ;;  %s10156_s28 = scalar_lea.sflag [#allocation3], %s807_s30 }
 0x501   : > { %2429 = vmatmul.bf16.vlgmr.msrb.gmra.mxu0 %v13487_v29  ;;  %2540 = vmatmul.bf16.vlgmr.msra.gmra.mxu1 %v13487_v29  ;;  %s17434_s7 = scalar_lea.vmem [#allocation2], %s10237_s8  ;;  %s10170_s8 = sshll.u32 %s10167_s10, 4  ;;  %s10171_s8 = int_to_ptr.hbm [resolvable:$true] %s10170_s8 }
 0x502   : > { %3358 = vmatmul.bf16.vlgmr.msra.gmra.mxu3 %v13487_v29  ;;  %v2317_v33 = vpop.f32.mrf.mxu3  ;;  %s10168_s9 = sshll.u32 %s17434_s7, 4  ;;  %s12588_s29 = sshra.s32 %s10171_s8, 4  ;;  %s10169_s9 = int_to_ptr.vmem [resolvable:$true] %s10168_s9  ;;  %s12589_s29 = int_to_ptr.hbm [resolvable:$true] %s12588_s29 }
 0x503   : > { %v2341_v17 = vmul.f32 %v2334_v55, %v2317_v33  ;;  %v12160_v33 = vld [vmem:[%s18381_s11 + $0x8] sm:$0xff]  ;;  %s12590_s1 = scalar_lea.hbm %s12589_s29, 256  ;;  %p12595_p0 = scmp.lt.s32.totalorder %s12589_s29, %s18265_s27 }
 0x504   : > { %v12176_v55 = vld [vmem:[%s18381_s11 + $0x4c] sm:$0xff]  ;;  %p12591_p11 = scmp.ne.s32.totalorder %s12589_s29, %s12590_s1  ;;  %p12596_p1 = scmp.lt.s32.totalorder %s12594_s5, %s12590_s1 }
 0x505   : > { %v2348_v38 = vmax.f32 %v2341_v17, 0.0  ;;  %v10691_v17 = vld [vmem:[%s18379_s6 + $0x120] sm:$0xf] }
 0x506   : > { %p12592_p12 = pnand %p12591_p11, %p12819_p5  ;;  %p12597_p2 = por %p12596_p1, %p12595_p0 }
 0x508   : > { %p12593_p13 = pneg %p12592_p12 }
 0x50a   : > { %v2320_v42 = vpop.f32.mrf.mxu3  ;;  %p12598_p3 = pnand %p12597_p2, %p12593_p13 }
 0x50b   : > { %v2342_v46 = vmul.f32 %v2335_v39, %v2320_v42  ;;  %v12161_v39 = vld [vmem:[%s18381_s11 + $0x10] sm:$0xff] }
 0x50c   : > { %v12188_v42 = vld [vmem:[%s18379_s6 + $0x130] sm:$0xf0] }
 0x50d   : > { %v2349_v52 = vmax.f32 %v2342_v46, 0.0  ;;  %v10687_v46 = vld [vmem:[%s18379_s6 + $0xf8] sm:$0xf]  ;;  %v10692_v47 = vor.u32 %v12188_v42, %v10691_v17  ;;  %v10746_v17 = vld [vmem:[%s18379_s6 + $0xc] sm:$0xf] }
 0x50e   : > { %v12196_v42 = vld [vmem:[%s18379_s6 + $0x1c] sm:$0xf0] }
 0x50f   : > { %v13494_v56 = vpack.c.bf16 %v2349_v52, %v2348_v38  ;;  %v12187_v38 = vld [vmem:[%s18379_s6 + $0x108] sm:$0xf0] }
 0x510   : > { %v10688_v52 = vor.u32 %v12187_v38, %v10687_v46  ;;  %v10747_v46 = vor.u32 %v12196_v42, %v10746_v17  ;;  %v2467_v38 = vld [vmem:[%s18381_s11 + $0x38] sm:$0xf] }
 0x511   : > { %2434 = vmatmul.bf16.gmra.mxu0 %v13494_v56  ;;  %2545 = vmatmul.bf16.gmra.mxu1 %v13494_v56 }
 0x512   : > { %3363 = vmatmul.bf16.gmra.mxu3 %v13494_v56  ;;  %v2323_v61 = vpop.f32.mrf.mxu3 }
 0x513   : > { %v2343_v28 = vmul.f32 %v2336_v59, %v2323_v61  ;;  %v10683_v61 = vld [vmem:[%s18379_s6 + $0xd0] sm:$0xf] }
 0x514   : > { %v10684_v59 = vor.u32 %v12186_v0, %v10683_v61  ;;  %v2722_v61 = vunpack.c.l.b16 %v2467_v38 }
 0x515   : > { %v2350_v57 = vmax.f32 %v2343_v28, 0.0  ;;  %v12162_v28 = vld [vmem:[%s18381_s11 + $0x18] sm:$0xff] }
 0x51a   : > { %v2326_v25 = vpop.f32.mrf.mxu3 }
 0x51b   : > { %v2344_v36 = vmul.f32 %v2337_v34, %v2326_v25  ;;  %v12177_v34 = vld [vmem:[%s18381_s11 + $0x54] sm:$0xff]  ;;  %v10679_v25 = vld [vmem:[%s18379_s6 + $0xa8] sm:$0xf] }
 0x51d   : > { %v2351_v60 = vmax.f32 %v2344_v36, 0.0  ;;  %v12185_v36 = vld [vmem:[%s18379_s6 + $0xb8] sm:$0xf0] }
 0x51f   : > { %v13501_v3 = vpack.c.bf16 %v2351_v60, %v2350_v57  ;;  %v10675_v57 = vld [vmem:[%s18379_s6 + $0x80] sm:$0xf]  ;;  %v10680_v60 = vor.u32 %v12185_v36, %v10679_v25 }
 0x521   : > { %2439 = vmatmul.bf16.gmra.mxu0 %v13501_v3  ;;  %2550 = vmatmul.bf16.gmra.mxu1 %v13501_v3 }
 0x522   : > { %3368 = vmatmul.bf16.gmra.mxu3 %v13501_v3  ;;  %v2329_v8 = vpop.f32.mrf.mxu3 }
 0x523   : > { %v2345_v21 = vmul.f32 %v2338_v14, %v2329_v8  ;;  %v10676_v8 = vor.u32 %v12184_v4, %v10675_v57  ;;  %v10671_v14 = vld [vmem:[%s18379_s6 + $0x58] sm:$0xf] }
 0x525   : > { %v2352_v53 = vmax.f32 %v2345_v21, 0.0  ;;  %v12183_v21 = vld [vmem:[%s18379_s6 + $0x68] sm:$0xf0] }
 0x527   : > { %v13507_v16 = vpack.c.bf16 %v2352_v53, %v2352_v53  ;;  %v10672_v53 = vor.u32 %v12183_v21, %v10671_v14 }
 0x531   : > { %2444 = vmatmul.bf16.gmra.mxu0 %v13507_v16  ;;  %2555 = vmatmul.bf16.gmra.mxu1 %v13507_v16 }
 0x532   : > { %3373 = vmatmul.bf16.gmra.mxu3 %v13507_v16 }
 0x57e   : > { %v2430_v50 = vpop.f32.mrf.mxu0  ;;  %v2541_v2 = vpop.f32.mrf.mxu1 }
 0x585   : > { %v13512_v9 = vpop.f32.mrf.mxu3 }
 0x586   : > { %v2432_v7 = vpop.f32.mrf.mxu0  ;;  %v2543_v11 = vpop.f32.mrf.mxu1 }
 0x587   : > { %v2449_v6 = vpack.c.bf16 %v2432_v7, %v2430_v50  ;;  %v2560_v31 = vpack.c.bf16 %v2543_v11, %v2541_v2  ;;  %v10667_v50 = vld [vmem:[%s18379_s6 + $0x30] sm:$0xf]  ;;  %v12182_v2 = vld [vmem:[%s18379_s6 + $0x40] sm:$0xf0]  ;;  %v12178_v11 = vld [vmem:[%s18381_s11 + $0x5c] sm:$0xff] }
 0x588   : > { %v10668_v7 = vor.u32 %v12182_v2, %v10667_v50 }
 0x58d   : > { %v13514_v12 = vpop.f32.mrf.mxu3 }
 0x58e   : > { %v2435_v18 = vpop.f32.mrf.mxu0  ;;  %v2546_v15 = vpop.f32.mrf.mxu1 }
 0x595   : > { %v13516_v19 = vpop.f32.mrf.mxu3 }
 0x596   : > { %v2437_v20 = vpop.f32.mrf.mxu0  ;;  %v2548_v22 = vpop.f32.mrf.mxu1 }
 0x597   : > { %v2450_v10 = vpack.c.bf16 %v2437_v20, %v2435_v18  ;;  %v2561_v13 = vpack.c.bf16 %v2548_v22, %v2546_v15  ;;  %v12163_v18 = vld [vmem:[%s18381_s11 + $0x20] sm:$0xff]  ;;  %v10663_v15 = vld [vmem:[%s18379_s6 + $0x8] sm:$0xf]  ;;  %v12181_v20 = vld [vmem:[%s18379_s6 + $0x18] sm:$0xf0] }
 0x598   : > { %v10774_v22 = vld [vmem:[%s18379_s6 + $0x124] sm:$0xf] }
 0x59d   : > { %v13518_v23 = vpop.f32.mrf.mxu3 }
 0x59e   : > { %v2440_v24 = vpop.f32.mrf.mxu0  ;;  %v2551_v27 = vpop.f32.mrf.mxu1 }
 0x5a5   : > { %v13520_v48 = vpop.f32.mrf.mxu3 }
 0x5a6   : > { %v2442_v1 = vpop.f32.mrf.mxu0  ;;  %v2553_v41 = vpop.f32.mrf.mxu1 }
 0x5a7   : > { %v2451_v45 = vpack.c.bf16 %v2442_v1, %v2440_v24  ;;  %v2562_v63 = vpack.c.bf16 %v2553_v41, %v2551_v27  ;;  %v10664_v24 = vor.u32 %v12181_v20, %v10663_v15  ;;  %v12203_v27 = vld [vmem:[%s18379_s6 + $0x134] sm:$0xf0]  ;;  %v10770_v1 = vld [vmem:[%s18379_s6 + $0xfc] sm:$0xf]  ;;  %v12202_v41 = vld [vmem:[%s18379_s6 + $0x10c] sm:$0xf0] }
 0x5ad   : > { %v13522_v44 = vpop.f32.mrf.mxu3 }
 0x5ae   : > { %v2445_v62 = vpop.f32.mrf.mxu0  ;;  %v2556_v35 = vpop.f32.mrf.mxu1  ;;  %v3380_v36 = vpack.c.bf16 %v13522_v44, %v13520_v48 }
 0x5af   : > { %v2452_v37 = vpack.c.bf16 %v2445_v62, %v2445_v62  ;;  %v2563_v40 = vpack.c.bf16 %v2556_v35, %v2556_v35  ;;  %v10775_v62 = vor.u32 %v12203_v27, %v10774_v22  ;;  %v10771_v35 = vor.u32 %v12202_v41, %v10770_v1 }
 0x5b1   : > { %v2756_v58 = vsel %vm1196_vm1, %v2452_v37, 0  ;;  %v2643_v49 = vsel %vm1196_vm1, %v2563_v40, 0  ;;  %v10766_v37 = vld [vmem:[%s18379_s6 + $0xd4] sm:$0xf]  ;;  %v12201_v40 = vld [vmem:[%s18379_s6 + $0xe4] sm:$0xf0] }
 0x5b2   : > { %2649 = vmatpush.bf16.msra.mxu2 %v2643_v49  ;;  %2762 = vmatpush.bf16.msra.mxu0 %v2756_v58  ;;  %v10767_v58 = vor.u32 %v12201_v40, %v10766_v37  ;;  %v10762_v49 = vld [vmem:[%s18379_s6 + $0xac] sm:$0xf] }
 0x5b5   : > { %v13526_v51 = vpop.f32.mrf.mxu3 }
 0x5b6   : > { %v2447_v54 = vpop.f32.mrf.mxu0  ;;  %v2558_v5 = vpop.f32.mrf.mxu1  ;;  %2650 = vmatpush.bf16.msra.mxu2 %v2562_v63  ;;  %2763 = vmatpush.bf16.msra.mxu0 %v2451_v45  ;;  %v12200_v45 = vld [vmem:[%s18379_s6 + $0xbc] sm:$0xf0]  ;;  %v12179_v63 = vld [vmem:[%s18381_s11 + $0x64] sm:$0xff] }
 0x5b7   : > { %v12164_v54 = vld [vmem:[%s18381_s11 + $0x28] sm:$0xff]  ;;  %v10763_v5 = vor.u32 %v12200_v45, %v10762_v49 }
 0x5ba   : > { %2651 = vmatpush.bf16.msra.mxu2 %v2561_v13  ;;  %2764 = vmatpush.bf16.msra.mxu0 %v2450_v10  ;;  %v10758_v10 = vld [vmem:[%s18379_s6 + $0x84] sm:$0xf]  ;;  %v12199_v13 = vld [vmem:[%s18379_s6 + $0x94] sm:$0xf0] }
 0x5bd   : > { %v3376_v32 = vpop.f32.mrf.mxu3 }
 0x5be   : > { %2652 = vmatpush.bf16.msra.mxu2 %v2560_v31  ;;  %2765 = vmatpush.bf16.msra.mxu0 %v2449_v6  ;;  %v10759_v6 = vor.u32 %v12199_v13, %v10758_v10  ;;  %v10754_v31 = vld [vmem:[%s18379_s6 + $0x5c] sm:$0xf]  ;;  %v12198_v32 = vld [vmem:[%s18379_s6 + $0x6c] sm:$0xf0] }
 0x5c1   : > { %10617 = vmatmul.msk.bf16.vlgmr.msra.gmra.mxu2 %vm1985_vm4, %v12174_v43  ;;  %10653 = vmatmul.msk.bf16.vlgmr.msra.gmra.mxu0 %vm1985_vm4, %v12159_v26  ;;  %v10755_v43 = vor.u32 %v12198_v32, %v10754_v31  ;;  %v10750_v26 = vld [vmem:[%s18379_s6 + $0x34] sm:$0xf] }
 0x5c2   : > { %2870 = vmatpush.bf16.msrb.mxu0 %v10692_v47  ;;  %v10588_v47 = vld [vmem:[%s18381_s11 + $0x74] sm:$0xf] }
 0x5c6   : > { %2871 = vmatpush.bf16.msrb.mxu0 %v10688_v52  ;;  %v2609_v52 = vunpack.c.l.b16 %v10588_v47 }
 0x5c8   : > { %v2617_v0 = vpack.c.b16 %v2609_v52, %v2609_v52  ;;  %v12191_v52 = vld [vmem:[%s18381_s11 + $0x88] sm:$0xff] }
 0x5ca   : > { %2872 = vmatpush.bf16.msrb.mxu0 %v10684_v59  ;;  %v2730_v59 = vpack.c.b16 %v2722_v61, %v2722_v61 }
 0x5ce   : > { %2873 = vmatpush.bf16.msrb.mxu0 %v10680_v60 }
 0x5d1   : > { %10618 = vmatmul.msk.bf16.gmra.mxu2 %vm1985_vm4, %v12175_v30  ;;  %10654 = vmatmul.msk.bf16.gmra.mxu0 %vm1985_vm4, %v12160_v33  ;;  %v12197_v30 = vld [vmem:[%s18379_s6 + $0x44] sm:$0xf0] }
 0x5d2   : > { %2874 = vmatpush.bf16.msrb.mxu0 %v10676_v8  ;;  %v10751_v33 = vor.u32 %v12197_v30, %v10750_v26  ;;  %v3379_v8 = vpack.c.bf16 %v13518_v23, %v13516_v19 }
 0x5d6   : > { %2875 = vmatpush.bf16.msrb.mxu0 %v10672_v53 }
 0x5da   : > { %2876 = vmatpush.bf16.msrb.mxu0 %v10668_v7 }
 0x5de   : > { %2877 = vmatpush.bf16.msrb.mxu0 %v10664_v24 }
 0x5e1   : > { %10619 = vmatmul.msk.bf16.gmra.mxu2 %vm1985_vm4, %v12176_v55  ;;  %10655 = vmatmul.msk.bf16.gmra.mxu0 %vm1985_vm4, %v12161_v39  ;;  %v12180_v55 = vld [vmem:[%s18381_s11 + $0x6c] sm:$0xff] }
 0x5e2   : > { %3110 = vmatpush.bf16.msra.mxu0 %v10775_v62  ;;  %v12165_v39 = vld [vmem:[%s18381_s11 + $0x30] sm:$0xff] }
 0x5e6   : > { %3111 = vmatpush.bf16.msra.mxu0 %v10771_v35 }
 0x5ea   : > { %3112 = vmatpush.bf16.msra.mxu0 %v10767_v58 }
 0x5ee   : > { %3113 = vmatpush.bf16.msra.mxu0 %v10763_v5 }
 0x5f1   : > { %10620 = vmatmul.msk.bf16.gmra.mxu2 %vm1985_vm4, %v12177_v34  ;;  %10656 = vmatmul.msk.bf16.gmra.mxu0 %vm1985_vm4, %v12162_v28  ;;  %v3381_v34 = vpack.c.bf16 %v13526_v51, %v13526_v51  ;;  %v3378_v51 = vpack.c.bf16 %v13514_v12, %v13512_v9 }
 0x5f2   : > { %3114 = vmatpush.bf16.msra.mxu0 %v10759_v6 }
 0x5f3   : > { %v3461_v25 = vsel %vm1196_vm1, %v3381_v34, 0  ;;  %v12192_v34 = vld [vmem:[%s18381_s11 + $0x90] sm:$0xff] }
 0x5f6   : > { %3115 = vmatpush.bf16.msra.mxu0 %v10755_v43 }
 0x5fa   : > { %3116 = vmatpush.bf16.msra.mxu0 %v10751_v33 }
 0x5fe   : > { %3117 = vmatpush.bf16.msra.mxu0 %v10747_v46  ;;  %v12190_v46 = vld [vmem:[%s18381_s11 + $0x80] sm:$0xff] }
 0x601   : > { %10621 = vmatmul.msk.bf16.gmra.mxu2 %vm1985_vm4, %v12178_v11  ;;  %10657 = vmatmul.msk.bf16.gmra.mxu0 %vm1985_vm4, %v12163_v18 }
 0x611   : > { %10622 = vmatmul.msk.bf16.gmra.mxu2 %vm1985_vm4, %v12179_v63  ;;  %10658 = vmatmul.msk.bf16.gmra.mxu0 %vm1985_vm4, %v12164_v54 }
 0x621   : > { %10623 = vmatmul.msk.bf16.gmra.mxu2 %vm1985_vm4, %v12180_v55  ;;  %10659 = vmatmul.msk.bf16.gmra.mxu0 %vm1985_vm4, %v12165_v39  ;;  %v12189_v39 = vld [vmem:[%s18381_s11 + $0x78] sm:$0xff] }
 0x631   : > { %10624 = vmatmul.msk.bf16.gmra.mxu2 %vm1985_vm4, %v2617_v0  ;;  %10660 = vmatmul.msk.bf16.gmra.mxu0 %vm1985_vm4, %v2730_v59  ;;  %v12219_v0 = vld [vmem:[%s18381_s11 + $0xf0] sm:$0xff] }
 0x63e   : > { %v2767_v28 = vpop.f32.mrf.mxu0 }
 0x641   : > { %2878 = vmatmul.bf16.vlgmr.msrb.gmra.mxu0 %v13487_v29 }
 0x642   : > { %3467 = vmatpush.bf16.msrb.mxu0 %v3461_v25 }
 0x644   : > { %v2654_v57 = vpop.f32.mrf.mxu2 }
 0x645   : > { %v13694_v60 = vadd.f32 %v2767_v28, %v2654_v57 }
 0x646   : > { %3468 = vmatpush.bf16.msrb.mxu0 %v3380_v36  ;;  %v13696_v4 = vpop.f32.mrf.mxu0  ;;  %v12220_v36 = vld [vmem:[%s18381_s11 + $0xf8] sm:$0xff] }
 0x647   : > { %18382 = vst [vmem:[#allocation14_spill] sm:$0xff] %v13694_v60 }
 0x64a   : > { %3469 = vmatpush.bf16.msrb.mxu0 %v3379_v8 }
 0x64c   : > { %v13702_v14 = vpop.f32.mrf.mxu2 }
 0x64e   : > { %3470 = vmatpush.bf16.msrb.mxu0 %v3378_v51  ;;  %v2772_v21 = vpop.f32.mrf.mxu0 }
 0x651   : > { %2883 = vmatmul.bf16.gmra.mxu0 %v13494_v56 }
 0x654   : > { %v2659_v48 = vpop.f32.mrf.mxu2 }
 0x655   : > { %v13705_v44 = vadd.f32 %v2772_v21, %v2659_v48 }
 0x656   : > { %v13707_v53 = vpop.f32.mrf.mxu0 }
 0x65c   : > { %v13709_v50 = vpop.f32.mrf.mxu2 }
 0x65e   : > { %v2777_v2 = vpop.f32.mrf.mxu0 }
 0x661   : > { %2888 = vmatmul.bf16.gmra.mxu0 %v13501_v3 }
 0x664   : > { %v2664_v19 = vpop.f32.mrf.mxu2 }
 0x665   : > { %v13712_v23 = vadd.f32 %v2777_v2, %v2664_v19  ;;  %v12193_v2 = vld [vmem:[%s18381_s11 + $0x98] sm:$0xff] }
 0x666   : > { %v13714_v9 = vpop.f32.mrf.mxu0  ;;  %v12204_v19 = vld [vmem:[%s18381_s11 + $0xb4] sm:$0xff] }
 0x66c   : > { %v13716_v12 = vpop.f32.mrf.mxu2 }
 0x66e   : > { %v2782_v7 = vpop.f32.mrf.mxu0 }
 0x671   : > { %2893 = vmatmul.bf16.gmra.mxu0 %v13507_v16 }
 0x674   : > { %v2669_v11 = vpop.f32.mrf.mxu2 }
 0x675   : > { %v13719_v18 = vadd.f32 %v2782_v7, %v2669_v11  ;;  %v12221_v7 = vld [vmem:[%s18381_s11 + $0x100] sm:$0xff] }
 0x676   : > { %v13721_v15 = vpop.f32.mrf.mxu0  ;;  %v12194_v11 = vld [vmem:[%s18381_s11 + $0xa0] sm:$0xff] }
 0x67c   : > { %v13723_v20 = vpop.f32.mrf.mxu2 }
 0x67e   : > { %v13725_v22 = vpop.f32.mrf.mxu0 }
 0x681   : > { %3118 = vmatmul.bf16.vlgmr.msra.gmra.mxu0 %v13487_v29 }
 0x684   : > { %v13728_v24 = vpop.f32.mrf.mxu2 }
 0x686   : > { %v13730_v27 = vpop.f32.mrf.mxu0 }
 0x68c   : > { %v13732_v1 = vpop.f32.mrf.mxu2 }
 0x68e   : > { %v13734_v41 = vpop.f32.mrf.mxu0 }
 0x691   : > { %3123 = vmatmul.bf16.gmra.mxu0 %v13494_v56 }
 0x694   : > { %v13737_v62 = vpop.f32.mrf.mxu2 }
 0x696   : > { %v13739_v35 = vpop.f32.mrf.mxu0 }
 0x69c   : > { %v13741_v37 = vpop.f32.mrf.mxu2 }
 0x69e   : > { %v13743_v40 = vpop.f32.mrf.mxu0 }
 0x6a1   : > { %3128 = vmatmul.bf16.gmra.mxu0 %v13501_v3 }
 0x6a4   : > { %v13746_v29 = vpop.f32.mrf.mxu2 }
 0x6a6   : > { %v13748_v58 = vpop.f32.mrf.mxu0 }
 0x6ac   : > { %v13750_v49 = vpop.f32.mrf.mxu2 }
 0x6ae   : > { %v13752_v45 = vpop.f32.mrf.mxu0 }
 0x6b1   : > { %3133 = vmatmul.bf16.gmra.mxu0 %v13507_v16 }
 0x6b4   : > { %v13755_v56 = vpop.f32.mrf.mxu2 }
 0x6b6   : > { %v2804_v63 = vpop.f32.mrf.mxu0 }
 0x6b7   : > { %v12205_v63 = vld [vmem:[%s18381_s11 + $0xbc] sm:$0xff] }
 0x6bc   : > { %v2691_v54 = vpop.f32.mrf.mxu2 }
 0x6bd   : > { %v12222_v54 = vld [vmem:[%s18381_s11 + $0x108] sm:$0xff] }
 0x6be   : > { %v2879_v5 = vpop.f32.mrf.mxu0 }
 0x6c1   : > { %10902 = vmatmul.msk.bf16.vlgmr.msrb.gmra.mxu0 %vm1985_vm4, %v12219_v0 }
 0x6c6   : > { %v2881_v10 = vpop.f32.mrf.mxu0 }
 0x6c7   : > { %v2898_v16 = vpack.c.bf16 %v2881_v10, %v2879_v5  ;;  %v12195_v5 = vld [vmem:[%s18381_s11 + $0xa8] sm:$0xff] }
 0x6c8   : > { %v12206_v10 = vld [vmem:[%s18381_s11 + $0xc4] sm:$0xff] }
 0x6ce   : > { %v2884_v13 = vpop.f32.mrf.mxu0 }
 0x6d1   : > { %10903 = vmatmul.msk.bf16.gmra.mxu0 %vm1985_vm4, %v12220_v36 }
 0x6d6   : > { %v2886_v6 = vpop.f32.mrf.mxu0 }
 0x6d7   : > { %v2899_v55 = vpack.c.bf16 %v2886_v6, %v2884_v13  ;;  %v12223_v13 = vld [vmem:[%s18381_s11 + $0x110] sm:$0xff] }
 0x6d8   : > { %v10707_v6 = vld [vmem:[%s18381_s11 + $0xb0] sm:$0xf] }
 0x6de   : > { %v2889_v31 = vpop.f32.mrf.mxu0 }
 0x6e1   : > { %10904 = vmatmul.msk.bf16.gmra.mxu0 %vm1985_vm4, %v12221_v7 }
 0x6e6   : > { %v2891_v3 = vpop.f32.mrf.mxu0 }
 0x6e7   : > { %v2900_v30 = vpack.c.bf16 %v2891_v3, %v2889_v31  ;;  %v2947_v31 = vunpack.c.l.b16 %v10707_v6 }
 0x6e9   : > { %v2955_v3 = vpack.c.b16 %v2947_v31, %v2947_v31 }
 0x6ee   : > { %v2894_v32 = vpop.f32.mrf.mxu0 }
 0x6ef   : > { %v2901_v43 = vpack.c.bf16 %v2894_v32, %v2894_v32  ;;  %v12207_v32 = vld [vmem:[%s18381_s11 + $0xcc] sm:$0xff] }
 0x6f1   : > { %v2981_v26 = vsel %vm1196_vm1, %v2901_v43, 0  ;;  %10905 = vmatmul.msk.bf16.gmra.mxu0 %vm1985_vm4, %v12222_v54  ;;  %v12224_v43 = vld [vmem:[%s18381_s11 + $0x118] sm:$0xff] }
 0x6f2   : > { %2987 = vmatpush.bf16.msrb.mxu1 %v2981_v26  ;;  %v12208_v26 = vld [vmem:[%s18381_s11 + $0xd4] sm:$0xff] }
 0x6f6   : > { %v2896_v33 = vpop.f32.mrf.mxu0  ;;  %2988 = vmatpush.bf16.msrb.mxu1 %v2900_v30 }
 0x6f7   : > { %v12225_v33 = vld [vmem:[%s18381_s11 + $0x120] sm:$0xff] }
 0x6fa   : > { %2989 = vmatpush.bf16.msrb.mxu1 %v2899_v55 }
 0x6fe   : > { %2990 = vmatpush.bf16.msrb.mxu1 %v2898_v16  ;;  %v3119_v17 = vpop.f32.mrf.mxu0  ;;  %v12209_v16 = vld [vmem:[%s18381_s11 + $0xdc] sm:$0xff] }
 0x701   : > { %10736 = vmatmul.msk.bf16.vlgmr.msrb.gmra.mxu1 %vm1985_vm4, %v12189_v39  ;;  %10906 = vmatmul.msk.bf16.gmra.mxu0 %vm1985_vm4, %v12223_v13  ;;  %v10873_v39 = vld [vmem:[%s18381_s11 + $0x128] sm:$0xf] }
 0x706   : > { %v3121_v42 = vpop.f32.mrf.mxu0 }
 0x707   : > { %v3138_v48 = vpack.c.bf16 %v3121_v42, %v3119_v17  ;;  %v3427_v42 = vunpack.c.l.b16 %v10873_v39 }
 0x70e   : > { %v3124_v47 = vpop.f32.mrf.mxu0 }
 0x711   : > { %10737 = vmatmul.msk.bf16.gmra.mxu1 %vm1985_vm4, %v12190_v46  ;;  %10907 = vmatmul.msk.bf16.gmra.mxu0 %vm1985_vm4, %v12224_v43  ;;  %v3435_v46 = vpack.c.b16 %v3427_v42, %v3427_v42  ;;  %v2803_v42 = vadd.f32 %v13752_v45, %v13755_v56 }
 0x716   : > { %v3126_v38 = vpop.f32.mrf.mxu0 }
 0x717   : > { %v3139_v21 = vpack.c.bf16 %v3126_v38, %v3124_v47  ;;  %v12210_v38 = vld [vmem:[%s18381_s11 + $0xe4] sm:$0xff] }
 0x71e   : > { %v3129_v61 = vpop.f32.mrf.mxu0 }
 0x721   : > { %10738 = vmatmul.msk.bf16.gmra.mxu1 %vm1985_vm4, %v12191_v52  ;;  %10908 = vmatmul.msk.bf16.gmra.mxu0 %vm1985_vm4, %v12225_v33 }
 0x726   : > { %v3131_v59 = vpop.f32.mrf.mxu0 }
 0x727   : > { %v3140_v8 = vpack.c.bf16 %v3131_v59, %v3129_v61  ;;  %v10790_v59 = vld [vmem:[%s18381_s11 + $0xec] sm:$0xf] }
 0x72e   : > { %v3134_v28 = vpop.f32.mrf.mxu0 }
 0x72f   : > { %v3141_v25 = vpack.c.bf16 %v3134_v28, %v3134_v28  ;;  %v3187_v28 = vunpack.c.l.b16 %v10790_v59 }
 0x731   : > { %10739 = vmatmul.msk.bf16.gmra.mxu1 %vm1985_vm4, %v12192_v34  ;;  %v3221_v57 = vsel %vm1196_vm1, %v3141_v25, 0  ;;  %10909 = vmatmul.msk.bf16.gmra.mxu0 %vm1985_vm4, %v3435_v46  ;;  %v3195_v25 = vpack.c.b16 %v3187_v28, %v3187_v28 }
 0x732   : > { %3227 = vmatpush.bf16.msrb.mxu2 %v3221_v57 }
 0x736   : > { %v3136_v51 = vpop.f32.mrf.mxu0  ;;  %3228 = vmatpush.bf16.msrb.mxu2 %v3140_v8 }
 0x73a   : > { %3229 = vmatpush.bf16.msrb.mxu2 %v3139_v21  ;;  %v2788_v21 = vadd.f32 %v13725_v22, %v13728_v24 }
 0x73e   : > { %3230 = vmatpush.bf16.msrb.mxu2 %v3138_v48  ;;  %v13860_v61 = vpop.f32.mrf.mxu0 }
 0x73f   : > { %18384 = vst [vmem:[#allocation12_spill] sm:$0xff] %v13860_v61 }
 0x741   : > { %10740 = vmatmul.msk.bf16.gmra.mxu1 %vm1985_vm4, %v12193_v2  ;;  %10819 = vmatmul.msk.bf16.vlgmr.msrb.gmra.mxu2 %vm1985_vm4, %v12204_v19 }
 0x746   : > { %v13868_v34 = vpop.f32.mrf.mxu0 }
 0x747   : > { %18385 = vst [vmem:[#allocation13_spill] sm:$0xff] %v13868_v34 }
 0x74e   : > { %v13872_v57 = vpop.f32.mrf.mxu0 }
 0x74f   : > { %18386 = vst [vmem:[#allocation16_spill] sm:$0xff] %v13872_v57 }
 0x751   : > { %10741 = vmatmul.msk.bf16.gmra.mxu1 %vm1985_vm4, %v12194_v11  ;;  %10820 = vmatmul.msk.bf16.gmra.mxu2 %vm1985_vm4, %v12205_v63 }
 0x756   : > { %v13877_v51 = vpop.f32.mrf.mxu0 }
 0x757   : > { %18387 = vst [vmem:[#allocation17_spill] sm:$0xff] %v13877_v51 }
 0x75e   : > { %v13881_v19 = vpop.f32.mrf.mxu0 }
 0x761   : > { %10742 = vmatmul.msk.bf16.gmra.mxu1 %vm1985_vm4, %v12195_v5  ;;  %10821 = vmatmul.msk.bf16.gmra.mxu2 %vm1985_vm4, %v12206_v10  ;;  %v2793_v5 = vadd.f32 %v13734_v41, %v13737_v62 }
 0x766   : > { %v13885_v63 = vpop.f32.mrf.mxu0 }
 0x76e   : > { %v13891_v6 = vpop.f32.mrf.mxu0 }
 0x771   : > { %10743 = vmatmul.msk.bf16.gmra.mxu1 %vm1985_vm4, %v2955_v3  ;;  %10822 = vmatmul.msk.bf16.gmra.mxu2 %vm1985_vm4, %v12207_v32  ;;  %v2798_v32 = vadd.f32 %v13743_v40, %v13746_v29 }
 0x776   : > { %v13895_v24 = vpop.f32.mrf.mxu0 }
 0x77e   : > { %v13834_v30 = vpop.f32.mrf.mxu1  ;;  %v3492_v33 = vpop.f32.mrf.mxu0 }
 0x77f   : > { %18383 = vst [vmem:[#allocation15_spill] sm:$0xff] %v13834_v30  ;;  %v2790_v30 = vadd.f32 %v13730_v27, %v13732_v1 }
 0x781   : > { %10823 = vmatmul.msk.bf16.gmra.mxu2 %vm1985_vm4, %v12208_v26 }
 0x786   : > { %v13841_v55 = vpop.f32.mrf.mxu1  ;;  %v3494_v62 = vpop.f32.mrf.mxu0 }
 0x78e   : > { %v13849_v17 = vpop.f32.mrf.mxu1  ;;  %v3497_v59 = vpop.f32.mrf.mxu0 }
 0x791   : > { %10824 = vmatmul.msk.bf16.gmra.mxu2 %vm1985_vm4, %v12209_v16 }
 0x796   : > { %v13853_v47 = vpop.f32.mrf.mxu1 }
 0x79e   : > { %v13858_v52 = vpop.f32.mrf.mxu1 }
 0x7a1   : > { %10825 = vmatmul.msk.bf16.gmra.mxu2 %vm1985_vm4, %v12210_v38 }
 0x7a6   : > { %v13863_v0 = vpop.f32.mrf.mxu1 }
 0x7ae   : > { %v13870_v36 = vpop.f32.mrf.mxu1 }
 0x7b1   : > { %10826 = vmatmul.msk.bf16.gmra.mxu2 %vm1985_vm4, %v3195_v25 }
 0x7b6   : > { %v13875_v8 = vpop.f32.mrf.mxu1 }
 0x7be   : > { %v3012_v48 = vpop.f32.mrf.mxu1 }
 0x7bf   : > { %v3039_v2 = vadd.f32 %v3012_v48, %v2788_v21  ;;  %v3499_v21 = vpop.f32.mrf.mxu0 }
 0x7c4   : > { %v13883_v7 = vpop.f32.mrf.mxu2 }
 0x7c5   : > { %18388 = vst [vmem:[#allocation18_spill] sm:$0xff] %v13883_v7 }
 0x7c6   : > { %v3014_v11 = vpop.f32.mrf.mxu1 }
 0x7c7   : > { %v3502_v40 = vpop.f32.mrf.mxu0 }
 0x7cc   : > { %v13887_v54 = vpop.f32.mrf.mxu2 }
 0x7cd   : > { %18389 = vst [vmem:[#allocation19_spill] sm:$0xff] %v13887_v54  ;;  %v2795_v54 = vadd.f32 %v13739_v35, %v13741_v37  ;;  %v2785_v35 = vadd.f32 %v13721_v15, %v13723_v20  ;;  %v2780_v20 = vadd.f32 %v13714_v9, %v13716_v12  ;;  %v3583_v9 = vld [vmem:[%s18391_s13 + $0x68] sm:$0xff] }
 0x7ce   : > { %v3017_v10 = vpop.f32.mrf.mxu1 }
 0x7cf   : > { %v3041_v13 = vadd.f32 %v3017_v10, %v2793_v5  ;;  %v3038_v1 = vadd.f32 %v13875_v8, %v2785_v35  ;;  %v3037_v8 = vadd.f32 %v13870_v36, %v13719_v18  ;;  %v3036_v12 = vadd.f32 %v13863_v0, %v2780_v20  ;;  %v3575_v20 = vld [vmem:[%s18391_s13 + $0x28] sm:$0xff] }
 0x7d0   : > { %v3035_v0 = vadd.f32 %v13858_v52, %v13712_v23 }
 0x7d4   : > { %v13893_v31 = vpop.f32.mrf.mxu2 }
 0x7d6   : > { %v3019_v22 = vpop.f32.mrf.mxu1 }
 0x7dc   : > { %v13897_v3 = vpop.f32.mrf.mxu2 }
 0x7de   : > { %v3022_v43 = vpop.f32.mrf.mxu1 }
 0x7df   : > { %v3043_v26 = vadd.f32 %v3022_v43, %v2798_v32  ;;  %v3504_v32 = vpop.f32.mrf.mxu0 }
 0x7e4   : > { %v13901_v16 = vpop.f32.mrf.mxu2 }
 0x7e5   : > { %v3275_v23 = vadd.f32 %v13901_v16, %v3035_v0  ;;  %v2770_v16 = vadd.f32 %v13696_v4, %v13702_v14  ;;  %v3579_v4 = vld [vmem:[%s18391_s13 + $0x48] sm:$0xff] }
 0x7e6   : > { %v3024_v41 = vpop.f32.mrf.mxu1 }
 0x7e7   : > { %v3507_v61 = vpop.f32.mrf.mxu0  ;;  %v3032_v14 = vadd.f32 %v13841_v55, %v2770_v16  ;;  %v18392_v55 = vld [vmem:[#allocation14_spill] sm:$0xff] }
 0x7ec   : > { %v13903_v39 = vpop.f32.mrf.mxu2 }
 0x7ee   : > { %v3027_v46 = vpop.f32.mrf.mxu1 }
 0x7ef   : > { %v3045_v38 = vadd.f32 %v3027_v46, %v2803_v42  ;;  %v3509_v51 = vpop.f32.mrf.mxu0  ;;  %v2800_v46 = vadd.f32 %v13748_v58, %v13750_v49  ;;  %v13918_v58 = vld [vmem:[%s18390_s12] ss:$0 sm:$0xff] }
 0x7f4   : > { %v3247_v28 = vpop.f32.mrf.mxu2 }
 0x7f5   : > { %v3277_v18 = vadd.f32 %v3247_v28, %v3037_v8  ;;  %v3276_v28 = vadd.f32 %v13903_v39, %v3036_v12  ;;  %v18399_v8 = vld [vmem:[#allocation12_spill] sm:$0xff] }
 0x7f6   : > { %v3029_v25 = vpop.f32.mrf.mxu1 }
 0x7f7   : > { %v3044_v25 = vadd.f32 %v3024_v41, %v2800_v46  ;;  %v3517_v52 = vadd.f32 %v13891_v6, %v3277_v18  ;;  %v3033_v6 = vadd.f32 %v13849_v17, %v13705_v44  ;;  %v3515_v17 = vadd.f32 %v13881_v19, %v3275_v23  ;;  %v18393_v46 = vld [vmem:[#allocation15_spill] sm:$0xff]  ;;  %v18395_v19 = vld [vmem:[#allocation17_spill] sm:$0xff] }
 0x7f8   : > { %v3573_v18 = vld [vmem:[%s18391_s13 + $0x18] sm:$0xff] }
 0x7f9   : > { %v3273_v44 = vadd.f32 %v13893_v31, %v3033_v6  ;;  %v3031_v31 = vadd.f32 %v18393_v46, %v18392_v55  ;;  %v3680_v46 = vld [vmem:[%s18253_s15 + $0x18] sm:$0xff] }
 0x7fc   : > { %v3249_v48 = vpop.f32.mrf.mxu2 }
 0x804   : > { %v3252_v29 = vpop.f32.mrf.mxu2 }
 0x805   : > { %v3279_v5 = vadd.f32 %v3252_v29, %v3039_v2 }
 0x807   : > { %v13907_v10 = vadd.f32 %v3492_v33, %v3279_v5  ;;  %v3042_v33 = vadd.f32 %v3019_v22, %v2795_v54 }
 0x809   : > { %v13987_v39 = vadd.f32 %v13918_v58, %v13907_v10 }
 0x80c   : > { %v3254_v43 = vpop.f32.mrf.mxu2 }
 0x814   : > { %v3257_v34 = vpop.f32.mrf.mxu2 }
 0x815   : > { %v3281_v57 = vadd.f32 %v3257_v34, %v3041_v13  ;;  %v3040_v13 = vadd.f32 %v3014_v11, %v2790_v30  ;;  %v3585_v30 = vld [vmem:[%s18391_s13 + $0x78] sm:$0xff]  ;;  %v3278_v11 = vadd.f32 %v3249_v48, %v3038_v1  ;;  %v2775_v48 = vadd.f32 %v13707_v53, %v13709_v50  ;;  %v18398_v1 = vld [vmem:[#allocation13_spill] sm:$0xff] }
 0x816   : > { %3641 = vmatpush.msrb.mxu3 %v3585_v30  ;;  %3586 = vmatpush.msra.mxu0 %v3585_v30  ;;  %v3581_v53 = vld [vmem:[%s18391_s13 + $0x58] sm:$0xff] }
 0x817   : > { %v3521_v7 = vadd.f32 %v3497_v59, %v3281_v57  ;;  %v3280_v37 = vadd.f32 %v3254_v43, %v3040_v13  ;;  %v3034_v50 = vadd.f32 %v13853_v47, %v2775_v48  ;;  %v3580_v47 = vld [vmem:[%s18391_s13 + $0x50] sm:$0xff]  ;;  %v18397_v13 = vld [vmem:[#allocation16_spill] sm:$0xff] }
 0x818   : > { %v3572_v48 = vld [vmem:[%s18391_s13 + $0x10] sm:$0xff] }
 0x819   : > { %v3274_v43 = vadd.f32 %v13897_v3, %v3034_v50  ;;  %v14014_v3 = vadd.f32 %v13918_v58, %v3517_v52 }
 0x81b   : > { %v3612_v35 = vmul.f32 %v14014_v3, %v14014_v3 }
 0x81c   : > { %v3259_v45 = vpop.f32.mrf.mxu2 }
 0x81d   : > { %v3282_v34 = vadd.f32 %v3259_v45, %v3042_v33  ;;  %v3516_v45 = vadd.f32 %v13885_v63, %v3276_v28  ;;  %v3614_v63 = vmul.f32 %v13987_v39, %v13987_v39  ;;  %v3514_v33 = vadd.f32 %v18395_v19, %v3274_v43  ;;  %v3545_v28 = vld [vmem:[%s18254_s16] sm:$0xff]  ;;  %v3682_v19 = vld [vmem:[%s18253_s15 + $0x28] sm:$0xff] }
 0x81f   : > { %v3522_v49 = vadd.f32 %v3499_v21, %v3282_v34  ;;  %v3582_v21 = vld [vmem:[%s18391_s13 + $0x60] sm:$0xff]  ;;  %v3577_v34 = vld [vmem:[%s18391_s13 + $0x38] sm:$0xff] }
 0x824   : > { %v3262_v56 = vpop.f32.mrf.mxu2 }
 0x825   : > { %v3283_v29 = vadd.f32 %v3262_v56, %v3043_v26  ;;  %v3520_v26 = vadd.f32 %v3494_v62, %v3280_v37  ;;  %v13959_v62 = vadd.f32 %v13918_v58, %v3521_v7  ;;  %v14038_v37 = vadd.f32 %v13918_v58, %v3515_v17 }
 0x827   : > { %v3523_v59 = vadd.f32 %v3502_v40, %v3283_v29  ;;  %v3518_v40 = vadd.f32 %v13895_v24, %v3278_v11  ;;  %v3616_v24 = vmul.f32 %v13959_v62, %v13959_v62 }
 0x829   : > { %v13936_v15 = vadd.f32 %v13918_v58, %v3523_v59  ;;  %v14002_v56 = vadd.f32 %v13918_v58, %v3518_v40  ;;  %v3513_v59 = vadd.f32 %v18397_v13, %v3273_v44  ;;  %v3679_v44 = vld [vmem:[%s18253_s15 + $0x10] sm:$0xff]  ;;  %v3688_v13 = vld [vmem:[%s18253_s15 + $0x58] sm:$0xff] }
 0x82b   : > { %v3618_v36 = vmul.f32 %v13936_v15, %v13936_v15  ;;  %v3613_v29 = vmul.f32 %v14002_v56, %v14002_v56 }
 0x82c   : > { %v3264_v42 = vpop.f32.mrf.mxu2 }
 0x82d   : > { %v3284_v2 = vadd.f32 %v3264_v42, %v3044_v25  ;;  %v3578_v42 = vld [vmem:[%s18391_s13 + $0x40] sm:$0xff]  ;;  %v18394_v25 = vld [vmem:[#allocation19_spill] sm:$0xff] }
 0x82f   : > { %v3524_v57 = vadd.f32 %v3504_v32, %v3284_v2  ;;  %v13974_v32 = vadd.f32 %v13918_v58, %v3520_v26  ;;  %v3272_v2 = vadd.f32 %v18394_v25, %v3032_v14  ;;  %v14058_v26 = vadd.f32 %v13918_v58, %v3513_v59  ;;  %v3689_v59 = vld [vmem:[%s18253_s15 + $0x60] sm:$0xff] }
 0x831   : > { %v13926_v27 = vadd.f32 %v13918_v58, %v3524_v57  ;;  %v3615_v10 = vmul.f32 %v13974_v32, %v13974_v32  ;;  %v18396_v57 = vld [vmem:[#allocation18_spill] sm:$0xff]  ;;  %v3512_v30 = vadd.f32 %v18398_v1, %v3272_v2  ;;  %v3681_v2 = vld [vmem:[%s18253_s15 + $0x20] sm:$0xff] }
 0x832   : > { %v3691_v1 = vld [vmem:[%s18253_s15 + $0x70] sm:$0xff] }
 0x833   : > { %v3619_v41 = vmul.f32 %v13926_v27, %v13926_v27  ;;  %v14067_v12 = vadd.f32 %v13918_v58, %v3512_v30 }
 0x834   : > { %v3267_v5 = vpop.f32.mrf.mxu2 }
 0x835   : > { %v3285_v51 = vadd.f32 %v3267_v5, %v3045_v38  ;;  %v13949_v38 = vadd.f32 %v13918_v58, %v3522_v49  ;;  %v14027_v5 = vadd.f32 %v13918_v58, %v3516_v45  ;;  %v3576_v49 = vld [vmem:[%s18391_s13 + $0x30] sm:$0xff]  ;;  %v3607_v0 = vmul.f32 %v14067_v12, %v14067_v12 }
 0x837   : > { %v3525_v60 = vadd.f32 %v3507_v61, %v3285_v51  ;;  %v3617_v7 = vmul.f32 %v13949_v38, %v13949_v38  ;;  %v3271_v51 = vadd.f32 %v18396_v57, %v3031_v31  ;;  %v3686_v57 = vld [vmem:[%s18253_s15 + $0x48] sm:$0xff] }
 0x839   : > { %v13923_v54 = vadd.f32 %v13918_v58, %v3525_v60  ;;  %v3584_v60 = vld [vmem:[%s18391_s13 + $0x70] sm:$0xff]  ;;  %v3511_v11 = vadd.f32 %v18399_v8, %v3271_v51 }
 0x83a   : > { %3642 = vmatpush.msrb.mxu3 %v3584_v60  ;;  %3587 = vmatpush.msra.mxu0 %v3584_v60  ;;  %v14048_v60 = vadd.f32 %v13918_v58, %v3514_v33  ;;  %v3683_v33 = vld [vmem:[%s18253_s15 + $0x30] sm:$0xff] }
 0x83b   : > { %3551 = vmatpush.msra.mxu2 %v13923_v54  ;;  %v3620_v61 = vmul.f32 %v13923_v54, %v13923_v54  ;;  %v3687_v51 = vld [vmem:[%s18253_s15 + $0x50] sm:$0xff] }
 0x83c   : > { %v3269_v22 = vpop.f32.mrf.mxu2  ;;  %3643 = vmatpush.msrb.mxu3 %v3583_v9  ;;  %3588 = vmatpush.msra.mxu0 %v3583_v9  ;;  %v3609_v9 = vmul.f32 %v14048_v60, %v14048_v60 }
 0x83d   : > { %3552 = vmatpush.msra.mxu2 %v13926_v27  ;;  %3622 = vmatpush.msra.mxu1 %v3620_v61  ;;  %v3611_v61 = vmul.f32 %v14027_v5, %v14027_v5  ;;  %v3610_v22 = vmul.f32 %v14038_v37, %v14038_v37 }
 0x83e   : > { %3644 = vmatpush.msrb.mxu3 %v3582_v21  ;;  %3589 = vmatpush.msra.mxu0 %v3582_v21  ;;  %v14076_v21 = vadd.f32 %v13918_v58, %v3511_v11  ;;  %v3571_v58 = vld [vmem:[%s18391_s13 + $0x8] sm:$0xff] }
 0x83f   : > { %3553 = vmatpush.msra.mxu2 %v13936_v15  ;;  %3623 = vmatpush.msra.mxu1 %v3619_v41  ;;  %v3574_v41 = vld [vmem:[%s18391_s13 + $0x20] sm:$0xff] }
 0x840   : > { %3645 = vmatpush.msrb.mxu3 %v3581_v53  ;;  %3590 = vmatpush.msra.mxu0 %v3581_v53  ;;  %v3606_v40 = vmul.f32 %v14076_v21, %v14076_v21 }
 0x841   : > { %3554 = vmatpush.msra.mxu2 %v13949_v38  ;;  %3624 = vmatpush.msra.mxu1 %v3618_v36  ;;  %v3608_v36 = vmul.f32 %v14058_v26, %v14058_v26 }
 0x842   : > { %3646 = vmatpush.msrb.mxu3 %v3580_v47  ;;  %3591 = vmatpush.msra.mxu0 %v3580_v47 }
 0x843   : > { %3555 = vmatpush.msra.mxu2 %v13959_v62  ;;  %3625 = vmatpush.msra.mxu1 %v3617_v7  ;;  %v3570_v7 = vld [vmem:[%s18391_s13] sm:$0xff] }
 0x844   : > { %3647 = vmatpush.msrb.mxu3 %v3579_v4  ;;  %3592 = vmatpush.msra.mxu0 %v3579_v4  ;;  %v3678_v4 = vld [vmem:[%s18253_s15 + $0x8] sm:$0xff] }
 0x845   : > { %3556 = vmatpush.msra.mxu2 %v13974_v32  ;;  %3626 = vmatpush.msra.mxu1 %v3616_v24  ;;  %v3677_v24 = vld [vmem:[%s18253_s15] sm:$0xff] }
 0x846   : > { %3648 = vmatpush.msrb.mxu3 %v3578_v42  ;;  %3593 = vmatpush.msra.mxu0 %v3578_v42 }
 0x847   : > { %3557 = vmatpush.msra.mxu2 %v13987_v39  ;;  %3627 = vmatpush.msra.mxu1 %v3615_v10 }
 0x848   : > { %3649 = vmatpush.msrb.mxu3 %v3577_v34  ;;  %3594 = vmatpush.msra.mxu0 %v3577_v34  ;;  %v3685_v34 = vld [vmem:[%s18253_s15 + $0x40] sm:$0xff] }
 0x849   : > { %3558 = vmatpush.msra.mxu2 %v14002_v56  ;;  %3628 = vmatpush.msra.mxu1 %v3614_v63 }
 0x84a   : > { %3650 = vmatpush.msrb.mxu3 %v3576_v49  ;;  %3595 = vmatpush.msra.mxu0 %v3576_v49  ;;  %v3690_v49 = vld [vmem:[%s18253_s15 + $0x68] sm:$0xff] }
 0x84b   : > { %3559 = vmatpush.msra.mxu2 %v14014_v3  ;;  %3629 = vmatpush.msra.mxu1 %v3613_v29  ;;  %v3684_v29 = vld [vmem:[%s18253_s15 + $0x38] sm:$0xff] }
 0x84c   : > { %3651 = vmatpush.msrb.mxu3 %v3575_v20  ;;  %3596 = vmatpush.msra.mxu0 %v3575_v20 }
 0x84d   : > { %3560 = vmatpush.msra.mxu2 %v14027_v5  ;;  %3630 = vmatpush.msra.mxu1 %v3612_v35  ;;  %v3799_v35 = vld [vmem:[%s18252_s14] sm:$0xff] }
 0x84e   : > { %3652 = vmatpush.msrb.mxu3 %v3574_v41  ;;  %3597 = vmatpush.msra.mxu0 %v3574_v41 }
 0x84f   : > { %3561 = vmatpush.msra.mxu2 %v14038_v37  ;;  %3631 = vmatpush.msra.mxu1 %v3611_v61 }
 0x850   : > { %3653 = vmatpush.msrb.mxu3 %v3573_v18  ;;  %3598 = vmatpush.msra.mxu0 %v3573_v18 }
 0x851   : > { %3562 = vmatpush.msra.mxu2 %v14048_v60  ;;  %3632 = vmatpush.msra.mxu1 %v3610_v22 }
 0x852   : > { %3654 = vmatpush.msrb.mxu3 %v3572_v48  ;;  %3599 = vmatpush.msra.mxu0 %v3572_v48 }
 0x853   : > { %3563 = vmatpush.msra.mxu2 %v14058_v26  ;;  %3633 = vmatpush.msra.mxu1 %v3609_v9 }
 0x854   : > { %3655 = vmatpush.msrb.mxu3 %v3571_v58  ;;  %3600 = vmatpush.msra.mxu0 %v3571_v58 }
 0x855   : > { %3564 = vmatpush.msra.mxu2 %v14067_v12  ;;  %3634 = vmatpush.msra.mxu1 %v3608_v36 }
 0x856   : > { %3656 = vmatpush.msrb.mxu3 %v3570_v7  ;;  %3601 = vmatpush.msra.mxu0 %v3570_v7 }
 0x857   : > { %3565 = vmatpush.msra.mxu2 %v14076_v21  ;;  %3635 = vmatpush.msra.mxu1 %v3607_v0 }
 0x858   : > { %10910 = vmatmul.msk.f32.vlgmr.msra.gmra.mxu2 %vm3546_vm8, %v3545_v28  ;;  %3860 = vmatpush.msra.mxu3 %v3799_v35 }
 0x859   : > { %3636 = vmatpush.msra.mxu1 %v3606_v40  ;;  %4029 = vmatpush.msrb.mxu0 %v3799_v35  ;;  %v11022_v35 = vld [vmem:[%s18255_s17 + $0xa4] sm:$0xf] }
 0x85a   : > { %10911 = vmatmul.msk.f32.vlgmr.msra.gmra.mxu1 %vm3546_vm8, %v3545_v28 }
 0x8d7   : > { %v3638_v53 = vpop.f32.mrf.mxu1 }
 0x8d8   : > { %3657 = vmatmul.f32.vlgmr.msrb.gmra.mxu3 %v3638_v53 }
 0x8db   : > { %v3567_v50 = vpop.f32.mrf.mxu2 }
 0x8dc   : > { %3602 = vmatmul.f32.vlgmr.msra.gmra.mxu0 %v3567_v50 }
 0x959   : > { %v3603_v23 = vpop.f32.mrf.mxu0 }
 0x95a   : > { %v3661_v52 = vmul.f32 0.0044444446, %v3603_v23 }
 0x95b   : > { %v3658_v47 = vpop.f32.mrf.mxu3 }
 0x95c   : > { %v3663_v16 = vmul.f32 %v3661_v52, %v3661_v52  ;;  %v3662_v6 = vmul.f32 0.0044444446, %v3658_v47  ;;  %3752 = vmatpush.msrb.mxu1 %v3661_v52 }
 0x95d   : > { %10912 = vmatmul.msk.f32.vlgmr.msrb.gmra.mxu1 %vm1189_vm2, %v3677_v24 }
 0x95e   : > { %v3664_v43 = vsub.f32 %v3662_v6, %v3663_v16 }
 0x960   : > { %v3665_v45 = vmax.f32 %v3664_v43, 0.0  ;;  %v11002_v43 = vld [vmem:[%s18255_s17 + $0x118] sm:$0xf] }
 0x962   : > { %v3666_v10 = vadd.f32 1e-05, %v3665_v45  ;;  %v12233_v45 = vld [vmem:[%s18255_s17 + $0x128] sm:$0xf0] }
 0x964   : > { %12440 = vrsqrt.f32 %v3666_v10  ;;  %vm3673_vm10 = vweird.f32 %v3666_v10 }
 0x965   : > { %10913 = vmatmul.msk.f32.gmra.mxu1 %vm1189_vm2, %v3678_v4 }
 0x96a   : > { %v12441_v14 = vpop.eup %12440 }
 0x96b   : > { %v3668_v17 = vmul.f32 %v12441_v14, %v3666_v10  ;;  %vm3674_vm9 = vweird.f32 %v12441_v14  ;;  %v11034_v10 = vld [vmem:[%s18255_s17 + $0x11c] sm:$0xf] }
 0x96c   : > { %vm3675_vm11 = vmor %vm3673_vm10, %vm3674_vm9 }
 0x96d   : > { %v3669_v63 = vmul.f32 %v12441_v14, %v3668_v17  ;;  %10914 = vmatmul.msk.f32.gmra.mxu1 %vm1189_vm2, %v3679_v44 }
 0x96f   : > { %v3670_v42 = vmul.f32 0.5, %v3669_v63 }
 0x971   : > { %v3671_v55 = vsub.f32 1.5, %v3670_v42  ;;  %v10998_v42 = vld [vmem:[%s18255_s17 + $0xf0] sm:$0xf] }
 0x973   : > { %v3672_v31 = vmul.f32 %v12441_v14, %v3671_v55  ;;  %v12232_v55 = vld [vmem:[%s18255_s17 + $0x100] sm:$0xf0] }
 0x975   : > { %10915 = vmatmul.msk.f32.gmra.mxu1 %vm1189_vm2, %v3680_v46  ;;  %v3676_v25 = vsel %vm3675_vm11, %v12441_v14, %v3672_v31  ;;  %v12257_v14 = vld [vmem:[%s18255_s17 + $0x12c] sm:$0xf0]  ;;  %v10999_v31 = vor.u32 %v12232_v55, %v10998_v42 }
 0x976   : > { %3922 = vmatpush.msrb.mxu2 %v3676_v25  ;;  %v12256_v25 = vld [vmem:[%s18255_s17 + $0x104] sm:$0xf0] }
 0x977   : > { %10942 = vmatmul.msk.f32.vlgmr.msrb.gmra.mxu2 %vm1189_vm2, %v3677_v24 }
 0x97d   : > { %10916 = vmatmul.msk.f32.gmra.mxu1 %vm1189_vm2, %v3681_v2 }
 0x97f   : > { %10943 = vmatmul.msk.f32.gmra.mxu2 %vm1189_vm2, %v3678_v4  ;;  %v11003_v4 = vor.u32 %v12233_v45, %v11002_v43  ;;  %v12226_v43 = vld [vmem:[%s18255_s17 + $0x10] sm:$0xf0]  ;;  %v11006_v45 = vld [vmem:[%s18255_s17 + $0x4] sm:$0xf] }
 0x981   : > { %4193 = vmatpush.bf16.msra.mxu1 %v11003_v4  ;;  %v12250_v4 = vld [vmem:[%s18255_s17 + $0x14] sm:$0xf0] }
 0x985   : > { %10917 = vmatmul.msk.f32.gmra.mxu1 %vm1189_vm2, %v3682_v19 }
 0x986   : > { %4194 = vmatpush.bf16.msra.mxu1 %v10999_v31 }
 0x987   : > { %10944 = vmatmul.msk.f32.gmra.mxu2 %vm1189_vm2, %v3679_v44  ;;  %v11035_v44 = vor.u32 %v12257_v14, %v11034_v10  ;;  %v11007_v14 = vor.u32 %v12250_v4, %v11006_v45 }
 0x989   : > { %4345 = vmatpush.bf16.msrb.mxu3 %v11035_v44 }
 0x98d   : > { %10918 = vmatmul.msk.f32.gmra.mxu1 %vm1189_vm2, %v3683_v33 }
 0x98f   : > { %10945 = vmatmul.msk.f32.gmra.mxu2 %vm1189_vm2, %v3680_v46  ;;  %v11030_v46 = vld [vmem:[%s18255_s17 + $0xf4] sm:$0xf] }
 0x995   : > { %10919 = vmatmul.msk.f32.gmra.mxu1 %vm1189_vm2, %v3684_v29 }
 0x997   : > { %10946 = vmatmul.msk.f32.gmra.mxu2 %vm1189_vm2, %v3681_v2  ;;  %v11031_v2 = vor.u32 %v12256_v25, %v11030_v46 }
 0x999   : > { %4346 = vmatpush.bf16.msrb.mxu3 %v11031_v2 }
 0x99d   : > { %10920 = vmatmul.msk.f32.gmra.mxu1 %vm1189_vm2, %v3685_v34 }
 0x99f   : > { %10947 = vmatmul.msk.f32.gmra.mxu2 %vm1189_vm2, %v3682_v19  ;;  %v10994_v19 = vld [vmem:[%s18255_s17 + $0xc8] sm:$0xf] }
 0x9a5   : > { %10921 = vmatmul.msk.f32.gmra.mxu1 %vm1189_vm2, %v3686_v57 }
 0x9a7   : > { %10948 = vmatmul.msk.f32.gmra.mxu2 %vm1189_vm2, %v3683_v33  ;;  %v12231_v33 = vld [vmem:[%s18255_s17 + $0xd8] sm:$0xf0] }
 0x9ad   : > { %10922 = vmatmul.msk.f32.gmra.mxu1 %vm1189_vm2, %v3687_v51 }
 0x9af   : > { %10949 = vmatmul.msk.f32.gmra.mxu2 %vm1189_vm2, %v3684_v29  ;;  %v11026_v29 = vld [vmem:[%s18255_s17 + $0xcc] sm:$0xf] }
 0x9b5   : > { %10923 = vmatmul.msk.f32.gmra.mxu1 %vm1189_vm2, %v3688_v13 }
 0x9b7   : > { %10950 = vmatmul.msk.f32.gmra.mxu2 %vm1189_vm2, %v3685_v34  ;;  %v10995_v34 = vor.u32 %v12231_v33, %v10994_v19 }
 0x9b9   : > { %4195 = vmatpush.bf16.msra.mxu1 %v10995_v34 }
 0x9bd   : > { %10924 = vmatmul.msk.f32.gmra.mxu1 %vm1189_vm2, %v3689_v59 }
 0x9bf   : > { %10951 = vmatmul.msk.f32.gmra.mxu2 %vm1189_vm2, %v3686_v57  ;;  %v12255_v57 = vld [vmem:[%s18255_s17 + $0xdc] sm:$0xf0] }
 0x9c5   : > { %10925 = vmatmul.msk.f32.gmra.mxu1 %vm1189_vm2, %v3690_v49 }
 0x9c7   : > { %10952 = vmatmul.msk.f32.gmra.mxu2 %vm1189_vm2, %v3687_v51  ;;  %v10990_v51 = vld [vmem:[%s18255_s17 + $0xa0] sm:$0xf] }
 0x9cd   : > { %10926 = vmatmul.msk.f32.gmra.mxu1 %vm1189_vm2, %v3691_v1 }
 0x9cf   : > { %10953 = vmatmul.msk.f32.gmra.mxu2 %vm1189_vm2, %v3688_v13  ;;  %v12230_v13 = vld [vmem:[%s18255_s17 + $0xb0] sm:$0xf0] }
 0x9d7   : > { %10954 = vmatmul.msk.f32.gmra.mxu2 %vm1189_vm2, %v3689_v59  ;;  %v11027_v59 = vor.u32 %v12255_v57, %v11026_v29 }
 0x9d9   : > { %4347 = vmatpush.bf16.msrb.mxu3 %v11027_v59 }
 0x9da   : > { %v3754_v30 = vpop.f32.mrf.mxu1 }
 0x9db   : > { %10927 = vmatmul.msk.f32.vlgmr.msra.gmra.mxu3 %vm1189_vm2, %v3754_v30 }
 0x9df   : > { %10955 = vmatmul.msk.f32.gmra.mxu2 %vm1189_vm2, %v3690_v49  ;;  %v12254_v49 = vld [vmem:[%s18255_s17 + $0xb4] sm:$0xf0] }
 0x9e2   : > { %v3757_v61 = vpop.f32.mrf.mxu1 }
 0x9e3   : > { %10928 = vmatmul.msk.f32.gmra.mxu3 %vm1189_vm2, %v3757_v61  ;;  %v11023_v61 = vor.u32 %v12254_v49, %v11022_v35 }
 0x9e5   : > { %4348 = vmatpush.bf16.msrb.mxu3 %v11023_v61 }
 0x9e7   : > { %10956 = vmatmul.msk.f32.gmra.mxu2 %vm1189_vm2, %v3691_v1  ;;  %v10991_v1 = vor.u32 %v12230_v13, %v10990_v51 }
 0x9e9   : > { %4196 = vmatpush.bf16.msra.mxu1 %v10991_v1 }
 0x9ea   : > { %v3760_v20 = vpop.f32.mrf.mxu1 }
 0x9eb   : > { %10929 = vmatmul.msk.f32.gmra.mxu3 %vm1189_vm2, %v3760_v20  ;;  %v10986_v20 = vld [vmem:[%s18255_s17 + $0x78] sm:$0xf] }
 0x9f2   : > { %v3763_v8 = vpop.f32.mrf.mxu1 }
 0x9f3   : > { %10930 = vmatmul.msk.f32.gmra.mxu3 %vm1189_vm2, %v3763_v8  ;;  %v12229_v8 = vld [vmem:[%s18255_s17 + $0x88] sm:$0xf0] }
 0x9fa   : > { %v3766_v11 = vpop.f32.mrf.mxu1  ;;  %v3924_v22 = vpop.f32.mrf.mxu2 }
 0x9fb   : > { %10931 = vmatmul.msk.f32.gmra.mxu3 %vm1189_vm2, %v3766_v11  ;;  %10957 = vmatmul.msk.f32.vlgmr.msrb.gmra.mxu0 %vm1189_vm2, %v3924_v22  ;;  %v11018_v11 = vld [vmem:[%s18255_s17 + $0x7c] sm:$0xf]  ;;  %v10987_v22 = vor.u32 %v12229_v8, %v10986_v20 }
 0x9fd   : > { %4197 = vmatpush.bf16.msra.mxu1 %v10987_v22 }
 0xa02   : > { %v3769_v41 = vpop.f32.mrf.mxu1  ;;  %v3927_v9 = vpop.f32.mrf.mxu2 }
 0xa03   : > { %10932 = vmatmul.msk.f32.gmra.mxu3 %vm1189_vm2, %v3769_v41  ;;  %10958 = vmatmul.msk.f32.gmra.mxu0 %vm1189_vm2, %v3927_v9  ;;  %v12253_v41 = vld [vmem:[%s18255_s17 + $0x8c] sm:$0xf0] }
 0xa04   : > { %v11019_v9 = vor.u32 %v12253_v41, %v11018_v11 }
 0xa06   : > { %4349 = vmatpush.bf16.msrb.mxu3 %v11019_v9 }
 0xa0a   : > { %v3772_v18 = vpop.f32.mrf.mxu1  ;;  %v3930_v36 = vpop.f32.mrf.mxu2 }
 0xa0b   : > { %10933 = vmatmul.msk.f32.gmra.mxu3 %vm1189_vm2, %v3772_v18  ;;  %10959 = vmatmul.msk.f32.gmra.mxu0 %vm1189_vm2, %v3930_v36  ;;  %v10982_v36 = vld [vmem:[%s18255_s17 + $0x50] sm:$0xf] }
 0xa12   : > { %v3775_v48 = vpop.f32.mrf.mxu1  ;;  %v3933_v0 = vpop.f32.mrf.mxu2 }
 0xa13   : > { %10934 = vmatmul.msk.f32.gmra.mxu3 %vm1189_vm2, %v3775_v48  ;;  %10960 = vmatmul.msk.f32.gmra.mxu0 %vm1189_vm2, %v3933_v0  ;;  %v12228_v48 = vld [vmem:[%s18255_s17 + $0x60] sm:$0xf0]  ;;  %v11014_v0 = vld [vmem:[%s18255_s17 + $0x54] sm:$0xf] }
 0xa1a   : > { %v3778_v28 = vpop.f32.mrf.mxu1  ;;  %v3936_v58 = vpop.f32.mrf.mxu2 }
 0xa1b   : > { %10935 = vmatmul.msk.f32.gmra.mxu3 %vm1189_vm2, %v3778_v28  ;;  %10961 = vmatmul.msk.f32.gmra.mxu0 %vm1189_vm2, %v3936_v58  ;;  %v10983_v28 = vor.u32 %v12228_v48, %v10982_v36  ;;  %v12252_v58 = vld [vmem:[%s18255_s17 + $0x64] sm:$0xf0] }
 0xa1d   : > { %4198 = vmatpush.bf16.msra.mxu1 %v10983_v28 }
 0xa22   : > { %v3781_v40 = vpop.f32.mrf.mxu1  ;;  %v3939_v7 = vpop.f32.mrf.mxu2 }
 0xa23   : > { %10936 = vmatmul.msk.f32.gmra.mxu3 %vm1189_vm2, %v3781_v40  ;;  %10962 = vmatmul.msk.f32.gmra.mxu0 %vm1189_vm2, %v3939_v7  ;;  %v11015_v40 = vor.u32 %v12252_v58, %v11014_v0 }
 0xa25   : > { %4350 = vmatpush.bf16.msrb.mxu3 %v11015_v40 }
 0xa2a   : > { %v3784_v53 = vpop.f32.mrf.mxu1  ;;  %v3942_v50 = vpop.f32.mrf.mxu2 }
 0xa2b   : > { %10937 = vmatmul.msk.f32.gmra.mxu3 %vm1189_vm2, %v3784_v53  ;;  %10963 = vmatmul.msk.f32.gmra.mxu0 %vm1189_vm2, %v3942_v50  ;;  %v10978_v53 = vld [vmem:[%s18255_s17 + $0x28] sm:$0xf]  ;;  %v12227_v50 = vld [vmem:[%s18255_s17 + $0x38] sm:$0xf0] }
 0xa32   : > { %v3787_v23 = vpop.f32.mrf.mxu1  ;;  %v3945_v52 = vpop.f32.mrf.mxu2 }
 0xa33   : > { %10938 = vmatmul.msk.f32.gmra.mxu3 %vm1189_vm2, %v3787_v23  ;;  %10964 = vmatmul.msk.f32.gmra.mxu0 %vm1189_vm2, %v3945_v52  ;;  %v11010_v23 = vld [vmem:[%s18255_s17 + $0x2c] sm:$0xf]  ;;  %v10979_v52 = vor.u32 %v12227_v50, %v10978_v53 }
 0xa35   : > { %4199 = vmatpush.bf16.msra.mxu1 %v10979_v52 }
 0xa3a   : > { %v3790_v24 = vpop.f32.mrf.mxu1  ;;  %v3948_v47 = vpop.f32.mrf.mxu2 }
 0xa3b   : > { %10939 = vmatmul.msk.f32.gmra.mxu3 %vm1189_vm2, %v3790_v24  ;;  %10965 = vmatmul.msk.f32.gmra.mxu0 %vm1189_vm2, %v3948_v47  ;;  %v12251_v24 = vld [vmem:[%s18255_s17 + $0x3c] sm:$0xf0] }
 0xa3c   : > { %v11011_v47 = vor.u32 %v12251_v24, %v11010_v23 }
 0xa3e   : > { %4351 = vmatpush.bf16.msrb.mxu3 %v11011_v47 }
 0xa42   : > { %v3793_v16 = vpop.f32.mrf.mxu1  ;;  %v3951_v6 = vpop.f32.mrf.mxu2  ;;  %4352 = vmatpush.bf16.msrb.mxu3 %v11007_v14  ;;  %v11258_v14 = vld [vmem:[%s18255_s17 + $0x120] sm:$0xf] }
 0xa43   : > { %10940 = vmatmul.msk.f32.gmra.mxu3 %vm1189_vm2, %v3793_v16  ;;  %10966 = vmatmul.msk.f32.gmra.mxu0 %vm1189_vm2, %v3951_v6  ;;  %v10974_v6 = vld [vmem:[%s18255_s17] sm:$0xf] }
 0xa44   : > { %v10975_v10 = vor.u32 %v12226_v43, %v10974_v6 }
 0xa46   : > { %4200 = vmatpush.bf16.msra.mxu1 %v10975_v10 }
 0xa4a   : > { %v3796_v17 = vpop.f32.mrf.mxu1  ;;  %v3954_v63 = vpop.f32.mrf.mxu2 }
 0xa4b   : > { %10941 = vmatmul.msk.f32.gmra.mxu3 %vm1189_vm2, %v3796_v17  ;;  %10967 = vmatmul.msk.f32.gmra.mxu0 %vm1189_vm2, %v3954_v63 }
 0xa52   : > { %v3957_v30 = vpop.f32.mrf.mxu2 }
 0xa53   : > { %10968 = vmatmul.msk.f32.gmra.mxu0 %vm1189_vm2, %v3957_v30 }
 0xa5a   : > { %v3960_v18 = vpop.f32.mrf.mxu2 }
 0xa5b   : > { %10969 = vmatmul.msk.f32.gmra.mxu0 %vm1189_vm2, %v3960_v18 }
 0xa5e   : > { %v3862_v7 = vpop.f32.mrf.mxu3 }
 0xa5f   : > { %v4076_v46 = vsub.f32 %v14076_v21, %v3862_v7 }
 0xa62   : > { %v3963_v16 = vpop.f32.mrf.mxu2 }
 0xa63   : > { %10970 = vmatmul.msk.f32.gmra.mxu0 %vm1189_vm2, %v3963_v16 }
 0xa66   : > { %v3865_v44 = vpop.f32.mrf.mxu3 }
 0xa67   : > { %v4077_v31 = vsub.f32 %v14067_v12, %v3865_v44  ;;  %v12281_v44 = vld [vmem:[%s18255_s17 + $0x130] sm:$0xf0] }
 0xa6a   : > { %v3966_v17 = vpop.f32.mrf.mxu2 }
 0xa6b   : > { %10971 = vmatmul.msk.f32.gmra.mxu0 %vm1189_vm2, %v3966_v17 }
 0xa6e   : > { %v3868_v63 = vpop.f32.mrf.mxu3 }
 0xa6f   : > { %v4078_v59 = vsub.f32 %v14058_v26, %v3868_v63  ;;  %v11254_v63 = vld [vmem:[%s18255_s17 + $0xf8] sm:$0xf] }
 0xa76   : > { %v3871_v42 = vpop.f32.mrf.mxu3 }
 0xa77   : > { %v4079_v21 = vsub.f32 %v14048_v60, %v3871_v42  ;;  %v12280_v42 = vld [vmem:[%s18255_s17 + $0x108] sm:$0xf0] }
 0xa78   : > { %v4031_v55 = vpop.f32.mrf.mxu0 }
 0xa79   : > { %v4091_v25 = vmul.f32 %v4076_v46, %v4031_v55  ;;  %v11255_v55 = vor.u32 %v12280_v42, %v11254_v63 }
 0xa7b   : > { %v4106_v29 = vmax.f32 %v4091_v25, 0.0  ;;  %v12279_v25 = vld [vmem:[%s18255_s17 + $0xe0] sm:$0xf0] }
 0xa7e   : > { %v3874_v33 = vpop.f32.mrf.mxu3 }
 0xa7f   : > { %v4080_v11 = vsub.f32 %v14038_v37, %v3874_v33  ;;  %v12278_v33 = vld [vmem:[%s18255_s17 + $0xb8] sm:$0xf0] }
 0xa80   : > { %v4034_v2 = vpop.f32.mrf.mxu0 }
 0xa81   : > { %v4092_v19 = vmul.f32 %v4077_v31, %v4034_v2  ;;  %v11250_v31 = vld [vmem:[%s18255_s17 + $0xd0] sm:$0xf] }
 0xa82   : > { %v11251_v2 = vor.u32 %v12279_v25, %v11250_v31 }
 0xa83   : > { %v4107_v34 = vmax.f32 %v4092_v19, 0.0  ;;  %v11246_v19 = vld [vmem:[%s18255_s17 + $0xa8] sm:$0xf] }
 0xa85   : > { %v14304_v57 = vpack.c.bf16 %v4107_v34, %v4106_v29 }
 0xa86   : > { %v3877_v13 = vpop.f32.mrf.mxu3 }
 0xa87   : > { %4201 = vmatmul.bf16.vlgmr.msra.gmra.mxu1 %v14304_v57  ;;  %4353 = vmatmul.bf16.vlgmr.msrb.gmra.mxu3 %v14304_v57  ;;  %v4081_v22 = vsub.f32 %v14027_v5, %v3877_v13  ;;  %v11247_v13 = vor.u32 %v12278_v33, %v11246_v19  ;;  %v11402_v33 = vld [vmem:[%s18255_s17 + $0x124] sm:$0xf] }
 0xa88   : > { %v4037_v51 = vpop.f32.mrf.mxu0 }
 0xa89   : > { %v4093_v35 = vmul.f32 %v4078_v59, %v4037_v51 }
 0xa8b   : > { %v4108_v1 = vmax.f32 %v4093_v35, 0.0 }
 0xa8e   : > { %v3880_v20 = vpop.f32.mrf.mxu3 }
 0xa8f   : > { %v4082_v58 = vsub.f32 %v14014_v3, %v3880_v20  ;;  %v12276_v20 = vld [vmem:[%s18255_s17 + $0x68] sm:$0xf0] }
 0xa90   : > { %v4040_v12 = vpop.f32.mrf.mxu0 }
 0xa91   : > { %v4094_v49 = vmul.f32 %v4079_v21, %v4040_v12 }
 0xa93   : > { %v4109_v30 = vmax.f32 %v4094_v49, 0.0  ;;  %v11242_v49 = vld [vmem:[%s18255_s17 + $0x80] sm:$0xf] }
 0xa95   : > { %v14310_v61 = vpack.c.bf16 %v4109_v30, %v4108_v1  ;;  %v12277_v1 = vld [vmem:[%s18255_s17 + $0x90] sm:$0xf0]  ;;  %v11238_v30 = vld [vmem:[%s18255_s17 + $0x58] sm:$0xf] }
 0xa96   : > { %v3883_v41 = vpop.f32.mrf.mxu3 }
 0xa97   : > { %4206 = vmatmul.bf16.gmra.mxu1 %v14310_v61  ;;  %4358 = vmatmul.bf16.gmra.mxu3 %v14310_v61  ;;  %v4083_v37 = vsub.f32 %v14002_v56, %v3883_v41 }
 0xa98   : > { %v4043_v8 = vpop.f32.mrf.mxu0 }
 0xa99   : > { %v4095_v26 = vmul.f32 %v4080_v11, %v4043_v8  ;;  %v11239_v11 = vor.u32 %v12276_v20, %v11238_v30  ;;  %v11390_v30 = vld [vmem:[%s18255_s17 + $0xac] sm:$0xf]  ;;  %v12302_v20 = vld [vmem:[%s18255_s17 + $0xbc] sm:$0xf0] }
 0xa9b   : > { %v4110_v18 = vmax.f32 %v4095_v26, 0.0  ;;  %v12275_v26 = vld [vmem:[%s18255_s17 + $0x40] sm:$0xf0] }
 0xa9e   : > { %v3886_v28 = vpop.f32.mrf.mxu3 }
 0xa9f   : > { %v4084_v47 = vsub.f32 %v13987_v39, %v3886_v28 }
 0xaa0   : > { %v4046_v60 = vpop.f32.mrf.mxu0 }
 0xaa1   : > { %v4096_v9 = vmul.f32 %v4081_v22, %v4046_v60  ;;  %v11234_v22 = vld [vmem:[%s18255_s17 + $0x30] sm:$0xf] }
 0xaa3   : > { %v4111_v36 = vmax.f32 %v4096_v9, 0.0  ;;  %v11235_v9 = vor.u32 %v12275_v26, %v11234_v22  ;;  %v11386_v22 = vld [vmem:[%s18255_s17 + $0x84] sm:$0xf]  ;;  %v12301_v26 = vld [vmem:[%s18255_s17 + $0x94] sm:$0xf0] }
 0xaa5   : > { %v14316_v48 = vpack.c.bf16 %v4111_v36, %v4110_v18 }
 0xaa6   : > { %v3889_v23 = vpop.f32.mrf.mxu3 }
 0xaa7   : > { %4211 = vmatmul.bf16.gmra.mxu1 %v14316_v48  ;;  %4363 = vmatmul.bf16.gmra.mxu3 %v14316_v48  ;;  %v4085_v3 = vsub.f32 %v13974_v32, %v3889_v23  ;;  %v11259_v32 = vor.u32 %v12281_v44, %v11258_v14 }
 0xaa8   : > { %v4049_v0 = vpop.f32.mrf.mxu0 }
 0xaa9   : > { %v4097_v40 = vmul.f32 %v4082_v58, %v4049_v0  ;;  %4938 = vmatpush.bf16.msrb.mxu1 %v11259_v32  ;;  %v11230_v58 = vld [vmem:[%s18255_s17 + $0x8] sm:$0xf] }
 0xaab   : > { %v4112_v53 = vmax.f32 %v4097_v40, 0.0 }
 0xaad   : > { %4939 = vmatpush.bf16.msrb.mxu1 %v11255_v55 }
 0xaae   : > { %v3892_v16 = vpop.f32.mrf.mxu3 }
 0xaaf   : > { %v4086_v46 = vsub.f32 %v13959_v62, %v3892_v16 }
 0xab0   : > { %v4052_v5 = vpop.f32.mrf.mxu0 }
 0xab1   : > { %v4098_v7 = vmul.f32 %v4083_v37, %v4052_v5  ;;  %4940 = vmatpush.bf16.msrb.mxu1 %v11251_v2  ;;  %v12274_v37 = vld [vmem:[%s18255_s17 + $0x18] sm:$0xf0] }
 0xab3   : > { %v4113_v50 = vmax.f32 %v4098_v7, 0.0  ;;  %v11231_v7 = vor.u32 %v12274_v37, %v11230_v58  ;;  %v12299_v58 = vld [vmem:[%s18255_s17 + $0x44] sm:$0xf0] }
 0xab5   : > { %v14322_v52 = vpack.c.bf16 %v4113_v50, %v4112_v53  ;;  %4941 = vmatpush.bf16.msrb.mxu1 %v11247_v13  ;;  %v12304_v13 = vld [vmem:[%s18255_s17 + $0x10c] sm:$0xf0] }
 0xab6   : > { %v3895_v39 = vpop.f32.mrf.mxu3 }
 0xab7   : > { %4216 = vmatmul.bf16.gmra.mxu1 %v14322_v52  ;;  %4368 = vmatmul.bf16.gmra.mxu3 %v14322_v52  ;;  %v4087_v62 = vsub.f32 %v13949_v38, %v3895_v39  ;;  %v11243_v38 = vor.u32 %v12277_v1, %v11242_v49  ;;  %v12303_v49 = vld [vmem:[%s18255_s17 + $0xe4] sm:$0xf0] }
 0xab8   : > { %v4055_v24 = vpop.f32.mrf.mxu0 }
 0xab9   : > { %v4099_v6 = vmul.f32 %v4084_v47, %v4055_v24  ;;  %4942 = vmatpush.bf16.msrb.mxu1 %v11243_v38 }
 0xabb   : > { %v4114_v45 = vmax.f32 %v4099_v6, 0.0 }
 0xabd   : > { %4943 = vmatpush.bf16.msrb.mxu1 %v11239_v11 }
 0xabe   : > { %v3898_v59 = vpop.f32.mrf.mxu3 }
 0xabf   : > { %v4088_v60 = vsub.f32 %v13936_v15, %v3898_v59 }
 0xac0   : > { %v4058_v56 = vpop.f32.mrf.mxu0 }
 0xac1   : > { %v4100_v43 = vmul.f32 %v4085_v3, %v4058_v56  ;;  %4944 = vmatpush.bf16.msrb.mxu1 %v11235_v9  ;;  %v11382_v9 = vld [vmem:[%s18255_s17 + $0x5c] sm:$0xf] }
 0xac3   : > { %v4115_v10 = vmax.f32 %v4100_v43, 0.0 }
 0xac5   : > { %v14328_v4 = vpack.c.bf16 %v4115_v10, %v4114_v45  ;;  %4945 = vmatpush.bf16.msrb.mxu1 %v11231_v7  ;;  %v12298_v7 = vld [vmem:[%s18255_s17 + $0x1c] sm:$0xf0] }
 0xac6   : > { %v3901_v41 = vpop.f32.mrf.mxu3 }
 0xac7   : > { %4221 = vmatmul.bf16.gmra.mxu1 %v14328_v4  ;;  %4373 = vmatmul.bf16.gmra.mxu3 %v14328_v4  ;;  %v4089_v18 = vsub.f32 %v13926_v27, %v3901_v41  ;;  %v11387_v41 = vor.u32 %v12301_v26, %v11386_v22 }
 0xac8   : > { %v4061_v17 = vpop.f32.mrf.mxu0 }
 0xac9   : > { %v4101_v29 = vmul.f32 %v4086_v46, %v4061_v17 }
 0xacb   : > { %v4116_v21 = vmax.f32 %v4101_v29, 0.0 }
 0xace   : > { %v3904_v27 = vpop.f32.mrf.mxu3 }
 0xacf   : > { %v4090_v50 = vsub.f32 %v13923_v54, %v3904_v27 }
 0xad0   : > { %v4064_v34 = vpop.f32.mrf.mxu0 }
 0xad1   : > { %v4102_v51 = vmul.f32 %v4087_v62, %v4064_v34  ;;  %v12305_v62 = vld [vmem:[%s18255_s17 + $0x134] sm:$0xf0] }
 0xad2   : > { %v11403_v29 = vor.u32 %v12305_v62, %v11402_v33 }
 0xad3   : > { %v4117_v35 = vmax.f32 %v4102_v51, 0.0  ;;  %v11398_v51 = vld [vmem:[%s18255_s17 + $0xfc] sm:$0xf] }
 0xad4   : > { %5343 = vmatpush.bf16.msra.mxu1 %v11403_v29  ;;  %v11399_v59 = vor.u32 %v12304_v13, %v11398_v51 }
 0xad5   : > { %v14358_v12 = vpack.c.bf16 %v4117_v35, %v4116_v21  ;;  %v11394_v35 = vld [vmem:[%s18255_s17 + $0xd4] sm:$0xf] }
 0xad6   : > { %v11395_v1 = vor.u32 %v12303_v49, %v11394_v35 }
 0xad7   : > { %4226 = vmatmul.bf16.gmra.mxu1 %v14358_v12  ;;  %4378 = vmatmul.bf16.gmra.mxu3 %v14358_v12 }
 0xad8   : > { %v4067_v8 = vpop.f32.mrf.mxu0  ;;  %5344 = vmatpush.bf16.msra.mxu1 %v11399_v59 }
 0xad9   : > { %v4103_v36 = vmul.f32 %v4088_v60, %v4067_v8  ;;  %v11391_v8 = vor.u32 %v12302_v20, %v11390_v30 }
 0xadb   : > { %v4118_v40 = vmax.f32 %v4103_v36, 0.0 }
 0xadc   : > { %5345 = vmatpush.bf16.msra.mxu1 %v11395_v1 }
 0xae0   : > { %v4070_v0 = vpop.f32.mrf.mxu0  ;;  %5346 = vmatpush.bf16.msra.mxu1 %v11391_v8 }
 0xae1   : > { %v4104_v28 = vmul.f32 %v4089_v18, %v4070_v0  ;;  %v12300_v18 = vld [vmem:[%s18255_s17 + $0x6c] sm:$0xf0] }
 0xae2   : > { %v11383_v36 = vor.u32 %v12300_v18, %v11382_v9  ;;  %v12262_v18 = vld [vmem:[%s18256_s18 + $0xa0] sm:$0xff] }
 0xae3   : > { %v4119_v5 = vmax.f32 %v4104_v28, 0.0  ;;  %v11378_v28 = vld [vmem:[%s18255_s17 + $0x34] sm:$0xf] }
 0xae4   : > { %5347 = vmatpush.bf16.msra.mxu1 %v11387_v41  ;;  %v11379_v37 = vor.u32 %v12299_v58, %v11378_v28  ;;  %v12263_v58 = vld [vmem:[%s18256_s18 + $0xa8] sm:$0xff] }
 0xae5   : > { %v14388_v15 = vpack.c.bf16 %v4119_v5, %v4118_v40  ;;  %v11374_v5 = vld [vmem:[%s18255_s17 + $0xc] sm:$0xf] }
 0xae6   : > { %v11375_v27 = vor.u32 %v12298_v7, %v11374_v5 }
 0xae7   : > { %4231 = vmatmul.bf16.gmra.mxu1 %v14388_v15  ;;  %4383 = vmatmul.bf16.gmra.mxu3 %v14388_v15 }
 0xae8   : > { %v4073_v53 = vpop.f32.mrf.mxu0  ;;  %5348 = vmatpush.bf16.msra.mxu1 %v11383_v36 }
 0xae9   : > { %v4105_v23 = vmul.f32 %v4090_v50, %v4073_v53 }
 0xaeb   : > { %v4120_v24 = vmax.f32 %v4105_v23, 0.0 }
 0xaec   : > { %5349 = vmatpush.bf16.msra.mxu1 %v11379_v37 }
 0xaed   : > { %v14393_v47 = vpack.c.bf16 %v4120_v24, %v4120_v24 }
 0xaf0   : > { %5350 = vmatpush.bf16.msra.mxu1 %v11375_v27 }
 0xaf7   : > { %4236 = vmatmul.bf16.gmra.mxu1 %v14393_v47  ;;  %4388 = vmatmul.bf16.gmra.mxu3 %v14393_v47 }
 0xb04   : > { %v14397_v16 = vpop.f32.mrf.mxu1 }
 0xb07   : > { %4946 = vmatmul.bf16.vlgmr.msrb.gmra.mxu1 %v14304_v57 }
 0xb0a   : > { %v14400_v3 = vpop.f32.mrf.mxu3 }
 0xb0c   : > { %v14402_v6 = vpop.f32.mrf.mxu1 }
 0xb0d   : > { %v4241_v56 = vpack.c.bf16 %v14402_v6, %v14397_v16  ;;  %v12235_v6 = vld [vmem:[%s18256_s18 + $0x8] sm:$0xff] }
 0xb12   : > { %v14406_v54 = vpop.f32.mrf.mxu3 }
 0xb14   : > { %v14408_v43 = vpop.f32.mrf.mxu1 }
 0xb17   : > { %4951 = vmatmul.bf16.gmra.mxu1 %v14310_v61 }
 0xb1a   : > { %v14411_v45 = vpop.f32.mrf.mxu3 }
 0xb1c   : > { %v14413_v10 = vpop.f32.mrf.mxu1 }
 0xb1d   : > { %v4242_v14 = vpack.c.bf16 %v14413_v10, %v14408_v43  ;;  %v4393_v43 = vpack.c.bf16 %v14406_v54, %v14400_v3  ;;  %v12258_v10 = vld [vmem:[%s18256_s18 + $0x80] sm:$0xff]  ;;  %v12259_v3 = vld [vmem:[%s18256_s18 + $0x88] sm:$0xff] }
 0xb22   : > { %v14417_v44 = vpop.f32.mrf.mxu3 }
 0xb24   : > { %v14419_v32 = vpop.f32.mrf.mxu1 }
 0xb27   : > { %4956 = vmatmul.bf16.gmra.mxu1 %v14316_v48 }
 0xb2a   : > { %v14422_v39 = vpop.f32.mrf.mxu3 }
 0xb2c   : > { %v14424_v17 = vpop.f32.mrf.mxu1 }
 0xb2d   : > { %v4243_v63 = vpack.c.bf16 %v14424_v17, %v14419_v32  ;;  %v4394_v32 = vpack.c.bf16 %v14417_v44, %v14411_v45  ;;  %v12236_v44 = vld [vmem:[%s18256_s18 + $0x10] sm:$0xff] }
 0xb32   : > { %v14428_v42 = vpop.f32.mrf.mxu3 }
 0xb34   : > { %v14430_v55 = vpop.f32.mrf.mxu1 }
 0xb37   : > { %4961 = vmatmul.bf16.gmra.mxu1 %v14322_v52 }
 0xb3a   : > { %v14433_v46 = vpop.f32.mrf.mxu3 }
 0xb3c   : > { %v14435_v31 = vpop.f32.mrf.mxu1 }
 0xb3d   : > { %v4244_v25 = vpack.c.bf16 %v14435_v31, %v14430_v55  ;;  %v12234_v55 = vld [vmem:[%s18256_s18] sm:$0xff]  ;;  %v12237_v31 = vld [vmem:[%s18256_s18 + $0x18] sm:$0xff] }
 0xb42   : > { %v14439_v2 = vpop.f32.mrf.mxu3 }
 0xb44   : > { %v14441_v19 = vpop.f32.mrf.mxu1 }
 0xb47   : > { %4966 = vmatmul.bf16.gmra.mxu1 %v14328_v4 }
 0xb4a   : > { %v14450_v34 = vpop.f32.mrf.mxu3 }
 0xb4c   : > { %v4224_v21 = vpop.f32.mrf.mxu1 }
 0xb4d   : > { %v4245_v20 = vpack.c.bf16 %v4224_v21, %v14441_v19 }
 0xb52   : > { %v4376_v38 = vpop.f32.mrf.mxu3 }
 0xb53   : > { %v4397_v41 = vpack.c.bf16 %v4376_v38, %v14450_v34  ;;  %v4395_v34 = vpack.c.bf16 %v14428_v42, %v14422_v39 }
 0xb54   : > { %v4227_v11 = vpop.f32.mrf.mxu1 }
 0xb57   : > { %4971 = vmatmul.bf16.gmra.mxu1 %v14358_v12 }
 0xb5a   : > { %v4379_v60 = vpop.f32.mrf.mxu3 }
 0xb5c   : > { %v4229_v0 = vpop.f32.mrf.mxu1 }
 0xb5d   : > { %v4246_v1 = vpack.c.bf16 %v4229_v0, %v4227_v11  ;;  %v4396_v11 = vpack.c.bf16 %v14439_v2, %v14433_v46  ;;  %v12261_v2 = vld [vmem:[%s18256_s18 + $0x98] sm:$0xff]  ;;  %v12239_v0 = vld [vmem:[%s18256_s18 + $0x28] sm:$0xff] }
 0xb62   : > { %v4381_v40 = vpop.f32.mrf.mxu3 }
 0xb63   : > { %v4398_v22 = vpack.c.bf16 %v4381_v40, %v4379_v60  ;;  %v12238_v60 = vld [vmem:[%s18256_s18 + $0x20] sm:$0xff]  ;;  %v12240_v40 = vld [vmem:[%s18256_s18 + $0x30] sm:$0xff] }
 0xb64   : > { %v4232_v53 = vpop.f32.mrf.mxu1 }
 0xb67   : > { %4976 = vmatmul.bf16.gmra.mxu1 %v14388_v15 }
 0xb6a   : > { %v4384_v50 = vpop.f32.mrf.mxu3 }
 0xb6c   : > { %v4234_v23 = vpop.f32.mrf.mxu1 }
 0xb6d   : > { %v4247_v51 = vpack.c.bf16 %v4234_v23, %v4232_v53  ;;  %v12264_v53 = vld [vmem:[%s18256_s18 + $0xb0] sm:$0xff] }
 0xb72   : > { %v4386_v24 = vpop.f32.mrf.mxu3 }
 0xb73   : > { %v4399_v30 = vpack.c.bf16 %v4386_v24, %v4384_v50 }
 0xb74   : > { %v4237_v33 = vpop.f32.mrf.mxu1 }
 0xb75   : > { %v4248_v62 = vpack.c.bf16 %v4237_v33, %v4237_v33 }
 0xb77   : > { %v4783_v29 = vsel %vm1196_vm1, %v4248_v62, 0  ;;  %4981 = vmatmul.bf16.gmra.mxu1 %v14393_v47  ;;  %v12241_v62 = vld [vmem:[%s18256_s18 + $0x38] sm:$0xff] }
 0xb78   : > { %4785 = vmatpush.bf16.msra.mxu0 %v4783_v29 }
 0xb7a   : > { %v4389_v13 = vpop.f32.mrf.mxu3 }
 0xb7b   : > { %v4400_v59 = vpack.c.bf16 %v4389_v13, %v4389_v13 }
 0xb7c   : > { %v4239_v35 = vpop.f32.mrf.mxu1  ;;  %4786 = vmatpush.bf16.msra.mxu0 %v4247_v51  ;;  %v12265_v51 = vld [vmem:[%s18256_s18 + $0xb8] sm:$0xff] }
 0xb7d   : > { %v4563_v49 = vsel %vm1196_vm1, %v4400_v59, 0  ;;  %v12242_v59 = vld [vmem:[%s18256_s18 + $0x40] sm:$0xff] }
 0xb7e   : > { %4565 = vmatpush.bf16.msra.mxu2 %v4563_v49  ;;  %v12282_v35 = vld [vmem:[%s18256_s18 + $0x100] sm:$0xff] }
 0xb80   : > { %4787 = vmatpush.bf16.msra.mxu0 %v4246_v1 }
 0xb82   : > { %v4391_v8 = vpop.f32.mrf.mxu3  ;;  %4566 = vmatpush.bf16.msra.mxu2 %v4399_v30  ;;  %v12266_v30 = vld [vmem:[%s18256_s18 + $0xc0] sm:$0xff] }
 0xb84   : > { %4788 = vmatpush.bf16.msra.mxu0 %v4245_v20  ;;  %v14500_v26 = vpop.f32.mrf.mxu1 }
 0xb86   : > { %4567 = vmatpush.bf16.msra.mxu2 %v4398_v22 }
 0xb87   : > { %5351 = vmatmul.bf16.vlgmr.msra.gmra.mxu1 %v14304_v57 }
 0xb88   : > { %4789 = vmatpush.bf16.msra.mxu0 %v4244_v25 }
 0xb8a   : > { %4568 = vmatpush.bf16.msra.mxu2 %v4397_v41 }
 0xb8c   : > { %4790 = vmatpush.bf16.msra.mxu0 %v4243_v63  ;;  %v14512_v19 = vpop.f32.mrf.mxu1  ;;  %v12260_v63 = vld [vmem:[%s18256_s18 + $0x90] sm:$0xff] }
 0xb8d   : > { %v4986_v21 = vpack.c.bf16 %v14512_v19, %v14500_v26  ;;  %v12243_v26 = vld [vmem:[%s18256_s18 + $0x48] sm:$0xff] }
 0xb8e   : > { %4569 = vmatpush.bf16.msra.mxu2 %v4396_v11  ;;  %v12283_v11 = vld [vmem:[%s18256_s18 + $0x108] sm:$0xff] }
 0xb90   : > { %4791 = vmatpush.bf16.msra.mxu0 %v4242_v14 }
 0xb92   : > { %4570 = vmatpush.bf16.msra.mxu2 %v4395_v34 }
 0xb94   : > { %4792 = vmatpush.bf16.msra.mxu0 %v4241_v56  ;;  %v14529_v17 = vpop.f32.mrf.mxu1 }
 0xb96   : > { %4571 = vmatpush.bf16.msra.mxu2 %v4394_v32  ;;  %v12267_v32 = vld [vmem:[%s18256_s18 + $0xc8] sm:$0xff] }
 0xb97   : > { %11212 = vmatmul.msk.bf16.vlgmr.msra.gmra.mxu0 %vm3546_vm8, %v12234_v55  ;;  %5356 = vmatmul.bf16.gmra.mxu1 %v14310_v61 }
 0xb9a   : > { %4572 = vmatpush.bf16.msra.mxu2 %v4393_v43 }
 0xb9c   : > { %v14538_v45 = vpop.f32.mrf.mxu1 }
 0xb9d   : > { %v4987_v16 = vpack.c.bf16 %v14538_v45, %v14529_v17  ;;  %11132 = vmatmul.msk.bf16.vlgmr.msra.gmra.mxu2 %vm3546_vm8, %v12258_v10 }
 0xba4   : > { %v4957_v56 = vpop.f32.mrf.mxu1 }
 0xba7   : > { %11213 = vmatmul.msk.bf16.gmra.mxu0 %vm3546_vm8, %v12235_v6  ;;  %5361 = vmatmul.bf16.gmra.mxu1 %v14316_v48  ;;  %v12284_v6 = vld [vmem:[%s18256_s18 + $0x110] sm:$0xff] }
 0xbac   : > { %v4959_v54 = vpop.f32.mrf.mxu1 }
 0xbad   : > { %v4988_v14 = vpack.c.bf16 %v4959_v54, %v4957_v56  ;;  %11133 = vmatmul.msk.bf16.gmra.mxu2 %vm3546_vm8, %v12259_v3 }
 0xbb4   : > { %v4962_v39 = vpop.f32.mrf.mxu1 }
 0xbb7   : > { %11214 = vmatmul.msk.bf16.gmra.mxu0 %vm3546_vm8, %v12236_v44  ;;  %5366 = vmatmul.bf16.gmra.mxu1 %v14322_v52  ;;  %v12268_v44 = vld [vmem:[%s18256_s18 + $0xd0] sm:$0xff] }
 0xbbc   : > { %v4964_v42 = vpop.f32.mrf.mxu1 }
 0xbbd   : > { %v4989_v46 = vpack.c.bf16 %v4964_v42, %v4962_v39  ;;  %11134 = vmatmul.msk.bf16.gmra.mxu2 %vm3546_vm8, %v12260_v63 }
 0xbc4   : > { %v4967_v25 = vpop.f32.mrf.mxu1 }
 0xbc7   : > { %11215 = vmatmul.msk.bf16.gmra.mxu0 %vm3546_vm8, %v12237_v31  ;;  %5371 = vmatmul.bf16.gmra.mxu1 %v14328_v4  ;;  %v12245_v31 = vld [vmem:[%s18256_s18 + $0x58] sm:$0xff] }
 0xbcc   : > { %v4969_v38 = vpop.f32.mrf.mxu1 }
 0xbcd   : > { %11135 = vmatmul.msk.bf16.gmra.mxu2 %vm3546_vm8, %v12261_v2  ;;  %v4990_v33 = vpack.c.bf16 %v4969_v38, %v4967_v25  ;;  %v12285_v25 = vld [vmem:[%s18256_s18 + $0x118] sm:$0xff] }
 0xbd4   : > { %v4972_v9 = vpop.f32.mrf.mxu1 }
 0xbd7   : > { %11216 = vmatmul.msk.bf16.gmra.mxu0 %vm3546_vm8, %v12238_v60  ;;  %5376 = vmatmul.bf16.gmra.mxu1 %v14358_v12 }
 0xbdc   : > { %v4974_v36 = vpop.f32.mrf.mxu1 }
 0xbdd   : > { %11136 = vmatmul.msk.bf16.gmra.mxu2 %vm3546_vm8, %v12262_v18  ;;  %v4991_v24 = vpack.c.bf16 %v4974_v36, %v4972_v9  ;;  %v12269_v18 = vld [vmem:[%s18256_s18 + $0xd8] sm:$0xff] }
 0xbe4   : > { %v4977_v28 = vpop.f32.mrf.mxu1 }
 0xbe7   : > { %11217 = vmatmul.msk.bf16.gmra.mxu0 %vm3546_vm8, %v12239_v0  ;;  %5381 = vmatmul.bf16.gmra.mxu1 %v14388_v15 }
 0xbec   : > { %v4979_v37 = vpop.f32.mrf.mxu1 }
 0xbed   : > { %11137 = vmatmul.msk.bf16.gmra.mxu2 %vm3546_vm8, %v12263_v58  ;;  %v4992_v50 = vpack.c.bf16 %v4979_v37, %v4977_v28  ;;  %v12246_v37 = vld [vmem:[%s18256_s18 + $0x60] sm:$0xff] }
 0xbf4   : > { %v4982_v5 = vpop.f32.mrf.mxu1 }
 0xbf5   : > { %v4993_v7 = vpack.c.bf16 %v4982_v5, %v4982_v5 }
 0xbf7   : > { %v5156_v27 = vsel %vm1196_vm1, %v4993_v7, 0  ;;  %11218 = vmatmul.msk.bf16.gmra.mxu0 %vm3546_vm8, %v12240_v40  ;;  %5386 = vmatmul.bf16.gmra.mxu1 %v14393_v47  ;;  %v12286_v40 = vld [vmem:[%s18256_s18 + $0x120] sm:$0xff] }
 0xbf8   : > { %5158 = vmatpush.bf16.msra.mxu3 %v5156_v27  ;;  %v11546_v27 = vld [vmem:[%s18255_s17 + $0x128] sm:$0xf] }
 0xbfc   : > { %v4984_v23 = vpop.f32.mrf.mxu1  ;;  %5159 = vmatpush.bf16.msra.mxu3 %v4992_v50 }
 0xbfd   : > { %11138 = vmatmul.msk.bf16.gmra.mxu2 %vm3546_vm8, %v12264_v53  ;;  %v12329_v53 = vld [vmem:[%s18255_s17 + $0x138] sm:$0xf0] }
 0xbfe   : > { %v11547_v23 = vor.u32 %v12329_v53, %v11546_v27  ;;  %v11518_v53 = vld [vmem:[%s18255_s17 + $0x10] sm:$0xf] }
 0xc00   : > { %5160 = vmatpush.bf16.msra.mxu3 %v4991_v24  ;;  %5748 = vmatpush.bf16.msrb.mxu0 %v11547_v23  ;;  %v12248_v23 = vld [vmem:[%s18256_s18 + $0x70] sm:$0xff] }
 0xc04   : > { %5161 = vmatpush.bf16.msra.mxu3 %v4990_v33  ;;  %v14601_v29 = vpop.f32.mrf.mxu1  ;;  %v12270_v33 = vld [vmem:[%s18256_s18 + $0xe0] sm:$0xff] }
 0xc07   : > { %11219 = vmatmul.msk.bf16.gmra.mxu0 %vm3546_vm8, %v12241_v62  ;;  %v11542_v62 = vld [vmem:[%s18255_s17 + $0x100] sm:$0xf] }
 0xc08   : > { %5162 = vmatpush.bf16.msra.mxu3 %v4989_v46 }
 0xc0c   : > { %5163 = vmatpush.bf16.msra.mxu3 %v4988_v14  ;;  %v14607_v13 = vpop.f32.mrf.mxu1 }
 0xc0d   : > { %11139 = vmatmul.msk.bf16.gmra.mxu2 %vm3546_vm8, %v12265_v51  ;;  %v12328_v51 = vld [vmem:[%s18255_s17 + $0x110] sm:$0xf0] }
 0xc10   : > { %5164 = vmatpush.bf16.msra.mxu3 %v4987_v16  ;;  %v12244_v16 = vld [vmem:[%s18256_s18 + $0x50] sm:$0xff] }
 0xc14   : > { %v4794_v49 = vpop.f32.mrf.mxu0  ;;  %5165 = vmatpush.bf16.msra.mxu3 %v4986_v21  ;;  %v14622_v1 = vpop.f32.mrf.mxu1 }
 0xc17   : > { %11220 = vmatmul.msk.bf16.gmra.mxu0 %vm3546_vm8, %v12242_v59  ;;  %11356 = vmatmul.msk.bf16.vlgmr.msra.gmra.mxu3 %vm3546_vm8, %v12282_v35  ;;  %v11543_v59 = vor.u32 %v12328_v51, %v11542_v62 }
 0xc19   : > { %5749 = vmatpush.bf16.msrb.mxu0 %v11543_v59 }
 0xc1c   : > { %v4796_v20 = vpop.f32.mrf.mxu0  ;;  %v14629_v8 = vpop.f32.mrf.mxu1 }
 0xc1d   : > { %11140 = vmatmul.msk.bf16.gmra.mxu2 %vm3546_vm8, %v12266_v30  ;;  %v11538_v30 = vld [vmem:[%s18255_s17 + $0xd8] sm:$0xf] }
 0xc20   : > { %v4574_v22 = vpop.f32.mrf.mxu2 }
 0xc21   : > { %v14632_v41 = vadd.f32 %v4794_v49, %v4574_v22 }
 0xc24   : > { %v4799_v19 = vpop.f32.mrf.mxu0  ;;  %v14640_v21 = vpop.f32.mrf.mxu1 }
 0xc27   : > { %11221 = vmatmul.msk.bf16.gmra.mxu0 %vm3546_vm8, %v12243_v26  ;;  %11357 = vmatmul.msk.bf16.gmra.mxu3 %vm3546_vm8, %v12283_v11 }
 0xc28   : > { %v4576_v34 = vpop.f32.mrf.mxu2 }
 0xc29   : > { %v14644_v55 = vadd.f32 %v4796_v20, %v4576_v34  ;;  %v12327_v20 = vld [vmem:[%s18255_s17 + $0xe8] sm:$0xf0]  ;;  %v12326_v34 = vld [vmem:[%s18255_s17 + $0xc0] sm:$0xf0] }
 0xc2a   : > { %v11539_v22 = vor.u32 %v12327_v20, %v11538_v30 }
 0xc2c   : > { %v4801_v17 = vpop.f32.mrf.mxu0  ;;  %v14649_v43 = vpop.f32.mrf.mxu1  ;;  %5750 = vmatpush.bf16.msrb.mxu0 %v11539_v22 }
 0xc2d   : > { %11141 = vmatmul.msk.bf16.gmra.mxu2 %vm3546_vm8, %v12267_v32  ;;  %v12247_v32 = vld [vmem:[%s18256_s18 + $0x68] sm:$0xff] }
 0xc30   : > { %v4579_v10 = vpop.f32.mrf.mxu2 }
 0xc31   : > { %v14652_v45 = vadd.f32 %v4799_v19, %v4579_v10  ;;  %v11534_v19 = vld [vmem:[%s18255_s17 + $0xb0] sm:$0xf] }
 0xc32   : > { %v11535_v10 = vor.u32 %v12326_v34, %v11534_v19 }
 0xc34   : > { %v4804_v56 = vpop.f32.mrf.mxu0  ;;  %v14660_v3 = vpop.f32.mrf.mxu1  ;;  %5751 = vmatpush.bf16.msrb.mxu0 %v11535_v10 }
 0xc37   : > { %11222 = vmatmul.msk.bf16.gmra.mxu0 %vm3546_vm8, %v12244_v16  ;;  %11358 = vmatmul.msk.bf16.gmra.mxu3 %vm3546_vm8, %v12284_v6 }
 0xc38   : > { %v4581_v54 = vpop.f32.mrf.mxu2 }
 0xc39   : > { %v14664_v14 = vadd.f32 %v4801_v17, %v4581_v54  ;;  %v12287_v17 = vld [vmem:[%s18256_s18 + $0x128] sm:$0xff]  ;;  %v12325_v54 = vld [vmem:[%s18255_s17 + $0x98] sm:$0xf0] }
 0xc3c   : > { %v4806_v39 = vpop.f32.mrf.mxu0  ;;  %v14669_v63 = vpop.f32.mrf.mxu1 }
 0xc3d   : > { %11142 = vmatmul.msk.bf16.gmra.mxu2 %vm3546_vm8, %v12268_v44 }
 0xc40   : > { %v4584_v42 = vpop.f32.mrf.mxu2 }
 0xc41   : > { %v14672_v46 = vadd.f32 %v4804_v56, %v4584_v42  ;;  %v11530_v56 = vld [vmem:[%s18255_s17 + $0x88] sm:$0xf] }
 0xc42   : > { %v11531_v44 = vor.u32 %v12325_v54, %v11530_v56  ;;  %v12249_v54 = vld [vmem:[%s18256_s18 + $0x78] sm:$0xff] }
 0xc44   : > { %v4809_v2 = vpop.f32.mrf.mxu0  ;;  %v14680_v38 = vpop.f32.mrf.mxu1  ;;  %5752 = vmatpush.bf16.msrb.mxu0 %v11531_v44 }
 0xc47   : > { %11223 = vmatmul.msk.bf16.gmra.mxu0 %vm3546_vm8, %v12245_v31  ;;  %11359 = vmatmul.msk.bf16.gmra.mxu3 %vm3546_vm8, %v12285_v25  ;;  %v12271_v31 = vld [vmem:[%s18256_s18 + $0xe8] sm:$0xff]  ;;  %v11526_v25 = vld [vmem:[%s18255_s17 + $0x60] sm:$0xf] }
 0xc48   : > { %v4586_v60 = vpop.f32.mrf.mxu2 }
 0xc49   : > { %v14684_v9 = vadd.f32 %v4806_v39, %v4586_v60 }
 0xc4c   : > { %v4811_v36 = vpop.f32.mrf.mxu0  ;;  %v14689_v0 = vpop.f32.mrf.mxu1 }
 0xc4d   : > { %11143 = vmatmul.msk.bf16.gmra.mxu2 %vm3546_vm8, %v12269_v18  ;;  %v5395_v56 = vpack.c.bf16 %v14689_v0, %v14680_v38  ;;  %v12273_v0 = vld [vmem:[%s18256_s18 + $0xf8] sm:$0xff] }
 0xc50   : > { %v4589_v28 = vpop.f32.mrf.mxu2 }
 0xc51   : > { %v14692_v58 = vadd.f32 %v4809_v2, %v4589_v28  ;;  %v12324_v2 = vld [vmem:[%s18255_s17 + $0x70] sm:$0xf0]  ;;  %v11522_v28 = vld [vmem:[%s18255_s17 + $0x38] sm:$0xf] }
 0xc52   : > { %v11527_v60 = vor.u32 %v12324_v2, %v11526_v25  ;;  %v5391_v2 = vpack.c.bf16 %v14607_v13, %v14601_v29 }
 0xc54   : > { %v4814_v5 = vpop.f32.mrf.mxu0  ;;  %v14700_v7 = vpop.f32.mrf.mxu1  ;;  %5753 = vmatpush.bf16.msrb.mxu0 %v11527_v60  ;;  %v12290_v60 = vld [vmem:[%s18256_s18 + $0x140] sm:$0xff] }
 0xc57   : > { %11224 = vmatmul.msk.bf16.gmra.mxu0 %vm3546_vm8, %v12246_v37  ;;  %11360 = vmatmul.msk.bf16.gmra.mxu3 %vm3546_vm8, %v12286_v40  ;;  %v12323_v37 = vld [vmem:[%s18255_s17 + $0x48] sm:$0xf0] }
 0xc58   : > { %v4591_v50 = vpop.f32.mrf.mxu2  ;;  %v11523_v40 = vor.u32 %v12323_v37, %v11522_v28 }
 0xc59   : > { %v14710_v24 = vadd.f32 %v4811_v36, %v4591_v50  ;;  %v12322_v50 = vld [vmem:[%s18255_s17 + $0x20] sm:$0xf0] }
 0xc5a   : > { %5754 = vmatpush.bf16.msrb.mxu0 %v11523_v40  ;;  %v11519_v62 = vor.u32 %v12322_v50, %v11518_v53  ;;  %v12291_v40 = vld [vmem:[%s18256_s18 + $0x148] sm:$0xff] }
 0xc5b   : > { %v12307_v50 = vld [vmem:[%s18256_s18 + $0x188] sm:$0xff] }
 0xc5c   : > { %v4816_v35 = vpop.f32.mrf.mxu0  ;;  %v5379_v49 = vpop.f32.mrf.mxu1 }
 0xc5d   : > { %11144 = vmatmul.msk.bf16.gmra.mxu2 %vm3546_vm8, %v12270_v33  ;;  %v12288_v33 = vld [vmem:[%s18256_s18 + $0x130] sm:$0xff] }
 0xc5e   : > { %5755 = vmatpush.bf16.msrb.mxu0 %v11519_v62 }
 0xc60   : > { %v4594_v26 = vpop.f32.mrf.mxu2 }
 0xc61   : > { %v14728_v11 = vadd.f32 %v4814_v5, %v4594_v26  ;;  %v12272_v26 = vld [vmem:[%s18256_s18 + $0xf0] sm:$0xff] }
 0xc64   : > { %v4819_v16 = vpop.f32.mrf.mxu0  ;;  %v5382_v6 = vpop.f32.mrf.mxu1 }
 0xc67   : > { %11225 = vmatmul.msk.bf16.gmra.mxu0 %vm3546_vm8, %v12247_v32  ;;  %11361 = vmatmul.msk.bf16.gmra.mxu3 %vm3546_vm8, %v12287_v17  ;;  %v5396_v17 = vpack.c.bf16 %v5379_v49, %v14700_v7  ;;  %v5394_v7 = vpack.c.bf16 %v14669_v63, %v14660_v3  ;;  %v5392_v3 = vpack.c.bf16 %v14629_v8, %v14622_v1  ;;  %v12306_v1 = vld [vmem:[%s18256_s18 + $0x180] sm:$0xff] }
 0xc68   : > { %v4596_v39 = vpop.f32.mrf.mxu2 }
 0xc69   : > { %v14750_v42 = vadd.f32 %v4816_v35, %v4596_v39  ;;  %v5393_v39 = vpack.c.bf16 %v14649_v43, %v14640_v21 }
 0xc6c   : > { %v4821_v18 = vpop.f32.mrf.mxu0  ;;  %v5384_v36 = vpop.f32.mrf.mxu1 }
 0xc6d   : > { %11145 = vmatmul.msk.bf16.gmra.mxu2 %vm3546_vm8, %v12271_v31  ;;  %v5397_v19 = vpack.c.bf16 %v5384_v36, %v5382_v6  ;;  %v12289_v6 = vld [vmem:[%s18256_s18 + $0x138] sm:$0xff] }
 0xc70   : > { %v4599_v5 = vpop.f32.mrf.mxu2 }
 0xc71   : > { %v14768_v27 = vadd.f32 %v4819_v16, %v4599_v5 }
 0xc74   : > { %v4824_v51 = vpop.f32.mrf.mxu0  ;;  %v5387_v59 = vpop.f32.mrf.mxu1 }
 0xc75   : > { %v5398_v35 = vpack.c.bf16 %v5387_v59, %v5387_v59 }
 0xc77   : > { %v5561_v30 = vsel %vm1196_vm1, %v5398_v35, 0  ;;  %11226 = vmatmul.msk.bf16.gmra.mxu0 %vm3546_vm8, %v12248_v23  ;;  %11362 = vmatmul.msk.bf16.gmra.mxu3 %vm3546_vm8, %v12288_v33  ;;  %v12292_v35 = vld [vmem:[%s18256_s18 + $0x150] sm:$0xff] }
 0xc78   : > { %v4601_v20 = vpop.f32.mrf.mxu2  ;;  %5563 = vmatpush.bf16.msrb.mxu2 %v5561_v30 }
 0xc79   : > { %v14785_v22 = vadd.f32 %v4821_v18, %v4601_v20 }
 0xc7c   : > { %v4826_v34 = vpop.f32.mrf.mxu0  ;;  %v5389_v32 = vpop.f32.mrf.mxu1  ;;  %5564 = vmatpush.bf16.msrb.mxu2 %v5397_v19 }
 0xc7d   : > { %11146 = vmatmul.msk.bf16.gmra.mxu2 %vm3546_vm8, %v12272_v26  ;;  %v12308_v26 = vld [vmem:[%s18256_s18 + $0x190] sm:$0xff] }
 0xc80   : > { %v4604_v10 = vpop.f32.mrf.mxu2  ;;  %5565 = vmatpush.bf16.msrb.mxu2 %v5396_v17 }
 0xc81   : > { %v14792_v16 = vadd.f32 %v4824_v51, %v4604_v10 }
 0xc84   : > { %v4829_v44 = vpop.f32.mrf.mxu0  ;;  %5566 = vmatpush.bf16.msrb.mxu2 %v5395_v56  ;;  %v12293_v56 = vld [vmem:[%s18256_s18 + $0x158] sm:$0xff] }
 0xc87   : > { %11227 = vmatmul.msk.bf16.gmra.mxu0 %vm3546_vm8, %v12249_v54  ;;  %11363 = vmatmul.msk.bf16.gmra.mxu3 %vm3546_vm8, %v12289_v6 }
 0xc88   : > { %v4606_v49 = vpop.f32.mrf.mxu2  ;;  %5567 = vmatpush.bf16.msrb.mxu2 %v5394_v7 }
 0xc89   : > { %v14806_v38 = vadd.f32 %v4826_v34, %v4606_v49 }
 0xc8c   : > { %v4831_v31 = vpop.f32.mrf.mxu0  ;;  %5568 = vmatpush.bf16.msrb.mxu2 %v5393_v39 }
 0xc8d   : > { %11147 = vmatmul.msk.bf16.gmra.mxu2 %vm3546_vm8, %v12273_v0 }
 0xc90   : > { %v4609_v63 = vpop.f32.mrf.mxu2  ;;  %5569 = vmatpush.bf16.msrb.mxu2 %v5392_v3  ;;  %v12294_v3 = vld [vmem:[%s18256_s18 + $0x160] sm:$0xff] }
 0xc91   : > { %v14816_v25 = vadd.f32 %v4829_v44, %v4609_v63  ;;  %v12309_v44 = vld [vmem:[%s18256_s18 + $0x198] sm:$0xff] }
 0xc94   : > { %v4834_v18 = vpop.f32.mrf.mxu0  ;;  %5570 = vmatpush.bf16.msrb.mxu2 %v5391_v2 }
 0xc97   : > { %11364 = vmatmul.msk.bf16.gmra.mxu3 %vm3546_vm8, %v12290_v60  ;;  %5756 = vmatmul.bf16.vlgmr.msrb.gmra.mxu0 %v14304_v57  ;;  %v12310_v60 = vld [vmem:[%s18256_s18 + $0x1a0] sm:$0xff] }
 0xc98   : > { %v4611_v21 = vpop.f32.mrf.mxu2 }
 0xc99   : > { %v14825_v43 = vadd.f32 %v4831_v31, %v4611_v21  ;;  %v12295_v21 = vld [vmem:[%s18256_s18 + $0x168] sm:$0xff] }
 0xc9a   : > { %v5167_v8 = vpop.f32.mrf.mxu3 }
 0xc9b   : > { %v14831_v29 = vadd.f32 %v5167_v8, %v14632_v41  ;;  %v12311_v8 = vld [vmem:[%s18256_s18 + $0x1a8] sm:$0xff] }
 0xc9c   : > { %v4836_v13 = vpop.f32.mrf.mxu0 }
 0xc9d   : > { %11500 = vmatmul.msk.bf16.vlgmr.msrb.gmra.mxu2 %vm3546_vm8, %v12306_v1 }
 0xca0   : > { %v4614_v36 = vpop.f32.mrf.mxu2 }
 0xca1   : > { %v14834_v28 = vadd.f32 %v4834_v18, %v4614_v36 }
 0xca2   : > { %v5169_v37 = vpop.f32.mrf.mxu3 }
 0xca3   : > { %18400 = vst [vmem:[#allocation14_spill] sm:$0xff] %v14834_v28  ;;  %v14837_v57 = vadd.f32 %v5169_v37, %v14644_v55  ;;  %v12296_v37 = vld [vmem:[%s18256_s18 + $0x170] sm:$0xff] }
 0xca4   : > { %v4839_v5 = vpop.f32.mrf.mxu0 }
 0xca7   : > { %11365 = vmatmul.msk.bf16.gmra.mxu3 %vm3546_vm8, %v12291_v40  ;;  %5761 = vmatmul.bf16.gmra.mxu0 %v14310_v61 }
 0xca8   : > { %v4616_v41 = vpop.f32.mrf.mxu2 }
 0xca9   : > { %v14844_v53 = vadd.f32 %v4836_v13, %v4616_v41 }
 0xcaa   : > { %v5172_v23 = vpop.f32.mrf.mxu3 }
 0xcab   : > { %18401 = vst [vmem:[#allocation15_spill] sm:$0xff] %v14844_v53  ;;  %v14850_v55 = vadd.f32 %v5172_v23, %v14652_v45  ;;  %v12297_v23 = vld [vmem:[%s18256_s18 + $0x178] sm:$0xff] }
 0xcac   : > { %v4841_v33 = vpop.f32.mrf.mxu0 }
 0xcad   : > { %11501 = vmatmul.msk.bf16.gmra.mxu2 %vm3546_vm8, %v12307_v50 }
 0xcb0   : > { %v4619_v62 = vpop.f32.mrf.mxu2 }
 0xcb1   : > { %v14853_v51 = vadd.f32 %v4839_v5, %v4619_v62  ;;  %v12312_v5 = vld [vmem:[%s18256_s18 + $0x1b0] sm:$0xff]  ;;  %v12313_v62 = vld [vmem:[%s18256_s18 + $0x1b8] sm:$0xff] }
 0xcb2   : > { %v5174_v59 = vpop.f32.mrf.mxu3 }
 0xcb3   : > { %18402 = vst [vmem:[#allocation19_spill] sm:$0xff] %v14853_v51  ;;  %v14856_v61 = vadd.f32 %v5174_v59, %v14664_v14 }
 0xcb4   : > { %v4844_v30 = vpop.f32.mrf.mxu0 }
 0xcb7   : > { %11366 = vmatmul.msk.bf16.gmra.mxu3 %vm3546_vm8, %v12292_v35  ;;  %5766 = vmatmul.bf16.gmra.mxu0 %v14316_v48 }
 0xcb8   : > { %v4621_v45 = vpop.f32.mrf.mxu2 }
 0xcb9   : > { %v14863_v20 = vadd.f32 %v4841_v33, %v4621_v45 }
 0xcba   : > { %v5177_v19 = vpop.f32.mrf.mxu3 }
 0xcbb   : > { %18403 = vst [vmem:[#allocation17_spill] sm:$0xff] %v14863_v20  ;;  %v14869_v14 = vadd.f32 %v5177_v19, %v14672_v46 }
 0xcbc   : > { %v4846_v34 = vpop.f32.mrf.mxu0 }
 0xcbd   : > { %11502 = vmatmul.msk.bf16.gmra.mxu2 %vm3546_vm8, %v12308_v26 }
 0xcc0   : > { %v4624_v32 = vpop.f32.mrf.mxu2 }
 0xcc1   : > { %v14872_v17 = vadd.f32 %v4844_v30, %v4624_v32 }
 0xcc2   : > { %v5179_v10 = vpop.f32.mrf.mxu3 }
 0xcc3   : > { %18404 = vst [vmem:[#allocation18_spill] sm:$0xff] %v14872_v17  ;;  %v14875_v48 = vadd.f32 %v5179_v10, %v14684_v9 }
 0xcc4   : > { %v4849_v54 = vpop.f32.mrf.mxu0 }
 0xcc7   : > { %11367 = vmatmul.msk.bf16.gmra.mxu3 %vm3546_vm8, %v12293_v56  ;;  %5771 = vmatmul.bf16.gmra.mxu0 %v14322_v52 }
 0xcc8   : > { %v4626_v46 = vpop.f32.mrf.mxu2 }
 0xcc9   : > { %v14882_v6 = vadd.f32 %v4846_v34, %v4626_v46 }
 0xcca   : > { %v5182_v7 = vpop.f32.mrf.mxu3 }
 0xccb   : > { %18405 = vst [vmem:[#allocation16_spill] sm:$0xff] %v14882_v6  ;;  %v14888_v9 = vadd.f32 %v5182_v7, %v14692_v58 }
 0xccc   : > { %v4851_v49 = vpop.f32.mrf.mxu0 }
 0xccd   : > { %11503 = vmatmul.msk.bf16.gmra.mxu2 %vm3546_vm8, %v12309_v44 }
 0xcd0   : > { %v4629_v0 = vpop.f32.mrf.mxu2 }
 0xcd1   : > { %v14891_v39 = vadd.f32 %v4849_v54, %v4629_v0  ;;  %v12315_v54 = vld [vmem:[%s18256_s18 + $0x1c8] sm:$0xff] }
 0xcd2   : > { %v5184_v31 = vpop.f32.mrf.mxu3 }
 0xcd3   : > { %18406 = vst [vmem:[#allocation13_spill] sm:$0xff] %v14891_v39  ;;  %v14894_v52 = vadd.f32 %v5184_v31, %v14710_v24 }
 0xcd4   : > { %v14899_v63 = vpop.f32.mrf.mxu0 }
 0xcd5   : > { %18407 = vst [vmem:[#allocation12_spill] sm:$0xff] %v14899_v63 }
 0xcd7   : > { %11368 = vmatmul.msk.bf16.gmra.mxu3 %vm3546_vm8, %v12294_v3  ;;  %5776 = vmatmul.bf16.gmra.mxu0 %v14328_v4 }
 0xcd8   : > { %v4631_v58 = vpop.f32.mrf.mxu2 }
 0xcd9   : > { %v14903_v2 = vadd.f32 %v4851_v49, %v4631_v58 }
 0xcdb   : > { %18408 = vst [vmem:[#allocation20_spill] sm:$0xff] %v14903_v2 }
 0xcdc   : > { %v14908_v18 = vpop.f32.mrf.mxu0 }
 0xcdd   : > { %18409 = vst [vmem:[#allocation21_spill] sm:$0xff] %v14908_v18  ;;  %11504 = vmatmul.msk.bf16.gmra.mxu2 %vm3546_vm8, %v12310_v60 }
 0xce0   : > { %v14911_v24 = vpop.f32.mrf.mxu2 }
 0xce1   : > { %18410 = vst [vmem:[#allocation22_spill] sm:$0xff] %v14911_v24 }
 0xce4   : > { %v14916_v1 = vpop.f32.mrf.mxu0 }
 0xce7   : > { %11369 = vmatmul.msk.bf16.gmra.mxu3 %vm3546_vm8, %v12295_v21  ;;  %5781 = vmatmul.bf16.gmra.mxu0 %v14358_v12 }
 0xce8   : > { %v14920_v4 = vpop.f32.mrf.mxu2 }
 0xce9   : > { %18411 = vst [vmem:[#allocation23_spill] sm:$0xff] %v14920_v4 }
 0xcec   : > { %v14925_v13 = vpop.f32.mrf.mxu0 }
 0xced   : > { %11505 = vmatmul.msk.bf16.gmra.mxu2 %vm3546_vm8, %v12311_v8 }
 0xcf0   : > { %v14928_v36 = vpop.f32.mrf.mxu2 }
 0xcf4   : > { %v14933_v40 = vpop.f32.mrf.mxu0 }
 0xcf7   : > { %11370 = vmatmul.msk.bf16.gmra.mxu3 %vm3546_vm8, %v12296_v37  ;;  %5786 = vmatmul.bf16.gmra.mxu0 %v14388_v15 }
 0xcf8   : > { %v14937_v12 = vpop.f32.mrf.mxu2 }
 0xcfc   : > { %v14942_v41 = vpop.f32.mrf.mxu0 }
 0xcfd   : > { %11506 = vmatmul.msk.bf16.gmra.mxu2 %vm3546_vm8, %v12312_v5 }
 0xd00   : > { %v14945_v50 = vpop.f32.mrf.mxu2 }
 0xd04   : > { %v14950_v33 = vpop.f32.mrf.mxu0 }
 0xd07   : > { %11371 = vmatmul.msk.bf16.gmra.mxu3 %vm3546_vm8, %v12297_v23  ;;  %5791 = vmatmul.bf16.gmra.mxu0 %v14393_v47  ;;  %v12314_v47 = vld [vmem:[%s18256_s18 + $0x1c0] sm:$0xff] }
 0xd08   : > { %v14954_v15 = vpop.f32.mrf.mxu2 }
 0xd0c   : > { %v14959_v59 = vpop.f32.mrf.mxu0 }
 0xd0d   : > { %11507 = vmatmul.msk.bf16.gmra.mxu2 %vm3546_vm8, %v12313_v62 }
 0xd10   : > { %v14962_v35 = vpop.f32.mrf.mxu2 }
 0xd14   : > { %v14964_v30 = vpop.f32.mrf.mxu0 }
 0xd18   : > { %v14966_v45 = vpop.f32.mrf.mxu2 }
 0xd1c   : > { %v14971_v26 = vpop.f32.mrf.mxu0 }
 0xd1d   : > { %11508 = vmatmul.msk.bf16.gmra.mxu2 %vm3546_vm8, %v12314_v47 }
 0xd20   : > { %v5572_v19 = vpop.f32.mrf.mxu2 }
 0xd21   : > { %v14975_v34 = vadd.f32 %v5572_v19, %v14831_v29 }
 0xd24   : > { %v5762_v32 = vpop.f32.mrf.mxu0 }
 0xd28   : > { %v5574_v10 = vpop.f32.mrf.mxu2 }
 0xd29   : > { %v14978_v56 = vadd.f32 %v5574_v10, %v14837_v57  ;;  %v12316_v57 = vld [vmem:[%s18256_s18 + $0x1d0] sm:$0xff]  ;;  %v12319_v10 = vld [vmem:[%s18256_s18 + $0x1e8] sm:$0xff] }
 0xd2c   : > { %v5764_v46 = vpop.f32.mrf.mxu0 }
 0xd2d   : > { %11509 = vmatmul.msk.bf16.gmra.mxu2 %vm3546_vm8, %v12315_v54 }
 0xd30   : > { %v5577_v44 = vpop.f32.mrf.mxu2 }
 0xd31   : > { %v14985_v7 = vadd.f32 %v5577_v44, %v14850_v55 }
 0xd34   : > { %v5767_v49 = vpop.f32.mrf.mxu0 }
 0xd38   : > { %v5579_v0 = vpop.f32.mrf.mxu2 }
 0xd39   : > { %v14988_v29 = vadd.f32 %v5579_v0, %v14856_v61  ;;  %v12317_v61 = vld [vmem:[%s18256_s18 + $0x1d8] sm:$0xff] }
 0xd3c   : > { %v5769_v31 = vpop.f32.mrf.mxu0 }
 0xd3d   : > { %11510 = vmatmul.msk.bf16.gmra.mxu2 %vm3546_vm8, %v12316_v57 }
 0xd40   : > { %v5582_v3 = vpop.f32.mrf.mxu2 }
 0xd41   : > { %v14995_v58 = vadd.f32 %v5582_v3, %v14869_v14 }
 0xd44   : > { %v5772_v60 = vpop.f32.mrf.mxu0 }
 0xd48   : > { %v5584_v21 = vpop.f32.mrf.mxu2 }
 0xd49   : > { %v14998_v55 = vadd.f32 %v5584_v21, %v14875_v48  ;;  %v12318_v48 = vld [vmem:[%s18256_s18 + $0x1e0] sm:$0xff]  ;;  %v12321_v21 = vld [vmem:[%s18256_s18 + $0x1f8] sm:$0xff] }
 0xd4c   : > { %v5774_v8 = vpop.f32.mrf.mxu0 }
 0xd4d   : > { %11511 = vmatmul.msk.bf16.gmra.mxu2 %vm3546_vm8, %v12317_v61 }
 0xd50   : > { %v5587_v37 = vpop.f32.mrf.mxu2 }
 0xd51   : > { %v15005_v5 = vadd.f32 %v5587_v37, %v14888_v9 }
 0xd54   : > { %v5777_v23 = vpop.f32.mrf.mxu0 }
 0xd58   : > { %v5589_v62 = vpop.f32.mrf.mxu2 }
 0xd59   : > { %v15008_v14 = vadd.f32 %v5589_v62, %v14894_v52  ;;  %v12320_v52 = vld [vmem:[%s18256_s18 + $0x1f0] sm:$0xff] }
 0xd5c   : > { %v5779_v47 = vpop.f32.mrf.mxu0 }
 0xd5d   : > { %11512 = vmatmul.msk.bf16.gmra.mxu2 %vm3546_vm8, %v12318_v48  ;;  %v5800_v48 = vpack.c.bf16 %v5779_v47, %v5777_v23  ;;  %v12331_v23 = vld [vmem:[%s18256_s18 + $0x208] sm:$0xff] }
 0xd64   : > { %v5782_v19 = vpop.f32.mrf.mxu0 }
 0xd6c   : > { %v5784_v54 = vpop.f32.mrf.mxu0 }
 0xd6d   : > { %11513 = vmatmul.msk.bf16.gmra.mxu2 %vm3546_vm8, %v12319_v10  ;;  %v5801_v62 = vpack.c.bf16 %v5784_v54, %v5782_v19  ;;  %v5799_v10 = vpack.c.bf16 %v5774_v8, %v5772_v60  ;;  %v12338_v60 = vld [vmem:[%s18256_s18 + $0x240] sm:$0xff] }
 0xd74   : > { %v5787_v9 = vpop.f32.mrf.mxu0 }
 0xd7c   : > { %v5789_v44 = vpop.f32.mrf.mxu0 }
 0xd7d   : > { %11514 = vmatmul.msk.bf16.gmra.mxu2 %vm3546_vm8, %v12320_v52  ;;  %v5802_v61 = vpack.c.bf16 %v5789_v44, %v5787_v9  ;;  %v5798_v52 = vpack.c.bf16 %v5769_v31, %v5767_v49  ;;  %v12330_v9 = vld [vmem:[%s18256_s18 + $0x200] sm:$0xff]  ;;  %v12336_v49 = vld [vmem:[%s18256_s18 + $0x230] sm:$0xff]  ;;  %v12337_v31 = vld [vmem:[%s18256_s18 + $0x238] sm:$0xff]  ;;  %v15071_v44 = vpop.f32.mrf.mxu3 }
 0xd84   : > { %v5792_v0 = vpop.f32.mrf.mxu0 }
 0xd85   : > { %v5803_v57 = vpack.c.bf16 %v5792_v0, %v5792_v0  ;;  %v5797_v0 = vpack.c.bf16 %v5764_v46, %v5762_v32  ;;  %v12332_v32 = vld [vmem:[%s18256_s18 + $0x210] sm:$0xff]  ;;  %v12335_v46 = vld [vmem:[%s18256_s18 + $0x228] sm:$0xff] }
 0xd87   : > { %v5966_v3 = vsel %vm1196_vm1, %v5803_v57, 0  ;;  %v5796_v57 = vpack.c.bf16 %v14971_v26, %v14964_v30  ;;  %v12333_v30 = vld [vmem:[%s18256_s18 + $0x218] sm:$0xff]  ;;  %v12334_v26 = vld [vmem:[%s18256_s18 + $0x220] sm:$0xff] }
 0xd88   : > { %5968 = vmatpush.bf16.msrb.mxu1 %v5966_v3  ;;  %v15073_v3 = vpop.f32.mrf.mxu2 }
 0xd8c   : > { %v5794_v37 = vpop.f32.mrf.mxu0  ;;  %5969 = vmatpush.bf16.msrb.mxu1 %v5802_v61 }
 0xd8d   : > { %11515 = vmatmul.msk.bf16.gmra.mxu2 %vm3546_vm8, %v12321_v21  ;;  %v12339_v21 = vld [vmem:[%s18256_s18 + $0x248] sm:$0xff] }
 0xd90   : > { %5970 = vmatpush.bf16.msrb.mxu1 %v5801_v62  ;;  %v15084_v62 = vpop.f32.mrf.mxu2 }
 0xd94   : > { %5971 = vmatpush.bf16.msrb.mxu1 %v5800_v48 }
 0xd98   : > { %5972 = vmatpush.bf16.msrb.mxu1 %v5799_v10  ;;  %v12340_v10 = vld [vmem:[%s18256_s18 + $0x250] sm:$0xff] }
 0xd9c   : > { %5973 = vmatpush.bf16.msrb.mxu1 %v5798_v52 }
 0xda0   : > { %5974 = vmatpush.bf16.msrb.mxu1 %v5797_v0 }
 0xda4   : > { %5975 = vmatpush.bf16.msrb.mxu1 %v5796_v57 }
 0xda7   : > { %11644 = vmatmul.msk.bf16.vlgmr.msrb.gmra.mxu1 %vm3546_vm8, %v12330_v9 }
 0xdb7   : > { %11645 = vmatmul.msk.bf16.gmra.mxu1 %vm3546_vm8, %v12331_v23 }
 0xdc7   : > { %11646 = vmatmul.msk.bf16.gmra.mxu1 %vm3546_vm8, %v12332_v32 }
 0xdd7   : > { %11647 = vmatmul.msk.bf16.gmra.mxu1 %vm3546_vm8, %v12333_v30  ;;  %v12341_v30 = vld [vmem:[%s18256_s18 + $0x258] sm:$0xff] }
 0xde7   : > { %11648 = vmatmul.msk.bf16.gmra.mxu1 %vm3546_vm8, %v12334_v26 }
 0xdf7   : > { %11649 = vmatmul.msk.bf16.gmra.mxu1 %vm3546_vm8, %v12335_v46 }
 0xe07   : > { %11650 = vmatmul.msk.bf16.gmra.mxu1 %vm3546_vm8, %v12336_v49 }
 0xe17   : > { %11651 = vmatmul.msk.bf16.gmra.mxu1 %vm3546_vm8, %v12337_v31 }
 0xe24   : > { %v5977_v8 = vpop.f32.mrf.mxu1 }
 0xe25   : > { %v15065_v47 = vadd.f32 %v5977_v8, %v14975_v34  ;;  %v15082_v34 = vpop.f32.mrf.mxu3  ;;  %v12342_v8 = vld [vmem:[%s18256_s18 + $0x260] sm:$0xff] }
 0xe27   : > { %11652 = vmatmul.msk.bf16.gmra.mxu1 %vm3546_vm8, %v12338_v60 }
 0xe2c   : > { %v5979_v19 = vpop.f32.mrf.mxu1 }
 0xe2d   : > { %v15069_v54 = vadd.f32 %v5979_v19, %v14978_v56  ;;  %v5192_v52 = vpop.f32.mrf.mxu3 }
 0xe34   : > { %v5982_v61 = vpop.f32.mrf.mxu1 }
 0xe35   : > { %v15079_v37 = vadd.f32 %v5982_v61, %v14985_v7  ;;  %v15095_v7 = vpop.f32.mrf.mxu2  ;;  %v5194_v32 = vpop.f32.mrf.mxu3 }
 0xe37   : > { %11653 = vmatmul.msk.bf16.gmra.mxu1 %vm3546_vm8, %v12339_v21 }
 0xe3c   : > { %v5984_v56 = vpop.f32.mrf.mxu1 }
 0xe3d   : > { %v15087_v48 = vadd.f32 %v5984_v56, %v14988_v29  ;;  %v5599_v29 = vpop.f32.mrf.mxu2 }
 0xe44   : > { %v5987_v0 = vpop.f32.mrf.mxu1 }
 0xe45   : > { %v15093_v57 = vadd.f32 %v5987_v0, %v14995_v58  ;;  %v5197_v58 = vpop.f32.mrf.mxu3  ;;  %v5602_v49 = vpop.f32.mrf.mxu2 }
 0xe47   : > { %11654 = vmatmul.msk.bf16.gmra.mxu1 %vm3546_vm8, %v12340_v10  ;;  %v12343_v10 = vld [vmem:[%s18256_s18 + $0x268] sm:$0xff] }
 0xe4c   : > { %v5989_v9 = vpop.f32.mrf.mxu1 }
 0xe4d   : > { %v15099_v23 = vadd.f32 %v5989_v9, %v14998_v55  ;;  %v5199_v55 = vpop.f32.mrf.mxu3  ;;  %v5604_v19 = vpop.f32.mrf.mxu2 }
 0xe54   : > { %v5992_v26 = vpop.f32.mrf.mxu1 }
 0xe55   : > { %v15105_v46 = vadd.f32 %v5992_v26, %v15005_v5  ;;  %v5202_v5 = vpop.f32.mrf.mxu3  ;;  %v5607_v56 = vpop.f32.mrf.mxu2 }
 0xe56   : > { %v5261_v6 = vadd.f32 %v5202_v5, %v14816_v25  ;;  %v15149_v25 = vld [vmem:[%s18257_s19] ss:$0 sm:$0xff] }
 0xe57   : > { %11655 = vmatmul.msk.bf16.gmra.mxu1 %vm3546_vm8, %v12341_v30 }
 0xe58   : > { %v5666_v39 = vadd.f32 %v5607_v56, %v5261_v6 }
 0xe5c   : > { %v5994_v31 = vpop.f32.mrf.mxu1 }
 0xe5d   : > { %v15109_v60 = vadd.f32 %v5994_v31, %v15008_v14  ;;  %v5204_v14 = vpop.f32.mrf.mxu3  ;;  %v5609_v9 = vpop.f32.mrf.mxu2 }
 0xe64   : > { %v15114_v21 = vpop.f32.mrf.mxu1 }
 0xe65   : > { %v15121_v26 = vpop.f32.mrf.mxu3  ;;  %v15123_v31 = vpop.f32.mrf.mxu2 }
 0xe66   : > { %18412 = vst [vmem:[#allocation24_spill] sm:$0xff] %v15121_v26 }
 0xe67   : > { %11656 = vmatmul.msk.bf16.gmra.mxu1 %vm3546_vm8, %v12342_v8  ;;  %18413 = vst [vmem:[#allocation25_spill] sm:$0xff] %v15123_v31  ;;  %v12344_v8 = vld [vmem:[%s18256_s18 + $0x270] sm:$0xff] }
 0xe6c   : > { %v5999_v61 = vpop.f32.mrf.mxu1 }
 0xe6d   : > { %v15129_v53 = vpop.f32.mrf.mxu3  ;;  %v15131_v51 = vpop.f32.mrf.mxu2 }
 0xe6e   : > { %18414 = vst [vmem:[#allocation26_spill] sm:$0xff] %v15129_v53  ;;  %v5262_v53 = vadd.f32 %v5204_v14, %v14825_v43 }
 0xe6f   : > { %18415 = vst [vmem:[#allocation27_spill] sm:$0xff] %v15131_v51  ;;  %v5259_v51 = vadd.f32 %v5197_v58, %v14792_v16 }
 0xe70   : > { %v5667_v63 = vadd.f32 %v5609_v9, %v5262_v53 }
 0xe71   : > { %v5664_v4 = vadd.f32 %v5602_v49, %v5259_v51 }
 0xe74   : > { %v6002_v0 = vpop.f32.mrf.mxu1 }
 0xe75   : > { %v15136_v17 = vpop.f32.mrf.mxu3  ;;  %v15138_v31 = vpop.f32.mrf.mxu2 }
 0xe76   : > { %18416 = vst [vmem:[#allocation28_spill] sm:$0xff] %v15136_v17  ;;  %v5258_v17 = vadd.f32 %v5194_v32, %v14785_v22  ;;  %v5256_v22 = vadd.f32 %v15082_v34, %v14750_v42 }
 0xe77   : > { %11657 = vmatmul.msk.bf16.gmra.mxu1 %vm3546_vm8, %v12343_v10  ;;  %v12345_v10 = vld [vmem:[%s18256_s18 + $0x278] sm:$0xff] }
 0xe78   : > { %v5663_v6 = vadd.f32 %v5599_v29, %v5258_v17  ;;  %v5255_v17 = vadd.f32 %v15071_v44, %v14728_v11 }
 0xe7c   : > { %v6004_v30 = vpop.f32.mrf.mxu1 }
 0xe7d   : > { %v15152_v43 = vpop.f32.mrf.mxu3  ;;  %v15162_v51 = vpop.f32.mrf.mxu2 }
 0xe84   : > { %v6007_v28 = vpop.f32.mrf.mxu1 }
 0xe85   : > { %v6069_v16 = vadd.f32 %v6007_v28, %v5664_v4  ;;  %v5660_v4 = vadd.f32 %v15073_v3, %v5255_v17  ;;  %v15196_v32 = vpop.f32.mrf.mxu3  ;;  %v15204_v49 = vpop.f32.mrf.mxu2 }
 0xe87   : > { %11658 = vmatmul.msk.bf16.gmra.mxu1 %vm3546_vm8, %v12344_v8  ;;  %v5260_v8 = vadd.f32 %v5199_v55, %v14806_v38  ;;  %v5257_v38 = vadd.f32 %v5192_v52, %v14768_v27  ;;  %v15175_v42 = vadd.f32 %v15149_v25, %v6069_v16  ;;  %v6065_v44 = vadd.f32 %v15114_v21, %v5660_v4 }
 0xe89   : > { %v5665_v2 = vadd.f32 %v5604_v19, %v5260_v8  ;;  %18420 = vst [vmem:[#allocation32_spill] sm:$0xff] %v15175_v42  ;;  %v6215_v3 = vmul.f32 %v15175_v42, %v15175_v42  ;;  %v15207_v55 = vadd.f32 %v15149_v25, %v6065_v44 }
 0xe8b   : > { %18425 = vst [vmem:[#allocation37_spill] sm:$0xff] %v15207_v55  ;;  %v6211_v14 = vmul.f32 %v15207_v55, %v15207_v55 }
 0xe8c   : > { %v6009_v20 = vpop.f32.mrf.mxu1 }
 0xe8d   : > { %v6070_v5 = vadd.f32 %v6009_v20, %v5665_v2  ;;  %v5662_v20 = vadd.f32 %v15095_v7, %v5257_v38  ;;  %v5661_v2 = vadd.f32 %v15084_v62, %v5256_v22 }
 0xe8f   : > { %v15166_v27 = vadd.f32 %v15149_v25, %v6070_v5  ;;  %v6066_v52 = vadd.f32 %v5999_v61, %v5661_v2  ;;  %v15216_v61 = vadd.f32 %v15149_v25, %v15109_v60  ;;  %v15230_v60 = vadd.f32 %v15149_v25, %v15099_v23  ;;  %v15244_v23 = vpop.f32.mrf.mxu2 }
 0xe90   : > { %v15250_v5 = vadd.f32 %v15149_v25, %v15087_v48  ;;  %v15264_v48 = vadd.f32 %v15149_v25, %v15069_v54 }
 0xe91   : > { %18419 = vst [vmem:[#allocation31_spill] sm:$0xff] %v15166_v27  ;;  %v6216_v11 = vmul.f32 %v15166_v27, %v15166_v27  ;;  %v15199_v29 = vadd.f32 %v15149_v25, %v6066_v52  ;;  %v6210_v9 = vmul.f32 %v15216_v61, %v15216_v61 }
 0xe92   : > { %18427 = vst [vmem:[#allocation39_spill] sm:$0xff] %v15216_v61 }
 0xe93   : > { %18424 = vst [vmem:[#allocation36_spill] sm:$0xff] %v15199_v29  ;;  %v6212_v56 = vmul.f32 %v15199_v29, %v15199_v29 }
 0xe94   : > { %v6012_v26 = vpop.f32.mrf.mxu1  ;;  %18429 = vst [vmem:[#allocation41_spill] sm:$0xff] %v15230_v60 }
 0xe95   : > { %v6071_v24 = vadd.f32 %v6012_v26, %v5666_v39  ;;  %18432 = vst [vmem:[#allocation44_spill] sm:$0xff] %v15250_v5 }
 0xe96   : > { %18434 = vst [vmem:[#allocation46_spill] sm:$0xff] %v15264_v48 }
 0xe97   : > { %11659 = vmatmul.msk.bf16.gmra.mxu1 %vm3546_vm8, %v12345_v10  ;;  %v15155_v53 = vadd.f32 %v15149_v25, %v6071_v24 }
 0xe99   : > { %18417 = vst [vmem:[#allocation29_spill] sm:$0xff] %v15155_v53  ;;  %v6217_v24 = vmul.f32 %v15155_v53, %v15155_v53 }
 0xe9c   : > { %v6014_v18 = vpop.f32.mrf.mxu1 }
 0xe9d   : > { %v6072_v10 = vadd.f32 %v6014_v18, %v5667_v63  ;;  %v6068_v63 = vadd.f32 %v6004_v30, %v5663_v6  ;;  %v6067_v18 = vadd.f32 %v6002_v0, %v5662_v20  ;;  %v15223_v0 = vadd.f32 %v15149_v25, %v15105_v46  ;;  %v15235_v30 = vpop.f32.mrf.mxu3 }
 0xe9e   : > { %v15239_v46 = vadd.f32 %v15149_v25, %v15093_v57  ;;  %v6208_v57 = vmul.f32 %v15230_v60, %v15230_v60  ;;  %v6206_v6 = vmul.f32 %v15250_v5, %v15250_v5  ;;  %v6204_v20 = vmul.f32 %v15264_v48, %v15264_v48 }
 0xe9f   : > { %v15158_v39 = vadd.f32 %v15149_v25, %v6072_v10  ;;  %v15184_v7 = vadd.f32 %v15149_v25, %v6068_v63  ;;  %v15191_v62 = vadd.f32 %v15149_v25, %v6067_v18  ;;  %18428 = vst [vmem:[#allocation40_spill] sm:$0xff] %v15223_v0  ;;  %v6209_v26 = vmul.f32 %v15223_v0, %v15223_v0  ;;  %v15283_v63 = vpop.f32.mrf.mxu2 }
 0xea0   : > { %18430 = vst [vmem:[#allocation42_spill] sm:$0xff] %v15239_v46  ;;  %v15257_v10 = vadd.f32 %v15149_v25, %v15079_v37  ;;  %v6207_v38 = vmul.f32 %v15239_v46, %v15239_v46  ;;  %v15271_v37 = vadd.f32 %v15149_v25, %v15065_v47 }
 0xea1   : > { %18418 = vst [vmem:[#allocation30_spill] sm:$0xff] %v15158_v39  ;;  %6127 = vmatpush.msrb.mxu3 %v15158_v39  ;;  %v6218_v28 = vmul.f32 %v15158_v39, %v15158_v39  ;;  %v6214_v58 = vmul.f32 %v15184_v7, %v15184_v7  ;;  %v6213_v19 = vmul.f32 %v15191_v62, %v15191_v62 }
 0xea2   : > { %18422 = vst [vmem:[#allocation34_spill] sm:$0xff] %v15184_v7  ;;  %v6205_v16 = vmul.f32 %v15257_v10, %v15257_v10  ;;  %v6203_v47 = vmul.f32 %v15271_v37, %v15271_v37 }
 0xea3   : > { %6128 = vmatpush.msrb.mxu3 %v15155_v53  ;;  %6235 = vmatpush.msra.mxu0 %v6218_v28  ;;  %18423 = vst [vmem:[#allocation35_spill] sm:$0xff] %v15191_v62 }
 0xea4   : > { %v15181_v34 = vpop.f32.mrf.mxu1  ;;  %18433 = vst [vmem:[#allocation45_spill] sm:$0xff] %v15257_v10 }
 0xea5   : > { %18421 = vst [vmem:[#allocation33_spill] sm:$0xff] %v15181_v34  ;;  %6129 = vmatpush.msrb.mxu3 %v15166_v27  ;;  %6236 = vmatpush.msra.mxu0 %v6217_v24  ;;  %v15276_v22 = vpop.f32.mrf.mxu3 }
 0xea6   : > { %18435 = vst [vmem:[#allocation47_spill] sm:$0xff] %v15271_v37 }
 0xea7   : > { %6130 = vmatpush.msrb.mxu3 %v15175_v42  ;;  %6237 = vmatpush.msra.mxu0 %v6216_v11  ;;  %v15292_v2 = vpop.f32.mrf.mxu2 }
 0xea9   : > { %6131 = vmatpush.msrb.mxu3 %v15184_v7  ;;  %6238 = vmatpush.msra.mxu0 %v6215_v3 }
 0xeab   : > { %6132 = vmatpush.msrb.mxu3 %v15191_v62  ;;  %6239 = vmatpush.msra.mxu0 %v6214_v58 }
 0xeac   : > { %v15212_v21 = vpop.f32.mrf.mxu1 }
 0xead   : > { %18426 = vst [vmem:[#allocation38_spill] sm:$0xff] %v15212_v21  ;;  %6133 = vmatpush.msrb.mxu3 %v15199_v29  ;;  %6240 = vmatpush.msra.mxu0 %v6213_v19  ;;  %v15290_v17 = vpop.f32.mrf.mxu3  ;;  %v4870_v29 = vadd.f32 %v14950_v33, %v14962_v35 }
 0xeaf   : > { %6134 = vmatpush.msrb.mxu3 %v15207_v55  ;;  %6241 = vmatpush.msra.mxu0 %v6212_v56  ;;  %v15298_v4 = vpop.f32.mrf.mxu2  ;;  %v4872_v55 = vadd.f32 %v14959_v59, %v14966_v45  ;;  %v4862_v59 = vadd.f32 %v14925_v13, %v14937_v12  ;;  %v15331_v13 = vld [vmem:[%s18258_s20 + $0x78] sm:$0xff] }
 0xeb1   : > { %6135 = vmatpush.msrb.mxu3 %v15216_v61  ;;  %6242 = vmatpush.msra.mxu0 %v6211_v14  ;;  %v6125_v61 = vld [vmem:[%s18261_s23] sm:$0xff] }
 0xeb3   : > { %6136 = vmatpush.msrb.mxu3 %v15223_v0  ;;  %6243 = vmatpush.msra.mxu0 %v6210_v9 }
 0xeb4   : > { %v15246_v8 = vpop.f32.mrf.mxu1 }
 0xeb5   : > { %18431 = vst [vmem:[#allocation43_spill] sm:$0xff] %v15246_v8  ;;  %6137 = vmatpush.msrb.mxu3 %v15230_v60  ;;  %6244 = vmatpush.msra.mxu0 %v6209_v26  ;;  %v15296_v24 = vpop.f32.mrf.mxu3  ;;  %v4867_v60 = vadd.f32 %v14942_v41, %v14954_v15 }
 0xeb7   : > { %6138 = vmatpush.msrb.mxu3 %v15239_v46  ;;  %6245 = vmatpush.msra.mxu0 %v6208_v57  ;;  %v5634_v44 = vpop.f32.mrf.mxu2 }
 0xeb9   : > { %6139 = vmatpush.msrb.mxu3 %v15250_v5  ;;  %6246 = vmatpush.msra.mxu0 %v6207_v38 }
 0xebb   : > { %6140 = vmatpush.msrb.mxu3 %v15257_v10  ;;  %6247 = vmatpush.msra.mxu0 %v6206_v6  ;;  %v4865_v10 = vadd.f32 %v14933_v40, %v14945_v50  ;;  %v18437_v40 = vld [vmem:[#allocation23_spill] sm:$0xff]  ;;  %v18438_v50 = vld [vmem:[#allocation21_spill] sm:$0xff] }
 0xebc   : > { %v15278_v54 = vpop.f32.mrf.mxu1 }
 0xebd   : > { %6141 = vmatpush.msrb.mxu3 %v15264_v48  ;;  %6248 = vmatpush.msra.mxu0 %v6205_v16  ;;  %v5229_v11 = vpop.f32.mrf.mxu3 }
 0xebf   : > { %6142 = vmatpush.msrb.mxu3 %v15271_v37  ;;  %6249 = vmatpush.msra.mxu0 %v6204_v20  ;;  %v5637_v56 = vpop.f32.mrf.mxu2 }
 0xec0   : > { %6143 = vmatmul.f32.vlgmr.msrb.gmra.mxu3 %v6125_v61 }
 0xec1   : > { %6250 = vmatpush.msra.mxu0 %v6203_v47 }
 0xec2   : > { %6251 = vmatmul.f32.vlgmr.msra.gmra.mxu0 %v6125_v61  ;;  %v4860_v61 = vadd.f32 %v14916_v1, %v14928_v36  ;;  %v18440_v1 = vld [vmem:[#allocation22_spill] sm:$0xff]  ;;  %v18441_v36 = vld [vmem:[#allocation12_spill] sm:$0xff] }
 0xec3   : > { %6275 = vmatpush.msrb.mxu0 %v15331_v13 }
 0xec4   : > { %v15288_v28 = vpop.f32.mrf.mxu1 }
 0xec5   : > { %v5232_v58 = vpop.f32.mrf.mxu3 }
 0xec7   : > { %v5639_v26 = vpop.f32.mrf.mxu2 }
 0xecc   : > { %v15294_v18 = vpop.f32.mrf.mxu1 }
 0xecd   : > { %v5234_v9 = vpop.f32.mrf.mxu3 }
 0xece   : > { %v5274_v41 = vadd.f32 %v5234_v9, %v4862_v59  ;;  %v18446_v9 = vld [vmem:[#allocation13_spill] sm:$0xff] }
 0xecf   : > { %v5642_v6 = vpop.f32.mrf.mxu2 }
 0xed0   : > { %v5679_v12 = vadd.f32 %v5639_v26, %v5274_v41  ;;  %v5269_v26 = vadd.f32 %v15276_v22, %v18446_v9  ;;  %v15394_v22 = vld [vmem:[%s18258_s20 + $0x50] sm:$0xff]  ;;  %v18451_v41 = vld [vmem:[#allocation28_spill] sm:$0xff]  ;;  %v18460_v9 = vld [vmem:[#allocation33_spill] sm:$0xff] }
 0xed4   : > { %v15300_v52 = vpop.f32.mrf.mxu1 }
 0xed5   : > { %v5237_v38 = vpop.f32.mrf.mxu3 }
 0xed6   : > { %v5275_v37 = vadd.f32 %v5237_v38, %v4865_v10  ;;  %v18447_v38 = vld [vmem:[#allocation16_spill] sm:$0xff] }
 0xed7   : > { %v5644_v47 = vpop.f32.mrf.mxu2 }
 0xed8   : > { %v5680_v15 = vadd.f32 %v5642_v6, %v5275_v37  ;;  %v18444_v37 = vld [vmem:[#allocation20_spill] sm:$0xff]  ;;  %v5268_v6 = vadd.f32 %v15235_v30, %v18447_v38  ;;  %v15408_v30 = vld [vmem:[%s18258_s20 + $0x48] sm:$0xff] }
 0xedc   : > { %v15302_v3 = vpop.f32.mrf.mxu1 }
 0xedd   : > { %v5239_v20 = vpop.f32.mrf.mxu3 }
 0xede   : > { %v5276_v48 = vadd.f32 %v5239_v20, %v4867_v60  ;;  %v18448_v20 = vld [vmem:[#allocation18_spill] sm:$0xff] }
 0xedf   : > { %v5647_v42 = vpop.f32.mrf.mxu2 }
 0xee0   : > { %v5681_v34 = vadd.f32 %v5644_v47, %v5276_v48  ;;  %v5267_v47 = vadd.f32 %v15196_v32, %v18448_v20  ;;  %v6175_v32 = vld [vmem:[%s18258_s20 + $0x40] sm:$0xff] }
 0xee1   : > { %v6167_v20 = vld [vmem:[%s18258_s20] sm:$0xff] }
 0xee4   : > { %v15304_v19 = vpop.f32.mrf.mxu1 }
 0xee5   : > { %v5242_v53 = vpop.f32.mrf.mxu3 }
 0xee6   : > { %v5277_v46 = vadd.f32 %v5242_v53, %v4870_v29  ;;  %v5273_v29 = vadd.f32 %v5232_v58, %v4860_v61  ;;  %v18450_v61 = vld [vmem:[#allocation19_spill] sm:$0xff] }
 0xee7   : > { %v5649_v0 = vpop.f32.mrf.mxu2 }
 0xee8   : > { %v5682_v33 = vadd.f32 %v5647_v42, %v5277_v46  ;;  %v4857_v42 = vadd.f32 %v18438_v50, %v18437_v40  ;;  %v5678_v60 = vadd.f32 %v5637_v56, %v5273_v29  ;;  %v18453_v50 = vld [vmem:[#allocation26_spill] sm:$0xff] }
 0xee9   : > { %v6173_v29 = vld [vmem:[%s18258_s20 + $0x30] sm:$0xff] }
 0xeec   : > { %v15306_v14 = vpop.f32.mrf.mxu1 }
 0xeed   : > { %v5244_v62 = vpop.f32.mrf.mxu3 }
 0xeee   : > { %v5278_v5 = vadd.f32 %v5244_v62, %v4872_v55 }
 0xef0   : > { %v5683_v35 = vadd.f32 %v5649_v0, %v5278_v5  ;;  %v15343_v0 = vld [vmem:[%s18258_s20 + $0x70] sm:$0xff] }
 0xef1   : > { %6276 = vmatpush.msrb.mxu0 %v15343_v0 }
 0xef4   : > { %v6042_v57 = vpop.f32.mrf.mxu1 }
 0xef5   : > { %v6083_v10 = vadd.f32 %v6042_v57, %v5678_v60 }
 0xefc   : > { %v6044_v16 = vpop.f32.mrf.mxu1 }
 0xefd   : > { %v6084_v46 = vadd.f32 %v6044_v16, %v5679_v12  ;;  %v5674_v16 = vadd.f32 %v15283_v63, %v5269_v26 }
 0xeff   : > { %v15371_v56 = vadd.f32 %v15149_v25, %v6084_v46  ;;  %v6079_v63 = vadd.f32 %v15300_v52, %v5674_v16  ;;  %v18457_v46 = vld [vmem:[#allocation43_spill] sm:$0xff] }
 0xf01   : > { %18445 = vst [vmem:[#allocation12_spill] sm:$0xff] %v15371_v56 }
 0xf04   : > { %v6047_v39 = vpop.f32.mrf.mxu1 }
 0xf0c   : > { %v6049_v27 = vpop.f32.mrf.mxu1 }
 0xf0d   : > { %v6086_v53 = vadd.f32 %v6049_v27, %v5681_v34  ;;  %v4855_v27 = vadd.f32 %v18441_v36, %v18440_v1  ;;  %v5272_v34 = vadd.f32 %v5229_v11, %v4857_v42  ;;  %v5270_v11 = vadd.f32 %v15290_v17, %v18444_v37  ;;  %v15380_v17 = vld [vmem:[%s18258_s20 + $0x58] sm:$0xff]  ;;  %v18455_v1 = vld [vmem:[#allocation24_spill] sm:$0xff]  ;;  %v18459_v37 = vld [vmem:[#allocation38_spill] sm:$0xff] }
 0xf0f   : > { %v5677_v5 = vadd.f32 %v5634_v44, %v5272_v34  ;;  %v5675_v57 = vadd.f32 %v15292_v2, %v5270_v11  ;;  %v18456_v34 = vld [vmem:[#allocation27_spill] sm:$0xff] }
 0xf11   : > { %v6082_v44 = vadd.f32 %v15306_v14, %v5677_v5  ;;  %v15385_v14 = vadd.f32 %v15149_v25, %v6083_v10  ;;  %v6080_v2 = vadd.f32 %v15302_v3, %v5675_v57  ;;  %v18458_v5 = vld [vmem:[#allocation25_spill] sm:$0xff] }
 0xf13   : > { %v15425_v52 = vadd.f32 %v15149_v25, %v6080_v2  ;;  %v6126_v2 = vld [vmem:[%s18261_s23 + $0x8] sm:$0xff] }
 0xf14   : > { %v6052_v7 = vpop.f32.mrf.mxu1 }
 0xf15   : > { %v6087_v21 = vadd.f32 %v6052_v7, %v5682_v33  ;;  %v6085_v7 = vadd.f32 %v6047_v39, %v5680_v15  ;;  %v15346_v39 = vadd.f32 %v15149_v25, %v6086_v53  ;;  %v5673_v33 = vadd.f32 %v15244_v23, %v5268_v6  ;;  %v6168_v6 = vld [vmem:[%s18258_s20 + $0x8] sm:$0xff] }
 0xf16   : > { %v5265_v15 = vadd.f32 %v18451_v41, %v18450_v61 }
 0xf17   : > { %v15334_v55 = vadd.f32 %v15149_v25, %v6087_v21  ;;  %18442 = vst [vmem:[#allocation21_spill] sm:$0xff] %v15346_v39  ;;  %v5271_v21 = vadd.f32 %v15296_v24, %v4855_v27  ;;  %v15357_v48 = vadd.f32 %v15149_v25, %v6085_v7  ;;  %v15366_v24 = vld [vmem:[%s18258_s20 + $0x60] sm:$0xff]  ;;  %v6078_v23 = vadd.f32 %v15294_v18, %v5673_v33  ;;  %v18452_v18 = vld [vmem:[#allocation15_spill] sm:$0xff]  ;;  %v6172_v27 = vld [vmem:[%s18258_s20 + $0x28] sm:$0xff] }
 0xf18   : > { %v5264_v42 = vadd.f32 %v18453_v50, %v18452_v18  ;;  %v5670_v12 = vadd.f32 %v15138_v31, %v5265_v15 }
 0xf19   : > { %18439 = vst [vmem:[#allocation23_spill] sm:$0xff] %v15334_v55  ;;  %v5676_v58 = vadd.f32 %v15298_v4, %v5271_v21 }
 0xf1a   : > { %18443 = vst [vmem:[#allocation22_spill] sm:$0xff] %v15357_v48  ;;  %v5669_v60 = vadd.f32 %v18456_v34, %v5264_v42  ;;  %v6075_v21 = vadd.f32 %v18457_v46, %v5670_v12  ;;  %v15558_v12 = vld [vmem:[%s18260_s22 + $0x10] sm:$0xff]  ;;  %v15600_v34 = vld [vmem:[%s18260_s22 + $0x40] sm:$0xff]  ;;  %v12638_v46 = vmov 0  }
 0xf1b   : > { %v6081_v4 = vadd.f32 %v15304_v19, %v5676_v58  ;;  %v15399_v19 = vadd.f32 %v15149_v25, %v6082_v44  ;;  %v6170_v44 = vld [vmem:[%s18258_s20 + $0x18] sm:$0xff]  ;;  %12432 = vset.pattern.permute.xlu1 %v12638_v46  ;;  %12431 = vset.pattern.permute.xlu0 %v12638_v46 }
 0xf1c   : > { %v6054_v45 = vpop.f32.mrf.mxu1  ;;  %v6074_v11 = vadd.f32 %v18459_v37, %v5669_v60  ;;  %v15475_v57 = vadd.f32 %v15149_v25, %v6075_v21  ;;  %v15607_v60 = vld [vmem:[%s18260_s22 + $0x48] sm:$0xff]  ;;  %v7420_v21 = vld [vmem:[%s18263_s25] sm:$0xff]  ;;  %12433 = vset.pattern.permute.xlu2 %v12638_v46  ;;  %v7422_v37 = vld [vmem:[%s18263_s25 + $0x10] sm:$0xff] }
 0xf1d   : > { %v6088_v8 = vadd.f32 %v6054_v45, %v5683_v35  ;;  %v15413_v3 = vadd.f32 %v15149_v25, %v6081_v4  ;;  %v18449_v35 = vld [vmem:[#allocation17_spill] sm:$0xff]  ;;  %v5672_v45 = vadd.f32 %v15204_v49, %v5267_v47  ;;  %v15436_v49 = vadd.f32 %v15149_v25, %v6079_v63  ;;  %v6169_v4 = vld [vmem:[%s18258_s20 + $0x10] sm:$0xff]  ;;  %7454 = vperm.xlu0 %12431, %v7420_v21   ;;  %v7444_v46 = vld [vmem:[%s18263_s25 + $0xc0] sm:$0xff] }
 0xf1e   : > { %v5266_v59 = vadd.f32 %v15152_v43, %v18449_v35  ;;  %v6174_v43 = vld [vmem:[%s18258_s20 + $0x38] sm:$0xff]  ;;  %v15482_v38 = vadd.f32 %v15149_v25, %v6074_v11  ;;  %v7426_v11 = vld [vmem:[%s18263_s25 + $0x30] sm:$0xff]  ;;  %7464 = vperm.xlu1 %12432, %v7422_v37  }
 0xf1f   : > { %v15324_v62 = vadd.f32 %v15149_v25, %v6088_v8  ;;  %v15354_v8 = vld [vmem:[%s18258_s20 + $0x68] sm:$0xff]  ;;  %v6077_v40 = vadd.f32 %v15288_v28, %v5672_v45  ;;  %v18454_v28 = vld [vmem:[#allocation14_spill] sm:$0xff]  ;;  %v6227_v47 = vmul.f32 %v15413_v3, %v15413_v3  ;;  %v6225_v33 = vmul.f32 %v15436_v49, %v15436_v49 }
 0xf20   : > { %6277 = vmatpush.msrb.mxu0 %v15354_v8  ;;  %v5671_v53 = vadd.f32 %v15162_v51, %v5266_v59  ;;  %v15447_v51 = vadd.f32 %v15149_v25, %v6078_v23  ;;  %v5263_v36 = vadd.f32 %v18455_v1, %v18454_v28  ;;  %v6220_v45 = vmul.f32 %v15482_v38, %v15482_v38  ;;  %v15572_v28 = vld [vmem:[%s18260_s22 + $0x20] sm:$0xff]  ;;  %v15579_v1 = vld [vmem:[%s18260_s22 + $0x28] sm:$0xff] }
 0xf21   : > { %18436 = vst [vmem:[#allocation48_spill] sm:$0xff] %v15324_v62  ;;  %6147 = vmatpush.msra.mxu3 %v15324_v62  ;;  %v15458_v31 = vadd.f32 %v15149_v25, %v6077_v40  ;;  %v15543_v40 = vld [vmem:[%s18260_s22] sm:$0xff] }
 0xf22   : > { %6278 = vmatpush.msrb.mxu0 %v15366_v24  ;;  %v6076_v7 = vadd.f32 %v15278_v54, %v5671_v53  ;;  %v6171_v54 = vld [vmem:[%s18258_s20 + $0x20] sm:$0xff]  ;;  %v5668_v10 = vadd.f32 %v18458_v5, %v5263_v36  ;;  %v6224_v63 = vmul.f32 %v15447_v51, %v15447_v51  ;;  %v15586_v36 = vld [vmem:[%s18260_s22 + $0x30] sm:$0xff]  ;;  %v7421_v5 = vld [vmem:[%s18263_s25 + $0x8] sm:$0xff] }
 0xf23   : > { %6148 = vmatpush.msra.mxu3 %v15334_v55  ;;  %v6223_v35 = vmul.f32 %v15458_v31, %v15458_v31 }
 0xf24   : > { %6279 = vmatpush.msrb.mxu0 %v15380_v17  ;;  %v15467_v58 = vadd.f32 %v15149_v25, %v6076_v7  ;;  %v6073_v26 = vadd.f32 %v18460_v9, %v5668_v10  ;;  %v15565_v7 = vld [vmem:[%s18260_s22 + $0x18] sm:$0xff]  ;;  %v6552_v9 = vld [vmem:[%s18259_s21] sm:$0xf] }
 0xf25   : > { %6149 = vmatpush.msra.mxu3 %v15346_v39  ;;  %v15627_v10 = vld [vmem:[%s18260_s22 + $0x58] sm:$0xff]  ;;  %7459 = vperm.xlu0 %12431, %v7421_v5  }
 0xf26   : > { %6280 = vmatpush.msrb.mxu0 %v15394_v22  ;;  %v15489_v16 = vadd.f32 %v15149_v25, %v6073_v26  ;;  %v6234_v25 = vmul.f32 %v15324_v62, %v15324_v62  ;;  %v6222_v59 = vmul.f32 %v15467_v58, %v15467_v58  ;;  %v7423_v26 = vld [vmem:[%s18263_s25 + $0x18] sm:$0xff]  ;;  %11757 = vmatpush.msk.msra.mxu1 %vm1196_vm1, %v6552_v9  ;;  %v11972_v62 = vld [vmem:[%s18262_s24 + $0xd4] sm:$0xf] }
 0xf27   : > { %6150 = vmatpush.msra.mxu3 %v15357_v48  ;;  %7469 = vperm.xlu1 %12432, %v7423_v26   ;;  %v15753_v26 = vld [vmem:[%s18260_s22 + $0x98] sm:$0xff] }
 0xf28   : > { %6281 = vmatpush.msrb.mxu0 %v15408_v30  ;;  %v6219_v23 = vmul.f32 %v15489_v16, %v15489_v16 }
 0xf29   : > { %6151 = vmatpush.msra.mxu3 %v15371_v56 }
 0xf2a   : > { %6282 = vmatpush.msrb.mxu0 %v6175_v32 }
 0xf2b   : > { %6152 = vmatpush.msra.mxu3 %v15385_v14 }
 0xf2c   : > { %6283 = vmatpush.msrb.mxu0 %v6174_v43 }
 0xf2d   : > { %6153 = vmatpush.msra.mxu3 %v15399_v19  ;;  %7484 = vperm.xlu0 %12431, %v7426_v11   ;;  %v7442_v11 = vld [vmem:[%s18263_s25 + $0xb0] sm:$0xff] }
 0xf2e   : > { %6284 = vmatpush.msrb.mxu0 %v6173_v29 }
 0xf2f   : > { %6154 = vmatpush.msra.mxu3 %v15413_v3 }
 0xf30   : > { %6285 = vmatpush.msrb.mxu0 %v6172_v27 }
 0xf31   : > { %6155 = vmatpush.msra.mxu3 %v15425_v52 }
 0xf32   : > { %6286 = vmatpush.msrb.mxu0 %v6171_v54 }
 0xf33   : > { %6156 = vmatpush.msra.mxu3 %v15436_v49 }
 0xf34   : > { %6287 = vmatpush.msrb.mxu0 %v6170_v44 }
 0xf35   : > { %6157 = vmatpush.msra.mxu3 %v15447_v51 }
 0xf36   : > { %6288 = vmatpush.msrb.mxu0 %v6169_v4 }
 0xf37   : > { %6158 = vmatpush.msra.mxu3 %v15458_v31 }
 0xf38   : > { %6289 = vmatpush.msrb.mxu0 %v6168_v6 }
 0xf39   : > { %6159 = vmatpush.msra.mxu3 %v15467_v58 }
 0xf3a   : > { %6290 = vmatpush.msrb.mxu0 %v6167_v20 }
 0xf3b   : > { %6160 = vmatpush.msra.mxu3 %v15475_v57 }
 0xf3c   : > { %11692 = vmatpush.msk.msra.mxu0 %vm1196_vm1, %v6552_v9  ;;  %v7434_v9 = vld [vmem:[%s18263_s25 + $0x70] sm:$0xff] }
 0xf3d   : > { %6161 = vmatpush.msra.mxu3 %v15482_v38 }
 0xf3f   : > { %6162 = vmatpush.msra.mxu3 %v15489_v16  ;;  %v6252_v18 = vpop.f32.mrf.mxu0 }
 0xf40   : > { %6163 = vmatmul.f32.vlgmr.msra.gmra.mxu3 %v6126_v2 }
 0xf41   : > { %6183 = vmatpush.msrb.mxu3 %v15331_v13  ;;  %v6233_v13 = vmul.f32 %v15334_v55, %v15334_v55 }
 0xf43   : > { %6184 = vmatpush.msrb.mxu3 %v15343_v0  ;;  %v6232_v0 = vmul.f32 %v15346_v39, %v15346_v39  ;;  %v6144_v61 = vpop.f32.mrf.mxu3 }
 0xf45   : > { %6185 = vmatpush.msrb.mxu3 %v15354_v8  ;;  %v6231_v8 = vmul.f32 %v15357_v48, %v15357_v48  ;;  %v11956_v48 = vld [vmem:[%s18262_s24 + $0x34] sm:$0xf] }
 0xf47   : > { %6186 = vmatpush.msrb.mxu3 %v15366_v24  ;;  %v6230_v24 = vmul.f32 %v15371_v56, %v15371_v56  ;;  %v12371_v56 = vld [vmem:[%s18262_s24 + $0x44] sm:$0xf0] }
 0xf49   : > { %6187 = vmatpush.msrb.mxu3 %v15380_v17  ;;  %v6229_v17 = vmul.f32 %v15385_v14, %v15385_v14 }
 0xf4b   : > { %6188 = vmatpush.msrb.mxu3 %v15394_v22  ;;  %v6228_v22 = vmul.f32 %v15399_v19, %v15399_v19 }
 0xf4d   : > { %6189 = vmatpush.msrb.mxu3 %v15408_v30  ;;  %v6226_v30 = vmul.f32 %v15425_v52, %v15425_v52 }
 0xf4f   : > { %6190 = vmatpush.msrb.mxu3 %v6175_v32  ;;  %v6221_v32 = vmul.f32 %v15475_v57, %v15475_v57 }
 0xf51   : > { %6191 = vmatpush.msrb.mxu3 %v6174_v43 }
 0xf53   : > { %6192 = vmatpush.msrb.mxu3 %v6173_v29  ;;  %v15551_v29 = vld [vmem:[%s18260_s22 + $0x8] sm:$0xff] }
 0xf55   : > { %6193 = vmatpush.msrb.mxu3 %v6172_v27  ;;  %v15593_v27 = vld [vmem:[%s18260_s22 + $0x38] sm:$0xff] }
 0xf57   : > { %6194 = vmatpush.msrb.mxu3 %v6171_v54  ;;  %v15617_v54 = vld [vmem:[%s18260_s22 + $0x50] sm:$0xff] }
 0xf59   : > { %6195 = vmatpush.msrb.mxu3 %v6170_v44  ;;  %v15640_v44 = vld [vmem:[%s18260_s22 + $0x60] sm:$0xff] }
 0xf5b   : > { %6196 = vmatpush.msrb.mxu3 %v6169_v4  ;;  %v7429_v4 = vld [vmem:[%s18263_s25 + $0x48] sm:$0xff] }
 0xf5c   : > { %7499 = vperm.xlu0 %12431, %v7429_v4   ;;  %v7447_v4 = vld [vmem:[%s18263_s25 + $0xd8] sm:$0xff] }
 0xf5d   : > { %6197 = vmatpush.msrb.mxu3 %v6168_v6  ;;  %v15658_v6 = vld [vmem:[%s18260_s22 + $0x68] sm:$0xff] }
 0xf5f   : > { %6198 = vmatpush.msrb.mxu3 %v6167_v20  ;;  %v7432_v20 = vld [vmem:[%s18263_s25 + $0x60] sm:$0xff] }
 0xf61   : > { %6255 = vmatpush.msra.mxu3 %v6234_v25  ;;  %v15671_v25 = vld [vmem:[%s18260_s22 + $0x70] sm:$0xff] }
 0xf63   : > { %6256 = vmatpush.msra.mxu3 %v6233_v13  ;;  %v7430_v13 = vld [vmem:[%s18263_s25 + $0x50] sm:$0xff] }
 0xf64   : > { %7514 = vperm.xlu0 %12431, %v7432_v20  }
 0xf65   : > { %6257 = vmatpush.msra.mxu3 %v6232_v0  ;;  %v7424_v0 = vld [vmem:[%s18263_s25 + $0x20] sm:$0xff] }
 0xf66   : > { %7474 = vperm.xlu2 %12433, %v7424_v0  }
 0xf67   : > { %6258 = vmatpush.msra.mxu3 %v6231_v8  ;;  %v15684_v8 = vld [vmem:[%s18260_s22 + $0x78] sm:$0xff] }
 0xf69   : > { %6259 = vmatpush.msra.mxu3 %v6230_v24  ;;  %v7435_v24 = vld [vmem:[%s18263_s25 + $0x78] sm:$0xff] }
 0xf6b   : > { %6260 = vmatpush.msra.mxu3 %v6229_v17  ;;  %v7433_v17 = vld [vmem:[%s18263_s25 + $0x68] sm:$0xff] }
 0xf6c   : > { %7529 = vperm.xlu0 %12431, %v7435_v24  }
 0xf6d   : > { %6261 = vmatpush.msra.mxu3 %v6228_v22  ;;  %v7425_v22 = vld [vmem:[%s18263_s25 + $0x28] sm:$0xff] }
 0xf6e   : > { %7479 = vperm.xlu2 %12433, %v7425_v22   ;;  %v7437_v22 = vld [vmem:[%s18263_s25 + $0x88] sm:$0xff] }
 0xf6f   : > { %6262 = vmatpush.msra.mxu3 %v6227_v47  ;;  %v7438_v47 = vld [vmem:[%s18263_s25 + $0x90] sm:$0xff] }
 0xf71   : > { %6263 = vmatpush.msra.mxu3 %v6226_v30  ;;  %v15703_v30 = vld [vmem:[%s18260_s22 + $0x80] sm:$0xff] }
 0xf73   : > { %6264 = vmatpush.msra.mxu3 %v6225_v33 }
 0xf74   : > { %7544 = vperm.xlu0 %12431, %v7438_v47   ;;  %v15770_v47 = vld [vmem:[%s18260_s22 + $0xa0] sm:$0xff] }
 0xf75   : > { %6265 = vmatpush.msra.mxu3 %v6224_v63 }
 0xf77   : > { %6266 = vmatpush.msra.mxu3 %v6223_v35  ;;  %v7436_v35 = vld [vmem:[%s18263_s25 + $0x80] sm:$0xff] }
 0xf79   : > { %6267 = vmatpush.msra.mxu3 %v6222_v59  ;;  %v7428_v59 = vld [vmem:[%s18263_s25 + $0x40] sm:$0xff] }
 0xf7a   : > { %7494 = vperm.xlu2 %12433, %v7428_v59   ;;  %v7448_v59 = vld [vmem:[%s18263_s25 + $0xe0] sm:$0xff] }
 0xf7b   : > { %6268 = vmatpush.msra.mxu3 %v6221_v32 }
 0xf7d   : > { %6269 = vmatpush.msra.mxu3 %v6220_v45 }
 0xf7f   : > { %6270 = vmatpush.msra.mxu3 %v6219_v23  ;;  %v15719_v23 = vld [vmem:[%s18260_s22 + $0x88] sm:$0xff] }
 0xfc3   : > { %v6164_v41 = vpop.f32.mrf.mxu3 }
 0xfc4   : > { %v6165_v15 = vadd.f32 %v6164_v41, %v6144_v61  ;;  %v7441_v61 = vld [vmem:[%s18263_s25 + $0xa8] sm:$0xff] }
 0xfc5   : > { %7559 = vperm.xlu0 %12431, %v7441_v61  }
 0xfc6   : > { %6199 = vmatmul.f32.vlgmr.msrb.gmra.mxu3 %v6165_v15 }
 0xfcd   : > { %7574 = vperm.xlu0 %12431, %v7444_v46   ;;  %v15827_v46 = vld [vmem:[%s18260_s22 + $0xb8] sm:$0xff] }
 0xfce   : > { %6271 = vmatmul.f32.vlgmr.msra.gmra.mxu3 %v6126_v2  ;;  %v7427_v2 = vld [vmem:[%s18263_s25 + $0x38] sm:$0xff] }
 0xfcf   : > { %7489 = vperm.xlu1 %12432, %v7427_v2  }
 0xfd5   : > { %7589 = vperm.xlu0 %12431, %v7447_v4   ;;  %v11862_v4 = vld [vmem:[%s18263_s25 + $0x140] sm:$0xff] }
 0xfd7   : > { %7504 = vperm.xlu1 %12432, %v7430_v13  }
 0xfdf   : > { %7519 = vperm.xlu1 %12432, %v7433_v17   ;;  %v7445_v17 = vld [vmem:[%s18263_s25 + $0xc8] sm:$0xff] }
 0xfe7   : > { %7534 = vperm.xlu1 %12432, %v7436_v35  }
0x1049   : > { %v6200_v43 = vpop.f32.mrf.mxu3 }
0x104a   : > { %v15538_v53 = vmul.f32 0.0009765625, %v6200_v43 }
0x104c   : > { %6454 = vmatpush.msrb.mxu3 %v15538_v53  ;;  %v6297_v32 = vmul.f32 %v15538_v53, %v15538_v53 }
0x104d   : > { %11660 = vmatmul.msk.f32.vlgmr.msrb.gmra.mxu3 %vm1189_vm2, %v15543_v40 }
0x1051   : > { %v6272_v50 = vpop.f32.mrf.mxu3 }
0x1052   : > { %v6273_v42 = vadd.f32 %v6272_v50, %v6252_v18  ;;  %v7439_v18 = vld [vmem:[%s18263_s25 + $0x98] sm:$0xff] }
0x1053   : > { %v7431_v50 = vld [vmem:[%s18263_s25 + $0x58] sm:$0xff]  ;;  %7549 = vperm.xlu1 %12432, %v7439_v18   ;;  %v11856_v18 = vld [vmem:[%s18263_s25 + $0x110] sm:$0xff] }
0x1054   : > { %6291 = vmatmul.f32.vlgmr.msrb.gmra.mxu0 %v6273_v42  ;;  %v15736_v42 = vld [vmem:[%s18260_s22 + $0x90] sm:$0xff]  ;;  %7509 = vperm.xlu2 %12433, %v7431_v50  }
0x1055   : > { %11661 = vmatmul.msk.f32.gmra.mxu3 %vm1189_vm2, %v15551_v29  ;;  %v7446_v50 = vld [vmem:[%s18263_s25 + $0xd0] sm:$0xff] }
0x105b   : > { %7564 = vperm.xlu1 %12432, %v7442_v11   ;;  %v15846_v11 = vld [vmem:[%s18260_s22 + $0xc0] sm:$0xff] }
0x105c   : > { %7524 = vperm.xlu2 %12433, %v7434_v9  }
0x105d   : > { %11662 = vmatmul.msk.f32.gmra.mxu3 %vm1189_vm2, %v15558_v12 }
0x1063   : > { %7579 = vperm.xlu1 %12432, %v7445_v17   ;;  %v15884_v17 = vld [vmem:[%s18260_s22 + $0xd0] sm:$0xff] }
0x1064   : > { %7539 = vperm.xlu2 %12433, %v7437_v22  }
0x1065   : > { %11663 = vmatmul.msk.f32.gmra.mxu3 %vm1189_vm2, %v15565_v7 }
0x106b   : > { %7594 = vperm.xlu1 %12432, %v7448_v59  }
0x106d   : > { %11664 = vmatmul.msk.f32.gmra.mxu3 %vm1189_vm2, %v15572_v28 }
0x1075   : > { %11665 = vmatmul.msk.f32.gmra.mxu3 %vm1189_vm2, %v15579_v1 }
0x107d   : > { %11666 = vmatmul.msk.f32.gmra.mxu3 %vm1189_vm2, %v15586_v36 }
0x1085   : > { %11667 = vmatmul.msk.f32.gmra.mxu3 %vm1189_vm2, %v15593_v27 }
0x108d   : > { %11668 = vmatmul.msk.f32.gmra.mxu3 %vm1189_vm2, %v15600_v34 }
0x1095   : > { %11669 = vmatmul.msk.f32.gmra.mxu3 %vm1189_vm2, %v15607_v60 }
0x109d   : > { %11670 = vmatmul.msk.f32.gmra.mxu3 %vm1189_vm2, %v15617_v54 }
0x10a5   : > { %11671 = vmatmul.msk.f32.gmra.mxu3 %vm1189_vm2, %v15627_v10 }
0x10ad   : > { %11672 = vmatmul.msk.f32.gmra.mxu3 %vm1189_vm2, %v15640_v44 }
0x10b5   : > { %11673 = vmatmul.msk.f32.gmra.mxu3 %vm1189_vm2, %v15658_v6 }
0x10bd   : > { %11674 = vmatmul.msk.f32.gmra.mxu3 %vm1189_vm2, %v15671_v25 }
0x10c5   : > { %11675 = vmatmul.msk.f32.gmra.mxu3 %vm1189_vm2, %v15684_v8 }
0x10cd   : > { %11676 = vmatmul.msk.f32.gmra.mxu3 %vm1189_vm2, %v15703_v30 }
0x10d0   : > { %v6456_v33 = vpop.f32.mrf.mxu3 }
0x10d1   : > { %v6292_v63 = vpop.f32.mrf.mxu0  ;;  %11693 = vmatmul.msk.f32.vlgmr.msra.gmra.mxu0 %vm6553_vm12, %v6456_v33  ;;  %v7450_v33 = vld [vmem:[%s18263_s25 + $0xf0] sm:$0xff] }
0x10d2   : > { %v6296_v45 = vmul.f32 0.0009765625, %v6292_v63  ;;  %7604 = vperm.xlu0 %12431, %v7450_v33   ;;  %v11868_v33 = vld [vmem:[%s18263_s25 + $0x170] sm:$0xff] }
0x10d4   : > { %v6298_v41 = vsub.f32 %v6296_v45, %v6297_v32  ;;  %v7440_v32 = vld [vmem:[%s18263_s25 + $0xa0] sm:$0xff]  ;;  %v15789_v45 = vld [vmem:[%s18260_s22 + $0xa8] sm:$0xff] }
0x10d5   : > { %11677 = vmatmul.msk.f32.gmra.mxu3 %vm1189_vm2, %v15719_v23  ;;  %7554 = vperm.xlu2 %12433, %v7440_v32   ;;  %v11871_v32 = vld [vmem:[%s18263_s25 + $0x188] sm:$0xff] }
0x10d6   : > { %v6299_v15 = vmax.f32 %v6298_v41, 0.0  ;;  %v7451_v41 = vld [vmem:[%s18263_s25 + $0xf8] sm:$0xff] }
0x10d7   : > { %7609 = vperm.xlu1 %12432, %v7451_v41   ;;  %v15925_v41 = vld [vmem:[%s18260_s22 + $0xe0] sm:$0xff] }
0x10d8   : > { %v6300_v43 = vadd.f32 1e-05, %v6299_v15  ;;  %v6459_v53 = vpop.f32.mrf.mxu3  ;;  %v7443_v15 = vld [vmem:[%s18263_s25 + $0xb8] sm:$0xff] }
0x10d9   : > { %11694 = vmatmul.msk.f32.gmra.mxu0 %vm6553_vm12, %v6459_v53 }
0x10da   : > { %12442 = vrsqrt.f32 %v6300_v43  ;;  %vm6307_vm14 = vweird.f32 %v6300_v43 }
0x10dd   : > { %11678 = vmatmul.msk.f32.gmra.mxu3 %vm1189_vm2, %v15736_v42  ;;  %7569 = vperm.xlu2 %12433, %v7443_v15   ;;  %v11874_v15 = vld [vmem:[%s18263_s25 + $0x1a0] sm:$0xff] }
0x10df   : > { %7907 = vperm.xlu1 %12432, %v11856_v18   ;;  %v15944_v18 = vld [vmem:[%s18260_s22 + $0xe8] sm:$0xff] }
0x10e0   : > { %v12443_v21 = vpop.eup %12442  ;;  %v6462_v5 = vpop.f32.mrf.mxu3 }
0x10e1   : > { %v6302_v37 = vmul.f32 %v12443_v21, %v6300_v43  ;;  %11695 = vmatmul.msk.f32.gmra.mxu0 %vm6553_vm12, %v6462_v5  ;;  %vm6308_vm13 = vweird.f32 %v12443_v21  ;;  %v15808_v43 = vld [vmem:[%s18260_s22 + $0xb0] sm:$0xff]  ;;  %v11859_v5 = vld [vmem:[%s18263_s25 + $0x128] sm:$0xff] }
0x10e2   : > { %vm6309_vm15 = vmor %vm6307_vm14, %vm6308_vm13 }
0x10e3   : > { %v6303_v2 = vmul.f32 %v12443_v21, %v6302_v37  ;;  %v7449_v37 = vld [vmem:[%s18263_s25 + $0xe8] sm:$0xff] }
0x10e5   : > { %11679 = vmatmul.msk.f32.gmra.mxu3 %vm1189_vm2, %v15753_v26  ;;  %v6304_v20 = vmul.f32 0.5, %v6303_v2  ;;  %7584 = vperm.xlu2 %12433, %v7446_v50   ;;  %v11854_v2 = vld [vmem:[%s18263_s25 + $0x100] sm:$0xff]  ;;  %v11877_v50 = vld [vmem:[%s18263_s25 + $0x1b8] sm:$0xff] }
0x10e7   : > { %v6305_v13 = vsub.f32 1.5, %v6304_v20  ;;  %7922 = vperm.xlu1 %12432, %v11859_v5   ;;  %v15865_v20 = vld [vmem:[%s18260_s22 + $0xc8] sm:$0xff]  ;;  %v15963_v5 = vld [vmem:[%s18260_s22 + $0xf0] sm:$0xff] }
0x10e8   : > { %v6465_v0 = vpop.f32.mrf.mxu3 }
0x10e9   : > { %11696 = vmatmul.msk.f32.gmra.mxu0 %vm6553_vm12, %v6465_v0  ;;  %v6306_v24 = vmul.f32 %v12443_v21, %v6305_v13  ;;  %v11865_v0 = vld [vmem:[%s18263_s25 + $0x158] sm:$0xff] }
0x10eb   : > { %v6310_v63 = vsel %vm6309_vm15, %v12443_v21, %v6306_v24  ;;  %v11857_v24 = vld [vmem:[%s18263_s25 + $0x118] sm:$0xff] }
0x10ec   : > { %6781 = vmatpush.msra.mxu2 %v6310_v63  ;;  %v11860_v63 = vld [vmem:[%s18263_s25 + $0x130] sm:$0xff] }
0x10ed   : > { %11680 = vmatmul.msk.f32.gmra.mxu3 %vm1189_vm2, %v15770_v47  ;;  %11725 = vmatmul.msk.f32.vlgmr.msra.gmra.mxu2 %vm1189_vm2, %v15543_v40  ;;  %v11855_v40 = vld [vmem:[%s18263_s25 + $0x108] sm:$0xff] }
0x10ee   : > { %7902 = vperm.xlu0 %12431, %v11855_v40   ;;  %7599 = vperm.xlu2 %12433, %v7449_v37   ;;  %v11863_v40 = vld [vmem:[%s18263_s25 + $0x148] sm:$0xff]  ;;  %v11880_v37 = vld [vmem:[%s18263_s25 + $0x1d0] sm:$0xff] }
0x10ef   : > { %7937 = vperm.xlu1 %12432, %v11862_v4   ;;  %v15982_v4 = vld [vmem:[%s18260_s22 + $0xf8] sm:$0xff] }
0x10f0   : > { %v6468_v35 = vpop.f32.mrf.mxu3 }
0x10f1   : > { %11697 = vmatmul.msk.f32.gmra.mxu0 %vm6553_vm12, %v6468_v35  ;;  %v15903_v35 = vld [vmem:[%s18260_s22 + $0xd8] sm:$0xff] }
0x10f5   : > { %11681 = vmatmul.msk.f32.gmra.mxu3 %vm1189_vm2, %v15789_v45  ;;  %11726 = vmatmul.msk.f32.gmra.mxu2 %vm1189_vm2, %v15551_v29  ;;  %v11858_v29 = vld [vmem:[%s18263_s25 + $0x120] sm:$0xff] }
0x10f6   : > { %7917 = vperm.xlu0 %12431, %v11858_v29   ;;  %7897 = vperm.xlu2 %12433, %v11854_v2   ;;  %v11866_v29 = vld [vmem:[%s18263_s25 + $0x160] sm:$0xff]  ;;  %v11883_v2 = vld [vmem:[%s18263_s25 + $0x1e8] sm:$0xff] }
0x10f7   : > { %7952 = vperm.xlu1 %12432, %v11865_v0  }
0x10f8   : > { %v6471_v61 = vpop.f32.mrf.mxu3 }
0x10f9   : > { %11698 = vmatmul.msk.f32.gmra.mxu0 %vm6553_vm12, %v6471_v61  ;;  %v11876_v61 = vld [vmem:[%s18263_s25 + $0x1b0] sm:$0xff] }
0x10fd   : > { %11682 = vmatmul.msk.f32.gmra.mxu3 %vm1189_vm2, %v15808_v43  ;;  %11727 = vmatmul.msk.f32.gmra.mxu2 %vm1189_vm2, %v15558_v12  ;;  %v11861_v12 = vld [vmem:[%s18263_s25 + $0x138] sm:$0xff] }
0x10fe   : > { %7932 = vperm.xlu0 %12431, %v11861_v12   ;;  %7912 = vperm.xlu2 %12433, %v11857_v24   ;;  %v11869_v12 = vld [vmem:[%s18263_s25 + $0x178] sm:$0xff]  ;;  %v11918_v24 = vld [vmem:[%s18263_s25 + $0x200] sm:$0xff] }
0x10ff   : > { %7967 = vperm.xlu1 %12432, %v11868_v33  }
0x1100   : > { %v6474_v53 = vpop.f32.mrf.mxu3 }
0x1101   : > { %11699 = vmatmul.msk.f32.gmra.mxu0 %vm6553_vm12, %v6474_v53  ;;  %v11879_v53 = vld [vmem:[%s18263_s25 + $0x1c8] sm:$0xff] }
0x1105   : > { %11683 = vmatmul.msk.f32.gmra.mxu3 %vm1189_vm2, %v15827_v46  ;;  %11728 = vmatmul.msk.f32.gmra.mxu2 %vm1189_vm2, %v15565_v7  ;;  %v11864_v7 = vld [vmem:[%s18263_s25 + $0x150] sm:$0xff] }
0x1106   : > { %7947 = vperm.xlu0 %12431, %v11864_v7   ;;  %7927 = vperm.xlu2 %12433, %v11860_v63   ;;  %v11872_v7 = vld [vmem:[%s18263_s25 + $0x190] sm:$0xff]  ;;  %v11881_v63 = vld [vmem:[%s18263_s25 + $0x1d8] sm:$0xff] }
0x1107   : > { %7982 = vperm.xlu1 %12432, %v11871_v32  }
0x1108   : > { %v6477_v21 = vpop.f32.mrf.mxu3 }
0x1109   : > { %11700 = vmatmul.msk.f32.gmra.mxu0 %vm6553_vm12, %v6477_v21  ;;  %v11882_v21 = vld [vmem:[%s18263_s25 + $0x1e0] sm:$0xff] }
0x110d   : > { %11684 = vmatmul.msk.f32.gmra.mxu3 %vm1189_vm2, %v15846_v11  ;;  %11729 = vmatmul.msk.f32.gmra.mxu2 %vm1189_vm2, %v15572_v28  ;;  %v11867_v28 = vld [vmem:[%s18263_s25 + $0x168] sm:$0xff] }
0x110e   : > { %7962 = vperm.xlu0 %12431, %v11867_v28   ;;  %7942 = vperm.xlu2 %12433, %v11863_v40   ;;  %v11875_v28 = vld [vmem:[%s18263_s25 + $0x1a8] sm:$0xff]  ;;  %v11884_v40 = vld [vmem:[%s18263_s25 + $0x1f0] sm:$0xff] }
0x110f   : > { %7997 = vperm.xlu1 %12432, %v11874_v15  }
0x1110   : > { %v6480_v9 = vpop.f32.mrf.mxu3 }
0x1111   : > { %11701 = vmatmul.msk.f32.gmra.mxu0 %vm6553_vm12, %v6480_v9  ;;  %v11885_v9 = vld [vmem:[%s18263_s25 + $0x1f8] sm:$0xff] }
0x1115   : > { %11685 = vmatmul.msk.f32.gmra.mxu3 %vm1189_vm2, %v15865_v20  ;;  %11730 = vmatmul.msk.f32.gmra.mxu2 %vm1189_vm2, %v15579_v1  ;;  %v11870_v1 = vld [vmem:[%s18263_s25 + $0x180] sm:$0xff] }
0x1116   : > { %7977 = vperm.xlu0 %12431, %v11870_v1   ;;  %7957 = vperm.xlu2 %12433, %v11866_v29   ;;  %v11878_v1 = vld [vmem:[%s18263_s25 + $0x1c0] sm:$0xff]  ;;  %v11919_v29 = vld [vmem:[%s18263_s25 + $0x208] sm:$0xff] }
0x1117   : > { %8012 = vperm.xlu1 %12432, %v11877_v50  }
0x1118   : > { %v6483_v13 = vpop.f32.mrf.mxu3 }
0x1119   : > { %11702 = vmatmul.msk.f32.gmra.mxu0 %vm6553_vm12, %v6483_v13  ;;  %v11920_v13 = vld [vmem:[%s18263_s25 + $0x210] sm:$0xff] }
0x111d   : > { %11686 = vmatmul.msk.f32.gmra.mxu3 %vm1189_vm2, %v15884_v17  ;;  %11731 = vmatmul.msk.f32.gmra.mxu2 %vm1189_vm2, %v15586_v36  ;;  %v11873_v36 = vld [vmem:[%s18263_s25 + $0x198] sm:$0xff] }
0x111e   : > { %7992 = vperm.xlu0 %12431, %v11873_v36   ;;  %7972 = vperm.xlu2 %12433, %v11869_v12   ;;  %v11921_v36 = vld [vmem:[%s18263_s25 + $0x218] sm:$0xff] }
0x111f   : > { %8027 = vperm.xlu1 %12432, %v11880_v37  }
0x1120   : > { %v6486_v22 = vpop.f32.mrf.mxu3 }
0x1121   : > { %11703 = vmatmul.msk.f32.gmra.mxu0 %vm6553_vm12, %v6486_v22  ;;  %v11923_v22 = vld [vmem:[%s18263_s25 + $0x228] sm:$0xff] }
0x1125   : > { %11687 = vmatmul.msk.f32.gmra.mxu3 %vm1189_vm2, %v15903_v35  ;;  %11732 = vmatmul.msk.f32.gmra.mxu2 %vm1189_vm2, %v15593_v27 }
0x1126   : > { %8007 = vperm.xlu0 %12431, %v11876_v61   ;;  %7987 = vperm.xlu2 %12433, %v11872_v7   ;;  %v11924_v61 = vld [vmem:[%s18263_s25 + $0x230] sm:$0xff] }
0x1127   : > { %8042 = vperm.xlu1 %12432, %v11883_v2   ;;  %v11925_v2 = vld [vmem:[%s18263_s25 + $0x238] sm:$0xff] }
0x1128   : > { %v6489_v59 = vpop.f32.mrf.mxu3 }
0x1129   : > { %11704 = vmatmul.msk.f32.gmra.mxu0 %vm6553_vm12, %v6489_v59  ;;  %v11926_v59 = vld [vmem:[%s18263_s25 + $0x240] sm:$0xff] }
0x112d   : > { %11688 = vmatmul.msk.f32.gmra.mxu3 %vm1189_vm2, %v15925_v41  ;;  %11733 = vmatmul.msk.f32.gmra.mxu2 %vm1189_vm2, %v15600_v34 }
0x112e   : > { %8022 = vperm.xlu0 %12431, %v11879_v53   ;;  %8002 = vperm.xlu2 %12433, %v11875_v28   ;;  %v11927_v53 = vld [vmem:[%s18263_s25 + $0x248] sm:$0xff] }
0x112f   : > { %8307 = vperm.xlu1 %12432, %v11918_v24   ;;  %v11936_v24 = vld [vmem:[%s18263_s25 + $0x290] sm:$0xff] }
0x1130   : > { %v6492_v27 = vpop.f32.mrf.mxu3 }
0x1131   : > { %11705 = vmatmul.msk.f32.gmra.mxu0 %vm6553_vm12, %v6492_v27  ;;  %v11929_v27 = vld [vmem:[%s18263_s25 + $0x258] sm:$0xff] }
0x1135   : > { %11689 = vmatmul.msk.f32.gmra.mxu3 %vm1189_vm2, %v15944_v18  ;;  %11734 = vmatmul.msk.f32.gmra.mxu2 %vm1189_vm2, %v15607_v60 }
0x1136   : > { %8037 = vperm.xlu0 %12431, %v11882_v21   ;;  %8017 = vperm.xlu2 %12433, %v11878_v1   ;;  %v11922_v21 = vld [vmem:[%s18263_s25 + $0x220] sm:$0xff]  ;;  %v11928_v1 = vld [vmem:[%s18263_s25 + $0x250] sm:$0xff] }
0x1137   : > { %8322 = vperm.xlu1 %12432, %v11921_v36   ;;  %v11939_v36 = vld [vmem:[%s18263_s25 + $0x2a8] sm:$0xff] }
0x1138   : > { %v6495_v34 = vpop.f32.mrf.mxu3 }
0x1139   : > { %11706 = vmatmul.msk.f32.gmra.mxu0 %vm6553_vm12, %v6495_v34  ;;  %v11932_v34 = vld [vmem:[%s18263_s25 + $0x270] sm:$0xff] }
0x113d   : > { %11690 = vmatmul.msk.f32.gmra.mxu3 %vm1189_vm2, %v15963_v5  ;;  %11735 = vmatmul.msk.f32.gmra.mxu2 %vm1189_vm2, %v15617_v54 }
0x113e   : > { %8052 = vperm.xlu0 %12431, %v11885_v9   ;;  %8032 = vperm.xlu2 %12433, %v11881_v63  }
0x113f   : > { %8337 = vperm.xlu1 %12432, %v11924_v61  }
0x1140   : > { %v6498_v60 = vpop.f32.mrf.mxu3 }
0x1141   : > { %11707 = vmatmul.msk.f32.gmra.mxu0 %vm6553_vm12, %v6498_v60  ;;  %v11930_v60 = vld [vmem:[%s18263_s25 + $0x260] sm:$0xff] }
0x1145   : > { %11691 = vmatmul.msk.f32.gmra.mxu3 %vm1189_vm2, %v15982_v4  ;;  %11736 = vmatmul.msk.f32.gmra.mxu2 %vm1189_vm2, %v15627_v10 }
0x1146   : > { %8317 = vperm.xlu0 %12431, %v11920_v13   ;;  %8047 = vperm.xlu2 %12433, %v11884_v40  }
0x1147   : > { %8352 = vperm.xlu1 %12432, %v11927_v53  }
0x1148   : > { %v6501_v54 = vpop.f32.mrf.mxu3 }
0x1149   : > { %11708 = vmatmul.msk.f32.gmra.mxu0 %vm6553_vm12, %v6501_v54  ;;  %v11933_v54 = vld [vmem:[%s18263_s25 + $0x278] sm:$0xff] }
0x114d   : > { %11737 = vmatmul.msk.f32.gmra.mxu2 %vm1189_vm2, %v15640_v44 }
0x114e   : > { %v16000_v10 = vpop.f32.mrf.mxu0  ;;  %8332 = vperm.xlu0 %12431, %v11923_v22   ;;  %8312 = vperm.xlu2 %12433, %v11919_v29  }
0x114f   : > { %8367 = vperm.xlu1 %12432, %v11930_v60  }
0x1150   : > { %v6504_v0 = vpop.f32.mrf.mxu3 }
0x1151   : > { %11709 = vmatmul.msk.f32.gmra.mxu0 %vm6553_vm12, %v6504_v0 }
0x1155   : > { %11738 = vmatmul.msk.f32.gmra.mxu2 %vm1189_vm2, %v15658_v6 }
0x1156   : > { %v16014_v44 = vpop.f32.mrf.mxu0  ;;  %8347 = vperm.xlu0 %12431, %v11926_v59   ;;  %8327 = vperm.xlu2 %12433, %v11922_v21   ;;  %v11931_v59 = vld [vmem:[%s18263_s25 + $0x268] sm:$0xff] }
0x1157   : > { %8382 = vperm.xlu1 %12432, %v11933_v54  }
0x1158   : > { %v6507_v33 = vpop.f32.mrf.mxu3 }
0x1159   : > { %11710 = vmatmul.msk.f32.gmra.mxu0 %vm6553_vm12, %v6507_v33 }
0x115d   : > { %11739 = vmatmul.msk.f32.gmra.mxu2 %vm1189_vm2, %v15671_v25 }
0x115e   : > { %v16028_v6 = vpop.f32.mrf.mxu0  ;;  %8362 = vperm.xlu0 %12431, %v11929_v27   ;;  %8342 = vperm.xlu2 %12433, %v11925_v2   ;;  %v11942_v27 = vld [vmem:[%s18263_s25 + $0x2c0] sm:$0xff] }
0x115f   : > { %8397 = vperm.xlu1 %12432, %v11936_v24  }
0x1160   : > { %v6510_v32 = vpop.f32.mrf.mxu3 }
0x1161   : > { %11711 = vmatmul.msk.f32.gmra.mxu0 %vm6553_vm12, %v6510_v32 }
0x1165   : > { %11740 = vmatmul.msk.f32.gmra.mxu2 %vm1189_vm2, %v15684_v8 }
0x1166   : > { %v16042_v25 = vpop.f32.mrf.mxu0  ;;  %8377 = vperm.xlu0 %12431, %v11932_v34   ;;  %8357 = vperm.xlu2 %12433, %v11928_v1  }
0x1167   : > { %8412 = vperm.xlu1 %12432, %v11939_v36  }
0x1168   : > { %v6513_v15 = vpop.f32.mrf.mxu3 }
0x1169   : > { %11712 = vmatmul.msk.f32.gmra.mxu0 %vm6553_vm12, %v6513_v15  ;;  %v11934_v15 = vld [vmem:[%s18263_s25 + $0x280] sm:$0xff] }
0x116d   : > { %11741 = vmatmul.msk.f32.gmra.mxu2 %vm1189_vm2, %v15703_v30  ;;  %v11935_v30 = vld [vmem:[%s18263_s25 + $0x288] sm:$0xff] }
0x116e   : > { %v16056_v8 = vpop.f32.mrf.mxu0  ;;  %8392 = vperm.xlu0 %12431, %v11935_v30   ;;  %8372 = vperm.xlu2 %12433, %v11931_v59  }
0x116f   : > { %8427 = vperm.xlu1 %12432, %v11942_v27   ;;  %v11820_v27 = vld [vmem:[%s18262_s24 + $0x118] sm:$0xf] }
0x1170   : > { %v6516_v50 = vpop.f32.mrf.mxu3  ;;  %v6783_v12 = vpop.f32.mrf.mxu2 }
0x1171   : > { %11713 = vmatmul.msk.f32.gmra.mxu0 %vm6553_vm12, %v6516_v50  ;;  %11758 = vmatmul.msk.f32.vlgmr.msra.gmra.mxu1 %vm6553_vm12, %v6783_v12  ;;  %v11945_v50 = vld [vmem:[%s18263_s25 + $0x2d8] sm:$0xff] }
0x1172   : > { %v11937_v12 = vld [vmem:[%s18263_s25 + $0x298] sm:$0xff] }
0x1175   : > { %11742 = vmatmul.msk.f32.gmra.mxu2 %vm1189_vm2, %v15719_v23  ;;  %v11938_v23 = vld [vmem:[%s18263_s25 + $0x2a0] sm:$0xff] }
0x1176   : > { %v16071_v37 = vpop.f32.mrf.mxu0  ;;  %8407 = vperm.xlu0 %12431, %v11938_v23   ;;  %8387 = vperm.xlu2 %12433, %v11934_v15   ;;  %v12353_v15 = vld [vmem:[%s18262_s24 + $0x128] sm:$0xf0] }
0x1177   : > { %8442 = vperm.xlu1 %12432, %v11945_v50   ;;  %v12361_v50 = vld [vmem:[%s18262_s24 + $0x12c] sm:$0xf0] }
0x1178   : > { %v6519_v7 = vpop.f32.mrf.mxu3  ;;  %v6786_v9 = vpop.f32.mrf.mxu2 }
0x1179   : > { %11714 = vmatmul.msk.f32.gmra.mxu0 %vm6553_vm12, %v6519_v7  ;;  %11759 = vmatmul.msk.f32.gmra.mxu1 %vm6553_vm12, %v6786_v9  ;;  %v11948_v7 = vld [vmem:[%s18263_s25 + $0x2f0] sm:$0xff] }
0x117a   : > { %v11940_v9 = vld [vmem:[%s18263_s25 + $0x2b0] sm:$0xff] }
0x117d   : > { %11743 = vmatmul.msk.f32.gmra.mxu2 %vm1189_vm2, %v15736_v42  ;;  %v11941_v42 = vld [vmem:[%s18263_s25 + $0x2b8] sm:$0xff] }
0x117e   : > { %v16086_v28 = vpop.f32.mrf.mxu0  ;;  %8422 = vperm.xlu0 %12431, %v11941_v42   ;;  %8402 = vperm.xlu2 %12433, %v11937_v12   ;;  %v11946_v42 = vld [vmem:[%s18263_s25 + $0x2e0] sm:$0xff] }
0x117f   : > { %8457 = vperm.xlu1 %12432, %v11948_v7   ;;  %v11916_v12 = vld [vmem:[%s18262_s24 + $0x120] sm:$0xf]  ;;  %v16226_v7 = vpop.permute.xlu0 %7454 }
0x1180   : > { %v6522_v13 = vpop.f32.mrf.mxu3  ;;  %v6789_v0 = vpop.f32.mrf.mxu2 }
0x1181   : > { %11715 = vmatmul.msk.f32.gmra.mxu0 %vm6553_vm12, %v6522_v13  ;;  %11760 = vmatmul.msk.f32.gmra.mxu1 %vm6553_vm12, %v6789_v0  ;;  %v11983_v13 = vld [vmem:[%s18263_s25 + $0x308] sm:$0xff] }
0x1182   : > { %v11943_v0 = vld [vmem:[%s18263_s25 + $0x2c8] sm:$0xff] }
0x1185   : > { %11744 = vmatmul.msk.f32.gmra.mxu2 %vm1189_vm2, %v15753_v26  ;;  %v11944_v26 = vld [vmem:[%s18263_s25 + $0x2d0] sm:$0xff] }
0x1186   : > { %v16101_v22 = vpop.f32.mrf.mxu0  ;;  %8437 = vperm.xlu0 %12431, %v11944_v26   ;;  %8417 = vperm.xlu2 %12433, %v11940_v9   ;;  %v16193_v26 = vpop.permute.xlu1 %7464 }
0x1187   : > { %8787 = vperm.xlu1 %12432, %v11983_v13   ;;  %v16239_v13 = vpop.permute.xlu2 %7474 }
0x1188   : > { %v6525_v33 = vpop.f32.mrf.mxu3  ;;  %v6792_v63 = vpop.f32.mrf.mxu2 }
0x1189   : > { %11716 = vmatmul.msk.f32.gmra.mxu0 %vm6553_vm12, %v6525_v33  ;;  %11761 = vmatmul.msk.f32.gmra.mxu1 %vm6553_vm12, %v6792_v63  ;;  %v11986_v33 = vld [vmem:[%s18263_s25 + $0x320] sm:$0xff]  ;;  %v11991_v63 = vld [vmem:[%s18263_s25 + $0x348] sm:$0xff] }
0x118d   : > { %11745 = vmatmul.msk.f32.gmra.mxu2 %vm1189_vm2, %v15770_v47  ;;  %v11947_v47 = vld [vmem:[%s18263_s25 + $0x2e8] sm:$0xff] }
0x118e   : > { %v16116_v32 = vpop.f32.mrf.mxu0  ;;  %8452 = vperm.xlu0 %12431, %v11947_v47   ;;  %8432 = vperm.xlu2 %12433, %v11943_v0   ;;  %v11852_v47 = vld [vmem:[%s18262_s24 + $0x11c] sm:$0xf] }
0x118f   : > { %8802 = vperm.xlu1 %12432, %v11986_v33  }
0x1190   : > { %v6528_v40 = vpop.f32.mrf.mxu3  ;;  %v6795_v61 = vpop.f32.mrf.mxu2 }
0x1191   : > { %11717 = vmatmul.msk.f32.gmra.mxu0 %vm6553_vm12, %v6528_v40  ;;  %11762 = vmatmul.msk.f32.gmra.mxu1 %vm6553_vm12, %v6795_v61  ;;  %v11949_v40 = vld [vmem:[%s18263_s25 + $0x2f8] sm:$0xff] }
0x1192   : > { %v11989_v61 = vld [vmem:[%s18263_s25 + $0x338] sm:$0xff] }
0x1195   : > { %11746 = vmatmul.msk.f32.gmra.mxu2 %vm1189_vm2, %v15789_v45  ;;  %v11982_v45 = vld [vmem:[%s18263_s25 + $0x300] sm:$0xff] }
0x1196   : > { %v16131_v29 = vpop.f32.mrf.mxu0  ;;  %8782 = vperm.xlu0 %12431, %v11982_v45   ;;  %8447 = vperm.xlu2 %12433, %v11946_v42   ;;  %v12369_v45 = vld [vmem:[%s18262_s24 + $0x130] sm:$0xf0] }
0x1197   : > { %8817 = vperm.xlu1 %12432, %v11989_v61   ;;  %v11812_v61 = vld [vmem:[%s18262_s24 + $0xc8] sm:$0xf] }
0x1198   : > { %v6531_v53 = vpop.f32.mrf.mxu3  ;;  %v6798_v34 = vpop.f32.mrf.mxu2 }
0x1199   : > { %11718 = vmatmul.msk.f32.gmra.mxu0 %vm6553_vm12, %v6531_v53  ;;  %11763 = vmatmul.msk.f32.gmra.mxu1 %vm6553_vm12, %v6798_v34  ;;  %v11821_v34 = vor.u32 %v12353_v15, %v11820_v27  ;;  %v11844_v27 = vld [vmem:[%s18262_s24 + $0xcc] sm:$0xf] }
0x119b   : > { %7264 = vmatpush.bf16.msra.mxu3 %v11821_v34  ;;  %v11908_v34 = vld [vmem:[%s18262_s24 + $0xd0] sm:$0xf] }
0x119d   : > { %11747 = vmatmul.msk.f32.gmra.mxu2 %vm1189_vm2, %v15808_v43  ;;  %v11985_v43 = vld [vmem:[%s18263_s25 + $0x318] sm:$0xff] }
0x119e   : > { %v16146_v21 = vpop.f32.mrf.mxu0  ;;  %8797 = vperm.xlu0 %12431, %v11985_v43   ;;  %8462 = vperm.xlu2 %12433, %v11949_v40   ;;  %v11816_v43 = vld [vmem:[%s18262_s24 + $0xf0] sm:$0xf]  ;;  %v11997_v40 = vld [vmem:[%s18263_s25 + $0x378] sm:$0xff] }
0x11a0   : > { %v6534_v60 = vpop.f32.mrf.mxu3  ;;  %v6801_v30 = vpop.f32.mrf.mxu2 }
0x11a1   : > { %11719 = vmatmul.msk.f32.gmra.mxu0 %vm6553_vm12, %v6534_v60  ;;  %11764 = vmatmul.msk.f32.gmra.mxu1 %vm6553_vm12, %v6801_v30  ;;  %v11853_v60 = vor.u32 %v12361_v50, %v11852_v47  ;;  %v11917_v30 = vor.u32 %v12369_v45, %v11916_v12  ;;  %v12359_v47 = vld [vmem:[%s18262_s24 + $0xdc] sm:$0xf0]  ;;  %v12367_v50 = vld [vmem:[%s18262_s24 + $0xe0] sm:$0xf0] }
0x11a2   : > { %v11845_v12 = vor.u32 %v12359_v47, %v11844_v27  ;;  %v11909_v45 = vor.u32 %v12367_v50, %v11908_v34  ;;  %v11836_v27 = vld [vmem:[%s18262_s24 + $0x7c] sm:$0xf]  ;;  %v12357_v34 = vld [vmem:[%s18262_s24 + $0x8c] sm:$0xf0]  ;;  %v11900_v50 = vld [vmem:[%s18262_s24 + $0x80] sm:$0xf] }
0x11a3   : > { %7708 = vmatpush.bf16.msrb.mxu0 %v11853_v60  ;;  %8183 = vmatpush.bf16.msrb.mxu2 %v11917_v30 }
0x11a5   : > { %11748 = vmatmul.msk.f32.gmra.mxu2 %vm1189_vm2, %v15827_v46  ;;  %v11988_v46 = vld [vmem:[%s18263_s25 + $0x330] sm:$0xff] }
0x11a6   : > { %v16161_v23 = vpop.f32.mrf.mxu0  ;;  %8812 = vperm.xlu0 %12431, %v11988_v46   ;;  %v12360_v46 = vld [vmem:[%s18262_s24 + $0x104] sm:$0xf0] }
0x11a8   : > { %v6537_v54 = vpop.f32.mrf.mxu3  ;;  %v6804_v2 = vpop.f32.mrf.mxu2 }
0x11a9   : > { %11720 = vmatmul.msk.f32.gmra.mxu0 %vm6553_vm12, %v6537_v54  ;;  %11765 = vmatmul.msk.f32.gmra.mxu1 %vm6553_vm12, %v6804_v2  ;;  %v12352_v54 = vld [vmem:[%s18262_s24 + $0x100] sm:$0xf0]  ;;  %v11848_v2 = vld [vmem:[%s18262_s24 + $0xf4] sm:$0xf] }
0x11aa   : > { %v11817_v0 = vor.u32 %v12352_v54, %v11816_v43  ;;  %v11849_v42 = vor.u32 %v12360_v46, %v11848_v2  ;;  %v11840_v43 = vld [vmem:[%s18262_s24 + $0xa4] sm:$0xf]  ;;  %v16294_v54 = vpop.permute.xlu0 %7459  ;;  %v11904_v46 = vld [vmem:[%s18262_s24 + $0xa8] sm:$0xf] }
0x11ac   : > { %7265 = vmatpush.bf16.msra.mxu3 %v11817_v0  ;;  %7709 = vmatpush.bf16.msrb.mxu0 %v11849_v42  ;;  %v12358_v0 = vld [vmem:[%s18262_s24 + $0xb4] sm:$0xf0] }
0x11ad   : > { %11749 = vmatmul.msk.f32.gmra.mxu2 %vm1189_vm2, %v15846_v11 }
0x11ae   : > { %v16187_v11 = vpop.f32.mrf.mxu0  ;;  %8827 = vperm.xlu0 %12431, %v11991_v63   ;;  %v11984_v63 = vld [vmem:[%s18263_s25 + $0x310] sm:$0xff] }
0x11af   : > { %8792 = vperm.xlu2 %12433, %v11984_v63   ;;  %v11995_v63 = vld [vmem:[%s18263_s25 + $0x368] sm:$0xff] }
0x11b0   : > { %v6540_v24 = vpop.f32.mrf.mxu3  ;;  %v6807_v1 = vpop.f32.mrf.mxu2  ;;  %7710 = vmatpush.bf16.msrb.mxu0 %v11845_v12  ;;  %v12365_v12 = vld [vmem:[%s18262_s24 + $0x90] sm:$0xf0] }
0x11b1   : > { %11721 = vmatmul.msk.f32.gmra.mxu0 %vm6553_vm12, %v6540_v24  ;;  %11766 = vmatmul.msk.f32.gmra.mxu1 %vm6553_vm12, %v6807_v1  ;;  %v11912_v24 = vld [vmem:[%s18262_s24 + $0xf8] sm:$0xf]  ;;  %v12368_v1 = vld [vmem:[%s18262_s24 + $0x108] sm:$0xf0] }
0x11b2   : > { %v11913_v33 = vor.u32 %v12368_v1, %v11912_v24  ;;  %v12366_v24 = vld [vmem:[%s18262_s24 + $0xb8] sm:$0xf0]  ;;  %v11841_v1 = vor.u32 %v12358_v0, %v11840_v43  ;;  %v11896_v0 = vld [vmem:[%s18262_s24 + $0x58] sm:$0xf] }
0x11b3   : > { %v11905_v42 = vor.u32 %v12366_v24, %v11904_v46  ;;  %v12364_v46 = vld [vmem:[%s18262_s24 + $0x68] sm:$0xf0] }
0x11b4   : > { %8184 = vmatpush.bf16.msrb.mxu2 %v11913_v33  ;;  %v11987_v33 = vld [vmem:[%s18263_s25 + $0x328] sm:$0xff]  ;;  %7711 = vmatpush.bf16.msrb.mxu0 %v11841_v1 }
0x11b5   : > { %11750 = vmatmul.msk.f32.gmra.mxu2 %vm1189_vm2, %v15865_v20  ;;  %v11994_v20 = vld [vmem:[%s18263_s25 + $0x360] sm:$0xff] }
0x11b6   : > { %8842 = vperm.xlu0 %12431, %v11994_v20   ;;  %v16213_v53 = vpop.f32.mrf.mxu0  ;;  %v12351_v20 = vld [vmem:[%s18262_s24 + $0xd8] sm:$0xf0] }
0x11b7   : > { %v11813_v15 = vor.u32 %v12351_v20, %v11812_v61  ;;  %8807 = vperm.xlu2 %12433, %v11987_v33   ;;  %v11804_v61 = vld [vmem:[%s18262_s24 + $0x78] sm:$0xf]  ;;  %v12349_v20 = vld [vmem:[%s18262_s24 + $0x88] sm:$0xf0]  ;;  %v11990_v33 = vld [vmem:[%s18263_s25 + $0x340] sm:$0xff] }
0x11b8   : > { %v6543_v36 = vpop.f32.mrf.mxu3  ;;  %v6810_v59 = vpop.f32.mrf.mxu2  ;;  %8185 = vmatpush.bf16.msrb.mxu2 %v11909_v45  ;;  %v11805_v47 = vor.u32 %v12349_v20, %v11804_v61  ;;  %v11837_v45 = vor.u32 %v12357_v34, %v11836_v27  ;;  %v12003_v61 = vld [vmem:[%s18263_s25 + $0x3a8] sm:$0xff]  ;;  %v12347_v27 = vld [vmem:[%s18262_s24 + $0x38] sm:$0xf0] }
0x11b9   : > { %11722 = vmatmul.msk.f32.gmra.mxu0 %vm6553_vm12, %v6543_v36  ;;  %11767 = vmatmul.msk.f32.gmra.mxu1 %vm6553_vm12, %v6810_v59  ;;  %v11992_v36 = vld [vmem:[%s18263_s25 + $0x350] sm:$0xff]  ;;  %v16256_v59 = vpop.permute.xlu1 %7469  ;;  %v11796_v20 = vld [vmem:[%s18262_s24 + $0x28] sm:$0xf] }
0x11ba   : > { %8832 = vperm.xlu1 %12432, %v11992_v36   ;;  %7266 = vmatpush.bf16.msra.mxu3 %v11813_v15  ;;  %v16311_v36 = vpop.permute.xlu2 %7479 }
0x11bb   : > { %7712 = vmatpush.bf16.msrb.mxu0 %v11837_v45  ;;  %v11892_v45 = vld [vmem:[%s18262_s24 + $0x30] sm:$0xf] }
0x11bc   : > { %8186 = vmatpush.bf16.msrb.mxu2 %v11905_v42  ;;  %v11897_v42 = vor.u32 %v12364_v46, %v11896_v0  ;;  %v12354_v46 = vld [vmem:[%s18262_s24 + $0x14] sm:$0xf0] }
0x11bd   : > { %11751 = vmatmul.msk.f32.gmra.mxu2 %vm1189_vm2, %v15884_v17 }
0x11be   : > { %8857 = vperm.xlu0 %12431, %v11997_v40   ;;  %v16281_v60 = vpop.f32.mrf.mxu0  ;;  %v12000_v40 = vld [vmem:[%s18263_s25 + $0x390] sm:$0xff] }
0x11bf   : > { %8822 = vperm.xlu2 %12433, %v11990_v33  }
0x11c0   : > { %v6546_v9 = vpop.f32.mrf.mxu3  ;;  %v6813_v17 = vpop.f32.mrf.mxu2 }
0x11c1   : > { %11723 = vmatmul.msk.f32.gmra.mxu0 %vm6553_vm12, %v6546_v9  ;;  %11768 = vmatmul.msk.f32.gmra.mxu1 %vm6553_vm12, %v6813_v17  ;;  %v11808_v9 = vld [vmem:[%s18262_s24 + $0xa0] sm:$0xf]  ;;  %v12350_v17 = vld [vmem:[%s18262_s24 + $0xb0] sm:$0xf0]  ;;  %v16327_v15 = vpop.permute.xlu1 %7489 }
0x11c2   : > { %v11809_v2 = vor.u32 %v12350_v17, %v11808_v9  ;;  %18461 = vst [vmem:[#allocation20_spill] sm:$0xff] %v16327_v15  ;;  %8847 = vperm.xlu1 %12432, %v11995_v63   ;;  %v12348_v9 = vld [vmem:[%s18262_s24 + $0x60] sm:$0xf0]  ;;  %v11832_v17 = vld [vmem:[%s18262_s24 + $0x54] sm:$0xf]  ;;  %v16381_v34 = vpop.permute.xlu2 %7494 }
0x11c3   : > { %v11998_v63 = vld [vmem:[%s18263_s25 + $0x380] sm:$0xff]  ;;  %18462 = vst [vmem:[#allocation13_spill] sm:$0xff] %v16381_v34 }
0x11c4   : > { %7267 = vmatpush.bf16.msra.mxu3 %v11809_v2  ;;  %v12356_v2 = vld [vmem:[%s18262_s24 + $0x64] sm:$0xf0] }
0x11c5   : > { %11752 = vmatmul.msk.f32.gmra.mxu2 %vm1189_vm2, %v15903_v35  ;;  %v11833_v1 = vor.u32 %v12356_v2, %v11832_v17  ;;  %v11792_v17 = vld [vmem:[%s18262_s24] sm:$0xf]  ;;  %v11824_v2 = vld [vmem:[%s18262_s24 + $0x4] sm:$0xf] }
0x11c6   : > { %8872 = vperm.xlu0 %12431, %v12000_v40   ;;  %v16357_v24 = vpop.f32.mrf.mxu0  ;;  %v16365_v40 = vpop.permute.xlu0 %7484  ;;  %v11825_v33 = vor.u32 %v12354_v46, %v11824_v2  ;;  %v12007_v46 = vld [vmem:[%s18263_s25 + $0x3c8] sm:$0xff] }
0x11c7   : > { %7713 = vmatpush.bf16.msrb.mxu0 %v11833_v1  ;;  %v11888_v1 = vld [vmem:[%s18262_s24 + $0x8] sm:$0xf] }
0x11c8   : > { %v6549_v35 = vpop.f32.mrf.mxu3  ;;  %v6816_v30 = vpop.f32.mrf.mxu2  ;;  %7268 = vmatpush.bf16.msra.mxu3 %v11805_v47  ;;  %v11828_v47 = vld [vmem:[%s18262_s24 + $0x2c] sm:$0xf] }
0x11c9   : > { %11724 = vmatmul.msk.f32.gmra.mxu0 %vm6553_vm12, %v6549_v35  ;;  %11769 = vmatmul.msk.f32.gmra.mxu1 %vm6553_vm12, %v6816_v30  ;;  %v11901_v35 = vor.u32 %v12365_v12, %v11900_v50  ;;  %v11800_v30 = vld [vmem:[%s18262_s24 + $0x50] sm:$0xf]  ;;  %v11797_v50 = vor.u32 %v12347_v27, %v11796_v20  ;;  %v12355_v12 = vld [vmem:[%s18262_s24 + $0x3c] sm:$0xf0]  ;;  %v12001_v20 = vld [vmem:[%s18263_s25 + $0x398] sm:$0xff] }
0x11ca   : > { %v11801_v43 = vor.u32 %v12348_v9, %v11800_v30  ;;  %8862 = vperm.xlu1 %12432, %v11998_v63   ;;  %v12006_v27 = vld [vmem:[%s18263_s25 + $0x3c0] sm:$0xff] }
0x11cb   : > { %8187 = vmatpush.bf16.msrb.mxu2 %v11901_v35  ;;  %v12363_v35 = vld [vmem:[%s18262_s24 + $0x40] sm:$0xf0] }
0x11cc   : > { %7269 = vmatpush.bf16.msra.mxu3 %v11801_v43  ;;  %v11893_v30 = vor.u32 %v12363_v35, %v11892_v45  ;;  %v12346_v43 = vld [vmem:[%s18262_s24 + $0x10] sm:$0xf0] }
0x11cd   : > { %11753 = vmatmul.msk.f32.gmra.mxu2 %vm1189_vm2, %v15925_v41  ;;  %v11793_v0 = vor.u32 %v12346_v43, %v11792_v17 }
0x11ce   : > { %8887 = vperm.xlu0 %12431, %v12003_v61   ;;  %v11993_v61 = vld [vmem:[%s18263_s25 + $0x358] sm:$0xff] }
0x11cf   : > { %8188 = vmatpush.bf16.msrb.mxu2 %v11897_v42  ;;  %v12362_v42 = vld [vmem:[%s18262_s24 + $0x18] sm:$0xf0]  ;;  %8837 = vperm.xlu2 %12433, %v11993_v61  }
0x11d0   : > { %v6819_v41 = vpop.f32.mrf.mxu2  ;;  %7270 = vmatpush.bf16.msra.mxu3 %v11797_v50  ;;  %v11889_v63 = vor.u32 %v12362_v42, %v11888_v1  ;;  %v16426_v50 = vpop.permute.xlu0 %7499  ;;  %v12012_v1 = vld [vmem:[%s18263_s25 + $0x3f0] sm:$0xff] }
0x11d1   : > { %11770 = vmatmul.msk.f32.gmra.mxu1 %vm6553_vm12, %v6819_v41  ;;  %v11829_v41 = vor.u32 %v12355_v12, %v11828_v47  ;;  %v16422_v47 = vpop.f32.mrf.mxu0  ;;  %18464 = vst [vmem:[#allocation18_spill] sm:$0xff] %v16426_v50  ;;  %v16428_v12 = vpop.permute.xlu2 %7509 }
0x11d2   : > { %8877 = vperm.xlu1 %12432, %v12001_v20   ;;  %18465 = vst [vmem:[#allocation17_spill] sm:$0xff] %v16428_v12  ;;  %v12002_v20 = vld [vmem:[%s18263_s25 + $0x3a0] sm:$0xff] }
0x11d3   : > { %7714 = vmatpush.bf16.msrb.mxu0 %v11829_v41  ;;  %8189 = vmatpush.bf16.msrb.mxu2 %v11893_v30  ;;  %v11996_v41 = vld [vmem:[%s18263_s25 + $0x370] sm:$0xff] }
0x11d4   : > { %7271 = vmatpush.bf16.msra.mxu3 %v11793_v0  ;;  %v12004_v30 = vld [vmem:[%s18263_s25 + $0x3b0] sm:$0xff]  ;;  %v11999_v0 = vld [vmem:[%s18263_s25 + $0x388] sm:$0xff] }
0x11d5   : > { %11754 = vmatmul.msk.f32.gmra.mxu2 %vm1189_vm2, %v15944_v18  ;;  %v16392_v18 = vpop.permute.xlu1 %7504 }
0x11d6   : > { %18463 = vst [vmem:[#allocation16_spill] sm:$0xff] %v16392_v18  ;;  %8902 = vperm.xlu0 %12431, %v12006_v27   ;;  %v12010_v27 = vld [vmem:[%s18263_s25 + $0x3e0] sm:$0xff] }
0x11d7   : > { %7715 = vmatpush.bf16.msrb.mxu0 %v11825_v33  ;;  %8190 = vmatpush.bf16.msrb.mxu2 %v11889_v63 }
0x11d8   : > { %v6822_v9 = vpop.f32.mrf.mxu2  ;;  %8852 = vperm.xlu2 %12433, %v11996_v41   ;;  %v16446_v17 = vpop.permute.xlu0 %7514 }
0x11d9   : > { %11771 = vmatmul.msk.f32.gmra.mxu1 %vm6553_vm12, %v6822_v9  ;;  %v16444_v9 = vpop.f32.mrf.mxu0  ;;  %18467 = vst [vmem:[#allocation28_spill] sm:$0xff] %v16446_v17  ;;  %v16449_v2 = vpop.permute.xlu2 %7524  ;;  %v12055_v17 = vld [vmem:[%s18263_s25 + $0x448] sm:$0xff] }
0x11da   : > { %8892 = vperm.xlu1 %12432, %v12004_v30   ;;  %18468 = vst [vmem:[#allocation15_spill] sm:$0xff] %v16449_v2 }
0x11dd   : > { %11755 = vmatmul.msk.f32.gmra.mxu2 %vm1189_vm2, %v15963_v5  ;;  %v16431_v35 = vpop.permute.xlu1 %7519  ;;  %v12009_v5 = vld [vmem:[%s18263_s25 + $0x3d8] sm:$0xff] }
0x11de   : > { %18466 = vst [vmem:[#allocation19_spill] sm:$0xff] %v16431_v35  ;;  %8917 = vperm.xlu0 %12431, %v12009_v5   ;;  %v12047_v5 = vld [vmem:[%s18263_s25 + $0x408] sm:$0xff] }
0x11e0   : > { %v6825_v45 = vpop.f32.mrf.mxu2  ;;  %8867 = vperm.xlu2 %12433, %v11999_v0   ;;  %v16465_v61 = vpop.permute.xlu0 %7529 }
0x11e1   : > { %11772 = vmatmul.msk.f32.gmra.mxu1 %vm6553_vm12, %v6825_v45  ;;  %v16462_v33 = vpop.f32.mrf.mxu0  ;;  %18470 = vst [vmem:[#allocation14_spill] sm:$0xff] %v16465_v61  ;;  %v18471_v45 = vld [vmem:[#allocation47_spill] sm:$0xff]  ;;  %v16475_v30 = vpop.permute.xlu2 %7539 }
0x11e2   : > { %8907 = vperm.xlu1 %12432, %v12007_v46   ;;  %v7088_v41 = vsub.f32 %v18471_v45, %v16000_v10  ;;  %18472 = vst [vmem:[#allocation24_spill] sm:$0xff] %v16475_v30 }
0x11e5   : > { %11756 = vmatmul.msk.f32.gmra.mxu2 %vm1189_vm2, %v15982_v4  ;;  %v16457_v4 = vpop.permute.xlu1 %7534 }
0x11e6   : > { %18469 = vst [vmem:[#allocation26_spill] sm:$0xff] %v16457_v4  ;;  %8932 = vperm.xlu0 %12431, %v12012_v1  }
0x11e8   : > { %v6828_v43 = vpop.f32.mrf.mxu2  ;;  %8882 = vperm.xlu2 %12433, %v12002_v20   ;;  %v12005_v20 = vld [vmem:[%s18263_s25 + $0x3b8] sm:$0xff] }
0x11e9   : > { %11773 = vmatmul.msk.f32.gmra.mxu1 %vm6553_vm12, %v6828_v43  ;;  %v18473_v43 = vld [vmem:[#allocation46_spill] sm:$0xff]  ;;  %v16488_v45 = vpop.f32.mrf.mxu0 }
0x11ea   : > { %v7089_v0 = vsub.f32 %v18473_v43, %v16014_v44  ;;  %8922 = vperm.xlu1 %12432, %v12010_v27   ;;  %v16492_v44 = vpop.permute.xlu0 %7544  ;;  %v18478_v43 = vld [vmem:[#allocation45_spill] sm:$0xff] }
0x11eb   : > { %18475 = vst [vmem:[#allocation43_spill] sm:$0xff] %v16492_v44 }
0x11ed   : > { %v16482_v1 = vpop.permute.xlu1 %7549 }
0x11ee   : > { %v6992_v42 = vpop.f32.mrf.mxu1  ;;  %18474 = vst [vmem:[#allocation27_spill] sm:$0xff] %v16482_v1  ;;  %9262 = vperm.xlu0 %12431, %v12047_v5   ;;  %v12008_v5 = vld [vmem:[%s18263_s25 + $0x3d0] sm:$0xff] }
0x11ef   : > { %v7120_v46 = vmul.f32 %v7088_v41, %v6992_v42  ;;  %v12013_v42 = vld [vmem:[%s18263_s25 + $0x3f8] sm:$0xff] }
0x11f0   : > { %v6831_v63 = vpop.f32.mrf.mxu2  ;;  %8897 = vperm.xlu2 %12433, %v12005_v20   ;;  %v18479_v20 = vld [vmem:[#allocation44_spill] sm:$0xff] }
0x11f1   : > { %11774 = vmatmul.msk.f32.gmra.mxu1 %vm6553_vm12, %v6831_v63  ;;  %v7152_v2 = vmax.f32 %v7120_v46, 0.0  ;;  %v12048_v46 = vld [vmem:[%s18263_s25 + $0x410] sm:$0xff] }
0x11f2   : > { %8937 = vperm.xlu1 %12432, %v12013_v42   ;;  %v7091_v42 = vsub.f32 %v18479_v20, %v16042_v25  ;;  %v12011_v25 = vld [vmem:[%s18263_s25 + $0x3e8] sm:$0xff] }
0x11f5   : > { %v16505_v27 = vpop.permute.xlu1 %7564 }
0x11f6   : > { %v6995_v63 = vpop.f32.mrf.mxu1  ;;  %18477 = vst [vmem:[#allocation38_spill] sm:$0xff] %v16505_v27 }
0x11f7   : > { %v7121_v4 = vmul.f32 %v7089_v0, %v6995_v63  ;;  %v7090_v0 = vsub.f32 %v18478_v43, %v16028_v6  ;;  %v16516_v63 = vpop.f32.mrf.mxu0 }
0x11f8   : > { %v6834_v61 = vpop.f32.mrf.mxu2  ;;  %8912 = vperm.xlu2 %12433, %v12008_v5  }
0x11f9   : > { %v7153_v10 = vmax.f32 %v7121_v4, 0.0  ;;  %11775 = vmatmul.msk.f32.gmra.mxu1 %vm6553_vm12, %v6834_v61  ;;  %v12050_v4 = vld [vmem:[%s18263_s25 + $0x420] sm:$0xff]  ;;  %v16502_v61 = vpop.permute.xlu2 %7554 }
0x11fa   : > { %18476 = vst [vmem:[#allocation25_spill] sm:$0xff] %v16502_v61  ;;  %9277 = vperm.xlu0 %12431, %v12050_v4   ;;  %9267 = vperm.xlu1 %12432, %v12048_v46  }
0x11fb   : > { %v16490_v30 = vpack.c.bf16 %v7153_v10, %v7152_v2  ;;  %v12053_v10 = vld [vmem:[%s18263_s25 + $0x438] sm:$0xff] }
0x11fd   : > { %7272 = vmatmul.bf16.vlgmr.msra.gmra.mxu3 %v16490_v30  ;;  %7716 = vmatmul.bf16.vlgmr.msrb.gmra.mxu0 %v16490_v30  ;;  %v16528_v44 = vpop.permute.xlu1 %7579 }
0x11fe   : > { %8191 = vmatmul.bf16.vlgmr.msrb.gmra.mxu2 %v16490_v30  ;;  %v6998_v2 = vpop.f32.mrf.mxu1  ;;  %18482 = vst [vmem:[#allocation46_spill] sm:$0xff] %v16528_v44 }
0x11ff   : > { %v7122_v4 = vmul.f32 %v7090_v0, %v6998_v2  ;;  %v12056_v0 = vld [vmem:[%s18263_s25 + $0x450] sm:$0xff]  ;;  %v16543_v46 = vpop.f32.mrf.mxu0 }
0x1200   : > { %v6837_v41 = vpop.f32.mrf.mxu2  ;;  %8927 = vperm.xlu2 %12433, %v12011_v25   ;;  %v12054_v25 = vld [vmem:[%s18263_s25 + $0x440] sm:$0xff] }
0x1201   : > { %11776 = vmatmul.msk.f32.gmra.mxu1 %vm6553_vm12, %v6837_v41  ;;  %v16523_v41 = vpop.permute.xlu0 %7559  ;;  %v16525_v5 = vpop.permute.xlu2 %7569  ;;  %v7154_v61 = vmax.f32 %v7122_v4, 0.0  ;;  %v18485_v4 = vld [vmem:[#allocation42_spill] sm:$0xff] }
0x1202   : > { %18480 = vst [vmem:[#allocation33_spill] sm:$0xff] %v16523_v41  ;;  %9292 = vperm.xlu0 %12431, %v12053_v10   ;;  %v12049_v41 = vld [vmem:[%s18263_s25 + $0x418] sm:$0xff] }
0x1203   : > { %18481 = vst [vmem:[#allocation47_spill] sm:$0xff] %v16525_v5 }
0x1206   : > { %v7001_v27 = vpop.f32.mrf.mxu1 }
0x1207   : > { %v7123_v6 = vmul.f32 %v7091_v42, %v7001_v27  ;;  %v12051_v27 = vld [vmem:[%s18263_s25 + $0x428] sm:$0xff]  ;;  %v12046_v42 = vld [vmem:[%s18263_s25 + $0x400] sm:$0xff] }
0x1208   : > { %v6840_v43 = vpop.f32.mrf.mxu2  ;;  %9282 = vperm.xlu1 %12432, %v12051_v27   ;;  %9257 = vperm.xlu2 %12433, %v12046_v42   ;;  %v12059_v27 = vld [vmem:[%s18263_s25 + $0x468] sm:$0xff] }
0x1209   : > { %v7155_v1 = vmax.f32 %v7123_v6, 0.0  ;;  %11777 = vmatmul.msk.f32.gmra.mxu1 %vm6553_vm12, %v6840_v43  ;;  %v16549_v20 = vpop.permute.xlu2 %7584  ;;  %v7092_v6 = vsub.f32 %v18485_v4, %v16056_v8  ;;  %v16556_v43 = vpop.permute.xlu1 %7594 }
0x120a   : > { %9307 = vperm.xlu0 %12431, %v12056_v0   ;;  %18484 = vst [vmem:[#allocation44_spill] sm:$0xff] %v16549_v20  ;;  %v18487_v0 = vld [vmem:[#allocation41_spill] sm:$0xff]  ;;  %v16566_v8 = vpop.f32.mrf.mxu0 }
0x120b   : > { %v16533_v2 = vpack.c.bf16 %v7155_v1, %v7154_v61  ;;  %v16546_v1 = vpop.permute.xlu0 %7574  ;;  %18486 = vst [vmem:[#allocation42_spill] sm:$0xff] %v16556_v43 }
0x120c   : > { %18483 = vst [vmem:[#allocation45_spill] sm:$0xff] %v16546_v1 }
0x120d   : > { %7277 = vmatmul.bf16.gmra.mxu3 %v16533_v2  ;;  %7721 = vmatmul.bf16.gmra.mxu0 %v16533_v2 }
0x120e   : > { %8196 = vmatmul.bf16.gmra.mxu2 %v16533_v2  ;;  %v7004_v10 = vpop.f32.mrf.mxu1 }
0x120f   : > { %v7124_v20 = vmul.f32 %v7092_v6, %v7004_v10  ;;  %v12062_v10 = vld [vmem:[%s18263_s25 + $0x480] sm:$0xff]  ;;  %v12052_v6 = vld [vmem:[%s18263_s25 + $0x430] sm:$0xff] }
0x1210   : > { %v6843_v61 = vpop.f32.mrf.mxu2  ;;  %9297 = vperm.xlu1 %12432, %v12054_v25   ;;  %9272 = vperm.xlu2 %12433, %v12049_v41   ;;  %v18491_v25 = vld [vmem:[#allocation40_spill] sm:$0xff] }
0x1211   : > { %11778 = vmatmul.msk.f32.gmra.mxu1 %vm6553_vm12, %v6843_v61  ;;  %v7093_v61 = vsub.f32 %v18487_v0, %v16071_v37  ;;  %v7156_v42 = vmax.f32 %v7124_v20, 0.0  ;;  %v16576_v37 = vpop.permute.xlu2 %7599 }
0x1212   : > { %9322 = vperm.xlu0 %12431, %v12059_v27   ;;  %18489 = vst [vmem:[#allocation49_spill] sm:$0xff] %v16576_v37  ;;  %v7094_v27 = vsub.f32 %v18491_v25, %v16086_v28 }
0x1213   : > { %v16569_v5 = vpop.permute.xlu0 %7589 }
0x1214   : > { %18488 = vst [vmem:[#allocation41_spill] sm:$0xff] %v16569_v5 }
0x1216   : > { %v7007_v44 = vpop.f32.mrf.mxu1 }
0x1217   : > { %v7125_v1 = vmul.f32 %v7093_v61, %v7007_v44  ;;  %v12057_v44 = vld [vmem:[%s18263_s25 + $0x458] sm:$0xff]  ;;  %v12060_v61 = vld [vmem:[%s18263_s25 + $0x470] sm:$0xff] }
0x1218   : > { %v6846_v4 = vpop.f32.mrf.mxu2  ;;  %9312 = vperm.xlu1 %12432, %v12057_v44   ;;  %9287 = vperm.xlu2 %12433, %v12052_v6  }
0x1219   : > { %v7157_v43 = vmax.f32 %v7125_v1, 0.0  ;;  %11779 = vmatmul.msk.f32.gmra.mxu1 %vm6553_vm12, %v6846_v4  ;;  %v16586_v1 = vpop.permute.xlu1 %7609  ;;  %v12065_v4 = vld [vmem:[%s18263_s25 + $0x498] sm:$0xff] }
0x121a   : > { %18490 = vst [vmem:[#allocation50_spill] sm:$0xff] %v16586_v1  ;;  %9337 = vperm.xlu0 %12431, %v12062_v10  }
0x121b   : > { %v16574_v35 = vpack.c.bf16 %v7157_v43, %v7156_v42  ;;  %v16593_v43 = vpop.f32.mrf.mxu0  ;;  %v16597_v0 = vpop.permute.xlu0 %7604  ;;  %v18493_v42 = vld [vmem:[#allocation39_spill] sm:$0xff] }
0x121c   : > { %18492 = vst [vmem:[#allocation40_spill] sm:$0xff] %v16597_v0  ;;  %v7095_v44 = vsub.f32 %v18493_v42, %v16101_v22  ;;  %v12063_v22 = vld [vmem:[%s18263_s25 + $0x488] sm:$0xff] }
0x121d   : > { %7282 = vmatmul.bf16.gmra.mxu3 %v16574_v35  ;;  %7726 = vmatmul.bf16.gmra.mxu0 %v16574_v35 }
0x121e   : > { %8201 = vmatmul.bf16.gmra.mxu2 %v16574_v35  ;;  %v7010_v20 = vpop.f32.mrf.mxu1 }
0x121f   : > { %v7126_v10 = vmul.f32 %v7094_v27, %v7010_v20  ;;  %v12068_v20 = vld [vmem:[%s18263_s25 + $0x4b0] sm:$0xff] }
0x1220   : > { %v6849_v41 = vpop.f32.mrf.mxu2  ;;  %9327 = vperm.xlu1 %12432, %v12060_v61   ;;  %9302 = vperm.xlu2 %12433, %v12055_v17   ;;  %v11980_v61 = vld [vmem:[%s18262_s24 + $0x124] sm:$0xf] }
0x1221   : > { %11780 = vmatmul.msk.f32.gmra.mxu1 %vm6553_vm12, %v6849_v41  ;;  %v16607_v41 = vpop.permute.xlu2 %7897  ;;  %v16609_v25 = vpop.permute.xlu1 %7907  ;;  %v7158_v0 = vmax.f32 %v7126_v10, 0.0  ;;  %v12058_v10 = vld [vmem:[%s18263_s25 + $0x460] sm:$0xff] }
0x1222   : > { %9352 = vperm.xlu0 %12431, %v12065_v4   ;;  %v12377_v4 = vld [vmem:[%s18262_s24 + $0x134] sm:$0xf0] }
0x1223   : > { %v16627_v27 = vpop.permute.xlu0 %7902 }
0x1226   : > { %v7013_v37 = vpop.f32.mrf.mxu1 }
0x1227   : > { %v7127_v28 = vmul.f32 %v7095_v44, %v7013_v37  ;;  %v16620_v37 = vpop.f32.mrf.mxu0  ;;  %v11981_v44 = vor.u32 %v12377_v4, %v11980_v61  ;;  %v12071_v61 = vld [vmem:[%s18263_s25 + $0x4c8] sm:$0xff] }
0x1228   : > { %v6852_v6 = vpop.f32.mrf.mxu2  ;;  %9342 = vperm.xlu1 %12432, %v12063_v22   ;;  %9317 = vperm.xlu2 %12433, %v12058_v10   ;;  %v12066_v22 = vld [vmem:[%s18263_s25 + $0x4a0] sm:$0xff] }
0x1229   : > { %v7159_v5 = vmax.f32 %v7127_v28, 0.0  ;;  %11781 = vmatmul.msk.f32.gmra.mxu1 %vm6553_vm12, %v6852_v6  ;;  %v16630_v17 = vpop.permute.xlu2 %7912  ;;  %v16639_v42 = vpop.permute.xlu1 %7922  ;;  %v18494_v28 = vld [vmem:[#allocation37_spill] sm:$0xff] }
0x122a   : > { %9367 = vperm.xlu0 %12431, %v12068_v20   ;;  %v7096_v6 = vsub.f32 %v18494_v28, %v16116_v32  ;;  %8593 = vmatpush.bf16.msrb.mxu1 %v11981_v44  ;;  %v11976_v20 = vld [vmem:[%s18262_s24 + $0xfc] sm:$0xf]  ;;  %v18495_v32 = vld [vmem:[#allocation36_spill] sm:$0xff] }
0x122b   : > { %v16615_v12 = vpack.c.bf16 %v7159_v5, %v7158_v0  ;;  %v7097_v4 = vsub.f32 %v18495_v32, %v16131_v29  ;;  %v16662_v1 = vpop.permute.xlu0 %7917  ;;  %v12375_v29 = vld [vmem:[%s18262_s24 + $0xe4] sm:$0xf0]  ;;  %v12069_v32 = vld [vmem:[%s18263_s25 + $0x4b8] sm:$0xff] }
0x122d   : > { %7287 = vmatmul.bf16.gmra.mxu3 %v16615_v12  ;;  %7731 = vmatmul.bf16.gmra.mxu0 %v16615_v12 }
0x122e   : > { %8206 = vmatmul.bf16.gmra.mxu2 %v16615_v12  ;;  %v7016_v5 = vpop.f32.mrf.mxu1 }
0x122f   : > { %v7128_v44 = vmul.f32 %v7096_v6, %v7016_v5  ;;  %v16660_v28 = vpop.f32.mrf.mxu0 }
0x1230   : > { %v6855_v0 = vpop.f32.mrf.mxu2  ;;  %9357 = vperm.xlu1 %12432, %v12066_v22   ;;  %v12061_v22 = vld [vmem:[%s18263_s25 + $0x478] sm:$0xff] }
0x1231   : > { %11782 = vmatmul.msk.f32.gmra.mxu1 %vm6553_vm12, %v6855_v0  ;;  %v12376_v0 = vld [vmem:[%s18262_s24 + $0x10c] sm:$0xf0]  ;;  %v7160_v5 = vmax.f32 %v7128_v44, 0.0  ;;  %9332 = vperm.xlu2 %12433, %v12061_v22  }
0x1232   : > { %v11977_v10 = vor.u32 %v12376_v0, %v11976_v20  ;;  %9382 = vperm.xlu0 %12431, %v12071_v61   ;;  %v16671_v20 = vpop.permute.xlu2 %7927  ;;  %v16678_v61 = vpop.permute.xlu1 %7937 }
0x1233   : > { %18496 = vst [vmem:[#allocation39_spill] sm:$0xff] %v16678_v61 }
0x1234   : > { %8594 = vmatpush.bf16.msrb.mxu1 %v11977_v10 }
0x1236   : > { %v7019_v18 = vpop.f32.mrf.mxu1 }
0x1237   : > { %v7129_v50 = vmul.f32 %v7097_v4, %v7019_v18  ;;  %v11973_v18 = vor.u32 %v12375_v29, %v11972_v62  ;;  %v12374_v62 = vld [vmem:[%s18262_s24 + $0xbc] sm:$0xf0]  ;;  %v16695_v10 = vpop.f32.mrf.mxu0 }
0x1238   : > { %v6858_v34 = vpop.f32.mrf.mxu2  ;;  %9372 = vperm.xlu1 %12432, %v12069_v32   ;;  %v12064_v32 = vld [vmem:[%s18263_s25 + $0x490] sm:$0xff] }
0x1239   : > { %v7161_v6 = vmax.f32 %v7129_v50, 0.0  ;;  %11783 = vmatmul.msk.f32.gmra.mxu1 %vm6553_vm12, %v6858_v34  ;;  %v11968_v34 = vld [vmem:[%s18262_s24 + $0xac] sm:$0xf]  ;;  %v12074_v50 = vld [vmem:[%s18263_s25 + $0x4e0] sm:$0xff]  ;;  %9347 = vperm.xlu2 %12433, %v12064_v32  }
0x123a   : > { %8595 = vmatpush.bf16.msrb.mxu1 %v11973_v18  ;;  %v11969_v4 = vor.u32 %v12374_v62, %v11968_v34  ;;  %9397 = vperm.xlu0 %12431, %v12074_v50   ;;  %v16704_v18 = vpop.permute.xlu0 %7932  ;;  %v18497_v34 = vld [vmem:[#allocation35_spill] sm:$0xff]  ;;  %v16711_v50 = vpop.permute.xlu2 %7942 }
0x123b   : > { %v16676_v0 = vpack.c.bf16 %v7161_v6, %v7160_v5  ;;  %v11964_v5 = vld [vmem:[%s18262_s24 + $0x84] sm:$0xf]  ;;  %v12373_v6 = vld [vmem:[%s18262_s24 + $0x94] sm:$0xf0]  ;;  %v7098_v62 = vsub.f32 %v18497_v34, %v16146_v21  ;;  %18498 = vst [vmem:[#allocation37_spill] sm:$0xff] %v16711_v50  ;;  %v16727_v34 = vpop.permute.xlu1 %7952 }
0x123c   : > { %v11965_v22 = vor.u32 %v12373_v6, %v11964_v5  ;;  %v12372_v5 = vld [vmem:[%s18262_s24 + $0x6c] sm:$0xf0]  ;;  %v12077_v21 = vld [vmem:[%s18263_s25 + $0x4f8] sm:$0xff]  ;;  %18500 = vst [vmem:[#allocation36_spill] sm:$0xff] %v16727_v34 }
0x123d   : > { %7292 = vmatmul.bf16.gmra.mxu3 %v16676_v0  ;;  %7736 = vmatmul.bf16.gmra.mxu0 %v16676_v0  ;;  %v18499_v6 = vld [vmem:[#allocation34_spill] sm:$0xff] }
0x123e   : > { %8211 = vmatmul.bf16.gmra.mxu2 %v16676_v0  ;;  %v7022_v44 = vpop.f32.mrf.mxu1  ;;  %8596 = vmatpush.bf16.msrb.mxu1 %v11969_v4  ;;  %v12072_v4 = vld [vmem:[%s18263_s25 + $0x4d0] sm:$0xff] }
0x123f   : > { %v7130_v32 = vmul.f32 %v7098_v62, %v7022_v44  ;;  %v11957_v44 = vor.u32 %v12371_v56, %v11956_v48  ;;  %v16739_v62 = vpop.f32.mrf.mxu0 }
0x1240   : > { %v6861_v29 = vpop.f32.mrf.mxu2  ;;  %9387 = vperm.xlu1 %12432, %v12072_v4  }
0x1241   : > { %11784 = vmatmul.msk.f32.gmra.mxu1 %vm6553_vm12, %v6861_v29  ;;  %v11960_v29 = vld [vmem:[%s18262_s24 + $0x5c] sm:$0xf]  ;;  %v7162_v15 = vmax.f32 %v7130_v32, 0.0 }
0x1242   : > { %8597 = vmatpush.bf16.msrb.mxu1 %v11965_v22  ;;  %v7099_v22 = vsub.f32 %v18499_v6, %v16161_v23  ;;  %v11961_v50 = vor.u32 %v12372_v5, %v11960_v29  ;;  %9412 = vperm.xlu0 %12431, %v12077_v21   ;;  %v16743_v4 = vpop.permute.xlu0 %7947  ;;  %v12075_v29 = vld [vmem:[%s18263_s25 + $0x4e8] sm:$0xff]  ;;  %v16756_v48 = vpop.permute.xlu2 %7957  ;;  %v12070_v6 = vld [vmem:[%s18263_s25 + $0x4c0] sm:$0xff] }
0x1243   : > { %18501 = vst [vmem:[#allocation35_spill] sm:$0xff] %v16743_v4  ;;  %v16759_v5 = vpop.permute.xlu1 %7967 }
0x1244   : > { %18502 = vst [vmem:[#allocation34_spill] sm:$0xff] %v16756_v48 }
0x1245   : > { %18503 = vst [vmem:[#allocation51_spill] sm:$0xff] %v16759_v5 }
0x1246   : > { %v7025_v61 = vpop.f32.mrf.mxu1  ;;  %8598 = vmatpush.bf16.msrb.mxu1 %v11961_v50 }
0x1247   : > { %v7131_v55 = vmul.f32 %v7099_v22, %v7025_v61  ;;  %v12067_v61 = vld [vmem:[%s18263_s25 + $0x4a8] sm:$0xff]  ;;  %v18504_v22 = vld [vmem:[#allocation32_spill] sm:$0xff] }
0x1248   : > { %v6864_v39 = vpop.f32.mrf.mxu2  ;;  %9362 = vperm.xlu2 %12433, %v12067_v61   ;;  %9402 = vperm.xlu1 %12432, %v12075_v29   ;;  %v7100_v32 = vsub.f32 %v18504_v22, %v16187_v11  ;;  %v12073_v11 = vld [vmem:[%s18263_s25 + $0x4d8] sm:$0xff] }
0x1249   : > { %v7163_v23 = vmax.f32 %v7131_v55, 0.0  ;;  %11785 = vmatmul.msk.f32.gmra.mxu1 %vm6553_vm12, %v6864_v39  ;;  %v11952_v55 = vld [vmem:[%s18262_s24 + $0xc] sm:$0xf]  ;;  %v12370_v39 = vld [vmem:[%s18262_s24 + $0x1c] sm:$0xf0] }
0x124a   : > { %8599 = vmatpush.bf16.msrb.mxu1 %v11957_v44  ;;  %v11953_v56 = vor.u32 %v12370_v39, %v11952_v55  ;;  %v18505_v44 = vld [vmem:[#allocation31_spill] sm:$0xff]  ;;  %v16771_v55 = vpop.permute.xlu0 %7962  ;;  %v16773_v5 = vpop.permute.xlu2 %7972 }
0x124b   : > { %v16741_v50 = vpack.c.bf16 %v7163_v23, %v7162_v15  ;;  %v16767_v23 = vpop.f32.mrf.mxu0  ;;  %v7101_v61 = vsub.f32 %v18505_v44, %v16213_v53  ;;  %18506 = vst [vmem:[#allocation32_spill] sm:$0xff] %v16771_v55  ;;  %v16775_v4 = vpop.permute.xlu1 %7982 }
0x124c   : > { %18507 = vst [vmem:[#allocation31_spill] sm:$0xff] %v16773_v5 }
0x124d   : > { %7297 = vmatmul.bf16.gmra.mxu3 %v16741_v50  ;;  %7741 = vmatmul.bf16.gmra.mxu0 %v16741_v50  ;;  %18508 = vst [vmem:[#allocation52_spill] sm:$0xff] %v16775_v4 }
0x124e   : > { %8216 = vmatmul.bf16.gmra.mxu2 %v16741_v50  ;;  %v7028_v15 = vpop.f32.mrf.mxu1  ;;  %8600 = vmatpush.bf16.msrb.mxu1 %v11953_v56 }
0x124f   : > { %v7132_v29 = vmul.f32 %v7100_v32, %v7028_v15 }
0x1250   : > { %v6867_v21 = vpop.f32.mrf.mxu2  ;;  %9377 = vperm.xlu2 %12433, %v12070_v6  }
0x1251   : > { %11786 = vmatmul.msk.f32.gmra.mxu1 %vm6553_vm12, %v6867_v21  ;;  %v7164_v48 = vmax.f32 %v7132_v29, 0.0 }
0x1252   : > { %v16788_v22 = vpop.permute.xlu0 %7977  ;;  %v16790_v44 = vpop.permute.xlu2 %7987 }
0x1253   : > { %v16785_v53 = vpop.f32.mrf.mxu0  ;;  %18510 = vst [vmem:[#allocation54_spill] sm:$0xff] %v16788_v22  ;;  %v16798_v29 = vpop.permute.xlu1 %7997 }
0x1254   : > { %18509 = vst [vmem:[#allocation53_spill] sm:$0xff] %v16785_v53 }
0x1255   : > { %18511 = vst [vmem:[#allocation55_spill] sm:$0xff] %v16790_v44 }
0x1256   : > { %v7031_v39 = vpop.f32.mrf.mxu1 }
0x1257   : > { %v7133_v56 = vmul.f32 %v7101_v61, %v7031_v39  ;;  %v18514_v39 = vld [vmem:[#allocation30_spill] sm:$0xff] }
0x1258   : > { %v6870_v21 = vpop.f32.mrf.mxu2  ;;  %9392 = vperm.xlu2 %12433, %v12073_v11  }
0x1259   : > { %v7165_v34 = vmax.f32 %v7133_v56, 0.0  ;;  %11787 = vmatmul.msk.f32.gmra.mxu1 %vm6553_vm12, %v6870_v21  ;;  %v7103_v56 = vsub.f32 %v18514_v39, %v16357_v24 }
0x125a   : > { %v16804_v55 = vpop.permute.xlu0 %7992 }
0x125b   : > { %v16781_v6 = vpack.c.bf16 %v7165_v34, %v7164_v48  ;;  %v12076_v34 = vld [vmem:[%s18263_s25 + $0x4f0] sm:$0xff]  ;;  %v18512_v48 = vld [vmem:[#allocation29_spill] sm:$0xff]  ;;  %v16802_v22 = vpop.f32.mrf.mxu0  ;;  %18515 = vst [vmem:[#allocation30_spill] sm:$0xff] %v16804_v55 }
0x125c   : > { %v7102_v61 = vsub.f32 %v18512_v48, %v16281_v60  ;;  %18513 = vst [vmem:[#allocation29_spill] sm:$0xff] %v16798_v29  ;;  %v16809_v60 = vpop.permute.xlu2 %8002 }
0x125d   : > { %7302 = vmatmul.bf16.gmra.mxu3 %v16781_v6  ;;  %7746 = vmatmul.bf16.gmra.mxu0 %v16781_v6  ;;  %18516 = vst [vmem:[#allocation56_spill] sm:$0xff] %v16809_v60  ;;  %v7385_v60 = vlaneseq }
0x125e   : > { %8221 = vmatmul.bf16.gmra.mxu2 %v16781_v6  ;;  %v7034_v15 = vpop.f32.mrf.mxu1 }
0x125f   : > { %v7134_v21 = vmul.f32 %v7102_v61, %v7034_v15  ;;  %v7104_v15 = vsub.f32 %v15489_v16, %v16422_v47  ;;  %v16838_v47 = vshrl.u32 %v7385_v60, 7  ;;  %v7107_v60 = vsub.f32 %v15467_v58, %v16488_v45 }
0x1260   : > { %v6873_v32 = vpop.f32.mrf.mxu2  ;;  %9407 = vperm.xlu2 %12433, %v12076_v34   ;;  %v16811_v34 = vpop.permute.xlu1 %8012 }
0x1261   : > { %11788 = vmatmul.msk.f32.gmra.mxu1 %vm6553_vm12, %v6873_v32  ;;  %v7166_v32 = vmax.f32 %v7134_v21, 0.0  ;;  %18517 = vst [vmem:[#allocation57_spill] sm:$0xff] %v16811_v34  ;;  %vm7829_vm0 = vcmp.lt.s32.totalorder %v16838_v47, 7  ;;  %vm7387_vm1 = vcmp.lt.s32.totalorder %v16838_v47, 6  ;;  %vm8714_vm2 = vcmp.lt.s32.totalorder %v16838_v47, 1 }
0x1262   : > { %vm9189_vm3 = vcmp.lt.s32.totalorder %v16838_v47, 2 }
0x1264   : > { %v16825_v61 = vpop.permute.xlu2 %8017 }
0x1265   : > { %18519 = vst [vmem:[#allocation59_spill] sm:$0xff] %v16825_v61 }
0x1266   : > { %v7037_v11 = vpop.f32.mrf.mxu1 }
0x1267   : > { %v7135_v4 = vmul.f32 %v7103_v56, %v7037_v11 }
0x1268   : > { %v6876_v44 = vpop.f32.mrf.mxu2  ;;  %v16827_v56 = vpop.permute.xlu1 %8027 }
0x1269   : > { %v7167_v5 = vmax.f32 %v7135_v4, 0.0  ;;  %11789 = vmatmul.msk.f32.gmra.mxu1 %vm6553_vm12, %v6876_v44  ;;  %v16817_v4 = vpop.f32.mrf.mxu0  ;;  %v7105_v44 = vsub.f32 %v15482_v38, %v16444_v9  ;;  %18520 = vst [vmem:[#allocation60_spill] sm:$0xff] %v16827_v56 }
0x126b   : > { %v16807_v53 = vpack.c.bf16 %v7167_v5, %v7166_v32  ;;  %v16821_v5 = vpop.permute.xlu0 %8007 }
0x126c   : > { %18518 = vst [vmem:[#allocation58_spill] sm:$0xff] %v16821_v5  ;;  %v16840_v9 = vpop.permute.xlu2 %8032 }
0x126d   : > { %7307 = vmatmul.bf16.gmra.mxu3 %v16807_v53  ;;  %7751 = vmatmul.bf16.gmra.mxu0 %v16807_v53  ;;  %18523 = vst [vmem:[#allocation63_spill] sm:$0xff] %v16840_v9 }
0x126e   : > { %8226 = vmatmul.bf16.gmra.mxu2 %v16807_v53  ;;  %v7040_v24 = vpop.f32.mrf.mxu1 }
0x126f   : > { %v7136_v48 = vmul.f32 %v7104_v15, %v7040_v24 }
0x1270   : > { %v16844_v15 = vpop.permute.xlu1 %8042 }
0x1271   : > { %8601 = vmatmul.bf16.vlgmr.msrb.gmra.mxu1 %v16490_v30  ;;  %v7168_v11 = vmax.f32 %v7136_v48, 0.0  ;;  %18525 = vst [vmem:[#allocation65_spill] sm:$0xff] %v16844_v15 }
0x1273   : > { %v16833_v16 = vpop.permute.xlu0 %8022 }
0x1274   : > { %18522 = vst [vmem:[#allocation62_spill] sm:$0xff] %v16833_v16 }
0x1276   : > { %v7043_v39 = vpop.f32.mrf.mxu1 }
0x1277   : > { %v7137_v21 = vmul.f32 %v7105_v44, %v7043_v39  ;;  %v7106_v39 = vsub.f32 %v15475_v57, %v16462_v33  ;;  %v16860_v33 = vpop.permute.xlu2 %8047 }
0x1278   : > { %18527 = vst [vmem:[#allocation67_spill] sm:$0xff] %v16860_v33 }
0x1279   : > { %v7169_v32 = vmax.f32 %v7137_v21, 0.0 }
0x127a   : > { %v16829_v34 = vpop.f32.mrf.mxu0 }
0x127b   : > { %18521 = vst [vmem:[#allocation61_spill] sm:$0xff] %v16829_v34  ;;  %v16831_v29 = vpack.c.bf16 %v7169_v32, %v7168_v11  ;;  %v18311_v21 = vrot.slane %v16829_v34, 1  ;;  %v16857_v56 = vpop.permute.xlu0 %8037 }
0x127c   : > { %18526 = vst [vmem:[#allocation66_spill] sm:$0xff] %v16857_v56 }
0x127d   : > { %7312 = vmatmul.bf16.gmra.mxu3 %v16831_v29  ;;  %7756 = vmatmul.bf16.gmra.mxu0 %v16831_v29 }
0x127e   : > { %8231 = vmatmul.bf16.gmra.mxu2 %v16831_v29  ;;  %v7046_v38 = vpop.f32.mrf.mxu1 }
0x127f   : > { %v7138_v32 = vmul.f32 %v7106_v39, %v7046_v38  ;;  %v8308_v39 = vpop.permute.xlu1 %8307 }
0x1280   : > { %v16842_v24 = vpop.f32.mrf.mxu3 }
0x1281   : > { %18524 = vst [vmem:[#allocation64_spill] sm:$0xff] %v16842_v24  ;;  %v8192_v44 = vpop.f32.mrf.mxu2  ;;  %8606 = vmatmul.bf16.gmra.mxu1 %v16533_v2  ;;  %v7170_v57 = vmax.f32 %v7138_v32, 0.0 }
0x1282   : > { %v7719_v48 = vpop.f32.mrf.mxu0 }
0x1283   : > { %v7798_v11 = vrot.slane %v7719_v48, 1  ;;  %v18312_v48 = vrot.slane %v16842_v24, 2 }
0x1285   : > { %v7860_v15 = vsel %vm7829_vm0, %v18311_v21, %v7798_v11 }
0x1286   : > { %v7049_v9 = vpop.f32.mrf.mxu1  ;;  %v8055_v21 = vmul.f32 %v16607_v41, %v7860_v15 }
0x1287   : > { %v7139_v16 = vmul.f32 %v7107_v60, %v7049_v9 }
0x1288   : > { %v7275_v61 = vpop.f32.mrf.mxu3 }
0x1289   : > { %v7171_v5 = vmax.f32 %v7139_v16, 0.0  ;;  %v7354_v58 = vrot.slane %v7275_v61, 2  ;;  %v8194_v45 = vpop.f32.mrf.mxu2  ;;  %v8465_v61 = vmul.f32 %v8308_v39, %v8192_v44 }
0x128a   : > { %v7722_v38 = vpop.f32.mrf.mxu0 }
0x128b   : > { %v16863_v55 = vpack.c.bf16 %v7171_v5, %v7170_v57  ;;  %v7418_v9 = vsel %vm7387_vm1, %v18312_v48, %v7354_v58  ;;  %v7799_v60 = vrot.slane %v7722_v38, 1  ;;  %v16878_v38 = vpop.permute.xlu0 %8052  ;;  %v8323_v48 = vpop.permute.xlu1 %8322 }
0x128c   : > { %v7612_v32 = vmul.f32 %v16226_v7, %v7418_v9  ;;  %18529 = vst [vmem:[#allocation69_spill] sm:$0xff] %v16878_v38  ;;  %v8313_v9 = vpop.permute.xlu2 %8312 }
0x128d   : > { %v7859_v33 = vsel %vm7829_vm0, %v7798_v11, %v7799_v60  ;;  %7317 = vmatmul.bf16.gmra.mxu3 %v16863_v55  ;;  %7761 = vmatmul.bf16.gmra.mxu0 %v16863_v55  ;;  %v7108_v11 = vsub.f32 %v15458_v31, %v16516_v63 }
0x128e   : > { %v8087_v5 = vadd.f32 %v8055_v21, %v7612_v32  ;;  %8236 = vmatmul.bf16.gmra.mxu2 %v16863_v55  ;;  %v7052_v16 = vpop.f32.mrf.mxu1  ;;  %v8056_v39 = vmul.f32 %v16627_v27, %v7859_v33 }
0x1290   : > { %v7278_v57 = vpop.f32.mrf.mxu3  ;;  %v16876_v56 = vadd.f32 %v8465_v61, %v8087_v5  ;;  %v7109_v61 = vsub.f32 %v15447_v51, %v16543_v46  ;;  %v7140_v5 = vmul.f32 %v7108_v11, %v7052_v16 }
0x1291   : > { %v7355_v41 = vrot.slane %v7278_v57, 2  ;;  %v8197_v15 = vpop.f32.mrf.mxu2  ;;  %8611 = vmatmul.bf16.gmra.mxu1 %v16574_v35 }
0x1292   : > { %18528 = vst [vmem:[#allocation68_spill] sm:$0xff] %v16876_v56  ;;  %v7724_v7 = vpop.f32.mrf.mxu0  ;;  %v8466_v56 = vmul.f32 %v8313_v9, %v8194_v45 }
0x1293   : > { %v7417_v44 = vsel %vm7387_vm1, %v7354_v58, %v7355_v41  ;;  %v7800_v21 = vrot.slane %v7724_v7, 1  ;;  %v7172_v58 = vmax.f32 %v7140_v5, 0.0 }
0x1294   : > { %v7613_v32 = vmul.f32 %v16294_v54, %v7417_v44  ;;  %v8318_v54 = vpop.permute.xlu0 %8317 }
0x1295   : > { %v7858_v57 = vsel %vm7829_vm0, %v7799_v60, %v7800_v21 }
0x1296   : > { %v7055_v38 = vpop.f32.mrf.mxu1  ;;  %v8088_v31 = vadd.f32 %v8056_v39, %v7613_v32  ;;  %v8057_v45 = vmul.f32 %v16609_v25, %v7858_v57 }
0x1297   : > { %v7141_v63 = vmul.f32 %v7109_v61, %v7055_v38  ;;  %v8467_v38 = vmul.f32 %v8318_v54, %v8197_v15 }
0x1298   : > { %v7280_v24 = vpop.f32.mrf.mxu3  ;;  %v16891_v34 = vadd.f32 %v8466_v56, %v8088_v31  ;;  %v7111_v31 = vsub.f32 %v15425_v52, %v16593_v43 }
0x1299   : > { %v7173_v7 = vmax.f32 %v7141_v63, 0.0  ;;  %v7356_v27 = vrot.slane %v7280_v24, 2  ;;  %v8199_v46 = vpop.f32.mrf.mxu2  ;;  %v8328_v24 = vpop.permute.xlu2 %8327 }
0x129a   : > { %v7727_v33 = vpop.f32.mrf.mxu0  ;;  %v8468_v54 = vmul.f32 %v8323_v48, %v8199_v46 }
0x129b   : > { %v16893_v44 = vpack.c.bf16 %v7173_v7, %v7172_v58  ;;  %v7416_v51 = vsel %vm7387_vm1, %v7355_v41, %v7356_v27  ;;  %v7801_v60 = vrot.slane %v7727_v33, 1  ;;  %v16904_v41 = vpop.permute.xlu1 %8337 }
0x129c   : > { %v7614_v16 = vmul.f32 %v16193_v26, %v7416_v51  ;;  %v8333_v33 = vpop.permute.xlu0 %8332 }
0x129d   : > { %v7857_v56 = vsel %vm7829_vm0, %v7800_v21, %v7801_v60  ;;  %7322 = vmatmul.bf16.gmra.mxu3 %v16893_v44  ;;  %7766 = vmatmul.bf16.gmra.mxu0 %v16893_v44  ;;  %v7110_v21 = vsub.f32 %v15436_v49, %v16566_v8 }
0x129e   : > { %8241 = vmatmul.bf16.gmra.mxu2 %v16893_v44  ;;  %v7058_v11 = vpop.f32.mrf.mxu1  ;;  %v8089_v9 = vadd.f32 %v8057_v45, %v7614_v16  ;;  %v8058_v5 = vmul.f32 %v16630_v17, %v7857_v56 }
0x129f   : > { %v7142_v63 = vmul.f32 %v7110_v21, %v7058_v11 }
0x12a0   : > { %v7283_v39 = vpop.f32.mrf.mxu3  ;;  %v16906_v32 = vadd.f32 %v8467_v38, %v8089_v9 }
0x12a1   : > { %v7357_v25 = vrot.slane %v7283_v39, 2  ;;  %8616 = vmatmul.bf16.gmra.mxu1 %v16615_v12  ;;  %v8202_v58 = vpop.f32.mrf.mxu2  ;;  %v16919_v45 = vpop.permute.xlu2 %8342  ;;  %v7174_v17 = vmax.f32 %v7142_v63, 0.0 }
0x12a2   : > { %v7729_v26 = vpop.f32.mrf.mxu0  ;;  %v8469_v39 = vmul.f32 %v8328_v24, %v8202_v58 }
0x12a3   : > { %v7415_v61 = vsel %vm7387_vm1, %v7356_v27, %v7357_v25  ;;  %v7802_v15 = vrot.slane %v7729_v26, 1  ;;  %v16923_v38 = vpop.permute.xlu1 %8352 }
0x12a4   : > { %v7615_v57 = vmul.f32 %v16256_v59, %v7415_v61 }
0x12a5   : > { %v7856_v7 = vsel %vm7829_vm0, %v7801_v60, %v7802_v15 }
0x12a6   : > { %v7061_v51 = vpop.f32.mrf.mxu1  ;;  %v8090_v49 = vadd.f32 %v8058_v5, %v7615_v57  ;;  %v8059_v46 = vmul.f32 %v16662_v1, %v7856_v7  ;;  %v16936_v5 = vpop.permute.xlu0 %8347 }
0x12a7   : > { %v7143_v8 = vmul.f32 %v7111_v31, %v7061_v51  ;;  %v7112_v31 = vsub.f32 %v15413_v3, %v16620_v37  ;;  %v7113_v51 = vsub.f32 %v15399_v19, %v16660_v28 }
0x12a8   : > { %v7285_v27 = vpop.f32.mrf.mxu3  ;;  %v16921_v16 = vadd.f32 %v8468_v54, %v8090_v49 }
0x12a9   : > { %v7175_v59 = vmax.f32 %v7143_v8, 0.0  ;;  %v7358_v56 = vrot.slane %v7285_v27, 2  ;;  %v8204_v61 = vpop.f32.mrf.mxu2 }
0x12aa   : > { %v7732_v52 = vpop.f32.mrf.mxu0  ;;  %v8470_v27 = vmul.f32 %v8333_v33, %v8204_v61 }
0x12ab   : > { %v16925_v43 = vpack.c.bf16 %v7175_v59, %v7174_v17  ;;  %v7414_v60 = vsel %vm7387_vm1, %v7357_v25, %v7358_v56  ;;  %v7803_v48 = vrot.slane %v7732_v52, 1  ;;  %v16947_v58 = vpop.permute.xlu1 %8367 }
0x12ac   : > { %v7616_v11 = vmul.f32 %v16239_v13, %v7414_v60  ;;  %v16941_v13 = vpop.permute.xlu2 %8357 }
0x12ad   : > { %v7855_v9 = vsel %vm7829_vm0, %v7802_v15, %v7803_v48  ;;  %7327 = vmatmul.bf16.gmra.mxu3 %v16925_v43  ;;  %7771 = vmatmul.bf16.gmra.mxu0 %v16925_v43 }
0x12ae   : > { %8246 = vmatmul.bf16.gmra.mxu2 %v16925_v43  ;;  %v7064_v26 = vpop.f32.mrf.mxu1  ;;  %v8091_v21 = vadd.f32 %v8059_v46, %v7616_v11  ;;  %v8060_v7 = vmul.f32 %v16639_v42, %v7855_v9  ;;  %v16957_v11 = vpop.permute.xlu0 %8362 }
0x12af   : > { %v7144_v49 = vmul.f32 %v7112_v31, %v7064_v26  ;;  %v12385_v26 = vld [vmem:[%s18262_s24 + $0x138] sm:$0xf0]  ;;  %v12040_v31 = vld [vmem:[%s18262_s24 + $0x100] sm:$0xf] }
0x12b0   : > { %v7288_v25 = vpop.f32.mrf.mxu3  ;;  %v16938_v57 = vadd.f32 %v8469_v39, %v8091_v21  ;;  %v12044_v39 = vld [vmem:[%s18262_s24 + $0x128] sm:$0xf] }
0x12b1   : > { %v7359_v1 = vrot.slane %v7288_v25, 2  ;;  %8621 = vmatmul.bf16.gmra.mxu1 %v16676_v0  ;;  %v7176_v52 = vmax.f32 %v7144_v49, 0.0  ;;  %v8207_v60 = vpop.f32.mrf.mxu2  ;;  %v12045_v25 = vor.u32 %v12385_v26, %v12044_v39 }
0x12b2   : > { %v7734_v15 = vpop.f32.mrf.mxu0 }
0x12b3   : > { %v7413_v24 = vsel %vm7387_vm1, %v7358_v56, %v7359_v1  ;;  %v7804_v63 = vrot.slane %v7734_v15, 1  ;;  %v16978_v61 = vpop.permute.xlu1 %8382  ;;  %9068 = vmatpush.bf16.msrb.mxu3 %v12045_v25 }
0x12b4   : > { %v7617_v54 = vmul.f32 %v16311_v36, %v7413_v24  ;;  %v16965_v33 = vpop.permute.xlu2 %8372  ;;  %v12384_v24 = vld [vmem:[%s18262_s24 + $0x110] sm:$0xf0] }
0x12b5   : > { %v7854_v8 = vsel %vm7829_vm0, %v7803_v48, %v7804_v63 }
0x12b6   : > { %v7067_v17 = vpop.f32.mrf.mxu1  ;;  %v8092_v3 = vadd.f32 %v8060_v7, %v7617_v54  ;;  %v8061_v48 = vmul.f32 %v16671_v20, %v7854_v8  ;;  %v8471_v20 = vmul.f32 %v16904_v41, %v8207_v60  ;;  %v7114_v8 = vsub.f32 %v15385_v14, %v16695_v10  ;;  %v12383_v60 = vld [vmem:[%s18262_s24 + $0xe8] sm:$0xf0]  ;;  %v18531_v14 = vld [vmem:[#allocation12_spill] sm:$0xff] }
0x12b7   : > { %v7145_v37 = vmul.f32 %v7113_v51, %v7067_v17  ;;  %v12041_v51 = vor.u32 %v12384_v24, %v12040_v31  ;;  %v7115_v10 = vsub.f32 %v18531_v14, %v16739_v62  ;;  %v12382_v62 = vld [vmem:[%s18262_s24 + $0xc0] sm:$0xf0] }
0x12b8   : > { %v7290_v59 = vpop.f32.mrf.mxu3  ;;  %v16955_v56 = vadd.f32 %v8470_v27, %v8092_v3  ;;  %v17001_v3 = vpop.permute.xlu0 %8377 }
0x12b9   : > { %v7177_v46 = vmax.f32 %v7145_v37, 0.0  ;;  %v7360_v42 = vrot.slane %v7290_v59, 2  ;;  %v8209_v27 = vpop.f32.mrf.mxu2  ;;  %9069 = vmatpush.bf16.msrb.mxu3 %v12041_v51  ;;  %v18530_v59 = vld [vmem:[#allocation20_spill] sm:$0xff] }
0x12ba   : > { %v16959_v36 = vpop.f32.mrf.mxu0 }
0x12bb   : > { %v16961_v19 = vpack.c.bf16 %v7177_v46, %v7176_v52  ;;  %v7412_v28 = vsel %vm7387_vm1, %v7359_v1, %v7360_v42  ;;  %v18315_v21 = vrot.slane %v16959_v36, 1  ;;  %v12036_v52 = vld [vmem:[%s18262_s24 + $0xd8] sm:$0xf]  ;;  %v17016_v26 = vpop.permute.xlu1 %8397 }
0x12bc   : > { %v7618_v9 = vmul.f32 %v16365_v40, %v7412_v28  ;;  %v12037_v28 = vor.u32 %v12383_v60, %v12036_v52  ;;  %18533 = vst [vmem:[#allocation12_spill] sm:$0xff] %v17016_v26  ;;  %v12024_v52 = vld [vmem:[%s18262_s24 + $0x60] sm:$0xf]  ;;  %v12380_v60 = vld [vmem:[%s18262_s24 + $0x70] sm:$0xf0] }
0x12bd   : > { %7332 = vmatmul.bf16.gmra.mxu3 %v16961_v19  ;;  %7776 = vmatmul.bf16.gmra.mxu0 %v16961_v19  ;;  %v7853_v41 = vsel %vm7829_vm0, %v7804_v63, %v18315_v21 }
0x12be   : > { %8251 = vmatmul.bf16.gmra.mxu2 %v16961_v19  ;;  %v7070_v40 = vpop.f32.mrf.mxu1  ;;  %v8093_v1 = vadd.f32 %v8061_v48, %v7618_v9  ;;  %v8062_v37 = vmul.f32 %v16704_v18, %v7853_v41  ;;  %v8472_v48 = vmul.f32 %v16919_v45, %v8209_v27  ;;  %9070 = vmatpush.bf16.msrb.mxu3 %v12037_v28  ;;  %v12381_v27 = vld [vmem:[%s18262_s24 + $0x98] sm:$0xf0] }
0x12bf   : > { %v7146_v46 = vmul.f32 %v7114_v8, %v7070_v40  ;;  %v12028_v8 = vld [vmem:[%s18262_s24 + $0x88] sm:$0xf] }
0x12c0   : > { %v7293_v15 = vpop.f32.mrf.mxu3  ;;  %v16988_v7 = vadd.f32 %v8471_v20, %v8093_v1  ;;  %v12032_v20 = vld [vmem:[%s18262_s24 + $0xb0] sm:$0xf] }
0x12c1   : > { %v7361_v54 = vrot.slane %v7293_v15, 2  ;;  %8626 = vmatmul.bf16.gmra.mxu1 %v16741_v50  ;;  %v7178_v1 = vmax.f32 %v7146_v46, 0.0  ;;  %v12033_v31 = vor.u32 %v12382_v62, %v12032_v20  ;;  %v12025_v46 = vor.u32 %v12380_v60, %v12024_v52  ;;  %v18538_v20 = vld [vmem:[#allocation53_spill] sm:$0xff] }
0x12c2   : > { %v16995_v49 = vpop.f32.mrf.mxu0  ;;  %v18539_v62 = vld [vmem:[#allocation21_spill] sm:$0xff] }
0x12c3   : > { %v7411_v17 = vsel %vm7387_vm1, %v7360_v42, %v7361_v54  ;;  %v17013_v42 = vpop.permute.xlu2 %8387  ;;  %9071 = vmatpush.bf16.msrb.mxu3 %v12033_v31 }
0x12c4   : > { %v7619_v63 = vmul.f32 %v18530_v59, %v7411_v17  ;;  %18532 = vst [vmem:[#allocation20_spill] sm:$0xff] %v17013_v42  ;;  %v17042_v17 = vpop.permute.xlu0 %8392 }
0x12c5   : > { %18534 = vst [vmem:[#allocation70_spill] sm:$0xff] %v17042_v17 }
0x12c6   : > { %v7073_v18 = vpop.f32.mrf.mxu1  ;;  %v8094_v9 = vadd.f32 %v8062_v37, %v7619_v63  ;;  %v12029_v37 = vor.u32 %v12381_v27, %v12028_v8 }
0x12c7   : > { %v7147_v39 = vmul.f32 %v7115_v10, %v7073_v18  ;;  %v17054_v10 = vpop.permute.xlu1 %8412 }
0x12c8   : > { %v7295_v25 = vpop.f32.mrf.mxu3  ;;  %v17024_v40 = vadd.f32 %v8472_v48, %v8094_v9  ;;  %9072 = vmatpush.bf16.msrb.mxu3 %v12029_v37  ;;  %18536 = vst [vmem:[#allocation72_spill] sm:$0xff] %v17054_v10  ;;  %v18537_v48 = vld [vmem:[#allocation22_spill] sm:$0xff] }
0x12c9   : > { %v7179_v15 = vmax.f32 %v7147_v39, 0.0  ;;  %v7362_v45 = vrot.slane %v7295_v25, 2  ;;  %v7116_v18 = vsub.f32 %v18537_v48, %v16767_v23  ;;  %v12020_v39 = vld [vmem:[%s18262_s24 + $0x38] sm:$0xf]  ;;  %v12379_v25 = vld [vmem:[%s18262_s24 + $0x48] sm:$0xf0] }
0x12ca   : > { %v17026_v24 = vpop.f32.mrf.mxu0  ;;  %v12021_v31 = vor.u32 %v12379_v25, %v12020_v39  ;;  %v12016_v37 = vld [vmem:[%s18262_s24 + $0x10] sm:$0xf] }
0x12cb   : > { %v17028_v41 = vpack.c.bf16 %v7179_v15, %v7178_v1  ;;  %v17032_v51 = vsel %vm7387_vm1, %v7361_v54, %v7362_v45  ;;  %v17045_v59 = vpop.permute.xlu2 %8402  ;;  %v7117_v1 = vsub.f32 %v18539_v62, %v18538_v20 }
0x12cc   : > { %18535 = vst [vmem:[#allocation71_spill] sm:$0xff] %v17045_v59  ;;  %9073 = vmatpush.bf16.msrb.mxu3 %v12025_v46  ;;  %v17072_v27 = vpop.permute.xlu0 %8407 }
0x12cd   : > { %7337 = vmatmul.bf16.gmra.mxu3 %v17028_v41  ;;  %7781 = vmatmul.bf16.gmra.mxu0 %v17028_v41  ;;  %18540 = vst [vmem:[#allocation22_spill] sm:$0xff] %v17072_v27 }
0x12ce   : > { %8256 = vmatmul.bf16.gmra.mxu2 %v17028_v41  ;;  %v7076_v54 = vpop.f32.mrf.mxu1 }
0x12cf   : > { %v7148_v15 = vmul.f32 %v7116_v18, %v7076_v54  ;;  %v17090_v20 = vpop.permute.xlu1 %8427 }
0x12d0   : > { %v7298_v63 = vpop.f32.mrf.mxu3  ;;  %9074 = vmatpush.bf16.msrb.mxu3 %v12021_v31  ;;  %18542 = vst [vmem:[#allocation21_spill] sm:$0xff] %v17090_v20 }
0x12d1   : > { %v7363_v14 = vrot.slane %v7298_v63, 2  ;;  %8631 = vmatmul.bf16.gmra.mxu1 %v16781_v6  ;;  %v12378_v63 = vld [vmem:[%s18262_s24 + $0x20] sm:$0xf0]  ;;  %v7180_v52 = vmax.f32 %v7148_v15, 0.0 }
0x12d2   : > { %v17056_v28 = vpop.f32.mrf.mxu0  ;;  %v12017_v54 = vor.u32 %v12378_v63, %v12016_v37  ;;  %v18546_v63 = vld [vmem:[#allocation48_spill] sm:$0xff] }
0x12d3   : > { %v17062_v9 = vsel %vm7387_vm1, %v7362_v45, %v7363_v14  ;;  %v17080_v48 = vpop.permute.xlu2 %8417 }
0x12d4   : > { %18541 = vst [vmem:[#allocation53_spill] sm:$0xff] %v17080_v48  ;;  %9075 = vmatpush.bf16.msrb.mxu3 %v12017_v54  ;;  %v17096_v31 = vpop.permute.xlu0 %8422 }
0x12d5   : > { %18543 = vst [vmem:[#allocation73_spill] sm:$0xff] %v17096_v31 }
0x12d6   : > { %v7079_v8 = vpop.f32.mrf.mxu1 }
0x12d7   : > { %v7149_v23 = vmul.f32 %v7117_v1, %v7079_v8  ;;  %v17110_v54 = vpop.permute.xlu1 %8442 }
0x12d8   : > { %v7300_v45 = vpop.f32.mrf.mxu3  ;;  %18547 = vst [vmem:[#allocation48_spill] sm:$0xff] %v17110_v54 }
0x12d9   : > { %v7181_v60 = vmax.f32 %v7149_v23, 0.0  ;;  %v7364_v46 = vrot.slane %v7300_v45, 2 }
0x12da   : > { %v17082_v18 = vpop.f32.mrf.mxu0 }
0x12db   : > { %v17084_v39 = vpack.c.bf16 %v7181_v60, %v7180_v52  ;;  %v17088_v25 = vsel %vm7387_vm1, %v7363_v14, %v7364_v46  ;;  %v18544_v14 = vld [vmem:[#allocation23_spill] sm:$0xff]  ;;  %v17106_v37 = vpop.permute.xlu2 %8432  ;;  %v7119_v52 = vsub.f32 %v18546_v63, %v16817_v4 }
0x12dc   : > { %v7118_v23 = vsub.f32 %v18544_v14, %v16802_v22  ;;  %18545 = vst [vmem:[#allocation23_spill] sm:$0xff] %v17106_v37  ;;  %v17120_v14 = vpop.permute.xlu0 %8437 }
0x12dd   : > { %7342 = vmatmul.bf16.gmra.mxu3 %v17084_v39  ;;  %7786 = vmatmul.bf16.gmra.mxu0 %v17084_v39  ;;  %18549 = vst [vmem:[#allocation75_spill] sm:$0xff] %v17120_v14 }
0x12de   : > { %8261 = vmatmul.bf16.gmra.mxu2 %v17084_v39  ;;  %v7082_v62 = vpop.f32.mrf.mxu1 }
0x12df   : > { %v7150_v60 = vmul.f32 %v7118_v23, %v7082_v62 }
0x12e0   : > { %v7303_v1 = vpop.f32.mrf.mxu3 }
0x12e1   : > { %v7365_v15 = vrot.slane %v7303_v1, 2  ;;  %8636 = vmatmul.bf16.gmra.mxu1 %v16807_v53  ;;  %v7182_v31 = vmax.f32 %v7150_v60, 0.0 }
0x12e2   : > { %v17098_v8 = vpop.f32.mrf.mxu0 }
0x12e3   : > { %v17104_v45 = vsel %vm7387_vm1, %v7364_v46, %v7365_v15  ;;  %v17124_v4 = vpop.permute.xlu2 %8447 }
0x12e4   : > { %18550 = vst [vmem:[#allocation76_spill] sm:$0xff] %v17124_v4  ;;  %v17138_v23 = vpop.permute.xlu0 %8452 }
0x12e5   : > { %18553 = vst [vmem:[#allocation79_spill] sm:$0xff] %v17138_v23 }
0x12e6   : > { %v7085_v1 = vpop.f32.mrf.mxu1 }
0x12e7   : > { %v7151_v21 = vmul.f32 %v7119_v52, %v7085_v1 }
0x12e8   : > { %v7305_v20 = vpop.f32.mrf.mxu3 }
0x12e9   : > { %v7183_v48 = vmax.f32 %v7151_v21, 0.0  ;;  %v7366_v10 = vrot.slane %v7305_v20, 2  ;;  %v17129_v20 = vpop.permute.xlu1 %8457 }
0x12ea   : > { %v17112_v27 = vpop.f32.mrf.mxu0  ;;  %18552 = vst [vmem:[#allocation78_spill] sm:$0xff] %v17129_v20 }
0x12eb   : > { %v17114_v22 = vpack.c.bf16 %v7183_v48, %v7182_v31  ;;  %v17118_v46 = vsel %vm7387_vm1, %v7365_v15, %v7366_v10  ;;  %v17142_v1 = vpop.permute.xlu2 %8462 }
0x12ec   : > { %18554 = vst [vmem:[#allocation80_spill] sm:$0xff] %v17142_v1  ;;  %v17158_v1 = vpop.permute.xlu0 %8782 }
0x12ed   : > { %18548 = vst [vmem:[#allocation74_spill] sm:$0xff] %v17114_v22  ;;  %7347 = vmatmul.bf16.gmra.mxu3 %v17114_v22  ;;  %7791 = vmatmul.bf16.gmra.mxu0 %v17114_v22 }
0x12ee   : > { %8266 = vmatmul.bf16.gmra.mxu2 %v17114_v22  ;;  %v17127_v21 = vpop.f32.mrf.mxu1  ;;  %18555 = vst [vmem:[#allocation81_spill] sm:$0xff] %v17158_v1 }
0x12ef   : > { %18551 = vst [vmem:[#allocation77_spill] sm:$0xff] %v17127_v21  ;;  %v18317_v52 = vrot.slane %v17127_v21, 7 }
0x12f0   : > { %v7308_v48 = vpop.f32.mrf.mxu3 }
0x12f1   : > { %v7367_v62 = vrot.slane %v7308_v48, 2  ;;  %8641 = vmatmul.bf16.gmra.mxu1 %v16831_v29  ;;  %v8788_v4 = vpop.permute.xlu1 %8787 }
0x12f2   : > { %v17132_v15 = vpop.f32.mrf.mxu0 }
0x12f3   : > { %v17136_v31 = vsel %vm7387_vm1, %v7366_v10, %v7367_v62  ;;  %v8793_v26 = vpop.permute.xlu2 %8792 }
0x12f4   : > { %v8798_v1 = vpop.permute.xlu0 %8797 }
0x12f6   : > { %v8604_v63 = vpop.f32.mrf.mxu1 }
0x12f7   : > { %v8683_v60 = vrot.slane %v8604_v63, 7 }
0x12f8   : > { %v7310_v20 = vpop.f32.mrf.mxu3 }
0x12f9   : > { %v7368_v48 = vrot.slane %v7310_v20, 2  ;;  %v8745_v54 = vsel %vm8714_vm2, %v18317_v52, %v8683_v60 }
0x12fa   : > { %v8941_v10 = vmul.f32 %v8788_v4, %v8745_v54  ;;  %v17148_v14 = vpop.f32.mrf.mxu0 }
0x12fb   : > { %v17152_v23 = vsel %vm7387_vm1, %v7367_v62, %v7368_v48 }
0x12fc   : > { %v17155_v37 = vadd.f32 %v8941_v10, %v16891_v34 }
0x12fd   : > { %9076 = vmatmul.bf16.vlgmr.msrb.gmra.mxu3 %v16490_v30 }
0x12fe   : > { %v8607_v63 = vpop.f32.mrf.mxu1 }
0x12ff   : > { %v8684_v20 = vrot.slane %v8607_v63, 7 }
0x1300   : > { %v7313_v21 = vpop.f32.mrf.mxu3 }
0x1301   : > { %v7369_v59 = vrot.slane %v7313_v21, 2  ;;  %v8744_v54 = vsel %vm8714_vm2, %v8683_v60, %v8684_v20  ;;  %8646 = vmatmul.bf16.gmra.mxu1 %v16863_v55 }
0x1302   : > { %v8942_v4 = vmul.f32 %v8793_v26, %v8744_v54  ;;  %v17163_v62 = vpop.f32.mrf.mxu0 }
0x1303   : > { %v17167_v34 = vsel %vm7387_vm1, %v7368_v48, %v7369_v59 }
0x1304   : > { %18556 = vst [vmem:[#allocation82_spill] sm:$0xff] %v17167_v34  ;;  %v17170_v30 = vadd.f32 %v8942_v4, %v16906_v32 }
0x1306   : > { %v8609_v10 = vpop.f32.mrf.mxu1 }
0x1307   : > { %v8685_v63 = vrot.slane %v8609_v10, 7  ;;  %v8803_v10 = vpop.permute.xlu1 %8802 }
0x1308   : > { %v7315_v52 = vpop.f32.mrf.mxu3 }
0x1309   : > { %v7370_v21 = vrot.slane %v7315_v52, 2  ;;  %v8743_v60 = vsel %vm8714_vm2, %v8684_v20, %v8685_v63 }
0x130a   : > { %v8943_v17 = vmul.f32 %v8798_v1, %v8743_v60  ;;  %v17174_v42 = vpop.f32.mrf.mxu0 }
0x130b   : > { %18557 = vst [vmem:[#allocation83_spill] sm:$0xff] %v17174_v42  ;;  %v17178_v26 = vsel %vm7387_vm1, %v7369_v59, %v7370_v21 }
0x130c   : > { %18558 = vst [vmem:[#allocation84_spill] sm:$0xff] %v17178_v26  ;;  %v17181_v48 = vadd.f32 %v8943_v17, %v16921_v16  ;;  %v8808_v26 = vpop.permute.xlu2 %8807 }
0x130d   : > { %9081 = vmatmul.bf16.gmra.mxu3 %v16533_v2 }
0x130e   : > { %v8612_v32 = vpop.f32.mrf.mxu1 }
0x130f   : > { %v8686_v54 = vrot.slane %v8612_v32, 7 }
0x1310   : > { %v7318_v4 = vpop.f32.mrf.mxu3 }
0x1311   : > { %v7371_v52 = vrot.slane %v7318_v4, 2  ;;  %v8742_v20 = vsel %vm8714_vm2, %v8685_v63, %v8686_v54  ;;  %8651 = vmatmul.bf16.gmra.mxu1 %v16893_v44 }
0x1312   : > { %v8944_v1 = vmul.f32 %v8803_v10, %v8742_v20  ;;  %v17187_v60 = vpop.f32.mrf.mxu0 }
0x1313   : > { %18559 = vst [vmem:[#allocation85_spill] sm:$0xff] %v17187_v60  ;;  %v17191_v59 = vsel %vm7387_vm1, %v7370_v21, %v7371_v52 }
0x1314   : > { %18560 = vst [vmem:[#allocation86_spill] sm:$0xff] %v17191_v59  ;;  %v17194_v16 = vadd.f32 %v8944_v1, %v16938_v57 }
0x1316   : > { %v8614_v2 = vpop.f32.mrf.mxu1 }
0x1317   : > { %v8687_v17 = vrot.slane %v8614_v2, 7 }
0x1318   : > { %v7320_v32 = vpop.f32.mrf.mxu3 }
0x1319   : > { %v7372_v4 = vrot.slane %v7320_v32, 2  ;;  %v8741_v63 = vsel %vm8714_vm2, %v8686_v54, %v8687_v17  ;;  %v8813_v32 = vpop.permute.xlu0 %8812 }
0x131a   : > { %v8945_v42 = vmul.f32 %v8808_v26, %v8741_v63  ;;  %v17198_v34 = vpop.f32.mrf.mxu0 }
0x131b   : > { %18561 = vst [vmem:[#allocation87_spill] sm:$0xff] %v17198_v34  ;;  %v17202_v10 = vsel %vm7387_vm1, %v7371_v52, %v7372_v4 }
0x131c   : > { %18562 = vst [vmem:[#allocation88_spill] sm:$0xff] %v17202_v10  ;;  %v17205_v21 = vadd.f32 %v8945_v42, %v16955_v56  ;;  %v18569_v10 = vld [vmem:[#allocation39_spill] sm:$0xff] }
0x131d   : > { %9086 = vmatmul.bf16.gmra.mxu3 %v16574_v35  ;;  %v18319_v35 = vrot.slane %v16995_v49, 1 }
0x131e   : > { %v8617_v57 = vpop.f32.mrf.mxu1 }
0x131f   : > { %v8688_v20 = vrot.slane %v8617_v57, 7 }
0x1320   : > { %v7323_v1 = vpop.f32.mrf.mxu3 }
0x1321   : > { %v7373_v2 = vrot.slane %v7323_v1, 2  ;;  %v8740_v54 = vsel %vm8714_vm2, %v8687_v17, %v8688_v20  ;;  %8656 = vmatmul.bf16.gmra.mxu1 %v16925_v43  ;;  %v18565_v17 = vrot.slane %v16959_v36, 1 }
0x1322   : > { %v8946_v26 = vmul.f32 %v8813_v32, %v8740_v54  ;;  %v17211_v63 = vpop.f32.mrf.mxu0 }
0x1323   : > { %18563 = vst [vmem:[#allocation89_spill] sm:$0xff] %v17211_v63  ;;  %v17215_v52 = vsel %vm7387_vm1, %v7372_v4, %v7373_v2  ;;  %v7852_v32 = vsel %vm7829_vm0, %v18565_v17, %v18319_v35  ;;  %v8818_v63 = vpop.permute.xlu1 %8817  ;;  %v8823_v35 = vpop.permute.xlu2 %8822 }
0x1324   : > { %18564 = vst [vmem:[#allocation90_spill] sm:$0xff] %v17215_v52  ;;  %v17218_v56 = vadd.f32 %v8946_v26, %v16988_v7  ;;  %v18566_v7 = vld [vmem:[#allocation13_spill] sm:$0xff]  ;;  %v8063_v36 = vmul.f32 %v18569_v10, %v7852_v32 }
0x1325   : > { %v7620_v26 = vmul.f32 %v18566_v7, %v17032_v51 }
0x1326   : > { %v8619_v42 = vpop.f32.mrf.mxu1 }
0x1327   : > { %v8689_v57 = vrot.slane %v8619_v42, 7 }
0x1328   : > { %v7325_v1 = vpop.f32.mrf.mxu3 }
0x1329   : > { %v7374_v54 = vrot.slane %v7325_v1, 2  ;;  %v8739_v4 = vsel %vm8714_vm2, %v8688_v20, %v8689_v57  ;;  %v8212_v1 = vpop.f32.mrf.mxu2  ;;  %v8095_v20 = vadd.f32 %v8063_v36, %v7620_v26 }
0x132a   : > { %v8947_v52 = vmul.f32 %v8818_v63, %v8739_v4  ;;  %v17231_v34 = vpop.f32.mrf.mxu0  ;;  %v8473_v63 = vmul.f32 %v16936_v5, %v8212_v1 }
0x132b   : > { %18567 = vst [vmem:[#allocation13_spill] sm:$0xff] %v17231_v34  ;;  %v17235_v42 = vsel %vm7387_vm1, %v7373_v2, %v7374_v54  ;;  %v18607_v34 = vld [vmem:[#allocation69_spill] sm:$0xff] }
0x132c   : > { %18568 = vst [vmem:[#allocation91_spill] sm:$0xff] %v17235_v42  ;;  %v17239_v60 = vadd.f32 %v8947_v52, %v17024_v40  ;;  %v8505_v40 = vadd.f32 %v8473_v63, %v8095_v20 }
0x132d   : > { %9091 = vmatmul.bf16.gmra.mxu3 %v16615_v12 }
0x132e   : > { %v17242_v17 = vpop.f32.mrf.mxu1 }
0x132f   : > { %v18320_v51 = vrot.slane %v17242_v17, 7 }
0x1330   : > { %v7328_v4 = vpop.f32.mrf.mxu3 }
0x1331   : > { %v7375_v7 = vrot.slane %v7328_v4, 2  ;;  %v8738_v10 = vsel %vm8714_vm2, %v8689_v57, %v18320_v51  ;;  %8661 = vmatmul.bf16.gmra.mxu1 %v16961_v19  ;;  %v17265_v57 = vpop.permute.xlu0 %8827  ;;  %v17275_v4 = vpop.permute.xlu1 %8832 }
0x1332   : > { %v8948_v2 = vmul.f32 %v8823_v35, %v8738_v10  ;;  %v17251_v12 = vpop.f32.mrf.mxu0 }
0x1333   : > { %18570 = vst [vmem:[#allocation39_spill] sm:$0xff] %v17251_v12  ;;  %v17255_v52 = vsel %vm7387_vm1, %v7374_v54, %v7375_v7 }
0x1334   : > { %18571 = vst [vmem:[#allocation92_spill] sm:$0xff] %v17255_v52  ;;  %v17257_v32 = vadd.f32 %v8948_v2, %v8505_v40 }
0x1338   : > { %v7330_v5 = vpop.f32.mrf.mxu3 }
0x1339   : > { %v7376_v26 = vrot.slane %v7330_v5, 2  ;;  %v17277_v10 = vpop.permute.xlu0 %8842  ;;  %v17285_v5 = vpop.permute.xlu2 %8837 }
0x133a   : > { %v17259_v36 = vpop.f32.mrf.mxu0 }
0x133b   : > { %18572 = vst [vmem:[#allocation93_spill] sm:$0xff] %v17259_v36  ;;  %v17263_v1 = vsel %vm7387_vm1, %v7375_v7, %v7376_v26 }
0x133c   : > { %18573 = vst [vmem:[#allocation94_spill] sm:$0xff] %v17263_v1 }
0x133d   : > { %9096 = vmatmul.bf16.gmra.mxu3 %v16676_v0 }
0x1340   : > { %v7333_v35 = vpop.f32.mrf.mxu3 }
0x1341   : > { %v7377_v20 = vrot.slane %v7333_v35, 2  ;;  %8666 = vmatmul.bf16.gmra.mxu1 %v17028_v41  ;;  %v17288_v35 = vpop.permute.xlu1 %8847 }
0x1342   : > { %v17269_v54 = vpop.f32.mrf.mxu0  ;;  %18578 = vst [vmem:[#allocation99_spill] sm:$0xff] %v17288_v35 }
0x1343   : > { %18574 = vst [vmem:[#allocation95_spill] sm:$0xff] %v17269_v54  ;;  %v17273_v63 = vsel %vm7387_vm1, %v7376_v26, %v7377_v20  ;;  %v17290_v26 = vpop.permute.xlu0 %8857 }
0x1344   : > { %18575 = vst [vmem:[#allocation96_spill] sm:$0xff] %v17273_v63 }
0x1345   : > { %18579 = vst [vmem:[#allocation100_spill] sm:$0xff] %v17290_v26 }
0x1348   : > { %v7335_v7 = vpop.f32.mrf.mxu3 }
0x1349   : > { %v7378_v40 = vrot.slane %v7335_v7, 2 }
0x134a   : > { %v17279_v2 = vpop.f32.mrf.mxu0 }
0x134b   : > { %18576 = vst [vmem:[#allocation97_spill] sm:$0xff] %v17279_v2  ;;  %v17283_v0 = vsel %vm7387_vm1, %v7377_v20, %v7378_v40  ;;  %v17299_v20 = vpop.permute.xlu2 %8852  ;;  %v17303_v36 = vpop.permute.xlu0 %8872 }
0x134c   : > { %18577 = vst [vmem:[#allocation98_spill] sm:$0xff] %v17283_v0  ;;  %v17301_v0 = vpop.permute.xlu1 %8862 }
0x134d   : > { %9101 = vmatmul.bf16.gmra.mxu3 %v16741_v50  ;;  %18582 = vst [vmem:[#allocation103_spill] sm:$0xff] %v17299_v20 }
0x134e   : > { %18583 = vst [vmem:[#allocation104_spill] sm:$0xff] %v17301_v0 }
0x134f   : > { %18584 = vst [vmem:[#allocation105_spill] sm:$0xff] %v17303_v36 }
0x1350   : > { %v7338_v51 = vpop.f32.mrf.mxu3 }
0x1351   : > { %v7379_v63 = vrot.slane %v7338_v51, 2  ;;  %8671 = vmatmul.bf16.gmra.mxu1 %v17084_v39 }
0x1352   : > { %v17293_v54 = vpop.f32.mrf.mxu0 }
0x1353   : > { %18580 = vst [vmem:[#allocation101_spill] sm:$0xff] %v17293_v54  ;;  %v17297_v7 = vsel %vm7387_vm1, %v7378_v40, %v7379_v63  ;;  %v17312_v54 = vpop.permute.xlu2 %8867 }
0x1354   : > { %18581 = vst [vmem:[#allocation102_spill] sm:$0xff] %v17297_v7  ;;  %v17315_v52 = vpop.permute.xlu1 %8877 }
0x1355   : > { %18587 = vst [vmem:[#allocation108_spill] sm:$0xff] %v17312_v54  ;;  %v18608_v54 = vld [vmem:[#allocation50_spill] sm:$0xff] }
0x1356   : > { %18588 = vst [vmem:[#allocation109_spill] sm:$0xff] %v17315_v52 }
0x1358   : > { %v7340_v2 = vpop.f32.mrf.mxu3 }
0x1359   : > { %v7380_v50 = vrot.slane %v7340_v2, 2 }
0x135a   : > { %v17305_v1 = vpop.f32.mrf.mxu0 }
0x135b   : > { %18585 = vst [vmem:[#allocation106_spill] sm:$0xff] %v17305_v1  ;;  %v17309_v51 = vsel %vm7387_vm1, %v7379_v63, %v7380_v50  ;;  %v17323_v1 = vpop.permute.xlu0 %8887  ;;  %v17325_v42 = vpop.permute.xlu2 %8882 }
0x135c   : > { %18586 = vst [vmem:[#allocation107_spill] sm:$0xff] %v17309_v51  ;;  %v17333_v36 = vpop.permute.xlu1 %8892 }
0x135d   : > { %9106 = vmatmul.bf16.gmra.mxu3 %v16781_v6  ;;  %18591 = vst [vmem:[#allocation112_spill] sm:$0xff] %v17323_v1 }
0x135e   : > { %18592 = vst [vmem:[#allocation113_spill] sm:$0xff] %v17325_v42 }
0x135f   : > { %18595 = vst [vmem:[#allocation116_spill] sm:$0xff] %v17333_v36 }
0x1360   : > { %v7343_v40 = vpop.f32.mrf.mxu3 }
0x1361   : > { %v7381_v7 = vrot.slane %v7343_v40, 2  ;;  %8676 = vmatmul.bf16.gmra.mxu1 %v17114_v22 }
0x1362   : > { %v17317_v12 = vpop.f32.mrf.mxu0 }
0x1363   : > { %18589 = vst [vmem:[#allocation110_spill] sm:$0xff] %v17317_v12  ;;  %v17321_v2 = vsel %vm7387_vm1, %v7380_v50, %v7381_v7  ;;  %v17335_v52 = vpop.permute.xlu0 %8902  ;;  %v17344_v1 = vpop.permute.xlu2 %8897 }
0x1364   : > { %18590 = vst [vmem:[#allocation111_spill] sm:$0xff] %v17321_v2 }
0x1365   : > { %18596 = vst [vmem:[#allocation117_spill] sm:$0xff] %v17335_v52  ;;  %v18602_v52 = vld [vmem:[#allocation61_spill] sm:$0xff] }
0x1366   : > { %18599 = vst [vmem:[#allocation120_spill] sm:$0xff] %v17344_v1  ;;  %v18603_v42 = vrot.slane %v18602_v52, 1 }
0x1368   : > { %v7345_v63 = vpop.f32.mrf.mxu3 }
0x1369   : > { %v7382_v51 = vrot.slane %v7345_v63, 2 }
0x136a   : > { %v17327_v6 = vpop.f32.mrf.mxu0 }
0x136b   : > { %18593 = vst [vmem:[#allocation114_spill] sm:$0xff] %v17327_v6  ;;  %v17331_v40 = vsel %vm7387_vm1, %v7381_v7, %v7382_v51  ;;  %v17347_v7 = vpop.permute.xlu1 %8907  ;;  %v17367_v52 = vpop.permute.xlu2 %8912 }
0x136c   : > { %18594 = vst [vmem:[#allocation115_spill] sm:$0xff] %v17331_v40  ;;  %v17349_v40 = vpop.permute.xlu0 %8917 }
0x136d   : > { %9111 = vmatmul.bf16.gmra.mxu3 %v16807_v53  ;;  %18600 = vst [vmem:[#allocation121_spill] sm:$0xff] %v17347_v7 }
0x136e   : > { %18601 = vst [vmem:[#allocation122_spill] sm:$0xff] %v17349_v40 }
0x1370   : > { %v7348_v50 = vpop.f32.mrf.mxu3 }
0x1371   : > { %v7383_v2 = vrot.slane %v7348_v50, 2 }
0x1372   : > { %v17338_v12 = vpop.f32.mrf.mxu0 }
0x1373   : > { %18597 = vst [vmem:[#allocation118_spill] sm:$0xff] %v17338_v12  ;;  %v17342_v63 = vsel %vm7387_vm1, %v7382_v51, %v7383_v2  ;;  %v18330_v6 = vrot.slane %v17338_v12, 1 }
0x1374   : > { %18598 = vst [vmem:[#allocation119_spill] sm:$0xff] %v17342_v63  ;;  %v18605_v63 = vld [vmem:[#allocation64_spill] sm:$0xff] }
0x1375   : > { %v7861_v53 = vsel %vm7829_vm0, %v18330_v6, %v18603_v42  ;;  %v18606_v1 = vrot.slane %v18605_v63, 2  ;;  %18609 = vst [vmem:[#allocation64_spill] sm:$0xff] %v17367_v52  ;;  %v17372_v42 = vpop.permute.xlu1 %8922  ;;  %v17378_v63 = vpop.permute.xlu2 %8927 }
0x1376   : > { %v8086_v40 = vmul.f32 %v18607_v34, %v7861_v53  ;;  %18611 = vst [vmem:[#allocation50_spill] sm:$0xff] %v17372_v42 }
0x1377   : > { %18614 = vst [vmem:[#allocation125_spill] sm:$0xff] %v17378_v63  ;;  %v17402_v63 = vpop.f32.mrf.mxu2 }
0x1378   : > { %v7350_v36 = vpop.f32.mrf.mxu3 }
0x1379   : > { %v7384_v50 = vrot.slane %v7350_v36, 2 }
0x137b   : > { %v17359_v51 = vsel %vm7387_vm1, %v7383_v2, %v7384_v50  ;;  %v7419_v7 = vsel %vm7387_vm1, %v7384_v50, %v18606_v1  ;;  %v17376_v2 = vpop.permute.xlu0 %8932  ;;  %v17395_v50 = vpop.f32.mrf.mxu1 }
0x137c   : > { %18604 = vst [vmem:[#allocation61_spill] sm:$0xff] %v17359_v51  ;;  %v7643_v0 = vmul.f32 %v18608_v54, %v7419_v7 }
0x137d   : > { %9116 = vmatmul.bf16.gmra.mxu3 %v16831_v29  ;;  %18613 = vst [vmem:[#allocation124_spill] sm:$0xff] %v17376_v2  ;;  %v17382_v54 = vpop.permute.xlu1 %8937 }
0x137e   : > { %v17370_v12 = vadd.f32 %v8086_v40, %v7643_v0  ;;  %18615 = vst [vmem:[#allocation126_spill] sm:$0xff] %v17382_v54  ;;  %v17391_v40 = vld [vmem:[%s18264_s26] ss:$0 sm:$0xff] }
0x1380   : > { %18610 = vst [vmem:[#allocation69_spill] sm:$0xff] %v17370_v12  ;;  %v17374_v36 = vpop.f32.mrf.mxu3  ;;  %v17398_v12 = vpop.permute.xlu2 %9257 }
0x1381   : > { %18612 = vst [vmem:[#allocation123_spill] sm:$0xff] %v17374_v36  ;;  %v18332_v34 = vrot.slane %v17374_v36, 6 }
0x1382   : > { %18616 = vst [vmem:[#allocation127_spill] sm:$0xff] %v17398_v12 }
0x1383   : > { %v9263_v7 = vpop.permute.xlu0 %9262  ;;  %v17406_v42 = vpop.f32.mrf.mxu1 }
0x1388   : > { %v9079_v6 = vpop.f32.mrf.mxu3 }
0x1389   : > { %v9158_v1 = vrot.slane %v9079_v6, 6 }
0x138b   : > { %v9220_v29 = vsel %vm9189_vm3, %v18332_v34, %v9158_v1  ;;  %v9268_v34 = vpop.permute.xlu1 %9267 }
0x138c   : > { %v9416_v0 = vmul.f32 %v9263_v7, %v9220_v29 }
0x138d   : > { %9121 = vmatmul.bf16.gmra.mxu3 %v16863_v55 }
0x138e   : > { %v9448_v53 = vadd.f32 %v9416_v0, %v17155_v37 }
0x1390   : > { %v9484_v6 = vadd.f32 %v17391_v40, %v9448_v53  ;;  %v9082_v54 = vpop.f32.mrf.mxu3 }
0x1391   : > { %v9159_v36 = vrot.slane %v9082_v54, 6 }
0x1392   : > { %v12079_v2 = vmul.f32 -1.442695, %v9484_v6  ;;  %v9273_v6 = vpop.permute.xlu2 %9272 }
0x1393   : > { %v9219_v7 = vsel %vm9189_vm3, %v9158_v1, %v9159_v36 }
0x1394   : > { %12444 = vpow2.f32 %v12079_v2  ;;  %v9417_v29 = vmul.f32 %v9268_v34, %v9219_v7  ;;  %v17412_v34 = vpop.f32.mrf.mxu2 }
0x1396   : > { %v9449_v55 = vadd.f32 %v9417_v29, %v17170_v30 }
0x1398   : > { %v9485_v37 = vadd.f32 %v17391_v40, %v9449_v55  ;;  %v9084_v0 = vpop.f32.mrf.mxu3 }
0x1399   : > { %v9160_v51 = vrot.slane %v9084_v0, 6 }
0x139a   : > { %v12445_v53 = vpop.eup %12444  ;;  %v12080_v12 = vmul.f32 -1.442695, %v9485_v37 }
0x139b   : > { %v9612_v54 = vadd.f32 1.0, %v12445_v53  ;;  %v9218_v52 = vsel %vm9189_vm3, %v9159_v36, %v9160_v51 }
0x139c   : > { %12446 = vpow2.f32 %v12080_v12  ;;  %v9418_v2 = vmul.f32 %v9273_v6, %v9218_v52  ;;  %v17417_v52 = vpop.f32.mrf.mxu1  ;;  %v17423_v59 = vpop.f32.mrf.mxu2 }
0x139d   : > { %12448 = vrcp.f32 %v9612_v54  ;;  %9126 = vmatmul.bf16.gmra.mxu3 %v16893_v44  ;;  %v9278_v44 = vpop.permute.xlu0 %9277  ;;  %vm9663_vm5 = vweird.f32 %v9612_v54 }
0x139e   : > { %v9450_v30 = vadd.f32 %v9418_v2, %v17181_v48  ;;  %v9667_v2 = vand.u32 2147483647, %v9612_v54 }
0x13a0   : > { %v9486_v1 = vadd.f32 %v17391_v40, %v9450_v30  ;;  %v9087_v7 = vpop.f32.mrf.mxu3  ;;  %v9669_v30 = vand.u32 2147483648, %v9612_v54  ;;  %vm9668_vm7 = vcmp.eq.f32.partialorder %v9667_v2, 8.507059e+37 }
0x13a1   : > { %v9161_v29 = vrot.slane %v9087_v7, 6 }
0x13a2   : > { %v12447_v55 = vpop.eup %12446  ;;  %v12081_v37 = vmul.f32 -1.442695, %v9486_v1 }
0x13a3   : > { %v12449_v0 = vpop.eup %12448  ;;  %v9613_v53 = vadd.f32 1.0, %v12447_v55  ;;  %v9217_v12 = vsel %vm9189_vm3, %v9160_v51, %v9161_v29 }
0x13a4   : > { %v9659_v36 = vmul.f32 %v12449_v0, %v9612_v54  ;;  %12450 = vpow2.f32 %v12081_v37  ;;  %v9419_v6 = vmul.f32 %v9278_v44, %v9217_v12  ;;  %vm9664_vm4 = vweird.f32 %v12449_v0  ;;  %v17432_v54 = vpop.f32.mrf.mxu1 }
0x13a5   : > { %12452 = vrcp.f32 %v9613_v53  ;;  %vm9665_vm6 = vmor %vm9663_vm5, %vm9664_vm4  ;;  %v9670_v12 = vor.u32 1.1754944e-38, %v9669_v30  ;;  %v9283_v30 = vpop.permute.xlu1 %9282  ;;  %vm9678_vm9 = vweird.f32 %v9613_v53 }
0x13a6   : > { %v9660_v48 = vsub.f32 1.0, %v9659_v36  ;;  %v9451_v1 = vadd.f32 %v9419_v6, %v17194_v16 }
0x13a8   : > { %v9661_v7 = vmul.f32 %v12449_v0, %v9660_v48  ;;  %v9089_v55 = vpop.f32.mrf.mxu3  ;;  %v9487_v37 = vadd.f32 %v17391_v40, %v9451_v1  ;;  %v9682_v1 = vand.u32 2147483647, %v9613_v53 }
0x13a9   : > { %v9162_v26 = vrot.slane %v9089_v55, 6 }
0x13aa   : > { %v12451_v51 = vpop.eup %12450  ;;  %v9662_v20 = vadd.f32 %v12449_v0, %v9661_v7  ;;  %v12082_v35 = vmul.f32 -1.442695, %v9487_v37  ;;  %vm9683_vm11 = vcmp.eq.f32.partialorder %v9682_v1, 8.507059e+37 }
0x13ab   : > { %v12453_v22 = vpop.eup %12452  ;;  %v17426_v36 = vadd.f32 1.0, %v12451_v51  ;;  %v9216_v16 = vsel %vm9189_vm3, %v9161_v29, %v9162_v26 }
0x13ac   : > { %v9666_v44 = vsel %vm9665_vm6, %v12449_v0, %v9662_v20  ;;  %v9674_v48 = vmul.f32 %v12453_v22, %v9613_v53  ;;  %v9684_v20 = vand.u32 2147483648, %v9613_v53  ;;  %v9420_v0 = vmul.f32 %v9283_v30, %v9216_v16  ;;  %v17441_v16 = vpop.f32.mrf.mxu2 }
0x13ad   : > { %v9671_v6 = vsel %vm9668_vm7, %v9670_v12, %v9666_v44  ;;  %12454 = vrcp.f32 %v17426_v36  ;;  %9131 = vmatmul.bf16.gmra.mxu3 %v16925_v43  ;;  %vm9679_vm8 = vweird.f32 %v12453_v22  ;;  %vm9693_vm13 = vweird.f32 %v17426_v36 }
0x13ae   : > { %10124 = vst [vmem:[%s17434_s7 + $0x8] sm:$0xff] %v9671_v6  ;;  %v9675_v2 = vsub.f32 1.0, %v9674_v48  ;;  %12456 = vpow2.f32 %v12082_v35  ;;  %v9452_v55 = vadd.f32 %v9420_v0, %v17205_v21  ;;  %vm9680_vm10 = vmor %vm9678_vm9, %vm9679_vm8  ;;  %v9685_v12 = vor.u32 1.1754944e-38, %v9684_v20  ;;  %v9288_v21 = vpop.permute.xlu2 %9287 }
0x13b0   : > { %v9676_v7 = vmul.f32 %v12453_v22, %v9675_v2  ;;  %v9092_v29 = vpop.f32.mrf.mxu3  ;;  %v9488_v44 = vadd.f32 %v17391_v40, %v9452_v55  ;;  %v9697_v55 = vand.u32 2147483647, %v17426_v36 }
0x13b1   : > { %v9163_v51 = vrot.slane %v9092_v29, 6  ;;  %v7807_v29 = vrot.slane %v17026_v24, 1 }
0x13b2   : > { %v9677_v37 = vadd.f32 %v12453_v22, %v9676_v7  ;;  %v12083_v53 = vmul.f32 -1.442695, %v9488_v44  ;;  %v7808_v44 = vrot.slane %v17056_v28, 1  ;;  %vm9698_vm15 = vcmp.eq.f32.partialorder %v9697_v55, 8.507059e+37  ;;  %v18619_v55 = vld [vmem:[#allocation18_spill] sm:$0xff] }
0x13b3   : > { %v12455_v43 = vpop.eup %12454  ;;  %v9215_v35 = vsel %vm9189_vm3, %v9162_v26, %v9163_v51  ;;  %v9699_v26 = vand.u32 2147483648, %v17426_v36 }
0x13b4   : > { %v12457_v48 = vpop.eup %12456  ;;  %v9681_v6 = vsel %vm9680_vm10, %v12453_v22, %v9677_v37  ;;  %v9689_v2 = vmul.f32 %v12455_v43, %v17426_v36  ;;  %v9421_v7 = vmul.f32 %v9288_v21, %v9215_v35  ;;  %v17451_v22 = vpop.f32.mrf.mxu1  ;;  %vm9694_vm12 = vweird.f32 %v12455_v43 }
0x13b5   : > { %v9686_v30 = vsel %vm9683_vm11, %v9685_v12, %v9681_v6  ;;  %v17444_v0 = vadd.f32 1.0, %v12457_v48  ;;  %v18617_v6 = vrot.slane %v16995_v49, 1  ;;  %v9293_v21 = vpop.permute.xlu0 %9292  ;;  %vm9695_vm14 = vmor %vm9693_vm13, %vm9694_vm12  ;;  %v8474_v36 = vmul.f32 %v16923_v38, %v17402_v63  ;;  %v18620_v63 = vld [vmem:[#allocation16_spill] sm:$0xff] }
0x13b6   : > { %10125 = vst [vmem:[%s17434_s7 + $0x10] sm:$0xff] %v9686_v30  ;;  %v9690_v20 = vsub.f32 1.0, %v9689_v2  ;;  %v9453_v37 = vadd.f32 %v9421_v7, %v17218_v56  ;;  %v9700_v30 = vor.u32 1.1754944e-38, %v9699_v26  ;;  %v7850_v49 = vsel %vm7829_vm0, %v7807_v29, %v7808_v44 }
0x13b7   : > { %12458 = vrcp.f32 %v17444_v0  ;;  %v7851_v2 = vsel %vm7829_vm0, %v18617_v6, %v7807_v29  ;;  %v17469_v6 = vpop.f32.mrf.mxu2  ;;  %v7621_v38 = vmul.f32 %v18619_v55, %v17062_v9  ;;  %v7622_v29 = vmul.f32 %v18620_v63, %v17088_v25  ;;  %v18622_v55 = vld [vmem:[#allocation17_spill] sm:$0xff] }
0x13b8   : > { %v9691_v1 = vmul.f32 %v12455_v43, %v9690_v20  ;;  %12460 = vpow2.f32 %v12083_v53  ;;  %v9094_v12 = vpop.f32.mrf.mxu3  ;;  %v9489_v24 = vadd.f32 %v17391_v40, %v9453_v37  ;;  %v9712_v9 = vand.u32 2147483647, %v17444_v0 }
0x13b9   : > { %v9164_v35 = vrot.slane %v9094_v12, 6  ;;  %v18618_v12 = vld [vmem:[#allocation37_spill] sm:$0xff]  ;;  %vm9708_vm4 = vweird.f32 %v17444_v0  ;;  %v7623_v63 = vmul.f32 %v18622_v55, %v17104_v45 }
0x13ba   : > { %v9692_v48 = vadd.f32 %v12455_v43, %v9691_v1  ;;  %v12084_v28 = vmul.f32 -1.442695, %v9489_v24  ;;  %v8064_v26 = vmul.f32 %v18618_v12, %v7851_v2  ;;  %v8475_v24 = vmul.f32 %v16941_v13, %v17412_v34  ;;  %v18621_v2 = vld [vmem:[#allocation35_spill] sm:$0xff] }
0x13bb   : > { %v9214_v56 = vsel %vm9189_vm3, %v9163_v51, %v9164_v35  ;;  %vm9713_vm6 = vcmp.eq.f32.partialorder %v9712_v9, 8.507059e+37 }
0x13bc   : > { %v9696_v53 = vsel %vm9695_vm14, %v12455_v43, %v9692_v48  ;;  %v9422_v7 = vmul.f32 %v9293_v21, %v9214_v56  ;;  %12462 = vpow2.f32 %v12084_v28  ;;  %v7809_v48 = vrot.slane %v17082_v18, 1  ;;  %v17489_v18 = vpop.f32.mrf.mxu1 }
0x13bd   : > { %v12459_v20 = vpop.eup %12458  ;;  %v9701_v1 = vsel %vm9698_vm15, %v9700_v30, %v9696_v53  ;;  %9136 = vmatmul.bf16.gmra.mxu3 %v16961_v19  ;;  %v8065_v21 = vmul.f32 %v18621_v2, %v7850_v49  ;;  %v9714_v28 = vand.u32 2147483648, %v17444_v0  ;;  %v7810_v49 = vrot.slane %v17098_v8, 1 }
0x13be   : > { %v12461_v37 = vpop.eup %12460  ;;  %10126 = vst [vmem:[%s17434_s7 + $0x18] sm:$0xff] %v9701_v1  ;;  %v9704_v51 = vmul.f32 %v12459_v20, %v17444_v0  ;;  %v9454_v43 = vadd.f32 %v9422_v7, %v17239_v60  ;;  %v8691_v60 = vrot.slane %v17395_v50, 7  ;;  %vm9709_vm1 = vweird.f32 %v12459_v20 }
0x13bf   : > { %v17479_v19 = vadd.f32 1.0, %v12461_v37  ;;  %v7849_v34 = vsel %vm7829_vm0, %v7808_v44, %v7809_v48  ;;  %v8096_v1 = vadd.f32 %v8064_v26, %v7621_v38  ;;  %v8097_v37 = vadd.f32 %v8065_v21, %v7622_v29  ;;  %vm9710_vm5 = vmor %vm9708_vm4, %vm9709_vm1 }
0x13c0   : > { %v9705_v30 = vsub.f32 1.0, %v9704_v51  ;;  %v9490_v56 = vadd.f32 %v17391_v40, %v9454_v43  ;;  %v9097_v53 = vpop.f32.mrf.mxu3  ;;  %v9298_v51 = vpop.permute.xlu1 %9297  ;;  %v9715_v2 = vor.u32 1.1754944e-38, %v9714_v28  ;;  %v18623_v26 = vrot.slane %v17242_v17, 7 }
0x13c1   : > { %12464 = vrcp.f32 %v17479_v19  ;;  %v9165_v13 = vrot.slane %v9097_v53, 6  ;;  %v8692_v0 = vrot.slane %v17406_v42, 7  ;;  %v7848_v45 = vsel %vm7829_vm0, %v7809_v48, %v7810_v49  ;;  %v17514_v28 = vpop.f32.mrf.mxu2 }
0x13c2   : > { %v9706_v25 = vmul.f32 %v12459_v20, %v9705_v30  ;;  %v12085_v7 = vmul.f32 -1.442695, %v9490_v56  ;;  %v12463_v50 = vpop.eup %12462  ;;  %v8737_v38 = vsel %vm8714_vm2, %v18623_v26, %v8691_v60  ;;  %v8476_v17 = vmul.f32 %v16957_v11, %v17423_v59 }
0x13c3   : > { %v9213_v43 = vsel %vm9189_vm3, %v9164_v35, %v9165_v13  ;;  %v17499_v44 = vadd.f32 1.0, %v12463_v50  ;;  %v18624_v35 = vld [vmem:[#allocation36_spill] sm:$0xff]  ;;  %v8507_v50 = vadd.f32 %v8475_v24, %v8097_v37  ;;  %v8736_v11 = vsel %vm8714_vm2, %v8691_v60, %v8692_v0 }
0x13c4   : > { %v9707_v12 = vadd.f32 %v12459_v20, %v9706_v25  ;;  %12466 = vpow2.f32 %v12085_v7  ;;  %v9423_v30 = vmul.f32 %v9298_v51, %v9213_v43  ;;  %v8066_v56 = vmul.f32 %v18624_v35, %v7849_v34  ;;  %v18625_v43 = vld [vmem:[#allocation34_spill] sm:$0xff] }
0x13c5   : > { %12468 = vrcp.f32 %v17499_v44  ;;  %v8506_v25 = vadd.f32 %v8474_v36, %v8096_v1  ;;  %v8949_v34 = vmul.f32 %v17265_v57, %v8737_v38  ;;  %v17521_v55 = vmul.f32 %v18625_v43, %v7848_v45  ;;  %v9303_v1 = vpop.permute.xlu2 %9302  ;;  %v18626_v45 = vld [vmem:[#allocation28_spill] sm:$0xff] }
0x13c6   : > { %v9711_v29 = vsel %vm9710_vm5, %v12459_v20, %v9707_v12  ;;  %v9455_v9 = vadd.f32 %v9423_v30, %v17257_v32  ;;  %v8098_v12 = vadd.f32 %v8066_v56, %v7623_v63  ;;  %v9727_v32 = vand.u32 2147483647, %v17479_v19  ;;  %v17534_v63 = vpop.f32.mrf.mxu1 }
0x13c7   : > { %v12465_v21 = vpop.eup %12464  ;;  %v9716_v53 = vsel %vm9713_vm6, %v9715_v2, %v9711_v29  ;;  %v9729_v57 = vand.u32 2147483648, %v17479_v19  ;;  %v7811_v38 = vrot.slane %v17112_v27, 1  ;;  %v8981_v29 = vadd.f32 %v8949_v34, %v8506_v25 }
0x13c8   : > { %10127 = vst [vmem:[%s17434_s7 + $0x20] sm:$0xff] %v9716_v53  ;;  %v9719_v20 = vmul.f32 %v12465_v21, %v17479_v19  ;;  %v9099_v7 = vpop.f32.mrf.mxu3  ;;  %v9491_v36 = vadd.f32 %v17391_v40, %v9455_v9  ;;  %vm9724_vm7 = vweird.f32 %v12465_v21  ;;  %v17537_v35 = vadd.f32 %v8476_v17, %v8098_v12 }
0x13c9   : > { %v9166_v48 = vrot.slane %v9099_v7, 6  ;;  %vm9723_vm8 = vweird.f32 %v17479_v19  ;;  %v7624_v53 = vmul.f32 %v18626_v45, %v17118_v46  ;;  %v9730_v17 = vor.u32 1.1754944e-38, %v9729_v57  ;;  %v9308_v57 = vpop.permute.xlu0 %9307 }
0x13ca   : > { %v12467_v51 = vpop.eup %12466  ;;  %v9720_v59 = vsub.f32 1.0, %v9719_v20  ;;  %v12086_v30 = vmul.f32 -1.442695, %v9491_v36  ;;  %v8950_v20 = vmul.f32 %v17275_v4, %v8736_v11  ;;  %vm9725_vm9 = vmor %vm9723_vm8, %vm9724_vm7  ;;  %v8693_v9 = vrot.slane %v17417_v52, 7  ;;  %v17556_v4 = vpop.f32.mrf.mxu2  ;;  %v18627_v36 = vld [vmem:[#allocation19_spill] sm:$0xff] }
0x13cb   : > { %v17530_v24 = vadd.f32 1.0, %v12467_v51  ;;  %v9212_v37 = vsel %vm9189_vm3, %v9165_v13, %v9166_v48  ;;  %v12469_v60 = vpop.eup %12468  ;;  %vm9728_vm10 = vcmp.eq.f32.partialorder %v9727_v32, 8.507059e+37  ;;  %v9744_v12 = vand.u32 2147483648, %v17499_v44 }
0x13cc   : > { %v9721_v2 = vmul.f32 %v12465_v21, %v9720_v59  ;;  %v9424_v26 = vmul.f32 %v9303_v1, %v9212_v37  ;;  %v9734_v13 = vmul.f32 %v12469_v60, %v17499_v44  ;;  %v7847_v46 = vsel %vm7829_vm0, %v7810_v49, %v7811_v38 }
0x13cd   : > { %12470 = vrcp.f32 %v17530_v24  ;;  %9141 = vmatmul.bf16.gmra.mxu3 %v17028_v41  ;;  %vm9739_vm11 = vweird.f32 %v12469_v60  ;;  %v9742_v11 = vand.u32 2147483647, %v17499_v44  ;;  %v7625_v1 = vmul.f32 %v18627_v36, %v17136_v31  ;;  %v9313_v36 = vpop.permute.xlu1 %9312 }
0x13ce   : > { %v9722_v56 = vadd.f32 %v12465_v21, %v9721_v2  ;;  %12472 = vpow2.f32 %v12086_v30  ;;  %v9456_v25 = vadd.f32 %v9424_v26, %v8981_v29  ;;  %v9735_v41 = vsub.f32 1.0, %v9734_v13 }
0x13cf   : > { %v8982_v32 = vadd.f32 %v8950_v20, %v8507_v50  ;;  %vm9738_vm12 = vweird.f32 %v17499_v44  ;;  %v8735_v31 = vsel %vm8714_vm2, %v8692_v0, %v8693_v9  ;;  %v9745_v50 = vor.u32 1.1754944e-38, %v9744_v12 }
0x13d0   : > { %v9726_v7 = vsel %vm9725_vm9, %v12465_v21, %v9722_v56  ;;  %v9102_v34 = vpop.f32.mrf.mxu3  ;;  %v9492_v51 = vadd.f32 %v17391_v40, %v9456_v25  ;;  %v9736_v21 = vmul.f32 %v12469_v60, %v9735_v41  ;;  %vm9740_vm13 = vmor %vm9738_vm12, %vm9739_vm11  ;;  %vm9743_vm14 = vcmp.eq.f32.partialorder %v9742_v11, 8.507059e+37  ;;  %v18628_v41 = vld [vmem:[#allocation32_spill] sm:$0xff] }
0x13d1   : > { %v9731_v19 = vsel %vm9728_vm10, %v9730_v17, %v9726_v7  ;;  %v9167_v43 = vrot.slane %v9102_v34, 6  ;;  %v9757_v20 = vand.u32 2147483647, %v17530_v24  ;;  %v9759_v42 = vand.u32 2147483648, %v17530_v24 }
0x13d2   : > { %10128 = vst [vmem:[%s17434_s7 + $0x28] sm:$0xff] %v9731_v19  ;;  %v12087_v37 = vmul.f32 -1.442695, %v9492_v51  ;;  %v9737_v30 = vadd.f32 %v12469_v60, %v9736_v21  ;;  %v8099_v0 = vadd.f32 %v17521_v55, %v7624_v53  ;;  %v7812_v34 = vrot.slane %v17132_v15, 1  ;;  %v17589_v15 = vpop.f32.mrf.mxu2 }
0x13d3   : > { %v12471_v59 = vpop.eup %12470  ;;  %v9211_v8 = vsel %vm9189_vm3, %v9166_v48, %v9167_v43  ;;  %v17574_v48 = vpop.f32.mrf.mxu1  ;;  %v8951_v19 = vmul.f32 %v17285_v5, %v8735_v31  ;;  %v8694_v51 = vrot.slane %v17432_v54, 7  ;;  %vm9753_vm1 = vweird.f32 %v17530_v24 }
0x13d4   : > { %v12473_v2 = vpop.eup %12472  ;;  %v9749_v49 = vmul.f32 %v12471_v59, %v17530_v24  ;;  %v9425_v26 = vmul.f32 %v9308_v57, %v9211_v8  ;;  %12474 = vpow2.f32 %v12087_v37  ;;  %v9741_v56 = vsel %vm9740_vm13, %v12469_v60, %v9737_v30 }
0x13d5   : > { %v17572_v29 = vadd.f32 1.0, %v12473_v2  ;;  %v9746_v45 = vsel %vm9743_vm14, %v9745_v50, %v9741_v56  ;;  %vm9754_vm15 = vweird.f32 %v12471_v59  ;;  %v8068_v60 = vmul.f32 %v18628_v41, %v7847_v46 }
0x13d6   : > { %v9750_v44 = vsub.f32 1.0, %v9749_v49  ;;  %v9457_v13 = vadd.f32 %v9425_v26, %v8982_v32  ;;  %10129 = vst [vmem:[%s17434_s7 + $0x30] sm:$0xff] %v9746_v45  ;;  %vm9755_vm4 = vmor %vm9753_vm1, %vm9754_vm15  ;;  %vm9758_vm5 = vcmp.eq.f32.partialorder %v9757_v20, 8.507059e+37  ;;  %v9760_v32 = vor.u32 1.1754944e-38, %v9759_v42  ;;  %v18630_v26 = vld [vmem:[#allocation15_spill] sm:$0xff] }
0x13d7   : > { %12476 = vrcp.f32 %v17572_v29  ;;  %v8100_v53 = vadd.f32 %v8068_v60, %v7625_v1  ;;  %v8477_v24 = vmul.f32 %v16947_v58, %v17441_v16  ;;  %v7846_v1 = vsel %vm7829_vm0, %v7811_v38, %v7812_v34 }
0x13d8   : > { %v9751_v17 = vmul.f32 %v12471_v59, %v9750_v44  ;;  %v9493_v25 = vadd.f32 %v17391_v40, %v9457_v13  ;;  %v9104_v7 = vpop.f32.mrf.mxu3  ;;  %v8983_v2 = vadd.f32 %v8951_v19, %v17537_v35  ;;  %v8734_v58 = vsel %vm8714_vm2, %v8693_v9, %v8694_v51  ;;  %v18629_v35 = vld [vmem:[#allocation51_spill] sm:$0xff]  ;;  %v9318_v19 = vpop.permute.xlu2 %9317 }
0x13d9   : > { %v9168_v12 = vrot.slane %v9104_v7, 6  ;;  %v8479_v16 = vmul.f32 %v17001_v3, %v17514_v28  ;;  %v8509_v38 = vadd.f32 %v8477_v24, %v8099_v0  ;;  %v7626_v31 = vmul.f32 %v18630_v26, %v17152_v23  ;;  %v18632_v24 = vld [vmem:[#allocation20_spill] sm:$0xff]  ;;  %v9323_v26 = vpop.permute.xlu0 %9322 }
0x13da   : > { %v9752_v21 = vadd.f32 %v12471_v59, %v9751_v17  ;;  %v12088_v11 = vmul.f32 -1.442695, %v9493_v25  ;;  %v12475_v55 = vpop.eup %12474  ;;  %v8952_v50 = vmul.f32 %v17277_v10, %v8734_v58  ;;  %v9774_v3 = vand.u32 2147483648, %v17572_v29 }
0x13db   : > { %v9210_v46 = vsel %vm9189_vm3, %v9167_v43, %v9168_v12  ;;  %v17591_v57 = vadd.f32 1.0, %v12475_v55  ;;  %v8478_v43 = vmul.f32 %v16965_v33, %v17469_v6  ;;  %v7813_v33 = vrot.slane %v17148_v14, 1  ;;  %v17618_v52 = vpop.f32.mrf.mxu1  ;;  %v18631_v55 = vld [vmem:[#allocation31_spill] sm:$0xff] }
0x13dc   : > { %v9756_v5 = vsel %vm9755_vm4, %v12471_v59, %v9752_v21  ;;  %12478 = vpow2.f32 %v12088_v11  ;;  %v9426_v37 = vmul.f32 %v9313_v36, %v9210_v46  ;;  %v8069_v59 = vmul.f32 %v18629_v35, %v7846_v1 }
0x13dd   : > { %v12477_v8 = vpop.eup %12476  ;;  %v9761_v30 = vsel %vm9758_vm5, %v9760_v32, %v9756_v5  ;;  %9146 = vmatmul.bf16.gmra.mxu3 %v17084_v39  ;;  %12480 = vrcp.f32 %v17591_v57  ;;  %v17616_v6 = vadd.f32 %v8478_v43, %v8100_v53  ;;  %v9772_v13 = vand.u32 2147483647, %v17572_v29 }
0x13de   : > { %10130 = vst [vmem:[%s17434_s7 + $0x38] sm:$0xff] %v9761_v30  ;;  %v9764_v27 = vmul.f32 %v12477_v8, %v17572_v29  ;;  %v9458_v39 = vadd.f32 %v9426_v37, %v8983_v2  ;;  %vm9769_vm6 = vweird.f32 %v12477_v8  ;;  %v17631_v20 = vmul.f32 %v16978_v61, %v17556_v4  ;;  %v17645_v4 = vpop.f32.mrf.mxu2  ;;  %v18633_v2 = vld [vmem:[#allocation99_spill] sm:$0xff] }
0x13df   : > { %v8695_v42 = vrot.slane %v17451_v22, 7  ;;  %v7845_v17 = vsel %vm7829_vm0, %v7812_v34, %v7813_v33  ;;  %vm9768_vm7 = vweird.f32 %v17572_v29  ;;  %v8101_v41 = vadd.f32 %v8069_v59, %v7626_v31 }
0x13e0   : > { %v9765_v49 = vsub.f32 1.0, %v9764_v27  ;;  %v17620_v9 = vpop.f32.mrf.mxu3  ;;  %v9494_v28 = vadd.f32 %v17391_v40, %v9458_v39  ;;  %vm9770_vm8 = vmor %vm9768_vm7, %vm9769_vm6  ;;  %v9775_v61 = vor.u32 1.1754944e-38, %v9774_v3  ;;  %v8984_v60 = vadd.f32 %v8952_v50, %v8509_v38  ;;  %v18634_v38 = vld [vmem:[#allocation82_spill] sm:$0xff] }
0x13e1   : > { %v9169_v45 = vrot.slane %v17620_v9, 6  ;;  %vm9773_vm9 = vcmp.eq.f32.partialorder %v9772_v13, 8.507059e+37  ;;  %v8733_v29 = vsel %vm8714_vm2, %v8694_v51, %v8695_v42  ;;  %v8070_v53 = vmul.f32 %v18631_v55, %v7845_v17  ;;  %v18635_v39 = vld [vmem:[#allocation14_spill] sm:$0xff] }
0x13e2   : > { %v12479_v56 = vpop.eup %12478  ;;  %v9766_v44 = vmul.f32 %v12477_v8, %v9765_v49  ;;  %v12089_v10 = vmul.f32 -1.442695, %v9494_v28  ;;  %v8696_v36 = vrot.slane %v17489_v18, 7  ;;  %v9787_v32 = vand.u32 2147483647, %v17591_v57  ;;  %v18636_v28 = vld [vmem:[#allocation74_spill] sm:$0xff] }
0x13e3   : > { %v17634_v23 = vadd.f32 1.0, %v12479_v56  ;;  %v12481_v0 = vpop.eup %12480  ;;  %v9209_v7 = vsel %vm9189_vm3, %v9168_v12, %v9169_v45  ;;  %v9789_v46 = vand.u32 2147483648, %v17591_v57  ;;  %v8511_v37 = vadd.f32 %v8479_v16, %v8101_v41  ;;  %v17662_v43 = vpop.f32.mrf.mxu1  ;;  %v18640_v55 = vld [vmem:[#allocation26_spill] sm:$0xff]  ;;  %v18645_v18 = vld [vmem:[#allocation52_spill] sm:$0xff] }
0x13e4   : > { %v9767_v25 = vadd.f32 %v12477_v8, %v9766_v44  ;;  %v9779_v22 = vmul.f32 %v12481_v0, %v17591_v57  ;;  %v9427_v11 = vmul.f32 %v9318_v19, %v9209_v7  ;;  %vm9784_vm10 = vweird.f32 %v12481_v0 }
0x13e5   : > { %12482 = vrcp.f32 %v17634_v23  ;;  %v17658_v51 = vmul.f32 %v18632_v24, %v17589_v15  ;;  %v7814_v1 = vrot.slane %v17163_v62, 1  ;;  %v8953_v30 = vmul.f32 %v18633_v2, %v8733_v29  ;;  %v18641_v24 = vld [vmem:[#allocation54_spill] sm:$0xff] }
0x13e6   : > { %v9771_v21 = vsel %vm9770_vm8, %v12477_v8, %v9767_v25  ;;  %12484 = vpow2.f32 %v12089_v10  ;;  %v9780_v12 = vsub.f32 1.0, %v9779_v22  ;;  %v9459_v54 = vadd.f32 %v9427_v11, %v8984_v60  ;;  %v18637_v10 = vld [vmem:[#allocation103_spill] sm:$0xff]  ;;  %v17684_v7 = vpop.f32.mrf.mxu2  ;;  %v18639_v11 = vld [vmem:[#allocation84_spill] sm:$0xff] }
0x13e7   : > { %v9776_v34 = vsel %vm9773_vm9, %v9775_v61, %v9771_v21  ;;  %v7627_v35 = vmul.f32 %v18635_v39, %v18634_v38  ;;  %vm9783_vm11 = vweird.f32 %v17591_v57  ;;  %v8732_v62 = vsel %vm8714_vm2, %v8695_v42, %v8696_v36  ;;  %v18638_v22 = vld [vmem:[#allocation83_spill] sm:$0xff] }
0x13e8   : > { %10131 = vst [vmem:[%s17434_s7 + $0x40] sm:$0xff] %v9776_v34  ;;  %v9109_v5 = vpop.f32.mrf.mxu3  ;;  %v9781_v8 = vmul.f32 %v12481_v0, %v9780_v12  ;;  %v9495_v16 = vadd.f32 %v17391_v40, %v9459_v54  ;;  %vm9785_vm12 = vmor %vm9783_vm11, %vm9784_vm10  ;;  %vm9788_vm13 = vcmp.eq.f32.partialorder %v9787_v32, 8.507059e+37  ;;  %v9790_v15 = vor.u32 1.1754944e-38, %v9789_v46 }
0x13e9   : > { %v9170_v58 = vrot.slane %v9109_v5, 6  ;;  %v8985_v56 = vadd.f32 %v8953_v30, %v17616_v6  ;;  %v8954_v17 = vmul.f32 %v18637_v10, %v8732_v62  ;;  %v9802_v25 = vand.u32 2147483647, %v17634_v23  ;;  %v9328_v5 = vpop.permute.xlu1 %9327 }
0x13ea   : > { %v9782_v59 = vadd.f32 %v12481_v0, %v9781_v8  ;;  %v12090_v3 = vmul.f32 -1.442695, %v9495_v16  ;;  %v7844_v6 = vsel %vm7829_vm0, %v7813_v33, %v7814_v1  ;;  %v7815_v60 = vrot.slane %v18638_v22, 1  ;;  %v18642_v16 = vld [vmem:[#allocation86_spill] sm:$0xff] }
0x13eb   : > { %v12483_v27 = vpop.eup %12482  ;;  %v9208_v57 = vsel %vm9189_vm3, %v9169_v45, %v9170_v58  ;;  %v8697_v19 = vrot.slane %v17534_v63, 7  ;;  %v8102_v29 = vadd.f32 %v8070_v53, %v7627_v35  ;;  %vm9798_vm15 = vweird.f32 %v17634_v23  ;;  %v17699_v63 = vpop.f32.mrf.mxu1 }
0x13ec   : > { %v12485_v49 = vpop.eup %12484  ;;  %v9794_v9 = vmul.f32 %v12483_v27, %v17634_v23  ;;  %v9786_v31 = vsel %vm9785_vm12, %v12481_v0, %v9782_v59  ;;  %v9428_v42 = vmul.f32 %v9323_v26, %v9208_v57  ;;  %v9804_v0 = vand.u32 2147483648, %v17634_v23 }
0x13ed   : > { %v17673_v50 = vadd.f32 1.0, %v12485_v49  ;;  %9151 = vmatmul.bf16.gmra.mxu3 %v18636_v28  ;;  %v9791_v44 = vsel %vm9788_vm13, %v9790_v15, %v9786_v31  ;;  %vm9799_vm14 = vweird.f32 %v12483_v27  ;;  %v7628_v32 = vmul.f32 %v18640_v55, %v18639_v11  ;;  %v18643_v49 = vld [vmem:[#allocation24_spill] sm:$0xff]  ;;  %v18644_v15 = vld [vmem:[#allocation85_spill] sm:$0xff] }
0x13ee   : > { %v9795_v13 = vsub.f32 1.0, %v9794_v9  ;;  %10132 = vst [vmem:[%s17434_s7 + $0x48] sm:$0xff] %v9791_v44  ;;  %v9460_v45 = vadd.f32 %v9428_v42, %v8985_v56  ;;  %v8986_v46 = vadd.f32 %v8954_v17, %v8511_v37  ;;  %vm9800_vm1 = vmor %vm9798_vm15, %vm9799_vm14  ;;  %v9805_v14 = vor.u32 1.1754944e-38, %v9804_v0 }
0x13ef   : > { %12486 = vrcp.f32 %v17673_v50  ;;  %vm9803_vm4 = vcmp.eq.f32.partialorder %v9802_v25, 8.507059e+37  ;;  %v8071_v2 = vmul.f32 %v18641_v24, %v7844_v6  ;;  %v7843_v37 = vsel %vm7829_vm0, %v7814_v1, %v7815_v60  ;;  %v18649_v6 = vld [vmem:[#allocation87_spill] sm:$0xff]  ;;  %v18651_v24 = vld [vmem:[#allocation12_spill] sm:$0xff] }
0x13f0   : > { %v9796_v41 = vmul.f32 %v12483_v27, %v9795_v13  ;;  %12488 = vpow2.f32 %v12090_v3  ;;  %v9112_v61 = vpop.f32.mrf.mxu3  ;;  %v9496_v12 = vadd.f32 %v17391_v40, %v9460_v45  ;;  %v8731_v30 = vsel %vm8714_vm2, %v8696_v36, %v8697_v19  ;;  %v18646_v36 = vld [vmem:[#allocation100_spill] sm:$0xff]  ;;  %v8239_v13 = vpop.f32.mrf.mxu2  ;;  %v18648_v45 = vld [vmem:[#allocation43_spill] sm:$0xff] }
0x13f1   : > { %v9171_v21 = vrot.slane %v9112_v61, 6  ;;  %v8103_v59 = vadd.f32 %v8071_v2, %v7628_v32  ;;  %v7629_v62 = vmul.f32 %v18643_v49, %v18642_v16  ;;  %v7816_v1 = vrot.slane %v18644_v15, 1 }
0x13f2   : > { %v9797_v34 = vadd.f32 %v12483_v27, %v9796_v41  ;;  %v12091_v8 = vmul.f32 -1.442695, %v9496_v12  ;;  %v8072_v26 = vmul.f32 %v18645_v18, %v7843_v37  ;;  %v8955_v31 = vmul.f32 %v18646_v36, %v8731_v30  ;;  %v18647_v41 = vld [vmem:[#allocation88_spill] sm:$0xff]  ;;  %v18652_v37 = vld [vmem:[#allocation55_spill] sm:$0xff] }
0x13f3   : > { %v9207_v33 = vsel %vm9189_vm3, %v9170_v58, %v9171_v21  ;;  %v8512_v58 = vadd.f32 %v17631_v20, %v8102_v29  ;;  %v8698_v28 = vrot.slane %v17574_v48, 7  ;;  %v9817_v56 = vand.u32 2147483647, %v17673_v50  ;;  %v9333_v29 = vpop.permute.xlu2 %9332 }
0x13f4   : > { %v9801_v53 = vsel %vm9800_vm1, %v12483_v27, %v9797_v34  ;;  %v9429_v23 = vmul.f32 %v9328_v5, %v9207_v33  ;;  %12490 = vpow2.f32 %v12091_v8  ;;  %v9819_v44 = vand.u32 2147483648, %v17673_v50 }
0x13f5   : > { %v12487_v54 = vpop.eup %12486  ;;  %v9806_v38 = vsel %vm9803_vm4, %v9805_v14, %v9801_v53  ;;  %v8104_v25 = vadd.f32 %v8072_v26, %v7629_v62  ;;  %v7842_v0 = vsel %vm7829_vm0, %v7815_v60, %v7816_v1  ;;  %v7630_v61 = vmul.f32 %v18648_v45, %v18647_v41  ;;  %v17736_v14 = vpop.f32.mrf.mxu1  ;;  %v18650_v53 = vld [vmem:[#allocation70_spill] sm:$0xff] }
0x13f6   : > { %v12489_v39 = vpop.eup %12488  ;;  %10133 = vst [vmem:[%s17434_s7 + $0x50] sm:$0xff] %v9806_v38  ;;  %v9809_v27 = vmul.f32 %v12487_v54, %v17673_v50  ;;  %v9461_v35 = vadd.f32 %v9429_v23, %v8986_v46  ;;  %vm9814_vm5 = vweird.f32 %v12487_v54  ;;  %v7817_v48 = vrot.slane %v18649_v6, 1  ;;  %v9338_v62 = vpop.permute.xlu0 %9337 }
0x13f7   : > { %v17714_v9 = vadd.f32 1.0, %v12489_v39  ;;  %vm9813_vm6 = vweird.f32 %v17673_v50  ;;  %v8987_v11 = vadd.f32 %v8955_v31, %v8512_v58  ;;  %v9820_v55 = vor.u32 1.1754944e-38, %v9819_v44  ;;  %v18653_v39 = vld [vmem:[#allocation104_spill] sm:$0xff]  ;;  %v18655_v44 = vld [vmem:[#allocation30_spill] sm:$0xff] }
0x13f8   : > { %v9810_v3 = vsub.f32 1.0, %v9809_v27  ;;  %v9497_v20 = vadd.f32 %v17391_v40, %v9461_v35  ;;  %v9114_v57 = vpop.f32.mrf.mxu3  ;;  %vm9815_vm7 = vmor %vm9813_vm6, %vm9814_vm5  ;;  %v8730_v46 = vsel %vm8714_vm2, %v8697_v19, %v8698_v28  ;;  %v8699_v5 = vrot.slane %v17618_v52, 7  ;;  %v17763_v36 = vpop.f32.mrf.mxu2 }
0x13f9   : > { %12492 = vrcp.f32 %v17714_v9  ;;  %v9172_v17 = vrot.slane %v9114_v57, 6  ;;  %vm9818_vm8 = vcmp.eq.f32.partialorder %v9817_v56, 8.507059e+37  ;;  %v8513_v8 = vadd.f32 %v17658_v51, %v8103_v59 }
0x13fa   : > { %v9811_v42 = vmul.f32 %v12487_v54, %v9810_v3  ;;  %v12092_v10 = vmul.f32 -1.442695, %v9497_v20  ;;  %v12491_v22 = vpop.eup %12490  ;;  %v8483_v2 = vmul.f32 %v18651_v24, %v17684_v7  ;;  %v8073_v19 = vmul.f32 %v18652_v37, %v7842_v0  ;;  %v18656_v0 = vld [vmem:[#allocation108_spill] sm:$0xff]  ;;  %v18658_v24 = vld [vmem:[#allocation90_spill] sm:$0xff] }
0x13fb   : > { %v9206_v12 = vsel %vm9189_vm3, %v9171_v21, %v9172_v17  ;;  %v17731_v32 = vadd.f32 1.0, %v12491_v22  ;;  %v8482_v21 = vmul.f32 %v18650_v53, %v17645_v4  ;;  %v7841_v4 = vsel %vm7829_vm0, %v7816_v1, %v7817_v48 }
0x13fc   : > { %v9812_v34 = vadd.f32 %v12487_v54, %v9811_v42  ;;  %12494 = vpow2.f32 %v12092_v10  ;;  %v9430_v60 = vmul.f32 %v9333_v29, %v9206_v12  ;;  %v8956_v51 = vmul.f32 %v18653_v39, %v8730_v46 }
0x13fd   : > { %12496 = vrcp.f32 %v17731_v32  ;;  %v8514_v58 = vadd.f32 %v8482_v21, %v8104_v25  ;;  %v8105_v59 = vadd.f32 %v8073_v19, %v7630_v61  ;;  %v8729_v7 = vsel %vm8714_vm2, %v8698_v28, %v8699_v5  ;;  %v18654_v28 = vld [vmem:[#allocation71_spill] sm:$0xff]  ;;  %v17778_v29 = vpop.f32.mrf.mxu1  ;;  %v9343_v19 = vpop.permute.xlu1 %9342 }
0x13fe   : > { %v9816_v33 = vsel %vm9815_vm7, %v12487_v54, %v9812_v34  ;;  %v9462_v38 = vadd.f32 %v9430_v60, %v8987_v11  ;;  %v9832_v15 = vand.u32 2147483647, %v17714_v9  ;;  %v9834_v18 = vand.u32 2147483648, %v17714_v9 }
0x13ff   : > { %v12493_v50 = vpop.eup %12492  ;;  %v9821_v23 = vsel %vm9818_vm8, %v9820_v55, %v9816_v33  ;;  %v17766_v56 = vmul.f32 %v18654_v28, %v8239_v13  ;;  %v17769_v42 = vmul.f32 %v18655_v44, %v7841_v4  ;;  %v8988_v10 = vadd.f32 %v8956_v51, %v8513_v8  ;;  %v18657_v33 = vld [vmem:[#allocation89_spill] sm:$0xff] }
0x1400   : > { %10134 = vst [vmem:[%s17434_s7 + $0x58] sm:$0xff] %v9821_v23  ;;  %v9824_v30 = vmul.f32 %v12493_v50, %v17714_v9  ;;  %v9117_v54 = vpop.f32.mrf.mxu3  ;;  %v9498_v49 = vadd.f32 %v17391_v40, %v9462_v38  ;;  %vm9829_vm9 = vweird.f32 %v12493_v50  ;;  %vm9828_vm10 = vweird.f32 %v17714_v9 }
0x1401   : > { %v9173_v27 = vrot.slane %v9117_v54, 6  ;;  %v8957_v41 = vmul.f32 %v18656_v0, %v8729_v7  ;;  %v17775_v45 = vadd.f32 %v8483_v2, %v8105_v59  ;;  %vm9830_vm11 = vmor %vm9828_vm10, %vm9829_vm9  ;;  %v9835_v13 = vor.u32 1.1754944e-38, %v9834_v18  ;;  %v18659_v2 = vld [vmem:[#allocation27_spill] sm:$0xff] }
0x1402   : > { %v12495_v35 = vpop.eup %12494  ;;  %v9825_v16 = vsub.f32 1.0, %v9824_v30  ;;  %v12093_v3 = vmul.f32 -1.442695, %v9498_v49  ;;  %v8700_v22 = vrot.slane %v17662_v43, 7  ;;  %vm9833_vm12 = vcmp.eq.f32.partialorder %v9832_v15, 8.507059e+37  ;;  %v18662_v0 = vld [vmem:[#allocation91_spill] sm:$0xff] }
0x1403   : > { %v17759_v1 = vadd.f32 1.0, %v12495_v35  ;;  %v9205_v26 = vsel %vm9189_vm3, %v9172_v17, %v9173_v27  ;;  %v12497_v57 = vpop.eup %12496  ;;  %v9849_v55 = vand.u32 2147483648, %v17731_v32  ;;  %v7818_v53 = vrot.slane %v18657_v33, 1  ;;  %v17810_v15 = vld [vmem:[%s18264_s26] ss:$0 sm:$0xff] }
0x1404   : > { %v9826_v31 = vmul.f32 %v12493_v50, %v9825_v16  ;;  %v9431_v20 = vmul.f32 %v9338_v62, %v9205_v26  ;;  %v9839_v17 = vmul.f32 %v12497_v57, %v17731_v32  ;;  %vm9844_vm13 = vweird.f32 %v12497_v57 }
0x1405   : > { %12498 = vrcp.f32 %v17759_v1  ;;  %v9847_v8 = vand.u32 2147483647, %v17731_v32  ;;  %v8989_v37 = vadd.f32 %v8957_v41, %v8514_v58  ;;  %vm9843_vm14 = vweird.f32 %v17731_v32  ;;  %v17817_v44 = vpop.f32.mrf.mxu1  ;;  %v18663_v41 = vld [vmem:[#allocation25_spill] sm:$0xff] }
0x1406   : > { %v9827_v25 = vadd.f32 %v12493_v50, %v9826_v31  ;;  %12500 = vpow2.f32 %v12093_v3  ;;  %v9463_v61 = vadd.f32 %v9431_v20, %v8988_v10  ;;  %v9840_v12 = vsub.f32 1.0, %v9839_v17  ;;  %vm9845_vm15 = vmor %vm9843_vm14, %vm9844_vm13  ;;  %v18660_v31 = vld [vmem:[#allocation13_spill] sm:$0xff] }
0x1407   : > { %v8728_v51 = vsel %vm8714_vm2, %v8699_v5, %v8700_v22  ;;  %v9850_v58 = vor.u32 1.1754944e-38, %v9849_v55  ;;  %vm9848_vm1 = vcmp.eq.f32.partialorder %v9847_v8, 8.507059e+37  ;;  %v9862_v49 = vand.u32 2147483647, %v17759_v1  ;;  %v18661_v20 = vld [vmem:[#allocation105_spill] sm:$0xff] }
0x1408   : > { %v9831_v34 = vsel %vm9830_vm11, %v12493_v50, %v9827_v25  ;;  %v9119_v11 = vpop.f32.mrf.mxu3  ;;  %v9499_v60 = vadd.f32 %v17391_v40, %v9463_v61  ;;  %v9841_v21 = vmul.f32 %v12497_v57, %v9840_v12  ;;  %v7631_v50 = vmul.f32 %v18659_v2, %v18658_v24  ;;  %v9348_v61 = vpop.permute.xlu2 %9347  ;;  %v18666_v2 = vld [vmem:[#allocation72_spill] sm:$0xff] }
0x1409   : > { %v9836_v9 = vsel %vm9833_vm12, %v9835_v13, %v9831_v34  ;;  %v9174_v46 = vrot.slane %v9119_v11, 6  ;;  %v9864_v62 = vand.u32 2147483648, %v17759_v1  ;;  %v7840_v52 = vsel %vm7829_vm0, %v7817_v48, %v7818_v53 }
0x140a   : > { %10135 = vst [vmem:[%s17434_s7 + $0x60] sm:$0xff] %v9836_v9  ;;  %v12094_v30 = vmul.f32 -1.442695, %v9499_v60  ;;  %v9842_v40 = vadd.f32 %v12497_v57, %v9841_v21  ;;  %v7819_v3 = vrot.slane %v18660_v31, 1  ;;  %v8701_v6 = vrot.slane %v17699_v63, 7 }
0x140b   : > { %v12499_v23 = vpop.eup %12498  ;;  %v9204_v38 = vsel %vm9189_vm3, %v9173_v27, %v9174_v46  ;;  %v8244_v27 = vpop.f32.mrf.mxu2  ;;  %v8106_v48 = vadd.f32 %v17769_v42, %v7631_v50  ;;  %vm9858_vm5 = vweird.f32 %v17759_v1  ;;  %v7632_v13 = vmul.f32 %v18663_v41, %v18662_v0 }
0x140c   : > { %v12501_v54 = vpop.eup %12500  ;;  %v9854_v4 = vmul.f32 %v12499_v23, %v17759_v1  ;;  %v9432_v39 = vmul.f32 %v9343_v19, %v9204_v38  ;;  %12502 = vpow2.f32 %v12094_v30  ;;  %v9846_v59 = vsel %vm9845_vm15, %v12497_v57, %v9842_v40  ;;  %v18668_v30 = vld [vmem:[#allocation109_spill] sm:$0xff] }
0x140d   : > { %v17797_v35 = vadd.f32 1.0, %v12501_v54  ;;  %v9851_v16 = vsel %vm9848_vm1, %v9850_v58, %v9846_v59  ;;  %vm9859_vm4 = vweird.f32 %v12499_v23  ;;  %v8958_v57 = vmul.f32 %v18661_v20, %v8728_v51 }
0x140e   : > { %v9855_v32 = vsub.f32 1.0, %v9854_v4  ;;  %v9464_v7 = vadd.f32 %v9432_v39, %v8989_v37  ;;  %10136 = vst [vmem:[%s17434_s7 + $0x68] sm:$0xff] %v9851_v16  ;;  %vm9860_vm6 = vmor %vm9858_vm5, %vm9859_vm4  ;;  %vm9863_vm7 = vcmp.eq.f32.partialorder %v9862_v49, 8.507059e+37  ;;  %v9865_v34 = vor.u32 1.1754944e-38, %v9864_v62  ;;  %v18667_v37 = vld [vmem:[#allocation56_spill] sm:$0xff]  ;;  %v18671_v16 = vld [vmem:[#allocation33_spill] sm:$0xff]  ;;  %v9353_v62 = vpop.permute.xlu0 %9352 }
0x140f   : > { %12504 = vrcp.f32 %v17797_v35  ;;  %v7839_v9 = vsel %vm7829_vm0, %v7818_v53, %v7819_v3  ;;  %v8990_v55 = vadd.f32 %v8958_v57, %v17775_v45  ;;  %v8727_v60 = vsel %vm8714_vm2, %v8700_v22, %v8701_v6  ;;  %v17861_v57 = vpop.f32.mrf.mxu1 }
0x1410   : > { %v9856_v5 = vmul.f32 %v12499_v23, %v9855_v32  ;;  %v9500_v18 = vadd.f32 %v17810_v15, %v9464_v7  ;;  %v9122_v26 = vpop.f32.mrf.mxu3  ;;  %v17843_v53 = vmul.f32 %v18666_v2, %v8244_v27  ;;  %v8516_v45 = vadd.f32 %v17766_v56, %v8106_v48  ;;  %v18669_v27 = vld [vmem:[#allocation39_spill] sm:$0xff]  ;;  %v18670_v7 = vld [vmem:[#allocation92_spill] sm:$0xff] }
0x1411   : > { %v9175_v28 = vrot.slane %v9122_v26, 6  ;;  %v8076_v22 = vmul.f32 %v18667_v37, %v7839_v9  ;;  %v8959_v38 = vmul.f32 %v18668_v30, %v8727_v60  ;;  %v8702_v4 = vrot.slane %v17736_v14, 7 }
0x1412   : > { %v9857_v10 = vadd.f32 %v12499_v23, %v9856_v5  ;;  %v12095_v25 = vmul.f32 -1.442695, %v9500_v18  ;;  %v12503_v17 = vpop.eup %12502  ;;  %v9879_v39 = vand.u32 2147483648, %v17797_v35  ;;  %v7820_v56 = vrot.slane %v18669_v27, 1 }
0x1413   : > { %v9203_v63 = vsel %vm9189_vm3, %v9174_v46, %v9175_v28  ;;  %v17825_v12 = vadd.f32 1.0, %v12503_v17  ;;  %v18664_v46 = vld [vmem:[#allocation29_spill] sm:$0xff]  ;;  %v17847_v19 = vpop.f32.mrf.mxu2  ;;  %v9877_v32 = vand.u32 2147483647, %v17797_v35  ;;  %v7633_v49 = vmul.f32 %v18671_v16, %v18670_v7 }
0x1414   : > { %v9861_v42 = vsel %vm9860_vm6, %v12499_v23, %v9857_v10  ;;  %12506 = vpow2.f32 %v12095_v25  ;;  %v9433_v11 = vmul.f32 %v9348_v61, %v9203_v63  ;;  %v8075_v21 = vmul.f32 %v18664_v46, %v7840_v52  ;;  %v18665_v23 = vld [vmem:[#allocation22_spill] sm:$0xff]  ;;  %v18672_v63 = vld [vmem:[#allocation113_spill] sm:$0xff] }
0x1415   : > { %v12505_v1 = vpop.eup %12504  ;;  %v9866_v33 = vsel %vm9863_vm7, %v9865_v34, %v9861_v42  ;;  %12508 = vrcp.f32 %v17825_v12  ;;  %v8485_v24 = vmul.f32 %v18665_v23, %v17763_v36  ;;  %v8991_v20 = vadd.f32 %v8959_v38, %v8516_v45 }
0x1416   : > { %10137 = vst [vmem:[%s17434_s7 + $0x70] sm:$0xff] %v9866_v33  ;;  %v9869_v8 = vmul.f32 %v12505_v1, %v17797_v35  ;;  %v9465_v43 = vadd.f32 %v9433_v11, %v8990_v55  ;;  %v8107_v50 = vadd.f32 %v8075_v21, %v7632_v13  ;;  %vm9874_vm8 = vweird.f32 %v12505_v1  ;;  %v18673_v33 = vld [vmem:[#allocation58_spill] sm:$0xff] }
0x1417   : > { %vm9873_vm9 = vweird.f32 %v17797_v35  ;;  %v8726_v25 = vsel %vm8714_vm2, %v8701_v6, %v8702_v4  ;;  %v9880_v17 = vor.u32 1.1754944e-38, %v9879_v39  ;;  %vm9878_vm11 = vcmp.eq.f32.partialorder %v9877_v32, 8.507059e+37  ;;  %v18675_v21 = vld [vmem:[#allocation38_spill] sm:$0xff] }
0x1418   : > { %v9870_v54 = vsub.f32 1.0, %v9869_v8  ;;  %v9124_v40 = vpop.f32.mrf.mxu3  ;;  %v9501_v36 = vadd.f32 %v17810_v15, %v9465_v43  ;;  %vm9875_vm10 = vmor %vm9873_vm9, %vm9874_vm8  ;;  %v7838_v35 = vsel %vm7829_vm0, %v7819_v3, %v7820_v56  ;;  %v8108_v34 = vadd.f32 %v8076_v22, %v7633_v49  ;;  %v18674_v3 = vld [vmem:[#allocation94_spill] sm:$0xff] }
0x1419   : > { %v9176_v51 = vrot.slane %v9124_v40, 6  ;;  %v8960_v42 = vmul.f32 %v18672_v63, %v8726_v25  ;;  %v9892_v11 = vand.u32 2147483647, %v17825_v12  ;;  %v8077_v46 = vmul.f32 %v18673_v33, %v7838_v35  ;;  %v18678_v25 = vld [vmem:[#allocation95_spill] sm:$0xff]  ;;  %v18682_v33 = vld [vmem:[#allocation57_spill] sm:$0xff] }
0x141a   : > { %v12507_v58 = vpop.eup %12506  ;;  %v9871_v59 = vmul.f32 %v12505_v1, %v9870_v54  ;;  %v12096_v5 = vmul.f32 -1.442695, %v9501_v36  ;;  %v7634_v8 = vmul.f32 %v18675_v21, %v18674_v3  ;;  %v8703_v45 = vrot.slane %v17778_v29, 7  ;;  %v18683_v3 = vld [vmem:[#allocation73_spill] sm:$0xff] }
0x141b   : > { %v17857_v52 = vadd.f32 1.0, %v12507_v58  ;;  %v9202_v18 = vsel %vm9189_vm3, %v9175_v28, %v9176_v51  ;;  %v12509_v26 = vpop.eup %12508  ;;  %v8517_v28 = vadd.f32 %v8485_v24, %v8107_v50  ;;  %v17884_v23 = vpop.f32.mrf.mxu2  ;;  %v18676_v24 = vld [vmem:[#allocation93_spill] sm:$0xff]  ;;  %vm9888_vm13 = vweird.f32 %v17825_v12 }
0x141c   : > { %v9872_v48 = vadd.f32 %v12505_v1, %v9871_v59  ;;  %v9434_v10 = vmul.f32 %v9353_v62, %v9202_v18  ;;  %v9884_v0 = vmul.f32 %v12509_v26, %v17825_v12  ;;  %vm9889_vm12 = vweird.f32 %v12509_v26  ;;  %v9358_v50 = vpop.permute.xlu1 %9357 }
0x141d   : > { %12510 = vrcp.f32 %v17857_v52  ;;  %v7821_v2 = vrot.slane %v18676_v24, 1  ;;  %v8992_v54 = vadd.f32 %v8960_v42, %v8517_v28  ;;  %vm9890_vm14 = vmor %vm9888_vm13, %vm9889_vm12  ;;  %vm9893_vm15 = vcmp.eq.f32.partialorder %v9892_v11, 8.507059e+37  ;;  %v18681_v11 = vld [vmem:[#allocation53_spill] sm:$0xff] }
0x141e   : > { %v9876_v41 = vsel %vm9875_vm10, %v12505_v1, %v9872_v48  ;;  %12512 = vpow2.f32 %v12096_v5  ;;  %v9885_v61 = vsub.f32 1.0, %v9884_v0  ;;  %v9466_v6 = vadd.f32 %v9434_v10, %v8991_v20 }
0x141f   : > { %v9881_v13 = vsel %vm9878_vm11, %v9880_v17, %v9876_v41  ;;  %v9894_v1 = vand.u32 2147483648, %v17825_v12  ;;  %v8725_v12 = vsel %vm8714_vm2, %v8702_v4, %v8703_v45  ;;  %v8518_v16 = vadd.f32 %v17843_v53, %v8108_v34  ;;  %v18679_v41 = vld [vmem:[#allocation96_spill] sm:$0xff] }
0x1420   : > { %10138 = vst [vmem:[%s17434_s7 + $0x78] sm:$0xff] %v9881_v13  ;;  %v9127_v9 = vpop.f32.mrf.mxu3  ;;  %v9886_v55 = vmul.f32 %v12509_v26, %v9885_v61  ;;  %v9502_v60 = vadd.f32 %v17810_v15, %v9466_v6  ;;  %v9907_v49 = vand.u32 2147483647, %v17857_v52  ;;  %v9909_v62 = vand.u32 2147483648, %v17857_v52  ;;  %v9363_v13 = vpop.permute.xlu2 %9362 }
0x1421   : > { %v9177_v31 = vrot.slane %v9127_v9, 6  ;;  %v9895_v40 = vor.u32 1.1754944e-38, %v9894_v1  ;;  %v7837_v14 = vsel %vm7829_vm0, %v7820_v56, %v7821_v2  ;;  %v8109_v53 = vadd.f32 %v8077_v46, %v7634_v8  ;;  %v18680_v56 = vld [vmem:[#allocation47_spill] sm:$0xff] }
0x1422   : > { %v9887_v37 = vadd.f32 %v12509_v26, %v9886_v55  ;;  %v12097_v22 = vmul.f32 -1.442695, %v9502_v60  ;;  %v8704_v48 = vrot.slane %v17817_v44, 7  ;;  %v7822_v17 = vrot.slane %v18678_v25, 1 }
0x1423   : > { %v12511_v43 = vpop.eup %12510  ;;  %v9201_v30 = vsel %vm9189_vm3, %v9176_v51, %v9177_v31  ;;  %v17899_v51 = vpop.f32.mrf.mxu1  ;;  %vm9903_vm4 = vweird.f32 %v17857_v52  ;;  %v7635_v35 = vmul.f32 %v18680_v56, %v18679_v41  ;;  %vm9908_vm6 = vcmp.eq.f32.partialorder %v9907_v49, 8.507059e+37 }
0x1424   : > { %v12513_v38 = vpop.eup %12512  ;;  %v9899_v39 = vmul.f32 %v12511_v43, %v17857_v52  ;;  %v9435_v36 = vmul.f32 %v9358_v50, %v9201_v30  ;;  %v9891_v58 = vsel %vm9890_vm14, %v12509_v26, %v9887_v37  ;;  %12514 = vpow2.f32 %v12097_v22  ;;  %v18677_v26 = vld [vmem:[#allocation112_spill] sm:$0xff]  ;;  %v8252_v44 = vpop.f32.mrf.mxu2  ;;  %v18684_v50 = vld [vmem:[#allocation21_spill] sm:$0xff] }
0x1425   : > { %v17893_v29 = vadd.f32 1.0, %v12513_v38  ;;  %v9896_v59 = vsel %vm9893_vm15, %v9895_v40, %v9891_v58  ;;  %vm9904_vm1 = vweird.f32 %v12511_v43  ;;  %v8961_v20 = vmul.f32 %v18677_v26, %v8725_v12  ;;  %v18685_v22 = vld [vmem:[#allocation116_spill] sm:$0xff]  ;;  %v18686_v58 = vld [vmem:[#allocation59_spill] sm:$0xff]  ;;  %v9368_v49 = vpop.permute.xlu0 %9367 }
0x1426   : > { %v9900_v32 = vsub.f32 1.0, %v9899_v39  ;;  %v9467_v7 = vadd.f32 %v9435_v36, %v8992_v54  ;;  %10139 = vst [vmem:[%s17434_s7 + $0x80] sm:$0xff] %v9896_v59  ;;  %vm9905_vm5 = vmor %vm9903_vm4, %vm9904_vm1  ;;  %v9910_v61 = vor.u32 1.1754944e-38, %v9909_v62  ;;  %v8487_v1 = vmul.f32 %v18681_v11, %v17847_v19 }
0x1427   : > { %12516 = vrcp.f32 %v17893_v29  ;;  %v8993_v9 = vadd.f32 %v8961_v20, %v8518_v16  ;;  %v8724_v55 = vsel %vm8714_vm2, %v8703_v45, %v8704_v48  ;;  %v8078_v46 = vmul.f32 %v18682_v33, %v7837_v14  ;;  %v18691_v33 = vld [vmem:[#allocation102_spill] sm:$0xff] }
0x1428   : > { %v9901_v4 = vmul.f32 %v12511_v43, %v9900_v32  ;;  %v9503_v5 = vadd.f32 %v17810_v15, %v9467_v7  ;;  %v9129_v18 = vpop.f32.mrf.mxu3  ;;  %v8488_v21 = vmul.f32 %v18683_v3, %v17884_v23  ;;  %v7836_v19 = vsel %vm7829_vm0, %v7821_v2, %v7822_v17  ;;  %v18687_v7 = vld [vmem:[#allocation97_spill] sm:$0xff] }
0x1429   : > { %v9178_v10 = vrot.slane %v9129_v18, 6  ;;  %v8519_v8 = vadd.f32 %v8487_v1, %v8109_v53  ;;  %v17940_v37 = vmul.f32 %v18684_v50, %v8252_v44  ;;  %v8962_v30 = vmul.f32 %v18685_v22, %v8724_v55  ;;  %v18690_v44 = vld [vmem:[#allocation120_spill] sm:$0xff] }
0x142a   : > { %v9902_v0 = vadd.f32 %v12511_v43, %v9901_v4  ;;  %v12098_v27 = vmul.f32 -1.442695, %v9503_v5  ;;  %v12515_v28 = vpop.eup %12514  ;;  %v8705_v23 = vrot.slane %v17861_v57, 7  ;;  %v9924_v39 = vand.u32 2147483648, %v17893_v29 }
0x142b   : > { %v9200_v6 = vsel %vm9189_vm3, %v9177_v31, %v9178_v10  ;;  %v17921_v63 = vadd.f32 1.0, %v12515_v28  ;;  %v17943_v38 = vpop.f32.mrf.mxu1  ;;  %v8079_v12 = vmul.f32 %v18686_v58, %v7836_v19  ;;  %v9922_v32 = vand.u32 2147483647, %v17893_v29  ;;  %v18688_v28 = vld [vmem:[#allocation98_spill] sm:$0xff] }
0x142c   : > { %v9906_v34 = vsel %vm9905_vm5, %v12511_v43, %v9902_v0  ;;  %12518 = vpow2.f32 %v12098_v27  ;;  %v9436_v42 = vmul.f32 %v9363_v13, %v9200_v6  ;;  %v8110_v43 = vadd.f32 %v8078_v46, %v7635_v35  ;;  %v17964_v56 = vpop.f32.mrf.mxu2  ;;  %v18692_v46 = vld [vmem:[#allocation46_spill] sm:$0xff] }
0x142d   : > { %v12517_v52 = vpop.eup %12516  ;;  %v9911_v60 = vsel %vm9908_vm6, %v9910_v61, %v9906_v34  ;;  %12520 = vrcp.f32 %v17921_v63  ;;  %v7823_v16 = vrot.slane %v18687_v7, 1  ;;  %v8994_v18 = vadd.f32 %v8962_v30, %v8519_v8  ;;  %v9373_v8 = vpop.permute.xlu1 %9372 }
0x142e   : > { %10140 = vst [vmem:[%s17434_s7 + $0x88] sm:$0xff] %v9911_v60  ;;  %v9914_v31 = vmul.f32 %v12517_v52, %v17893_v29  ;;  %v9468_v45 = vadd.f32 %v9436_v42, %v8993_v9  ;;  %vm9919_vm7 = vweird.f32 %v12517_v52  ;;  %vm9918_vm8 = vweird.f32 %v17893_v29 }
0x142f   : > { %v8723_v20 = vsel %vm8714_vm2, %v8704_v48, %v8705_v23  ;;  %vm9920_vm9 = vmor %vm9918_vm8, %vm9919_vm7  ;;  %v9925_v0 = vor.u32 1.1754944e-38, %v9924_v39  ;;  %vm9923_vm10 = vcmp.eq.f32.partialorder %v9922_v32, 8.507059e+37  ;;  %v8520_v29 = vadd.f32 %v8488_v21, %v8110_v43 }
0x1430   : > { %v9915_v54 = vsub.f32 1.0, %v9914_v31  ;;  %v9132_v40 = vpop.f32.mrf.mxu3  ;;  %v9504_v24 = vadd.f32 %v17810_v15, %v9468_v45  ;;  %v7835_v48 = vsel %vm7829_vm0, %v7822_v17, %v7823_v16  ;;  %v8963_v34 = vmul.f32 %v18690_v44, %v8723_v20  ;;  %v18693_v31 = vld [vmem:[#allocation101_spill] sm:$0xff] }
0x1431   : > { %v9179_v36 = vrot.slane %v9132_v40, 6  ;;  %v9937_v42 = vand.u32 2147483647, %v17921_v63  ;;  %v7637_v25 = vmul.f32 %v18692_v46, %v18691_v33  ;;  %v7824_v3 = vrot.slane %v18693_v31, 1  ;;  %v18701_v46 = vld [vmem:[#allocation60_spill] sm:$0xff] }
0x1432   : > { %v12519_v2 = vpop.eup %12518  ;;  %v9916_v59 = vmul.f32 %v12517_v52, %v9915_v54  ;;  %v12099_v14 = vmul.f32 -1.442695, %v9504_v24  ;;  %v8706_v17 = vrot.slane %v17899_v51, 7  ;;  %vm9933_vm12 = vweird.f32 %v17921_v63 }
0x1433   : > { %v17951_v62 = vadd.f32 1.0, %v12519_v2  ;;  %v9199_v4 = vsel %vm9189_vm3, %v9178_v10, %v9179_v36  ;;  %v12521_v5 = vpop.eup %12520  ;;  %v18689_v10 = vld [vmem:[#allocation45_spill] sm:$0xff]  ;;  %v17981_v21 = vpop.f32.mrf.mxu1  ;;  %v8995_v30 = vadd.f32 %v8963_v34, %v8520_v29  ;;  %vm9938_vm14 = vcmp.eq.f32.partialorder %v9937_v42, 8.507059e+37  ;;  %v18697_v42 = vld [vmem:[#allocation23_spill] sm:$0xff] }
0x1434   : > { %v9917_v53 = vadd.f32 %v12517_v52, %v9916_v59  ;;  %v9437_v26 = vmul.f32 %v9368_v49, %v9199_v4  ;;  %v9929_v27 = vmul.f32 %v12521_v5, %v17921_v63  ;;  %v7636_v41 = vmul.f32 %v18689_v10, %v18688_v28  ;;  %v9378_v29 = vpop.permute.xlu2 %9377 }
0x1435   : > { %12522 = vrcp.f32 %v17951_v62  ;;  %vm9934_vm11 = vweird.f32 %v12521_v5  ;;  %v9952_v32 = vand.u32 2147483647, %v17951_v62  ;;  %v9954_v49 = vand.u32 2147483648, %v17951_v62 }
0x1436   : > { %v9921_v35 = vsel %vm9920_vm9, %v12517_v52, %v9917_v53  ;;  %12524 = vpow2.f32 %v12099_v14  ;;  %v9930_v61 = vsub.f32 1.0, %v9929_v27  ;;  %v9469_v6 = vadd.f32 %v9437_v26, %v8994_v18  ;;  %vm9935_vm13 = vmor %vm9933_vm12, %vm9934_vm11  ;;  %v8257_v14 = vpop.f32.mrf.mxu2  ;;  %v18695_v53 = vld [vmem:[#allocation117_spill] sm:$0xff] }
0x1437   : > { %v9926_v13 = vsel %vm9923_vm10, %v9925_v0, %v9921_v35  ;;  %v9939_v52 = vand.u32 2147483648, %v17921_v63  ;;  %v8111_v60 = vadd.f32 %v8079_v12, %v7636_v41  ;;  %v8722_v63 = vsel %vm8714_vm2, %v8705_v23, %v8706_v17  ;;  %v18694_v12 = vld [vmem:[#allocation62_spill] sm:$0xff] }
0x1438   : > { %10141 = vst [vmem:[%s17434_s7 + $0x90] sm:$0xff] %v9926_v13  ;;  %v9134_v11 = vpop.f32.mrf.mxu3  ;;  %v9931_v1 = vmul.f32 %v12521_v5, %v9930_v61  ;;  %v9505_v9 = vadd.f32 %v17810_v15, %v9469_v6  ;;  %v8080_v59 = vmul.f32 %v18694_v12, %v7835_v48  ;;  %v7834_v18 = vsel %vm7829_vm0, %v7823_v16, %v7824_v3  ;;  %v18696_v41 = vld [vmem:[#allocation106_spill] sm:$0xff] }
0x1439   : > { %v9180_v55 = vrot.slane %v9134_v11, 6  ;;  %v9940_v54 = vor.u32 1.1754944e-38, %v9939_v52  ;;  %v8521_v4 = vadd.f32 %v17940_v37, %v8111_v60  ;;  %v8964_v26 = vmul.f32 %v18695_v53, %v8722_v63  ;;  %v18698_v11 = vld [vmem:[#allocation107_spill] sm:$0xff] }
0x143a   : > { %v9932_v45 = vadd.f32 %v12521_v5, %v9931_v1  ;;  %v12100_v43 = vmul.f32 -1.442695, %v9505_v9  ;;  %v8707_v20 = vrot.slane %v17943_v38, 7  ;;  %v8112_v27 = vadd.f32 %v8080_v59, %v7637_v25  ;;  %v18699_v1 = vld [vmem:[#allocation44_spill] sm:$0xff]  ;;  %v18700_v60 = vld [vmem:[#allocation75_spill] sm:$0xff] }
0x143b   : > { %v12523_v19 = vpop.eup %12522  ;;  %v9198_v50 = vsel %vm9189_vm3, %v9179_v36, %v9180_v55  ;;  %vm9948_vm1 = vweird.f32 %v17951_v62  ;;  %v7825_v35 = vrot.slane %v18696_v41, 1  ;;  %vm9953_vm5 = vcmp.eq.f32.partialorder %v9952_v32, 8.507059e+37  ;;  %v18013_v13 = vpop.f32.mrf.mxu1  ;;  %v18704_v53 = vld [vmem:[#allocation111_spill] sm:$0xff] }
0x143c   : > { %v12525_v22 = vpop.eup %12524  ;;  %v9944_v40 = vmul.f32 %v12523_v19, %v17951_v62  ;;  %v9438_v51 = vmul.f32 %v9373_v8, %v9198_v50  ;;  %v9936_v39 = vsel %vm9935_vm13, %v12521_v5, %v9932_v45  ;;  %12526 = vpow2.f32 %v12100_v43  ;;  %v18702_v8 = vld [vmem:[#allocation121_spill] sm:$0xff] }
0x143d   : > { %v17988_v24 = vadd.f32 1.0, %v12525_v22  ;;  %v9941_v36 = vsel %vm9938_vm14, %v9940_v54, %v9936_v39  ;;  %vm9949_vm15 = vweird.f32 %v12523_v19  ;;  %v9955_v7 = vor.u32 1.1754944e-38, %v9954_v49 }
0x143e   : > { %v9945_v2 = vsub.f32 1.0, %v9944_v40  ;;  %v9470_v58 = vadd.f32 %v9438_v51, %v8995_v30  ;;  %10142 = vst [vmem:[%s17434_s7 + $0x98] sm:$0xff] %v9941_v36  ;;  %vm9950_vm4 = vmor %vm9948_vm1, %vm9949_vm15  ;;  %v8996_v48 = vadd.f32 %v8964_v26, %v8521_v4  ;;  %v8721_v44 = vsel %vm8714_vm2, %v8706_v17, %v8707_v20  ;;  %v8259_v63 = vpop.f32.mrf.mxu2  ;;  %v18705_v26 = vld [vmem:[#allocation41_spill] sm:$0xff] }
0x143f   : > { %12528 = vrcp.f32 %v17988_v24  ;;  %v8490_v52 = vmul.f32 %v18697_v42, %v17964_v56  ;;  %v7638_v9 = vmul.f32 %v18699_v1, %v18698_v11  ;;  %v8491_v33 = vmul.f32 %v18700_v60, %v8257_v14 }
0x1440   : > { %v9946_v5 = vmul.f32 %v12523_v19, %v9945_v2  ;;  %v9506_v57 = vadd.f32 %v17810_v15, %v9470_v58  ;;  %v9137_v23 = vpop.f32.mrf.mxu3  ;;  %v8081_v25 = vmul.f32 %v18701_v46, %v7834_v18  ;;  %v7833_v56 = vsel %vm7829_vm0, %v7824_v3, %v7825_v35  ;;  %v18703_v3 = vld [vmem:[#allocation110_spill] sm:$0xff]  ;;  %v9383_v58 = vpop.permute.xlu0 %9382 }
0x1441   : > { %v9181_v0 = vrot.slane %v9137_v23, 6  ;;  %v8522_v17 = vadd.f32 %v8490_v52, %v8112_v27  ;;  %v8965_v45 = vmul.f32 %v18702_v8, %v8721_v44  ;;  %v8708_v22 = vrot.slane %v17981_v21, 7  ;;  %v9388_v46 = vpop.permute.xlu1 %9387 }
0x1442   : > { %v9947_v28 = vadd.f32 %v12523_v19, %v9946_v5  ;;  %v12101_v37 = vmul.f32 -1.442695, %v9506_v57  ;;  %v12527_v10 = vpop.eup %12526  ;;  %v9969_v30 = vand.u32 2147483648, %v17988_v24  ;;  %v8113_v39 = vadd.f32 %v8081_v25, %v7638_v9 }
0x1443   : > { %v9197_v16 = vsel %vm9189_vm3, %v9180_v55, %v9181_v0  ;;  %v18015_v61 = vadd.f32 1.0, %v12527_v10  ;;  %v9967_v31 = vand.u32 2147483647, %v17988_v24  ;;  %v7826_v2 = vrot.slane %v18703_v3, 1  ;;  %v18053_v27 = vpop.f32.mrf.mxu1 }
0x1444   : > { %v9951_v38 = vsel %vm9950_vm4, %v12523_v19, %v9947_v28  ;;  %12530 = vpow2.f32 %v12101_v37  ;;  %v9439_v6 = vmul.f32 %v9378_v29, %v9197_v16  ;;  %v8997_v14 = vadd.f32 %v8965_v45, %v8522_v17 }
0x1445   : > { %v12529_v62 = vpop.eup %12528  ;;  %v9956_v34 = vsel %vm9953_vm5, %v9955_v7, %v9951_v38  ;;  %12532 = vrcp.f32 %v18015_v61  ;;  %vm9963_vm7 = vweird.f32 %v17988_v24  ;;  %v8720_v57 = vsel %vm8714_vm2, %v8707_v20, %v8708_v22  ;;  %v18707_v7 = vld [vmem:[#allocation63_spill] sm:$0xff]  ;;  %v18708_v38 = vld [vmem:[#allocation64_spill] sm:$0xff] }
0x1446   : > { %10143 = vst [vmem:[%s17434_s7 + $0xa0] sm:$0xff] %v9956_v34  ;;  %v9959_v55 = vmul.f32 %v12529_v62, %v17988_v24  ;;  %v9471_v19 = vadd.f32 %v9439_v6, %v8996_v48  ;;  %vm9964_vm6 = vweird.f32 %v12529_v62  ;;  %v9970_v23 = vor.u32 1.1754944e-38, %v9969_v30  ;;  %v18706_v24 = vld [vmem:[#allocation48_spill] sm:$0xff]  ;;  %v8262_v8 = vpop.f32.mrf.mxu2 }
0x1447   : > { %vm9965_vm8 = vmor %vm9963_vm7, %vm9964_vm6  ;;  %vm9968_vm9 = vcmp.eq.f32.partialorder %v9967_v31, 8.507059e+37  ;;  %v8492_v37 = vmul.f32 %v18706_v24, %v8259_v63  ;;  %v8082_v16 = vmul.f32 %v18707_v7, %v7833_v56  ;;  %v8966_v6 = vmul.f32 %v18708_v38, %v8720_v57  ;;  %v18711_v31 = vld [vmem:[#allocation66_spill] sm:$0xff]  ;;  %v9393_v24 = vpop.permute.xlu2 %9392 }
0x1448   : > { %v9960_v43 = vsub.f32 1.0, %v9959_v55  ;;  %v9139_v50 = vpop.f32.mrf.mxu3  ;;  %v9507_v54 = vadd.f32 %v17810_v15, %v9471_v19  ;;  %v9982_v48 = vand.u32 2147483647, %v18015_v61  ;;  %v9984_v44 = vand.u32 2147483648, %v18015_v61 }
0x1449   : > { %v9182_v40 = vrot.slane %v9139_v50, 6  ;;  %v7832_v1 = vsel %vm7829_vm0, %v7825_v35, %v7826_v2  ;;  %v8523_v9 = vadd.f32 %v8491_v33, %v8113_v39  ;;  %v8709_v55 = vrot.slane %v18013_v13, 7 }
0x144a   : > { %v12531_v51 = vpop.eup %12530  ;;  %v9961_v36 = vmul.f32 %v12529_v62, %v9960_v43  ;;  %v12102_v59 = vmul.f32 -1.442695, %v9507_v54  ;;  %vm9978_vm11 = vweird.f32 %v18015_v61  ;;  %v9985_v41 = vor.u32 1.1754944e-38, %v9984_v44 }
0x144b   : > { %v18040_v12 = vadd.f32 1.0, %v12531_v51  ;;  %v9196_v32 = vsel %vm9189_vm3, %v9181_v0, %v9182_v40  ;;  %v12533_v49 = vpop.eup %12532  ;;  %v7639_v0 = vmul.f32 %v18705_v26, %v18704_v53  ;;  %v8998_v45 = vadd.f32 %v8966_v6, %v8523_v9  ;;  %v18710_v51 = vld [vmem:[#allocation42_spill] sm:$0xff] }
0x144c   : > { %v9962_v4 = vadd.f32 %v12529_v62, %v9961_v36  ;;  %v9440_v5 = vmul.f32 %v9383_v58, %v9196_v32  ;;  %v9974_v18 = vmul.f32 %v12533_v49, %v18015_v61  ;;  %vm9979_vm10 = vweird.f32 %v12533_v49 }
0x144d   : > { %12534 = vrcp.f32 %v18040_v12  ;;  %v8114_v11 = vadd.f32 %v8082_v16, %v7639_v0  ;;  %vm9980_vm12 = vmor %vm9978_vm11, %vm9979_vm10  ;;  %vm9983_vm13 = vcmp.eq.f32.partialorder %v9982_v48, 8.507059e+37  ;;  %v8719_v61 = vsel %vm8714_vm2, %v8708_v22, %v8709_v55  ;;  %v18714_v48 = vld [vmem:[#allocation76_spill] sm:$0xff] }
0x144e   : > { %v9966_v28 = vsel %vm9965_vm8, %v12529_v62, %v9962_v4  ;;  %12536 = vpow2.f32 %v12102_v59  ;;  %v9975_v29 = vsub.f32 1.0, %v9974_v18  ;;  %v9472_v20 = vadd.f32 %v9440_v5, %v8997_v14  ;;  %v18087_v59 = vpop.f32.mrf.mxu1  ;;  %v18713_v4 = vld [vmem:[#allocation122_spill] sm:$0xff] }
0x144f   : > { %v9971_v10 = vsel %vm9968_vm9, %v9970_v23, %v9966_v28  ;;  %v9997_v63 = vand.u32 2147483647, %v18040_v12  ;;  %v9999_v36 = vand.u32 2147483648, %v18040_v12  ;;  %v8083_v58 = vmul.f32 %v18711_v31, %v7832_v1  ;;  %v18717_v1 = vld [vmem:[#allocation65_spill] sm:$0xff] }
0x1450   : > { %10144 = vst [vmem:[%s17434_s7 + $0xa8] sm:$0xff] %v9971_v10  ;;  %v9142_v34 = vpop.f32.mrf.mxu3  ;;  %v9976_v42 = vmul.f32 %v12533_v49, %v9975_v29  ;;  %v9508_v62 = vadd.f32 %v17810_v15, %v9472_v20  ;;  %v8967_v5 = vmul.f32 %v18713_v4, %v8719_v61  ;;  %v8710_v57 = vrot.slane %v18053_v27, 7 }
0x1451   : > { %v9183_v52 = vrot.slane %v9142_v34, 6  ;;  %v8524_v18 = vadd.f32 %v8492_v37, %v8114_v11  ;;  %vm9993_vm15 = vweird.f32 %v18040_v12  ;;  %vm9998_vm4 = vcmp.eq.f32.partialorder %v9997_v63, 8.507059e+37  ;;  %v8264_v34 = vpop.f32.mrf.mxu2 }
0x1452   : > { %v9977_v25 = vadd.f32 %v12533_v49, %v9976_v42  ;;  %v12103_v19 = vmul.f32 -1.442695, %v9508_v62  ;;  %v10000_v10 = vor.u32 1.1754944e-38, %v9999_v36  ;;  %v8718_v38 = vsel %vm8714_vm2, %v8709_v55, %v8710_v57  ;;  %v18715_v62 = vld [vmem:[#allocation119_spill] sm:$0xff] }
0x1453   : > { %v12535_v60 = vpop.eup %12534  ;;  %v9195_v56 = vsel %vm9189_vm3, %v9182_v40, %v9183_v52  ;;  %v18709_v40 = vld [vmem:[#allocation115_spill] sm:$0xff]  ;;  %v8999_v16 = vadd.f32 %v8967_v5, %v8524_v18  ;;  %v8493_v44 = vmul.f32 %v18714_v48, %v8262_v8 }
0x1454   : > { %v12537_v17 = vpop.eup %12536  ;;  %v9989_v35 = vmul.f32 %v12535_v60, %v18040_v12  ;;  %v9441_v33 = vmul.f32 %v9388_v46, %v9195_v56  ;;  %v9981_v13 = vsel %vm9980_vm12, %v12533_v49, %v9977_v25  ;;  %12538 = vpow2.f32 %v12103_v19  ;;  %v18712_v49 = vld [vmem:[#allocation114_spill] sm:$0xff] }
0x1455   : > { %v18074_v43 = vadd.f32 1.0, %v12537_v17  ;;  %v9986_v50 = vsel %vm9983_vm13, %v9985_v41, %v9981_v13  ;;  %v7640_v39 = vmul.f32 %v18710_v51, %v18709_v40  ;;  %vm9994_vm14 = vweird.f32 %v12535_v60  ;;  %v18719_v41 = vld [vmem:[#allocation118_spill] sm:$0xff] }
0x1456   : > { %v9990_v30 = vsub.f32 1.0, %v9989_v35  ;;  %v9473_v54 = vadd.f32 %v9441_v33, %v8998_v45  ;;  %10145 = vst [vmem:[%s17434_s7 + $0xb0] sm:$0xff] %v9986_v50  ;;  %v7827_v14 = vrot.slane %v18712_v49, 1  ;;  %vm9995_vm1 = vmor %vm9993_vm15, %vm9994_vm14  ;;  %v8711_v19 = vrot.slane %v18087_v59, 7  ;;  %v18119_v13 = vpop.f32.mrf.mxu1  ;;  %v18721_v49 = vld [vmem:[#allocation61_spill] sm:$0xff] }
0x1457   : > { %12540 = vrcp.f32 %v18074_v43  ;;  %v8115_v28 = vadd.f32 %v8083_v58, %v7640_v39  ;;  %v10014_v56 = vand.u32 2147483648, %v18074_v43  ;;  %v18720_v35 = vrot.slane %v18719_v41, 1 }
0x1458   : > { %v9991_v21 = vmul.f32 %v12535_v60, %v9990_v30  ;;  %v9509_v22 = vadd.f32 %v17810_v15, %v9473_v54  ;;  %v9144_v32 = vpop.f32.mrf.mxu3  ;;  %v7831_v12 = vsel %vm7829_vm0, %v7826_v2, %v7827_v14  ;;  %v10012_v50 = vand.u32 2147483647, %v18074_v43  ;;  %v9398_v54 = vpop.permute.xlu0 %9397 }
0x1459   : > { %v9184_v23 = vrot.slane %v9144_v32, 6  ;;  %v8084_v9 = vmul.f32 %v18717_v1, %v7831_v12  ;;  %v8525_v2 = vadd.f32 %v8493_v44, %v8115_v28  ;;  %v7830_v33 = vsel %vm7829_vm0, %v7827_v14, %v18720_v35  ;;  %v18722_v14 = vld [vmem:[#allocation40_spill] sm:$0xff]  ;;  %v18726_v35 = vld [vmem:[#allocation78_spill] sm:$0xff] }
0x145a   : > { %v9992_v53 = vadd.f32 %v12535_v60, %v9991_v21  ;;  %v12104_v26 = vmul.f32 -1.442695, %v9509_v22  ;;  %v12539_v0 = vpop.eup %12538  ;;  %vm10008_vm6 = vweird.f32 %v18074_v43  ;;  %v8717_v21 = vsel %vm8714_vm2, %v8710_v57, %v8711_v19  ;;  %v18724_v57 = vld [vmem:[#allocation67_spill] sm:$0xff] }
0x145b   : > { %v9194_v29 = vsel %vm9189_vm3, %v9183_v52, %v9184_v23  ;;  %v18096_v7 = vadd.f32 1.0, %v12539_v0  ;;  %v18716_v52 = vld [vmem:[#allocation49_spill] sm:$0xff]  ;;  %v10015_v22 = vor.u32 1.1754944e-38, %v10014_v56  ;;  %v7642_v4 = vmul.f32 %v18722_v14, %v18721_v49  ;;  %v8267_v0 = vpop.f32.mrf.mxu2 }
0x145c   : > { %v9996_v20 = vsel %vm9995_vm1, %v12535_v60, %v9992_v53  ;;  %12542 = vpow2.f32 %v12104_v26  ;;  %v9442_v27 = vmul.f32 %v9393_v24, %v9194_v29  ;;  %v7641_v11 = vmul.f32 %v18716_v52, %v18715_v62  ;;  %v18718_v60 = vld [vmem:[#allocation50_spill] sm:$0xff]  ;;  %v18725_v24 = vld [vmem:[#allocation125_spill] sm:$0xff] }
0x145d   : > { %v12541_v37 = vpop.eup %12540  ;;  %v10001_v6 = vsel %vm9998_vm4, %v10000_v10, %v9996_v20  ;;  %12544 = vrcp.f32 %v18096_v7  ;;  %v8968_v46 = vmul.f32 %v18718_v60, %v8718_v38  ;;  %vm10013_vm7 = vcmp.eq.f32.partialorder %v10012_v50, 8.507059e+37  ;;  %v18727_v50 = vld [vmem:[#allocation124_spill] sm:$0xff] }
0x145e   : > { %10146 = vst [vmem:[%s17434_s7 + $0xb8] sm:$0xff] %v10001_v6  ;;  %v10004_v42 = vmul.f32 %v12541_v37, %v18074_v43  ;;  %v9474_v3 = vadd.f32 %v9442_v27, %v8999_v16  ;;  %vm10009_vm5 = vweird.f32 %v12541_v37  ;;  %v8116_v30 = vadd.f32 %v8084_v9, %v7641_v11  ;;  %v18723_v43 = vld [vmem:[#allocation79_spill] sm:$0xff]  ;;  %v8679_v1 = vpop.f32.mrf.mxu1 }
0x145f   : > { %v9000_v36 = vadd.f32 %v8968_v46, %v8525_v2  ;;  %vm10010_vm0 = vmor %vm10008_vm6, %vm10009_vm5  ;;  %v8085_v28 = vmul.f32 %v18724_v57, %v7830_v33  ;;  %v8969_v10 = vmul.f32 %v18725_v24, %v8717_v21  ;;  %v10027_v29 = vand.u32 2147483647, %v18096_v7 }
0x1460   : > { %v10005_v25 = vsub.f32 1.0, %v10004_v42  ;;  %v9147_v55 = vpop.f32.mrf.mxu3  ;;  %v9510_v17 = vadd.f32 %v17810_v15, %v9474_v3  ;;  %v10029_v20 = vand.u32 2147483648, %v18096_v7  ;;  %v8712_v48 = vrot.slane %v18119_v13, 7 }
0x1461   : > { %v9185_v8 = vrot.slane %v9147_v55, 6  ;;  %v8117_v38 = vadd.f32 %v8085_v28, %v7642_v4  ;;  %vm10023_vm9 = vweird.f32 %v18096_v7  ;;  %vm10028_vm11 = vcmp.eq.f32.partialorder %v10027_v29, 8.507059e+37 }
0x1462   : > { %v12543_v45 = vpop.eup %12542  ;;  %v10006_v61 = vmul.f32 %v12541_v37, %v10005_v25  ;;  %v12105_v51 = vmul.f32 -1.442695, %v9510_v17  ;;  %v10030_v9 = vor.u32 1.1754944e-38, %v10029_v20  ;;  %v8495_v33 = vmul.f32 %v18726_v35, %v8267_v0  ;;  %v18731_v0 = vld [vmem:[#allocation81_spill] sm:$0xff] }
0x1463   : > { %v18122_v40 = vadd.f32 1.0, %v12543_v45  ;;  %v9193_v39 = vsel %vm9189_vm3, %v9184_v23, %v9185_v8  ;;  %v12545_v63 = vpop.eup %12544  ;;  %v8494_v23 = vmul.f32 %v18723_v43, %v8264_v34  ;;  %v9403_v34 = vpop.permute.xlu1 %9402  ;;  %v18730_v43 = vld [vmem:[#allocation80_spill] sm:$0xff] }
0x1464   : > { %v10007_v31 = vadd.f32 %v12541_v37, %v10006_v61  ;;  %v9443_v58 = vmul.f32 %v9398_v54, %v9193_v39  ;;  %v10019_v32 = vmul.f32 %v12545_v63, %v18096_v7  ;;  %vm10024_vm8 = vweird.f32 %v12545_v63  ;;  %v8269_v54 = vpop.f32.mrf.mxu2 }
0x1465   : > { %12546 = vrcp.f32 %v18122_v40  ;;  %v8526_v6 = vadd.f32 %v8494_v23, %v8116_v30  ;;  %vm10025_vm10 = vmor %vm10023_vm9, %vm10024_vm8  ;;  %v8716_v7 = vsel %vm8714_vm2, %v8711_v19, %v8712_v48  ;;  %v10042_v45 = vand.u32 2147483647, %v18122_v40 }
0x1466   : > { %v10011_v5 = vsel %vm10010_vm0, %v12541_v37, %v10007_v31  ;;  %12548 = vpow2.f32 %v12105_v51  ;;  %v10020_v53 = vsub.f32 1.0, %v10019_v32  ;;  %v9475_v26 = vadd.f32 %v9443_v58, %v9000_v36  ;;  %v9408_v31 = vpop.permute.xlu2 %9407  ;;  %v18728_v58 = vld [vmem:[#allocation77_spill] sm:$0xff] }
0x1467   : > { %v10016_v18 = vsel %vm10013_vm7, %v10015_v22, %v10011_v5  ;;  %v9001_v3 = vadd.f32 %v8969_v10, %v8526_v6  ;;  %v10044_v41 = vand.u32 2147483648, %v18122_v40  ;;  %v8970_v19 = vmul.f32 %v18727_v50, %v8716_v7  ;;  %v18732_v10 = vld [vmem:[#allocation69_spill] sm:$0xff]  ;;  %v18737_v7 = vld [vmem:[#allocation127_spill] sm:$0xff]  ;;  %v12573_v50 = vld [vmem:[%s18264_s26] ss:$0 sm:$0xff] }
0x1468   : > { %10147 = vst [vmem:[%s17434_s7 + $0xc0] sm:$0xff] %v10016_v18  ;;  %v9149_v27 = vpop.f32.mrf.mxu3  ;;  %v10021_v12 = vmul.f32 %v12545_v63, %v10020_v53  ;;  %v9511_v37 = vadd.f32 %v17810_v15, %v9475_v26  ;;  %v8527_v51 = vadd.f32 %v8495_v33, %v8117_v38  ;;  %vm10038_vm13 = vweird.f32 %v18122_v40 }
0x1469   : > { %v9186_v16 = vrot.slane %v9149_v27, 6  ;;  %v18729_v21 = vrot.slane %v18728_v58, 7  ;;  %vm10043_vm15 = vcmp.eq.f32.partialorder %v10042_v45, 8.507059e+37  ;;  %v10045_v32 = vor.u32 1.1754944e-38, %v10044_v41 }
0x146a   : > { %v10022_v42 = vadd.f32 %v12545_v63, %v10021_v12  ;;  %v12106_v62 = vmul.f32 -1.442695, %v9511_v37  ;;  %v8496_v23 = vmul.f32 %v18730_v43, %v8269_v54  ;;  %v9002_v18 = vadd.f32 %v8970_v19, %v8527_v51  ;;  %v18733_v12 = vld [vmem:[#allocation126_spill] sm:$0xff] }
0x146b   : > { %v12547_v44 = vpop.eup %12546  ;;  %v9192_v52 = vsel %vm9189_vm3, %v9185_v8, %v9186_v16  ;;  %v8713_v8 = vrot.slane %v8679_v1, 7 }
0x146c   : > { %v12549_v11 = vpop.eup %12548  ;;  %v10034_v2 = vmul.f32 %v12547_v44, %v18122_v40  ;;  %v9444_v60 = vmul.f32 %v9403_v34, %v9192_v52  ;;  %v10026_v46 = vsel %vm10025_vm10, %v12545_v63, %v10022_v42  ;;  %12550 = vpow2.f32 %v12106_v62  ;;  %v9413_v52 = vpop.permute.xlu0 %9412 }
0x146d   : > { %v18148_v25 = vadd.f32 1.0, %v12549_v11  ;;  %v10031_v55 = vsel %vm10028_vm11, %v10030_v9, %v10026_v46  ;;  %vm10039_vm12 = vweird.f32 %v12547_v44  ;;  %v8746_v22 = vsel %vm8714_vm2, %v8713_v8, %v18729_v21  ;;  %v18735_v9 = vld [vmem:[#allocation123_spill] sm:$0xff] }
0x146e   : > { %v10035_v56 = vsub.f32 1.0, %v10034_v2  ;;  %v9476_v17 = vadd.f32 %v9444_v60, %v9001_v3  ;;  %10148 = vst [vmem:[%s17434_s7 + $0xc8] sm:$0xff] %v10031_v55  ;;  %vm10040_vm14 = vmor %vm10038_vm13, %vm10039_vm12  ;;  %v8715_v26 = vsel %vm8714_vm2, %v8712_v48, %v8713_v8  ;;  %v8940_v57 = vmul.f32 %v18731_v0, %v8746_v22 }
0x146f   : > { %12552 = vrcp.f32 %v18148_v25  ;;  %v8528_v29 = vadd.f32 %v8496_v23, %v18732_v10  ;;  %v8971_v37 = vmul.f32 %v18733_v12, %v8715_v26  ;;  %v10057_v62 = vand.u32 2147483647, %v18148_v25 }
0x1470   : > { %v10036_v13 = vmul.f32 %v12547_v44, %v10035_v56  ;;  %v9512_v59 = vadd.f32 %v17810_v15, %v9476_v17  ;;  %v9152_v61 = vpop.f32.mrf.mxu3  ;;  %v18736_v2 = vrot.slane %v18735_v9, 6  ;;  %vm10053_vm1 = vweird.f32 %v18148_v25 }
0x1471   : > { %v9187_v30 = vrot.slane %v9152_v61, 6  ;;  %v9003_v17 = vadd.f32 %v8971_v37, %v8528_v29  ;;  %vm10058_vm5 = vcmp.eq.f32.partialorder %v10057_v62, 8.507059e+37 }
0x1472   : > { %v10037_v39 = vadd.f32 %v12547_v44, %v10036_v13  ;;  %v12107_v63 = vmul.f32 -1.442695, %v9512_v59  ;;  %v12551_v36 = vpop.eup %12550 }
0x1473   : > { %v9191_v49 = vsel %vm9189_vm3, %v9186_v16, %v9187_v30  ;;  %v18168_v4 = vadd.f32 1.0, %v12551_v36  ;;  %v10059_v16 = vand.u32 2147483648, %v18148_v25 }
0x1474   : > { %v10041_v14 = vsel %vm10040_vm14, %v12547_v44, %v10037_v39  ;;  %12554 = vpow2.f32 %v12107_v63  ;;  %v9445_v40 = vmul.f32 %v9408_v31, %v9191_v49  ;;  %v18734_v44 = vld [vmem:[#allocation68_spill] sm:$0xff] }
0x1475   : > { %v12553_v5 = vpop.eup %12552  ;;  %v10046_v53 = vsel %vm10043_vm15, %v10045_v32, %v10041_v14  ;;  %12556 = vrcp.f32 %v18168_v4  ;;  %v8972_v34 = vadd.f32 %v8940_v57, %v18734_v44  ;;  %v10060_v8 = vor.u32 1.1754944e-38, %v10059_v16 }
0x1476   : > { %10149 = vst [vmem:[%s17434_s7 + $0xd0] sm:$0xff] %v10046_v53  ;;  %v10049_v28 = vmul.f32 %v12553_v5, %v18148_v25  ;;  %v9477_v24 = vadd.f32 %v9445_v40, %v9002_v18  ;;  %vm10054_vm2 = vweird.f32 %v12553_v5  ;;  %v10072_v59 = vand.u32 2147483647, %v18168_v4 }
0x1477   : > { %vm10055_vm4 = vmor %vm10053_vm1, %vm10054_vm2  ;;  %v10074_v25 = vand.u32 2147483648, %v18168_v4  ;;  %vm10068_vm6 = vweird.f32 %v18168_v4 }
0x1478   : > { %v10050_v20 = vsub.f32 1.0, %v10049_v28  ;;  %v9154_v27 = vpop.f32.mrf.mxu3  ;;  %v9513_v38 = vadd.f32 %v17810_v15, %v9477_v24  ;;  %vm10073_vm7 = vcmp.eq.f32.partialorder %v10072_v59, 8.507059e+37 }
0x1479   : > { %v9188_v6 = vrot.slane %v9154_v27, 6  ;;  %v10075_v31 = vor.u32 1.1754944e-38, %v10074_v25 }
0x147a   : > { %v12555_v48 = vpop.eup %12554  ;;  %v10051_v42 = vmul.f32 %v12553_v5, %v10050_v20  ;;  %v12108_v3 = vmul.f32 -1.442695, %v9513_v38 }
0x147b   : > { %v9640_v11 = vadd.f32 1.0, %v12555_v48  ;;  %v9190_v1 = vsel %vm9189_vm3, %v9187_v30, %v9188_v6  ;;  %v9221_v60 = vsel %vm9189_vm3, %v9188_v6, %v18736_v2  ;;  %v12557_v15 = vpop.eup %12556 }
0x147c   : > { %v10052_v46 = vadd.f32 %v12553_v5, %v10051_v42  ;;  %v9415_v55 = vmul.f32 %v18737_v7, %v9221_v60  ;;  %v9446_v56 = vmul.f32 %v9413_v52, %v9190_v1  ;;  %v10064_v45 = vmul.f32 %v12557_v15, %v18168_v4 }
0x147d   : > { %12558 = vrcp.f32 %v9640_v11  ;;  %vm10069_vm3 = vweird.f32 %v12557_v15  ;;  %v10089_v14 = vand.u32 2147483648, %v9640_v11  ;;  %v10087_v4 = vand.u32 2147483647, %v9640_v11 }
0x147e   : > { %v10056_v41 = vsel %vm10055_vm4, %v12553_v5, %v10052_v46  ;;  %12560 = vpow2.f32 %v12108_v3  ;;  %v10065_v47 = vsub.f32 1.0, %v10064_v45  ;;  %v9447_v33 = vadd.f32 %v9415_v55, %v8972_v34  ;;  %vm10070_vm0 = vmor %vm10068_vm6, %vm10069_vm3 }
0x147f   : > { %v10061_v35 = vsel %vm10058_vm5, %v10060_v8, %v10056_v41  ;;  %v9478_v13 = vadd.f32 %v9446_v56, %v9003_v17  ;;  %vm10083_vm9 = vweird.f32 %v9640_v11  ;;  %v10090_v23 = vor.u32 1.1754944e-38, %v10089_v14 }
0x1480   : > { %10150 = vst [vmem:[%s17434_s7 + $0xd8] sm:$0xff] %v10061_v35  ;;  %v10066_v61 = vmul.f32 %v12557_v15, %v10065_v47  ;;  %v9483_v19 = vadd.f32 %v12573_v50, %v9447_v33  ;;  %vm10088_vm11 = vcmp.eq.f32.partialorder %v10087_v4, 8.507059e+37 }
0x1481   : > { %v9514_v30 = vadd.f32 %v12573_v50, %v9478_v13 }
0x1482   : > { %v10067_v51 = vadd.f32 %v12557_v15, %v10066_v61  ;;  %v12078_v39 = vmul.f32 -1.442695, %v9483_v19 }
0x1483   : > { %v12559_v54 = vpop.eup %12558  ;;  %v12109_v63 = vmul.f32 -1.442695, %v9514_v30 }
0x1484   : > { %v12561_v36 = vpop.eup %12560  ;;  %v10079_v58 = vmul.f32 %v12559_v54, %v9640_v11  ;;  %v10071_v21 = vsel %vm10070_vm0, %v12557_v15, %v10067_v51  ;;  %12562 = vpow2.f32 %v12078_v39  ;;  %vm10084_vm8 = vweird.f32 %v12559_v54 }
0x1485   : > { %v9641_v22 = vadd.f32 1.0, %v12561_v36  ;;  %v10076_v32 = vsel %vm10073_vm7, %v10075_v31, %v10071_v21  ;;  %12564 = vpow2.f32 %v12109_v63  ;;  %vm10085_vm10 = vmor %vm10083_vm9, %vm10084_vm8 }
0x1486   : > { %v10080_v49 = vsub.f32 1.0, %v10079_v58  ;;  %10151 = vst [vmem:[%s17434_s7 + $0xe0] sm:$0xff] %v10076_v32 }
0x1487   : > { %12566 = vrcp.f32 %v9641_v22  ;;  %v10104_v29 = vand.u32 2147483648, %v9641_v22  ;;  %v10102_v27 = vand.u32 2147483647, %v9641_v22  ;;  %vm10098_vm13 = vweird.f32 %v9641_v22 }
0x1488   : > { %v10081_v40 = vmul.f32 %v12559_v54, %v10080_v49 }
0x1489   : > { %v10105_v38 = vor.u32 1.1754944e-38, %v10104_v29  ;;  %vm10103_vm15 = vcmp.eq.f32.partialorder %v10102_v27, 8.507059e+37 }
0x148a   : > { %v10082_v5 = vadd.f32 %v12559_v54, %v10081_v40  ;;  %v12563_v43 = vpop.eup %12562 }
0x148b   : > { %v12565_v18 = vpop.eup %12564  ;;  %v9611_v26 = vadd.f32 1.0, %v12563_v43 }
0x148c   : > { %v10086_v53 = vsel %vm10085_vm10, %v12559_v54, %v10082_v5  ;;  %v9642_v28 = vadd.f32 1.0, %v12565_v18 }
0x148d   : > { %v12567_v0 = vpop.eup %12566  ;;  %v10091_v57 = vsel %vm10088_vm11, %v10090_v23, %v10086_v53  ;;  %12568 = vrcp.f32 %v9611_v26  ;;  %v9654_v62 = vand.u32 2147483648, %v9611_v26  ;;  %v9652_v3 = vand.u32 2147483647, %v9611_v26 }
0x148e   : > { %10152 = vst [vmem:[%s17434_s7 + $0xe8] sm:$0xff] %v10091_v57  ;;  %v10094_v24 = vmul.f32 %v12567_v0, %v9641_v22  ;;  %12570 = vrcp.f32 %v9642_v28  ;;  %vm10099_vm12 = vweird.f32 %v12567_v0  ;;  %v10119_v1 = vand.u32 2147483648, %v9642_v28 }
0x148f   : > { %vm10100_vm14 = vmor %vm10098_vm13, %vm10099_vm12  ;;  %v10117_v2 = vand.u32 2147483647, %v9642_v28  ;;  %vm9648_vm4 = vweird.f32 %v9611_v26  ;;  %v9655_v15 = vor.u32 1.1754944e-38, %v9654_v62  ;;  %vm10113_vm3 = vweird.f32 %v9642_v28 }
0x1490   : > { %v10095_v10 = vsub.f32 1.0, %v10094_v24  ;;  %vm9653_vm6 = vcmp.eq.f32.partialorder %v9652_v3, 8.507059e+37  ;;  %v10120_v55 = vor.u32 1.1754944e-38, %v10119_v1 }
0x1491   : > { %vm10118_vm7 = vcmp.eq.f32.partialorder %v10117_v2, 8.507059e+37 }
0x1492   : > { %v10096_v20 = vmul.f32 %v12567_v0, %v10095_v10 }
0x1493   : > { %v12569_v12 = vpop.eup %12568 }
0x1494   : > { %v10097_v37 = vadd.f32 %v12567_v0, %v10096_v20  ;;  %v12571_v16 = vpop.eup %12570  ;;  %v9644_v6 = vmul.f32 %v12569_v12, %v9611_v26  ;;  %vm9649_vm2 = vweird.f32 %v12569_v12 }
0x1495   : > { %v10109_v44 = vmul.f32 %v12571_v16, %v9642_v28  ;;  %vm10114_vm1 = vweird.f32 %v12571_v16  ;;  %vm9650_vm5 = vmor %vm9648_vm4, %vm9649_vm2 }
0x1496   : > { %v10101_v48 = vsel %vm10100_vm14, %v12567_v0, %v10097_v37  ;;  %v9645_v42 = vsub.f32 1.0, %v9644_v6  ;;  %vm10115_vm0 = vmor %vm10113_vm3, %vm10114_vm1 }
0x1497   : > { %v10106_v34 = vsel %vm10103_vm15, %v10105_v38, %v10101_v48  ;;  %v10110_v52 = vsub.f32 1.0, %v10109_v44 }
0x1498   : > { %10153 = vst [vmem:[%s17434_s7 + $0xf0] sm:$0xff] %v10106_v34  ;;  %v9646_v11 = vmul.f32 %v12569_v12, %v9645_v42 }
0x1499   : > { %v10111_v9 = vmul.f32 %v12571_v16, %v10110_v52 }
0x149a   : > { %v9647_v60 = vadd.f32 %v12569_v12, %v9646_v11 }
0x149b   : > { %v10112_v46 = vadd.f32 %v12571_v16, %v10111_v9 }
0x149c   : > { %v9651_v7 = vsel %vm9650_vm5, %v12569_v12, %v9647_v60 }
0x149d   : > { %v9656_v56 = vsel %vm9653_vm6, %v9655_v15, %v9651_v7  ;;  %v10116_v17 = vsel %vm10115_vm0, %v12571_v16, %v10112_v46 }
0x149e   : > { %v10121_v8 = vsel %vm10118_vm7, %v10120_v55, %v10116_v17  ;;  %10123 = vst [vmem:[%s17434_s7] sm:$0xff] %v9656_v56 }
0x149f   : > { %10154 = vst [vmem:[%s17434_s7 + $0xf8] sm:$0xff] %v10121_v8 }
0x14a0   : > { %12601 = shalt.err (!%p12598_p3)
}
0x14a1   : > { %s12639_s30 = smov 128   ;;  %s12640_s7 = smov 8  }
0x14a2   : > { %12389 = dma.vmem_to_hbm [thread:$0]  (%p12819_p5), %s10169_s9, 4096, %s10171_s8, %s10156_s28, %s12639_s30, %s12639_s30, %s12640_s7  }
0x14a3 PF: > { %s18739_s11 = sld [smem:[#allocation7_spill]] }
0x14a4   : > { %s18740_s12 = sld [smem:[#allocation5_spill]] }
0x14a9   : > { %p12395_p4 = scmp.ge.s32.totalorder %s18739_s11, 2 }
0x14aa   : > { %s10185_s2 = sand.u32 1, %s18740_s12  }
0x14ab   : > { %p12392_p7 = pnand %p12395_p4, %p12823_p6  ;;  %s10186_s6 = scalar_lea.sflag [#allocation3], %s10185_s2 }
0x14ad   : > { %p12393_p8 = pneg %p12392_p7 }
0x14af   : > { %12619 = dma.done.wait (%p12393_p8), %s10186_s6, 4096  }
0x14b0   : > { %12621 = vsyncadd (%p12393_p8), %s10186_s6, 4294963200  ;;  %s18742_s30 = sld [smem:[#allocation8_spill]]  ;;  %s18745_s7 = smov %s12628_s4 }
0x14b1   : > { %s18743_s29 = sld [smem:[#allocation6_spill]] }
0x14b2   : > { %s18744_s8 = sld [smem:[#allocation9_spill]] }
0x14b6   : > { %p37_p9 = scmp.ge.s32.totalorder %s18742_s30, 4  }
0x14b7   : > { %s18746_s4 = smov %s18743_s29 }
0x14b8   :  { %39 = sbr.rel (!%p37_p9) target bundleno = 18 (0x12), region = 181 }
0x14bd   :  { %10192 = vsyncpa [#allocation3], 1 }
0x14be   :  { %10194 = vsyncpa [#allocation3 + $0x1], 1 }

</bundles_post_ra>
